<compile_context>
chip_gen: v7x
topology: tpu7x:2x2x1
jax: 0.10.0
libtpu: 0.0.40
codegen_flags: <defaults>
</compile_context>

<pallas_src>
import numpy as np

import jax
import jax.numpy as jnp
from jax.experimental import pallas as pl
from jax.experimental.pallas import tpu as pltpu

# ---- small, module-consistent sizes -----------------------------------------
IMG = 16            # input_width == input_height (module default is 48)
IN_C = 3            # input_channels
ACTION_DIM = 4      # added_fc_input_size
CONCAT_SIZE = 256   # CNN output_size (default concat_size)
FC_HIDDEN = 1024    # hidden_sizes=[1024]
HEAD_HIDDEN = (512, 512, 512)
OUT_SIZE = 1        # TwoHeadCNN output_size
AUG_PAD = 4         # image_augmentation_padding
CONV_CH = (16, 16, 16)

_VMEM = pl.BlockSpec(memory_space=pltpu.MemorySpace.VMEM)


# ------------------------------ fused kernel ---------------------------------
def _fused_kernel(xin_ref, act_ref,
                  a1_ref, b1r_ref, a2_ref, b2r_ref, a3_ref, b3r_ref,
                  r1_ref, s1_ref, r2_ref, s2_ref,
                  w1c_ref, w1a_ref, fb1_ref, wl_ref, bl_ref,
                  wh1_ref, bh1_ref, wh2_ref, bh2_ref, wh3_ref, bh3_ref,
                  who_ref, bho_ref,
                  out_ref,
                  x1p_ref, x2p_ref, x3p_ref, feat_ref):
    """Whole TwoHeadCNN forward for a small batch; everything stays in VMEM."""
    f32 = jnp.float32
    B = xin_ref.shape[0]
    H1, C0, C1 = IMG, IN_C, CONV_CH[0]           # 16, 3, 16
    H2, C2 = IMG // 2, CONV_CH[1]                # 8, 16
    H3, C3 = IMG // 4, CONV_CH[2]                # 4, 16

    def mm(a, b):
        return jnp.dot(a, b, preferred_element_type=f32)

    def conv_rows(xp, a_ref, brow_ref, h_out):
        # 3x3 "same" conv on one sample in (row=h, col=w*ci) layout:
        # out = bias_row + sum_dh xp[dh:dh+H, :] @ A[dh]
        acc = brow_ref[...]
        for dh in range(3):
            acc = acc + mm(xp[dh:dh + h_out, :], a_ref[dh])
        return acc

    def pool2x2_relu(y, r_ref, s_ref):
        # exact 2x2/stride-2 max pool via 0/1 selection matmuls, then ReLU
        ye = mm(y, s_ref[0])                     # even w column groups
        yo = mm(y, s_ref[1])                     # odd  w column groups
        m = jnp.maximum(jnp.maximum(mm(r_ref[0], ye), mm(r_ref[1], ye)),
                        jnp.maximum(mm(r_ref[0], yo), mm(r_ref[1], yo)))
        return jnp.maximum(m, 0.0)

    # zero the zero-padded activation buffers once
    x1p_ref[...] = jnp.zeros(x1p_ref.shape, f32)
    x2p_ref[...] = jnp.zeros(x2p_ref.shape, f32)
    x3p_ref[...] = jnp.zeros(x3p_ref.shape, f32)

    # conv-1 padded input: interior of (B, H+2, (W+2)*Ci)
    x1p_ref[:, 1:H1 + 1, C0:(H1 + 1) * C0] = xin_ref[...]

    seg = H3 * C3                                # 4*16 = 64 columns per output row
    for b in range(B):                           # B is small & static -> unrolled
        # conv1 -> maxpool 2x2 -> relu
        y1 = pool2x2_relu(conv_rows(x1p_ref[b], a1_ref, b1r_ref, H1), r1_ref, s1_ref)
        x2p_ref[b, 1:H2 + 1, C1:(H2 + 1) * C1] = y1
        # conv2 -> maxpool 2x2 -> relu
        y2 = pool2x2_relu(conv_rows(x2p_ref[b], a2_ref, b2r_ref, H2), r2_ref, s2_ref)
        x3p_ref[b, 1:H3 + 1, C2:(H3 + 1) * C2] = y2
        # conv3 -> relu, flatten in NHWC (h, w, c) order into feat
        y3 = jnp.maximum(conv_rows(x3p_ref[b], a3_ref, b3r_ref, H3), 0.0)   # (4, 64)
        for h in range(H3):
            feat_ref[b:b + 1, h * seg:(h + 1) * seg] = y3[h:h + 1, :]

    # --------------- fully-connected trunk + both heads ----------------------
    feat = feat_ref[...]                                          # (B, 256)
    h = mm(feat, w1c_ref[...]) + mm(act_ref[...], w1a_ref[...]) + fb1_ref[...]
    h = jnp.maximum(h, 0.0)                                       # fc1 + relu   (B, 1024)
    cnn_out = mm(h, wl_ref[...]) + bl_ref[...]                    # last_fc      (B, 256)

    for i in range(2):                                            # head1 / head2 (stacked)
        g = jnp.maximum(mm(cnn_out, wh1_ref[i]) + bh1_ref[i], 0.0)
        g = jnp.maximum(mm(g, wh2_ref[i]) + bh2_ref[i], 0.0)
        g = jnp.maximum(mm(g, wh3_ref[i]) + bh3_ref[i], 0.0)
        out_ref[:, i * OUT_SIZE:(i + 1) * OUT_SIZE] = mm(g, who_ref[i]) + bho_ref[i]


def _fused_forward(params, x_rows, action):
    """x_rows: (B, IMG, IMG*IN_C) NHWC rows; action: (B, ACTION_DIM)."""
    B = x_rows.shape[0]
    args = [
        x_rows, action,
        params["a1"], params["b1r"], params["a2"], params["b2r"],
        params["a3"], params["b3r"],
        params["r1"], params["s1"], params["r2"], params["s2"],
        params["w1c"], params["w1a"], params["b1"],
        params["wl"], params["bl"],
        params["wh1"], params["bh1"], params["wh2"], params["bh2"],
        params["wh3"], params["bh3"], params["who"], params["bho"],
    ]
    return pl.pallas_call(
        _fused_kernel,
        out_shape=jax.ShapeDtypeStruct((B, 2 * OUT_SIZE), jnp.float32),
        in_specs=[_VMEM] * len(args),
        out_specs=_VMEM,
        scratch_shapes=[
            pltpu.VMEM((B, IMG + 2, (IMG + 2) * IN_C), jnp.float32),               # x1 padded
            pltpu.VMEM((B, IMG // 2 + 2, (IMG // 2 + 2) * CONV_CH[0]), jnp.float32),  # x2 padded
            pltpu.VMEM((B, IMG // 4 + 2, (IMG // 4 + 2) * CONV_CH[1]), jnp.float32),  # x3 padded
            pltpu.VMEM((B, CONV_CH[2] * (IMG // 4) * (IMG // 4)), jnp.float32),    # conv feat
        ],
        compiler_params=pltpu.CompilerParams(vmem_limit_bytes=32 * 1024 * 1024),
    )(*args)


# ------------------------------ glue layers ----------------------------------
def random_crop(img_nchw, pad, key):
    """RandomCrop from the module: zero-pad by `pad`, per-sample random crop.
    # TODO(synk): torch's RNG stream is not reproducible; offsets come from a
    # fixed jax.random key instead."""
    B, C, H, W = img_nchw.shape
    padded = jnp.pad(img_nchw, ((0, 0), (0, 0), (pad, pad), (pad, pad)))
    offs = jax.random.randint(key, (B, 2), 0, 2 * pad + 1)

    def crop_one(im, o):
        return jax.lax.dynamic_slice(im, (0, o[0], o[1]), (C, H, W))

    return jax.vmap(crop_one)(padded, offs)


# ------------------------------ parameters -----------------------------------
def _xavier_uniform_conv(key, co, ci, k=3):
    fan_in, fan_out = ci * k * k, co * k * k
    bound = (6.0 / (fan_in + fan_out)) ** 0.5
    return jax.random.uniform(key, (co, ci, k, k), jnp.float32, -bound, bound)


def _build_conv_matrices(w, width):
    """w: (dh, dw, Ci, Co).  Returns A (3, (width+2)*Ci, width*Co) so that the
    'same' conv in (row=h, col=w*ci) layout is  sum_dh  Xpad[dh:dh+H,:] @ A[dh]."""
    _, _, ci, co = w.shape
    wp = width + 2
    a = np.zeros((3, wp * ci, width * co), np.float32)
    for dh in range(3):
        for w_out in range(width):
            for dw in range(3):
                wpix = w_out + dw
                a[dh, wpix * ci:(wpix + 1) * ci, w_out * co:(w_out + 1) * co] = w[dh, dw]
    return a


def _build_pool_select(hh, ww, ch):
    """0/1 selectors for 2x2/stride-2 max pool in (row=h, col=w*c) layout."""
    r = np.zeros((2, hh // 2, hh), np.float32)
    for p in range(2):
        for h2 in range(hh // 2):
            r[p, h2, 2 * h2 + p] = 1.0
    s = np.zeros((2, ww * ch, (ww // 2) * ch), np.float32)
    for q in range(2):
        for w2 in range(ww // 2):
            for c in range(ch):
                s[q, (2 * w2 + q) * ch + c, w2 * ch + c] = 1.0
    return r, s


def init_params(key):
    keys = iter(jax.random.split(key, 32))
    init_w = 1e-4
    p = {}

    # conv layers: xavier_uniform (torch layout), zero bias, folded into A[dh] matrices
    chans = (IN_C,) + CONV_CH
    widths = (IMG, IMG // 2, IMG // 4)
    for i in range(3):
        ci, co = chans[i], chans[i + 1]
        w_torch = _xavier_uniform_conv(next(keys), co, ci)           # (Co,Ci,3,3)
        w = np.asarray(jnp.transpose(w_torch, (2, 3, 1, 0)))         # (dh,dw,ci,co)
        p[f"a{i + 1}"] = jnp.asarray(_build_conv_matrices(w, widths[i]))
        p[f"b{i + 1}r"] = jnp.zeros((1, widths[i] * co), jnp.float32)  # conv.bias = 0

    r1, s1 = _build_pool_select(widths[0], widths[0], CONV_CH[0])
    r2, s2 = _build_pool_select(widths[1], widths[1], CONV_CH[1])
    p["r1"], p["s1"] = jnp.asarray(r1), jnp.asarray(s1)
    p["r2"], p["s2"] = jnp.asarray(r2), jnp.asarray(s2)

    # CNN fc1 (260 -> 1024) and last_fc (1024 -> 256), uniform +-1e-4
    conv_flat = CONV_CH[-1] * (IMG // 4) * (IMG // 4)                 # 256
    w1_t = jax.random.uniform(next(keys), (conv_flat + ACTION_DIM, FC_HIDDEN),
                              jnp.float32, -init_w, init_w)           # torch weight.T
    hh = ww = IMG // 4
    cc = CONV_CH[-1]
    # reorder fc1 conv rows from torch NCHW (c,h,w) flatten to the kernel's NHWC (h,w,c)
    perm = np.array([c * hh * ww + h * ww + w
                     for h in range(hh) for w in range(ww) for c in range(cc)], np.int32)
    p["w1c"] = w1_t[:conv_flat][perm]
    p["w1a"] = w1_t[conv_flat:]
    p["b1"] = jax.random.uniform(next(keys), (1, FC_HIDDEN), jnp.float32, -init_w, init_w)
    p["wl"] = jax.random.uniform(next(keys), (FC_HIDDEN, CONCAT_SIZE), jnp.float32, -init_w, init_w)
    p["bl"] = jax.random.uniform(next(keys), (1, CONCAT_SIZE), jnp.float32, -init_w, init_w)

    # two heads (rlkit Mlp: fanin_init hidden, bias 0.1, last +-3e-3), stacked on axis 0
    hw = {k: [] for k in ("wh1", "bh1", "wh2", "bh2", "wh3", "bh3", "who", "bho")}
    for _ in range(2):
        in_dim = CONCAT_SIZE
        for li, hdim in enumerate(HEAD_HIDDEN, start=1):
            bound = 1.0 / (in_dim ** 0.5)
            hw[f"wh{li}"].append(jax.random.uniform(next(keys), (in_dim, hdim),
                                                    jnp.float32, -bound, bound))
            hw[f"bh{li}"].append(jnp.full((1, hdim), 0.1, jnp.float32))
            in_dim = hdim
        hw["who"].append(jax.random.uniform(next(keys), (in_dim, OUT_SIZE),
                                            jnp.float32, -3e-3, 3e-3))
        hw["bho"].append(jax.random.uniform(next(keys), (1, OUT_SIZE),
                                            jnp.float32, -3e-3, 3e-3))
    for k, v in hw.items():
        p[k] = jnp.stack(v)
    return p


# ------------------------------ full forward ---------------------------------
def two_head_cnn_forward(params, obs, action, aug_key):
    B = obs.shape[0]
    flat = jnp.concatenate([obs, action], axis=1)          # torch.cat(inputs, dim=1)
    conv_len = IN_C * IMG * IMG
    conv_in = flat[:, :conv_len]
    extra = flat[:, conv_len:conv_len + ACTION_DIM]        # added_fc_input

    img = conv_in.reshape(B, IN_C, IMG, IMG)               # NCHW, matches .view
    if B > 1:                                              # image_augmentation
        img = random_crop(img, AUG_PAD, aug_key)
    # NCHW -> NHWC rows flattened to (B, H, W*C) for the in-kernel structured conv
    x = jnp.transpose(img, (0, 2, 3, 1)).reshape(B, IMG, IMG * IN_C)

    out = _fused_forward(params, x, extra)                 # (B, 2) = [head1 | head2]
    return out[:, :OUT_SIZE], out[:, OUT_SIZE:]


if __name__ == "__main__":
    root = jax.random.PRNGKey(0)
    pkey, okey, akey, ckey = jax.random.split(root, 4)

    params = init_params(pkey)
    B = 2
    obs = jax.random.normal(okey, (B, IN_C * IMG * IMG), jnp.float32)
    act = jax.random.normal(akey, (B, ACTION_DIM), jnp.float32)

    fwd = jax.jit(two_head_cnn_forward)
    out1, out2 = fwd(params, obs, act, ckey)
    jax.block_until_ready((out1, out2))

    assert out1.shape == (B, OUT_SIZE) and out2.shape == (B, OUT_SIZE)
    assert out1.dtype == jnp.float32 and out2.dtype == jnp.float32
    assert bool(jnp.all(jnp.isfinite(out1))) and bool(jnp.all(jnp.isfinite(out2)))
    print("KERNEL_OK")
</pallas_src>

<mosaic_0001>
module attributes {stable_mosaic.version = 11 : i64} {
  func.func @_fused_kernel(%arg0: memref<2x16x48xf32, #tpu.memory_space<vmem>>, %arg1: memref<2x4xf32, #tpu.memory_space<vmem>>, %arg2: memref<3x54x256xf32, #tpu.memory_space<vmem>>, %arg3: memref<1x256xf32, #tpu.memory_space<vmem>>, %arg4: memref<3x160x128xf32, #tpu.memory_space<vmem>>, %arg5: memref<1x128xf32, #tpu.memory_space<vmem>>, %arg6: memref<3x96x64xf32, #tpu.memory_space<vmem>>, %arg7: memref<1x64xf32, #tpu.memory_space<vmem>>, %arg8: memref<2x8x16xf32, #tpu.memory_space<vmem>>, %arg9: memref<2x256x128xf32, #tpu.memory_space<vmem>>, %arg10: memref<2x4x8xf32, #tpu.memory_space<vmem>>, %arg11: memref<2x128x64xf32, #tpu.memory_space<vmem>>, %arg12: memref<256x1024xf32, #tpu.memory_space<vmem>>, %arg13: memref<4x1024xf32, #tpu.memory_space<vmem>>, %arg14: memref<1x1024xf32, #tpu.memory_space<vmem>>, %arg15: memref<1024x256xf32, #tpu.memory_space<vmem>>, %arg16: memref<1x256xf32, #tpu.memory_space<vmem>>, %arg17: memref<2x256x512xf32, #tpu.memory_space<vmem>>, %arg18: memref<2x1x512xf32, #tpu.memory_space<vmem>>, %arg19: memref<2x512x512xf32, #tpu.memory_space<vmem>>, %arg20: memref<2x1x512xf32, #tpu.memory_space<vmem>>, %arg21: memref<2x512x512xf32, #tpu.memory_space<vmem>>, %arg22: memref<2x1x512xf32, #tpu.memory_space<vmem>>, %arg23: memref<2x512x1xf32, #tpu.memory_space<vmem>>, %arg24: memref<2x1x1xf32, #tpu.memory_space<vmem>>, %arg25: memref<2x2xf32, #tpu.memory_space<vmem>>, %arg26: memref<2x18x54xf32, #tpu.memory_space<vmem>>, %arg27: memref<2x10x160xf32, #tpu.memory_space<vmem>>, %arg28: memref<2x6x96xf32, #tpu.memory_space<vmem>>, %arg29: memref<2x256xf32, #tpu.memory_space<vmem>>) attributes {dimension_semantics = [], scalar_prefetch = 0 : i64, scratch_operands = 4 : i64, tpu.core_type = #tpu.core_type<tc>} {
    %cst = arith.constant 0.000000e+00 : f32
    %0 = vector.broadcast %cst : f32 to vector<2x18x54xf32>
    %c0 = arith.constant 0 : index
    %c0_0 = arith.constant 0 : index
    %c0_1 = arith.constant 0 : index
    %1 = vector.load %arg26[%c0, %c0_0, %c0_1] : memref<2x18x54xf32, #tpu.memory_space<vmem>>, vector<2x18x54xf32>
    tpu.vector_store %arg26[%c0, %c0_0, %c0_1], %0 {strides = array<i32>} : memref<2x18x54xf32, #tpu.memory_space<vmem>>, vector<2x18x54xf32>,
    %cst_2 = arith.constant 0.000000e+00 : f32
    %2 = vector.broadcast %cst_2 : f32 to vector<2x10x160xf32>
    %c0_3 = arith.constant 0 : index
    %c0_4 = arith.constant 0 : index
    %c0_5 = arith.constant 0 : index
    %3 = vector.load %arg27[%c0_3, %c0_4, %c0_5] : memref<2x10x160xf32, #tpu.memory_space<vmem>>, vector<2x10x160xf32>
    tpu.vector_store %arg27[%c0_3, %c0_4, %c0_5], %2 {strides = array<i32>} : memref<2x10x160xf32, #tpu.memory_space<vmem>>, vector<2x10x160xf32>,
    %cst_6 = arith.constant 0.000000e+00 : f32
    %4 = vector.broadcast %cst_6 : f32 to vector<2x6x96xf32>
    %c0_7 = arith.constant 0 : index
    %c0_8 = arith.constant 0 : index
    %c0_9 = arith.constant 0 : index
    %5 = vector.load %arg28[%c0_7, %c0_8, %c0_9] : memref<2x6x96xf32, #tpu.memory_space<vmem>>, vector<2x6x96xf32>
    tpu.vector_store %arg28[%c0_7, %c0_8, %c0_9], %4 {strides = array<i32>} : memref<2x6x96xf32, #tpu.memory_space<vmem>>, vector<2x6x96xf32>,
    %c0_10 = arith.constant 0 : index
    %c0_11 = arith.constant 0 : index
    %c0_12 = arith.constant 0 : index
    %6 = vector.load %arg0[%c0_10, %c0_11, %c0_12] : memref<2x16x48xf32, #tpu.memory_space<vmem>>, vector<2x16x48xf32>
    %c0_13 = arith.constant 0 : index
    %c1 = arith.constant 1 : index
    %c3 = arith.constant 3 : index
    %7 = vector.load %arg26[%c0_13, %c1, %c3] : memref<2x18x54xf32, #tpu.memory_space<vmem>>, vector<2x16x48xf32>
    tpu.vector_store %arg26[%c0_13, %c1, %c3], %6 {strides = array<i32>} : memref<2x18x54xf32, #tpu.memory_space<vmem>>, vector<2x16x48xf32>,
    %c0_14 = arith.constant 0 : index
    %c0_15 = arith.constant 0 : index
    %c0_16 = arith.constant 0 : index
    %8 = vector.load %arg26[%c0_14, %c0_15, %c0_16] : memref<2x18x54xf32, #tpu.memory_space<vmem>>, vector<1x18x54xf32>
    %9 = vector.shape_cast %8 : vector<1x18x54xf32> to vector<18x54xf32>
    %c0_17 = arith.constant 0 : index
    %c0_18 = arith.constant 0 : index
    %10 = vector.load %arg3[%c0_17, %c0_18] : memref<1x256xf32, #tpu.memory_space<vmem>>, vector<1x256xf32>
    %11 = vector.extract_strided_slice %9 {offsets = [0, 0], sizes = [16, 54], strides = [1, 1]} : vector<18x54xf32> to vector<16x54xf32>
    %c0_19 = arith.constant 0 : index
    %c0_20 = arith.constant 0 : index
    %c0_21 = arith.constant 0 : index
    %12 = vector.load %arg2[%c0_19, %c0_20, %c0_21] : memref<3x54x256xf32, #tpu.memory_space<vmem>>, vector<1x54x256xf32>
    %13 = vector.shape_cast %12 : vector<1x54x256xf32> to vector<54x256xf32>
    %cst_22 = arith.constant dense<0.000000e+00> : vector<16x256xf32>
    %14 = tpu.matmul %11, %13, %cst_22 {dimension_numbers = #tpu.dot_dimension_numbers<[1], [0], [0], [1], [0, 0, 1, 1], [], []>} : vector<16x54xf32>, vector<54x256xf32>, vector<16x256xf32> -> vector<16x256xf32>
    %15 = vector.broadcast %10 : vector<1x256xf32> to vector<16x256xf32>
    %16 = arith.addf %15, %14 : vector<16x256xf32>
    %17 = vector.extract_strided_slice %9 {offsets = [1, 0], sizes = [16, 54], strides = [1, 1]} : vector<18x54xf32> to vector<16x54xf32>
    %c1_23 = arith.constant 1 : index
    %c0_24 = arith.constant 0 : index
    %c0_25 = arith.constant 0 : index
    %18 = vector.load %arg2[%c1_23, %c0_24, %c0_25] : memref<3x54x256xf32, #tpu.memory_space<vmem>>, vector<1x54x256xf32>
    %19 = vector.shape_cast %18 : vector<1x54x256xf32> to vector<54x256xf32>
    %cst_26 = arith.constant dense<0.000000e+00> : vector<16x256xf32>
    %20 = tpu.matmul %17, %19, %cst_26 {dimension_numbers = #tpu.dot_dimension_numbers<[1], [0], [0], [1], [0, 0, 1, 1], [], []>} : vector<16x54xf32>, vector<54x256xf32>, vector<16x256xf32> -> vector<16x256xf32>
    %21 = arith.addf %16, %20 : vector<16x256xf32>
    %22 = vector.extract_strided_slice %9 {offsets = [2, 0], sizes = [16, 54], strides = [1, 1]} : vector<18x54xf32> to vector<16x54xf32>
    %c2 = arith.constant 2 : index
    %c0_27 = arith.constant 0 : index
    %c0_28 = arith.constant 0 : index
    %23 = vector.load %arg2[%c2, %c0_27, %c0_28] : memref<3x54x256xf32, #tpu.memory_space<vmem>>, vector<1x54x256xf32>
    %24 = vector.shape_cast %23 : vector<1x54x256xf32> to vector<54x256xf32>
    %cst_29 = arith.constant dense<0.000000e+00> : vector<16x256xf32>
    %25 = tpu.matmul %22, %24, %cst_29 {dimension_numbers = #tpu.dot_dimension_numbers<[1], [0], [0], [1], [0, 0, 1, 1], [], []>} : vector<16x54xf32>, vector<54x256xf32>, vector<16x256xf32> -> vector<16x256xf32>
    %26 = arith.addf %21, %25 : vector<16x256xf32>
    %c0_30 = arith.constant 0 : index
    %c0_31 = arith.constant 0 : index
    %c0_32 = arith.constant 0 : index
    %27 = vector.load %arg9[%c0_30, %c0_31, %c0_32] : memref<2x256x128xf32, #tpu.memory_space<vmem>>, vector<1x256x128xf32>
    %28 = vector.shape_cast %27 : vector<1x256x128xf32> to vector<256x128xf32>
    %cst_33 = arith.constant dense<0.000000e+00> : vector<16x128xf32>
    %29 = tpu.matmul %26, %28, %cst_33 {dimension_numbers = #tpu.dot_dimension_numbers<[1], [0], [0], [1], [0, 0, 1, 1], [], []>} : vector<16x256xf32>, vector<256x128xf32>, vector<16x128xf32> -> vector<16x128xf32>
    %c1_34 = arith.constant 1 : index
    %c0_35 = arith.constant 0 : index
    %c0_36 = arith.constant 0 : index
    %30 = vector.load %arg9[%c1_34, %c0_35, %c0_36] : memref<2x256x128xf32, #tpu.memory_space<vmem>>, vector<1x256x128xf32>
    %31 = vector.shape_cast %30 : vector<1x256x128xf32> to vector<256x128xf32>
    %cst_37 = arith.constant dense<0.000000e+00> : vector<16x128xf32>
    %32 = tpu.matmul %26, %31, %cst_37 {dimension_numbers = #tpu.dot_dimension_numbers<[1], [0], [0], [1], [0, 0, 1, 1], [], []>} : vector<16x256xf32>, vector<256x128xf32>, vector<16x128xf32> -> vector<16x128xf32>
    %c0_38 = arith.constant 0 : index
    %c0_39 = arith.constant 0 : index
    %c0_40 = arith.constant 0 : index
    %33 = vector.load %arg8[%c0_38, %c0_39, %c0_40] : memref<2x8x16xf32, #tpu.memory_space<vmem>>, vector<1x8x16xf32>
    %34 = vector.shape_cast %33 : vector<1x8x16xf32> to vector<8x16xf32>
    %cst_41 = arith.constant dense<0.000000e+00> : vector<8x128xf32>
    %35 = tpu.matmul %34, %29, %cst_41 {dimension_numbers = #tpu.dot_dimension_numbers<[1], [0], [0], [1], [0, 0, 1, 1], [], []>} : vector<8x16xf32>, vector<16x128xf32>, vector<8x128xf32> -> vector<8x128xf32>
    %c1_42 = arith.constant 1 : index
    %c0_43 = arith.constant 0 : index
    %c0_44 = arith.constant 0 : index
    %36 = vector.load %arg8[%c1_42, %c0_43, %c0_44] : memref<2x8x16xf32, #tpu.memory_space<vmem>>, vector<1x8x16xf32>
    %37 = vector.shape_cast %36 : vector<1x8x16xf32> to vector<8x16xf32>
    %cst_45 = arith.constant dense<0.000000e+00> : vector<8x128xf32>
    %38 = tpu.matmul %37, %29, %cst_45 {dimension_numbers = #tpu.dot_dimension_numbers<[1], [0], [0], [1], [0, 0, 1, 1], [], []>} : vector<8x16xf32>, vector<16x128xf32>, vector<8x128xf32> -> vector<8x128xf32>
    %39 = arith.maximumf %35, %38 : vector<8x128xf32>
    %c0_46 = arith.constant 0 : index
    %c0_47 = arith.constant 0 : index
    %c0_48 = arith.constant 0 : index
    %40 = vector.load %arg8[%c0_46, %c0_47, %c0_48] : memref<2x8x16xf32, #tpu.memory_space<vmem>>, vector<1x8x16xf32>
    %41 = vector.shape_cast %40 : vector<1x8x16xf32> to vector<8x16xf32>
    %cst_49 = arith.constant dense<0.000000e+00> : vector<8x128xf32>
    %42 = tpu.matmul %41, %32, %cst_49 {dimension_numbers = #tpu.dot_dimension_numbers<[1], [0], [0], [1], [0, 0, 1, 1], [], []>} : vector<8x16xf32>, vector<16x128xf32>, vector<8x128xf32> -> vector<8x128xf32>
    %c1_50 = arith.constant 1 : index
    %c0_51 = arith.constant 0 : index
    %c0_52 = arith.constant 0 : index
    %43 = vector.load %arg8[%c1_50, %c0_51, %c0_52] : memref<2x8x16xf32, #tpu.memory_space<vmem>>, vector<1x8x16xf32>
    %44 = vector.shape_cast %43 : vector<1x8x16xf32> to vector<8x16xf32>
    %cst_53 = arith.constant dense<0.000000e+00> : vector<8x128xf32>
    %45 = tpu.matmul %44, %32, %cst_53 {dimension_numbers = #tpu.dot_dimension_numbers<[1], [0], [0], [1], [0, 0, 1, 1], [], []>} : vector<8x16xf32>, vector<16x128xf32>, vector<8x128xf32> -> vector<8x128xf32>
    %46 = arith.maximumf %42, %45 : vector<8x128xf32>
    %47 = arith.maximumf %39, %46 : vector<8x128xf32>
    %cst_54 = arith.constant 0.000000e+00 : f32
    %48 = vector.broadcast %cst_54 : f32 to vector<8x128xf32>
    %49 = arith.maximumf %47, %48 : vector<8x128xf32>
    %c0_55 = arith.constant 0 : index
    %c1_56 = arith.constant 1 : index
    %c16 = arith.constant 16 : index
    %50 = vector.load %arg27[%c0_55, %c1_56, %c16] : memref<2x10x160xf32, #tpu.memory_space<vmem>>, vector<1x8x128xf32>
    %51 = vector.shape_cast %50 : vector<1x8x128xf32> to vector<8x128xf32>
    %52 = vector.shape_cast %49 : vector<8x128xf32> to vector<1x8x128xf32>
    tpu.vector_store %arg27[%c0_55, %c1_56, %c16], %52 {strides = array<i32>} : memref<2x10x160xf32, #tpu.memory_space<vmem>>, vector<1x8x128xf32>,
    %c0_57 = arith.constant 0 : index
    %c0_58 = arith.constant 0 : index
    %c0_59 = arith.constant 0 : index
    %53 = vector.load %arg27[%c0_57, %c0_58, %c0_59] : memref<2x10x160xf32, #tpu.memory_space<vmem>>, vector<1x10x160xf32>
    %54 = vector.shape_cast %53 : vector<1x10x160xf32> to vector<10x160xf32>
    %c0_60 = arith.constant 0 : index
    %c0_61 = arith.constant 0 : index
    %55 = vector.load %arg5[%c0_60, %c0_61] : memref<1x128xf32, #tpu.memory_space<vmem>>, vector<1x128xf32>
    %56 = vector.extract_strided_slice %54 {offsets = [0, 0], sizes = [8, 160], strides = [1, 1]} : vector<10x160xf32> to vector<8x160xf32>
    %c0_62 = arith.constant 0 : index
    %c0_63 = arith.constant 0 : index
    %c0_64 = arith.constant 0 : index
    %57 = vector.load %arg4[%c0_62, %c0_63, %c0_64] : memref<3x160x128xf32, #tpu.memory_space<vmem>>, vector<1x160x128xf32>
    %58 = vector.shape_cast %57 : vector<1x160x128xf32> to vector<160x128xf32>
    %cst_65 = arith.constant dense<0.000000e+00> : vector<8x128xf32>
    %59 = tpu.matmul %56, %58, %cst_65 {dimension_numbers = #tpu.dot_dimension_numbers<[1], [0], [0], [1], [0, 0, 1, 1], [], []>} : vector<8x160xf32>, vector<160x128xf32>, vector<8x128xf32> -> vector<8x128xf32>
    %60 = vector.broadcast %55 : vector<1x128xf32> to vector<8x128xf32>
    %61 = arith.addf %60, %59 : vector<8x128xf32>
    %62 = vector.extract_strided_slice %54 {offsets = [1, 0], sizes = [8, 160], strides = [1, 1]} : vector<10x160xf32> to vector<8x160xf32>
    %c1_66 = arith.constant 1 : index
    %c0_67 = arith.constant 0 : index
    %c0_68 = arith.constant 0 : index
    %63 = vector.load %arg4[%c1_66, %c0_67, %c0_68] : memref<3x160x128xf32, #tpu.memory_space<vmem>>, vector<1x160x128xf32>
    %64 = vector.shape_cast %63 : vector<1x160x128xf32> to vector<160x128xf32>
    %cst_69 = arith.constant dense<0.000000e+00> : vector<8x128xf32>
    %65 = tpu.matmul %62, %64, %cst_69 {dimension_numbers = #tpu.dot_dimension_numbers<[1], [0], [0], [1], [0, 0, 1, 1], [], []>} : vector<8x160xf32>, vector<160x128xf32>, vector<8x128xf32> -> vector<8x128xf32>
    %66 = arith.addf %61, %65 : vector<8x128xf32>
    %67 = vector.extract_strided_slice %54 {offsets = [2, 0], sizes = [8, 160], strides = [1, 1]} : vector<10x160xf32> to vector<8x160xf32>
    %c2_70 = arith.constant 2 : index
    %c0_71 = arith.constant 0 : index
    %c0_72 = arith.constant 0 : index
    %68 = vector.load %arg4[%c2_70, %c0_71, %c0_72] : memref<3x160x128xf32, #tpu.memory_space<vmem>>, vector<1x160x128xf32>
    %69 = vector.shape_cast %68 : vector<1x160x128xf32> to vector<160x128xf32>
    %cst_73 = arith.constant dense<0.000000e+00> : vector<8x128xf32>
    %70 = tpu.matmul %67, %69, %cst_73 {dimension_numbers = #tpu.dot_dimension_numbers<[1], [0], [0], [1], [0, 0, 1, 1], [], []>} : vector<8x160xf32>, vector<160x128xf32>, vector<8x128xf32> -> vector<8x128xf32>
    %71 = arith.addf %66, %70 : vector<8x128xf32>
    %c0_74 = arith.constant 0 : index
    %c0_75 = arith.constant 0 : index
    %c0_76 = arith.constant 0 : index
    %72 = vector.load %arg11[%c0_74, %c0_75, %c0_76] : memref<2x128x64xf32, #tpu.memory_space<vmem>>, vector<1x128x64xf32>
    %73 = vector.shape_cast %72 : vector<1x128x64xf32> to vector<128x64xf32>
    %cst_77 = arith.constant dense<0.000000e+00> : vector<8x64xf32>
    %74 = tpu.matmul %71, %73, %cst_77 {dimension_numbers = #tpu.dot_dimension_numbers<[1], [0], [0], [1], [0, 0, 1, 1], [], []>} : vector<8x128xf32>, vector<128x64xf32>, vector<8x64xf32> -> vector<8x64xf32>
    %c1_78 = arith.constant 1 : index
    %c0_79 = arith.constant 0 : index
    %c0_80 = arith.constant 0 : index
    %75 = vector.load %arg11[%c1_78, %c0_79, %c0_80] : memref<2x128x64xf32, #tpu.memory_space<vmem>>, vector<1x128x64xf32>
    %76 = vector.shape_cast %75 : vector<1x128x64xf32> to vector<128x64xf32>
    %cst_81 = arith.constant dense<0.000000e+00> : vector<8x64xf32>
    %77 = tpu.matmul %71, %76, %cst_81 {dimension_numbers = #tpu.dot_dimension_numbers<[1], [0], [0], [1], [0, 0, 1, 1], [], []>} : vector<8x128xf32>, vector<128x64xf32>, vector<8x64xf32> -> vector<8x64xf32>
    %c0_82 = arith.constant 0 : index
    %c0_83 = arith.constant 0 : index
    %c0_84 = arith.constant 0 : index
    %78 = vector.load %arg10[%c0_82, %c0_83, %c0_84] : memref<2x4x8xf32, #tpu.memory_space<vmem>>, vector<1x4x8xf32>
    %79 = vector.shape_cast %78 : vector<1x4x8xf32> to vector<4x8xf32>
    %cst_85 = arith.constant dense<0.000000e+00> : vector<4x64xf32>
    %80 = tpu.matmul %79, %74, %cst_85 {dimension_numbers = #tpu.dot_dimension_numbers<[1], [0], [0], [1], [0, 0, 1, 1], [], []>} : vector<4x8xf32>, vector<8x64xf32>, vector<4x64xf32> -> vector<4x64xf32>
    %c1_86 = arith.constant 1 : index
    %c0_87 = arith.constant 0 : index
    %c0_88 = arith.constant 0 : index
    %81 = vector.load %arg10[%c1_86, %c0_87, %c0_88] : memref<2x4x8xf32, #tpu.memory_space<vmem>>, vector<1x4x8xf32>
    %82 = vector.shape_cast %81 : vector<1x4x8xf32> to vector<4x8xf32>
    %cst_89 = arith.constant dense<0.000000e+00> : vector<4x64xf32>
    %83 = tpu.matmul %82, %74, %cst_89 {dimension_numbers = #tpu.dot_dimension_numbers<[1], [0], [0], [1], [0, 0, 1, 1], [], []>} : vector<4x8xf32>, vector<8x64xf32>, vector<4x64xf32> -> vector<4x64xf32>
    %84 = arith.maximumf %80, %83 : vector<4x64xf32>
    %c0_90 = arith.constant 0 : index
    %c0_91 = arith.constant 0 : index
    %c0_92 = arith.constant 0 : index
    %85 = vector.load %arg10[%c0_90, %c0_91, %c0_92] : memref<2x4x8xf32, #tpu.memory_space<vmem>>, vector<1x4x8xf32>
    %86 = vector.shape_cast %85 : vector<1x4x8xf32> to vector<4x8xf32>
    %cst_93 = arith.constant dense<0.000000e+00> : vector<4x64xf32>
    %87 = tpu.matmul %86, %77, %cst_93 {dimension_numbers = #tpu.dot_dimension_numbers<[1], [0], [0], [1], [0, 0, 1, 1], [], []>} : vector<4x8xf32>, vector<8x64xf32>, vector<4x64xf32> -> vector<4x64xf32>
    %c1_94 = arith.constant 1 : index
    %c0_95 = arith.constant 0 : index
    %c0_96 = arith.constant 0 : index
    %88 = vector.load %arg10[%c1_94, %c0_95, %c0_96] : memref<2x4x8xf32, #tpu.memory_space<vmem>>, vector<1x4x8xf32>
    %89 = vector.shape_cast %88 : vector<1x4x8xf32> to vector<4x8xf32>
    %cst_97 = arith.constant dense<0.000000e+00> : vector<4x64xf32>
    %90 = tpu.matmul %89, %77, %cst_97 {dimension_numbers = #tpu.dot_dimension_numbers<[1], [0], [0], [1], [0, 0, 1, 1], [], []>} : vector<4x8xf32>, vector<8x64xf32>, vector<4x64xf32> -> vector<4x64xf32>
    %91 = arith.maximumf %87, %90 : vector<4x64xf32>
    %92 = arith.maximumf %84, %91 : vector<4x64xf32>
    %cst_98 = arith.constant 0.000000e+00 : f32
    %93 = vector.broadcast %cst_98 : f32 to vector<4x64xf32>
    %94 = arith.maximumf %92, %93 : vector<4x64xf32>
    %c0_99 = arith.constant 0 : index
    %c1_100 = arith.constant 1 : index
    %c16_101 = arith.constant 16 : index
    %95 = vector.load %arg28[%c0_99, %c1_100, %c16_101] : memref<2x6x96xf32, #tpu.memory_space<vmem>>, vector<1x4x64xf32>
    %96 = vector.shape_cast %95 : vector<1x4x64xf32> to vector<4x64xf32>
    %97 = vector.shape_cast %94 : vector<4x64xf32> to vector<1x4x64xf32>
    tpu.vector_store %arg28[%c0_99, %c1_100, %c16_101], %97 {strides = array<i32>} : memref<2x6x96xf32, #tpu.memory_space<vmem>>, vector<1x4x64xf32>,
    %c0_102 = arith.constant 0 : index
    %c0_103 = arith.constant 0 : index
    %c0_104 = arith.constant 0 : index
    %98 = vector.load %arg28[%c0_102, %c0_103, %c0_104] : memref<2x6x96xf32, #tpu.memory_space<vmem>>, vector<1x6x96xf32>
    %99 = vector.shape_cast %98 : vector<1x6x96xf32> to vector<6x96xf32>
    %c0_105 = arith.constant 0 : index
    %c0_106 = arith.constant 0 : index
    %100 = vector.load %arg7[%c0_105, %c0_106] : memref<1x64xf32, #tpu.memory_space<vmem>>, vector<1x64xf32>
    %101 = vector.extract_strided_slice %99 {offsets = [0, 0], sizes = [4, 96], strides = [1, 1]} : vector<6x96xf32> to vector<4x96xf32>
    %c0_107 = arith.constant 0 : index
    %c0_108 = arith.constant 0 : index
    %c0_109 = arith.constant 0 : index
    %102 = vector.load %arg6[%c0_107, %c0_108, %c0_109] : memref<3x96x64xf32, #tpu.memory_space<vmem>>, vector<1x96x64xf32>
    %103 = vector.shape_cast %102 : vector<1x96x64xf32> to vector<96x64xf32>
    %cst_110 = arith.constant dense<0.000000e+00> : vector<4x64xf32>
    %104 = tpu.matmul %101, %103, %cst_110 {dimension_numbers = #tpu.dot_dimension_numbers<[1], [0], [0], [1], [0, 0, 1, 1], [], []>} : vector<4x96xf32>, vector<96x64xf32>, vector<4x64xf32> -> vector<4x64xf32>
    %105 = vector.broadcast %100 : vector<1x64xf32> to vector<4x64xf32>
    %106 = arith.addf %105, %104 : vector<4x64xf32>
    %107 = vector.extract_strided_slice %99 {offsets = [1, 0], sizes = [4, 96], strides = [1, 1]} : vector<6x96xf32> to vector<4x96xf32>
    %c1_111 = arith.constant 1 : index
    %c0_112 = arith.constant 0 : index
    %c0_113 = arith.constant 0 : index
    %108 = vector.load %arg6[%c1_111, %c0_112, %c0_113] : memref<3x96x64xf32, #tpu.memory_space<vmem>>, vector<1x96x64xf32>
    %109 = vector.shape_cast %108 : vector<1x96x64xf32> to vector<96x64xf32>
    %cst_114 = arith.constant dense<0.000000e+00> : vector<4x64xf32>
    %110 = tpu.matmul %107, %109, %cst_114 {dimension_numbers = #tpu.dot_dimension_numbers<[1], [0], [0], [1], [0, 0, 1, 1], [], []>} : vector<4x96xf32>, vector<96x64xf32>, vector<4x64xf32> -> vector<4x64xf32>
    %111 = arith.addf %106, %110 : vector<4x64xf32>
    %112 = vector.extract_strided_slice %99 {offsets = [2, 0], sizes = [4, 96], strides = [1, 1]} : vector<6x96xf32> to vector<4x96xf32>
    %c2_115 = arith.constant 2 : index
    %c0_116 = arith.constant 0 : index
    %c0_117 = arith.constant 0 : index
    %113 = vector.load %arg6[%c2_115, %c0_116, %c0_117] : memref<3x96x64xf32, #tpu.memory_space<vmem>>, vector<1x96x64xf32>
    %114 = vector.shape_cast %113 : vector<1x96x64xf32> to vector<96x64xf32>
    %cst_118 = arith.constant dense<0.000000e+00> : vector<4x64xf32>
    %115 = tpu.matmul %112, %114, %cst_118 {dimension_numbers = #tpu.dot_dimension_numbers<[1], [0], [0], [1], [0, 0, 1, 1], [], []>} : vector<4x96xf32>, vector<96x64xf32>, vector<4x64xf32> -> vector<4x64xf32>
    %116 = arith.addf %111, %115 : vector<4x64xf32>
    %cst_119 = arith.constant 0.000000e+00 : f32
    %117 = vector.broadcast %cst_119 : f32 to vector<4x64xf32>
    %118 = arith.maximumf %116, %117 : vector<4x64xf32>
    %119 = vector.extract_strided_slice %118 {offsets = [0, 0], sizes = [1, 64], strides = [1, 1]} : vector<4x64xf32> to vector<1x64xf32>
    %c0_120 = arith.constant 0 : index
    %c0_121 = arith.constant 0 : index
    %120 = vector.load %arg29[%c0_120, %c0_121] : memref<2x256xf32, #tpu.memory_space<vmem>>, vector<1x64xf32>
    tpu.vector_store %arg29[%c0_120, %c0_121], %119 {strides = array<i32>} : memref<2x256xf32, #tpu.memory_space<vmem>>, vector<1x64xf32>,
    %121 = vector.extract_strided_slice %118 {offsets = [1, 0], sizes = [1, 64], strides = [1, 1]} : vector<4x64xf32> to vector<1x64xf32>
    %c0_122 = arith.constant 0 : index
    %c64 = arith.constant 64 : index
    %122 = vector.load %arg29[%c0_122, %c64] : memref<2x256xf32, #tpu.memory_space<vmem>>, vector<1x64xf32>
    tpu.vector_store %arg29[%c0_122, %c64], %121 {strides = array<i32>} : memref<2x256xf32, #tpu.memory_space<vmem>>, vector<1x64xf32>,
    %123 = vector.extract_strided_slice %118 {offsets = [2, 0], sizes = [1, 64], strides = [1, 1]} : vector<4x64xf32> to vector<1x64xf32>
    %c0_123 = arith.constant 0 : index
    %c128 = arith.constant 128 : index
    %124 = vector.load %arg29[%c0_123, %c128] : memref<2x256xf32, #tpu.memory_space<vmem>>, vector<1x64xf32>
    tpu.vector_store %arg29[%c0_123, %c128], %123 {strides = array<i32>} : memref<2x256xf32, #tpu.memory_space<vmem>>, vector<1x64xf32>,
    %125 = vector.extract_strided_slice %118 {offsets = [3, 0], sizes = [1, 64], strides = [1, 1]} : vector<4x64xf32> to vector<1x64xf32>
    %c0_124 = arith.constant 0 : index
    %c192 = arith.constant 192 : index
    %126 = vector.load %arg29[%c0_124, %c192] : memref<2x256xf32, #tpu.memory_space<vmem>>, vector<1x64xf32>
    tpu.vector_store %arg29[%c0_124, %c192], %125 {strides = array<i32>} : memref<2x256xf32, #tpu.memory_space<vmem>>, vector<1x64xf32>,
    %c1_125 = arith.constant 1 : index
    %c0_126 = arith.constant 0 : index
    %c0_127 = arith.constant 0 : index
    %127 = vector.load %arg26[%c1_125, %c0_126, %c0_127] : memref<2x18x54xf32, #tpu.memory_space<vmem>>, vector<1x18x54xf32>
    %128 = vector.shape_cast %127 : vector<1x18x54xf32> to vector<18x54xf32>
    %c0_128 = arith.constant 0 : index
    %c0_129 = arith.constant 0 : index
    %129 = vector.load %arg3[%c0_128, %c0_129] : memref<1x256xf32, #tpu.memory_space<vmem>>, vector<1x256xf32>
    %130 = vector.extract_strided_slice %128 {offsets = [0, 0], sizes = [16, 54], strides = [1, 1]} : vector<18x54xf32> to vector<16x54xf32>
    %c0_130 = arith.constant 0 : index
    %c0_131 = arith.constant 0 : index
    %c0_132 = arith.constant 0 : index
    %131 = vector.load %arg2[%c0_130, %c0_131, %c0_132] : memref<3x54x256xf32, #tpu.memory_space<vmem>>, vector<1x54x256xf32>
    %132 = vector.shape_cast %131 : vector<1x54x256xf32> to vector<54x256xf32>
    %cst_133 = arith.constant dense<0.000000e+00> : vector<16x256xf32>
    %133 = tpu.matmul %130, %132, %cst_133 {dimension_numbers = #tpu.dot_dimension_numbers<[1], [0], [0], [1], [0, 0, 1, 1], [], []>} : vector<16x54xf32>, vector<54x256xf32>, vector<16x256xf32> -> vector<16x256xf32>
    %134 = vector.broadcast %129 : vector<1x256xf32> to vector<16x256xf32>
    %135 = arith.addf %134, %133 : vector<16x256xf32>
    %136 = vector.extract_strided_slice %128 {offsets = [1, 0], sizes = [16, 54], strides = [1, 1]} : vector<18x54xf32> to vector<16x54xf32>
    %c1_134 = arith.constant 1 : index
    %c0_135 = arith.constant 0 : index
    %c0_136 = arith.constant 0 : index
    %137 = vector.load %arg2[%c1_134, %c0_135, %c0_136] : memref<3x54x256xf32, #tpu.memory_space<vmem>>, vector<1x54x256xf32>
    %138 = vector.shape_cast %137 : vector<1x54x256xf32> to vector<54x256xf32>
    %cst_137 = arith.constant dense<0.000000e+00> : vector<16x256xf32>
    %139 = tpu.matmul %136, %138, %cst_137 {dimension_numbers = #tpu.dot_dimension_numbers<[1], [0], [0], [1], [0, 0, 1, 1], [], []>} : vector<16x54xf32>, vector<54x256xf32>, vector<16x256xf32> -> vector<16x256xf32>
    %140 = arith.addf %135, %139 : vector<16x256xf32>
    %141 = vector.extract_strided_slice %128 {offsets = [2, 0], sizes = [16, 54], strides = [1, 1]} : vector<18x54xf32> to vector<16x54xf32>
    %c2_138 = arith.constant 2 : index
    %c0_139 = arith.constant 0 : index
    %c0_140 = arith.constant 0 : index
    %142 = vector.load %arg2[%c2_138, %c0_139, %c0_140] : memref<3x54x256xf32, #tpu.memory_space<vmem>>, vector<1x54x256xf32>
    %143 = vector.shape_cast %142 : vector<1x54x256xf32> to vector<54x256xf32>
    %cst_141 = arith.constant dense<0.000000e+00> : vector<16x256xf32>
    %144 = tpu.matmul %141, %143, %cst_141 {dimension_numbers = #tpu.dot_dimension_numbers<[1], [0], [0], [1], [0, 0, 1, 1], [], []>} : vector<16x54xf32>, vector<54x256xf32>, vector<16x256xf32> -> vector<16x256xf32>
    %145 = arith.addf %140, %144 : vector<16x256xf32>
    %c0_142 = arith.constant 0 : index
    %c0_143 = arith.constant 0 : index
    %c0_144 = arith.constant 0 : index
    %146 = vector.load %arg9[%c0_142, %c0_143, %c0_144] : memref<2x256x128xf32, #tpu.memory_space<vmem>>, vector<1x256x128xf32>
    %147 = vector.shape_cast %146 : vector<1x256x128xf32> to vector<256x128xf32>
    %cst_145 = arith.constant dense<0.000000e+00> : vector<16x128xf32>
    %148 = tpu.matmul %145, %147, %cst_145 {dimension_numbers = #tpu.dot_dimension_numbers<[1], [0], [0], [1], [0, 0, 1, 1], [], []>} : vector<16x256xf32>, vector<256x128xf32>, vector<16x128xf32> -> vector<16x128xf32>
    %c1_146 = arith.constant 1 : index
    %c0_147 = arith.constant 0 : index
    %c0_148 = arith.constant 0 : index
    %149 = vector.load %arg9[%c1_146, %c0_147, %c0_148] : memref<2x256x128xf32, #tpu.memory_space<vmem>>, vector<1x256x128xf32>
    %150 = vector.shape_cast %149 : vector<1x256x128xf32> to vector<256x128xf32>
    %cst_149 = arith.constant dense<0.000000e+00> : vector<16x128xf32>
    %151 = tpu.matmul %145, %150, %cst_149 {dimension_numbers = #tpu.dot_dimension_numbers<[1], [0], [0], [1], [0, 0, 1, 1], [], []>} : vector<16x256xf32>, vector<256x128xf32>, vector<16x128xf32> -> vector<16x128xf32>
    %c0_150 = arith.constant 0 : index
    %c0_151 = arith.constant 0 : index
    %c0_152 = arith.constant 0 : index
    %152 = vector.load %arg8[%c0_150, %c0_151, %c0_152] : memref<2x8x16xf32, #tpu.memory_space<vmem>>, vector<1x8x16xf32>
    %153 = vector.shape_cast %152 : vector<1x8x16xf32> to vector<8x16xf32>
    %cst_153 = arith.constant dense<0.000000e+00> : vector<8x128xf32>
    %154 = tpu.matmul %153, %148, %cst_153 {dimension_numbers = #tpu.dot_dimension_numbers<[1], [0], [0], [1], [0, 0, 1, 1], [], []>} : vector<8x16xf32>, vector<16x128xf32>, vector<8x128xf32> -> vector<8x128xf32>
    %c1_154 = arith.constant 1 : index
    %c0_155 = arith.constant 0 : index
    %c0_156 = arith.constant 0 : index
    %155 = vector.load %arg8[%c1_154, %c0_155, %c0_156] : memref<2x8x16xf32, #tpu.memory_space<vmem>>, vector<1x8x16xf32>
    %156 = vector.shape_cast %155 : vector<1x8x16xf32> to vector<8x16xf32>
    %cst_157 = arith.constant dense<0.000000e+00> : vector<8x128xf32>
    %157 = tpu.matmul %156, %148, %cst_157 {dimension_numbers = #tpu.dot_dimension_numbers<[1], [0], [0], [1], [0, 0, 1, 1], [], []>} : vector<8x16xf32>, vector<16x128xf32>, vector<8x128xf32> -> vector<8x128xf32>
    %158 = arith.maximumf %154, %157 : vector<8x128xf32>
    %c0_158 = arith.constant 0 : index
    %c0_159 = arith.constant 0 : index
    %c0_160 = arith.constant 0 : index
    %159 = vector.load %arg8[%c0_158, %c0_159, %c0_160] : memref<2x8x16xf32, #tpu.memory_space<vmem>>, vector<1x8x16xf32>
    %160 = vector.shape_cast %159 : vector<1x8x16xf32> to vector<8x16xf32>
    %cst_161 = arith.constant dense<0.000000e+00> : vector<8x128xf32>
    %161 = tpu.matmul %160, %151, %cst_161 {dimension_numbers = #tpu.dot_dimension_numbers<[1], [0], [0], [1], [0, 0, 1, 1], [], []>} : vector<8x16xf32>, vector<16x128xf32>, vector<8x128xf32> -> vector<8x128xf32>
    %c1_162 = arith.constant 1 : index
    %c0_163 = arith.constant 0 : index
    %c0_164 = arith.constant 0 : index
    %162 = vector.load %arg8[%c1_162, %c0_163, %c0_164] : memref<2x8x16xf32, #tpu.memory_space<vmem>>, vector<1x8x16xf32>
    %163 = vector.shape_cast %162 : vector<1x8x16xf32> to vector<8x16xf32>
    %cst_165 = arith.constant dense<0.000000e+00> : vector<8x128xf32>
    %164 = tpu.matmul %163, %151, %cst_165 {dimension_numbers = #tpu.dot_dimension_numbers<[1], [0], [0], [1], [0, 0, 1, 1], [], []>} : vector<8x16xf32>, vector<16x128xf32>, vector<8x128xf32> -> vector<8x128xf32>
    %165 = arith.maximumf %161, %164 : vector<8x128xf32>
    %166 = arith.maximumf %158, %165 : vector<8x128xf32>
    %cst_166 = arith.constant 0.000000e+00 : f32
    %167 = vector.broadcast %cst_166 : f32 to vector<8x128xf32>
    %168 = arith.maximumf %166, %167 : vector<8x128xf32>
    %c1_167 = arith.constant 1 : index
    %c1_168 = arith.constant 1 : index
    %c16_169 = arith.constant 16 : index
    %169 = vector.load %arg27[%c1_167, %c1_168, %c16_169] : memref<2x10x160xf32, #tpu.memory_space<vmem>>, vector<1x8x128xf32>
    %170 = vector.shape_cast %169 : vector<1x8x128xf32> to vector<8x128xf32>
    %171 = vector.shape_cast %168 : vector<8x128xf32> to vector<1x8x128xf32>
    tpu.vector_store %arg27[%c1_167, %c1_168, %c16_169], %171 {strides = array<i32>} : memref<2x10x160xf32, #tpu.memory_space<vmem>>, vector<1x8x128xf32>,
    %c1_170 = arith.constant 1 : index
    %c0_171 = arith.constant 0 : index
    %c0_172 = arith.constant 0 : index
    %172 = vector.load %arg27[%c1_170, %c0_171, %c0_172] : memref<2x10x160xf32, #tpu.memory_space<vmem>>, vector<1x10x160xf32>
    %173 = vector.shape_cast %172 : vector<1x10x160xf32> to vector<10x160xf32>
    %c0_173 = arith.constant 0 : index
    %c0_174 = arith.constant 0 : index
    %174 = vector.load %arg5[%c0_173, %c0_174] : memref<1x128xf32, #tpu.memory_space<vmem>>, vector<1x128xf32>
    %175 = vector.extract_strided_slice %173 {offsets = [0, 0], sizes = [8, 160], strides = [1, 1]} : vector<10x160xf32> to vector<8x160xf32>
    %c0_175 = arith.constant 0 : index
    %c0_176 = arith.constant 0 : index
    %c0_177 = arith.constant 0 : index
    %176 = vector.load %arg4[%c0_175, %c0_176, %c0_177] : memref<3x160x128xf32, #tpu.memory_space<vmem>>, vector<1x160x128xf32>
    %177 = vector.shape_cast %176 : vector<1x160x128xf32> to vector<160x128xf32>
    %cst_178 = arith.constant dense<0.000000e+00> : vector<8x128xf32>
    %178 = tpu.matmul %175, %177, %cst_178 {dimension_numbers = #tpu.dot_dimension_numbers<[1], [0], [0], [1], [0, 0, 1, 1], [], []>} : vector<8x160xf32>, vector<160x128xf32>, vector<8x128xf32> -> vector<8x128xf32>
    %179 = vector.broadcast %174 : vector<1x128xf32> to vector<8x128xf32>
    %180 = arith.addf %179, %178 : vector<8x128xf32>
    %181 = vector.extract_strided_slice %173 {offsets = [1, 0], sizes = [8, 160], strides = [1, 1]} : vector<10x160xf32> to vector<8x160xf32>
    %c1_179 = arith.constant 1 : index
    %c0_180 = arith.constant 0 : index
    %c0_181 = arith.constant 0 : index
    %182 = vector.load %arg4[%c1_179, %c0_180, %c0_181] : memref<3x160x128xf32, #tpu.memory_space<vmem>>, vector<1x160x128xf32>
    %183 = vector.shape_cast %182 : vector<1x160x128xf32> to vector<160x128xf32>
    %cst_182 = arith.constant dense<0.000000e+00> : vector<8x128xf32>
    %184 = tpu.matmul %181, %183, %cst_182 {dimension_numbers = #tpu.dot_dimension_numbers<[1], [0], [0], [1], [0, 0, 1, 1], [], []>} : vector<8x160xf32>, vector<160x128xf32>, vector<8x128xf32> -> vector<8x128xf32>
    %185 = arith.addf %180, %184 : vector<8x128xf32>
    %186 = vector.extract_strided_slice %173 {offsets = [2, 0], sizes = [8, 160], strides = [1, 1]} : vector<10x160xf32> to vector<8x160xf32>
    %c2_183 = arith.constant 2 : index
    %c0_184 = arith.constant 0 : index
    %c0_185 = arith.constant 0 : index
    %187 = vector.load %arg4[%c2_183, %c0_184, %c0_185] : memref<3x160x128xf32, #tpu.memory_space<vmem>>, vector<1x160x128xf32>
    %188 = vector.shape_cast %187 : vector<1x160x128xf32> to vector<160x128xf32>
    %cst_186 = arith.constant dense<0.000000e+00> : vector<8x128xf32>
    %189 = tpu.matmul %186, %188, %cst_186 {dimension_numbers = #tpu.dot_dimension_numbers<[1], [0], [0], [1], [0, 0, 1, 1], [], []>} : vector<8x160xf32>, vector<160x128xf32>, vector<8x128xf32> -> vector<8x128xf32>
    %190 = arith.addf %185, %189 : vector<8x128xf32>
    %c0_187 = arith.constant 0 : index
    %c0_188 = arith.constant 0 : index
    %c0_189 = arith.constant 0 : index
    %191 = vector.load %arg11[%c0_187, %c0_188, %c0_189] : memref<2x128x64xf32, #tpu.memory_space<vmem>>, vector<1x128x64xf32>
    %192 = vector.shape_cast %191 : vector<1x128x64xf32> to vector<128x64xf32>
    %cst_190 = arith.constant dense<0.000000e+00> : vector<8x64xf32>
    %193 = tpu.matmul %190, %192, %cst_190 {dimension_numbers = #tpu.dot_dimension_numbers<[1], [0], [0], [1], [0, 0, 1, 1], [], []>} : vector<8x128xf32>, vector<128x64xf32>, vector<8x64xf32> -> vector<8x64xf32>
    %c1_191 = arith.constant 1 : index
    %c0_192 = arith.constant 0 : index
    %c0_193 = arith.constant 0 : index
    %194 = vector.load %arg11[%c1_191, %c0_192, %c0_193] : memref<2x128x64xf32, #tpu.memory_space<vmem>>, vector<1x128x64xf32>
    %195 = vector.shape_cast %194 : vector<1x128x64xf32> to vector<128x64xf32>
    %cst_194 = arith.constant dense<0.000000e+00> : vector<8x64xf32>
    %196 = tpu.matmul %190, %195, %cst_194 {dimension_numbers = #tpu.dot_dimension_numbers<[1], [0], [0], [1], [0, 0, 1, 1], [], []>} : vector<8x128xf32>, vector<128x64xf32>, vector<8x64xf32> -> vector<8x64xf32>
    %c0_195 = arith.constant 0 : index
    %c0_196 = arith.constant 0 : index
    %c0_197 = arith.constant 0 : index
    %197 = vector.load %arg10[%c0_195, %c0_196, %c0_197] : memref<2x4x8xf32, #tpu.memory_space<vmem>>, vector<1x4x8xf32>
    %198 = vector.shape_cast %197 : vector<1x4x8xf32> to vector<4x8xf32>
    %cst_198 = arith.constant dense<0.000000e+00> : vector<4x64xf32>
    %199 = tpu.matmul %198, %193, %cst_198 {dimension_numbers = #tpu.dot_dimension_numbers<[1], [0], [0], [1], [0, 0, 1, 1], [], []>} : vector<4x8xf32>, vector<8x64xf32>, vector<4x64xf32> -> vector<4x64xf32>
    %c1_199 = arith.constant 1 : index
    %c0_200 = arith.constant 0 : index
    %c0_201 = arith.constant 0 : index
    %200 = vector.load %arg10[%c1_199, %c0_200, %c0_201] : memref<2x4x8xf32, #tpu.memory_space<vmem>>, vector<1x4x8xf32>
    %201 = vector.shape_cast %200 : vector<1x4x8xf32> to vector<4x8xf32>
    %cst_202 = arith.constant dense<0.000000e+00> : vector<4x64xf32>
    %202 = tpu.matmul %201, %193, %cst_202 {dimension_numbers = #tpu.dot_dimension_numbers<[1], [0], [0], [1], [0, 0, 1, 1], [], []>} : vector<4x8xf32>, vector<8x64xf32>, vector<4x64xf32> -> vector<4x64xf32>
    %203 = arith.maximumf %199, %202 : vector<4x64xf32>
    %c0_203 = arith.constant 0 : index
    %c0_204 = arith.constant 0 : index
    %c0_205 = arith.constant 0 : index
    %204 = vector.load %arg10[%c0_203, %c0_204, %c0_205] : memref<2x4x8xf32, #tpu.memory_space<vmem>>, vector<1x4x8xf32>
    %205 = vector.shape_cast %204 : vector<1x4x8xf32> to vector<4x8xf32>
    %cst_206 = arith.constant dense<0.000000e+00> : vector<4x64xf32>
    %206 = tpu.matmul %205, %196, %cst_206 {dimension_numbers = #tpu.dot_dimension_numbers<[1], [0], [0], [1], [0, 0, 1, 1], [], []>} : vector<4x8xf32>, vector<8x64xf32>, vector<4x64xf32> -> vector<4x64xf32>
    %c1_207 = arith.constant 1 : index
    %c0_208 = arith.constant 0 : index
    %c0_209 = arith.constant 0 : index
    %207 = vector.load %arg10[%c1_207, %c0_208, %c0_209] : memref<2x4x8xf32, #tpu.memory_space<vmem>>, vector<1x4x8xf32>
    %208 = vector.shape_cast %207 : vector<1x4x8xf32> to vector<4x8xf32>
    %cst_210 = arith.constant dense<0.000000e+00> : vector<4x64xf32>
    %209 = tpu.matmul %208, %196, %cst_210 {dimension_numbers = #tpu.dot_dimension_numbers<[1], [0], [0], [1], [0, 0, 1, 1], [], []>} : vector<4x8xf32>, vector<8x64xf32>, vector<4x64xf32> -> vector<4x64xf32>
    %210 = arith.maximumf %206, %209 : vector<4x64xf32>
    %211 = arith.maximumf %203, %210 : vector<4x64xf32>
    %cst_211 = arith.constant 0.000000e+00 : f32
    %212 = vector.broadcast %cst_211 : f32 to vector<4x64xf32>
    %213 = arith.maximumf %211, %212 : vector<4x64xf32>
    %c1_212 = arith.constant 1 : index
    %c1_213 = arith.constant 1 : index
    %c16_214 = arith.constant 16 : index
    %214 = vector.load %arg28[%c1_212, %c1_213, %c16_214] : memref<2x6x96xf32, #tpu.memory_space<vmem>>, vector<1x4x64xf32>
    %215 = vector.shape_cast %214 : vector<1x4x64xf32> to vector<4x64xf32>
    %216 = vector.shape_cast %213 : vector<4x64xf32> to vector<1x4x64xf32>
    tpu.vector_store %arg28[%c1_212, %c1_213, %c16_214], %216 {strides = array<i32>} : memref<2x6x96xf32, #tpu.memory_space<vmem>>, vector<1x4x64xf32>,
    %c1_215 = arith.constant 1 : index
    %c0_216 = arith.constant 0 : index
    %c0_217 = arith.constant 0 : index
    %217 = vector.load %arg28[%c1_215, %c0_216, %c0_217] : memref<2x6x96xf32, #tpu.memory_space<vmem>>, vector<1x6x96xf32>
    %218 = vector.shape_cast %217 : vector<1x6x96xf32> to vector<6x96xf32>
    %c0_218 = arith.constant 0 : index
    %c0_219 = arith.constant 0 : index
    %219 = vector.load %arg7[%c0_218, %c0_219] : memref<1x64xf32, #tpu.memory_space<vmem>>, vector<1x64xf32>
    %220 = vector.extract_strided_slice %218 {offsets = [0, 0], sizes = [4, 96], strides = [1, 1]} : vector<6x96xf32> to vector<4x96xf32>
    %c0_220 = arith.constant 0 : index
    %c0_221 = arith.constant 0 : index
    %c0_222 = arith.constant 0 : index
    %221 = vector.load %arg6[%c0_220, %c0_221, %c0_222] : memref<3x96x64xf32, #tpu.memory_space<vmem>>, vector<1x96x64xf32>
    %222 = vector.shape_cast %221 : vector<1x96x64xf32> to vector<96x64xf32>
    %cst_223 = arith.constant dense<0.000000e+00> : vector<4x64xf32>
    %223 = tpu.matmul %220, %222, %cst_223 {dimension_numbers = #tpu.dot_dimension_numbers<[1], [0], [0], [1], [0, 0, 1, 1], [], []>} : vector<4x96xf32>, vector<96x64xf32>, vector<4x64xf32> -> vector<4x64xf32>
    %224 = vector.broadcast %219 : vector<1x64xf32> to vector<4x64xf32>
    %225 = arith.addf %224, %223 : vector<4x64xf32>
    %226 = vector.extract_strided_slice %218 {offsets = [1, 0], sizes = [4, 96], strides = [1, 1]} : vector<6x96xf32> to vector<4x96xf32>
    %c1_224 = arith.constant 1 : index
    %c0_225 = arith.constant 0 : index
    %c0_226 = arith.constant 0 : index
    %227 = vector.load %arg6[%c1_224, %c0_225, %c0_226] : memref<3x96x64xf32, #tpu.memory_space<vmem>>, vector<1x96x64xf32>
    %228 = vector.shape_cast %227 : vector<1x96x64xf32> to vector<96x64xf32>
    %cst_227 = arith.constant dense<0.000000e+00> : vector<4x64xf32>
    %229 = tpu.matmul %226, %228, %cst_227 {dimension_numbers = #tpu.dot_dimension_numbers<[1], [0], [0], [1], [0, 0, 1, 1], [], []>} : vector<4x96xf32>, vector<96x64xf32>, vector<4x64xf32> -> vector<4x64xf32>
    %230 = arith.addf %225, %229 : vector<4x64xf32>
    %231 = vector.extract_strided_slice %218 {offsets = [2, 0], sizes = [4, 96], strides = [1, 1]} : vector<6x96xf32> to vector<4x96xf32>
    %c2_228 = arith.constant 2 : index
    %c0_229 = arith.constant 0 : index
    %c0_230 = arith.constant 0 : index
    %232 = vector.load %arg6[%c2_228, %c0_229, %c0_230] : memref<3x96x64xf32, #tpu.memory_space<vmem>>, vector<1x96x64xf32>
    %233 = vector.shape_cast %232 : vector<1x96x64xf32> to vector<96x64xf32>
    %cst_231 = arith.constant dense<0.000000e+00> : vector<4x64xf32>
    %234 = tpu.matmul %231, %233, %cst_231 {dimension_numbers = #tpu.dot_dimension_numbers<[1], [0], [0], [1], [0, 0, 1, 1], [], []>} : vector<4x96xf32>, vector<96x64xf32>, vector<4x64xf32> -> vector<4x64xf32>
    %235 = arith.addf %230, %234 : vector<4x64xf32>
    %cst_232 = arith.constant 0.000000e+00 : f32
    %236 = vector.broadcast %cst_232 : f32 to vector<4x64xf32>
    %237 = arith.maximumf %235, %236 : vector<4x64xf32>
    %238 = vector.extract_strided_slice %237 {offsets = [0, 0], sizes = [1, 64], strides = [1, 1]} : vector<4x64xf32> to vector<1x64xf32>
    %c1_233 = arith.constant 1 : index
    %c0_234 = arith.constant 0 : index
    %239 = vector.load %arg29[%c1_233, %c0_234] : memref<2x256xf32, #tpu.memory_space<vmem>>, vector<1x64xf32>
    tpu.vector_store %arg29[%c1_233, %c0_234], %238 {strides = array<i32>} : memref<2x256xf32, #tpu.memory_space<vmem>>, vector<1x64xf32>,
    %240 = vector.extract_strided_slice %237 {offsets = [1, 0], sizes = [1, 64], strides = [1, 1]} : vector<4x64xf32> to vector<1x64xf32>
    %c1_235 = arith.constant 1 : index
    %c64_236 = arith.constant 64 : index
    %241 = vector.load %arg29[%c1_235, %c64_236] : memref<2x256xf32, #tpu.memory_space<vmem>>, vector<1x64xf32>
    tpu.vector_store %arg29[%c1_235, %c64_236], %240 {strides = array<i32>} : memref<2x256xf32, #tpu.memory_space<vmem>>, vector<1x64xf32>,
    %242 = vector.extract_strided_slice %237 {offsets = [2, 0], sizes = [1, 64], strides = [1, 1]} : vector<4x64xf32> to vector<1x64xf32>
    %c1_237 = arith.constant 1 : index
    %c128_238 = arith.constant 128 : index
    %243 = vector.load %arg29[%c1_237, %c128_238] : memref<2x256xf32, #tpu.memory_space<vmem>>, vector<1x64xf32>
    tpu.vector_store %arg29[%c1_237, %c128_238], %242 {strides = array<i32>} : memref<2x256xf32, #tpu.memory_space<vmem>>, vector<1x64xf32>,
    %244 = vector.extract_strided_slice %237 {offsets = [3, 0], sizes = [1, 64], strides = [1, 1]} : vector<4x64xf32> to vector<1x64xf32>
    %c1_239 = arith.constant 1 : index
    %c192_240 = arith.constant 192 : index
    %245 = vector.load %arg29[%c1_239, %c192_240] : memref<2x256xf32, #tpu.memory_space<vmem>>, vector<1x64xf32>
    tpu.vector_store %arg29[%c1_239, %c192_240], %244 {strides = array<i32>} : memref<2x256xf32, #tpu.memory_space<vmem>>, vector<1x64xf32>,
    %c0_241 = arith.constant 0 : index
    %c0_242 = arith.constant 0 : index
    %246 = vector.load %arg29[%c0_241, %c0_242] : memref<2x256xf32, #tpu.memory_space<vmem>>, vector<2x256xf32>
    %c0_243 = arith.constant 0 : index
    %c0_244 = arith.constant 0 : index
    %247 = vector.load %arg12[%c0_243, %c0_244] : memref<256x1024xf32, #tpu.memory_space<vmem>>, vector<256x1024xf32>
    %cst_245 = arith.constant dense<0.000000e+00> : vector<2x1024xf32>
    %248 = tpu.matmul %246, %247, %cst_245 {dimension_numbers = #tpu.dot_dimension_numbers<[1], [0], [0], [1], [0, 0, 1, 1], [], []>} : vector<2x256xf32>, vector<256x1024xf32>, vector<2x1024xf32> -> vector<2x1024xf32>
    %c0_246 = arith.constant 0 : index
    %c0_247 = arith.constant 0 : index
    %249 = vector.load %arg1[%c0_246, %c0_247] : memref<2x4xf32, #tpu.memory_space<vmem>>, vector<2x4xf32>
    %c0_248 = arith.constant 0 : index
    %c0_249 = arith.constant 0 : index
    %250 = vector.load %arg13[%c0_248, %c0_249] : memref<4x1024xf32, #tpu.memory_space<vmem>>, vector<4x1024xf32>
    %cst_250 = arith.constant dense<0.000000e+00> : vector<2x1024xf32>
    %251 = tpu.matmul %249, %250, %cst_250 {dimension_numbers = #tpu.dot_dimension_numbers<[1], [0], [0], [1], [0, 0, 1, 1], [], []>} : vector<2x4xf32>, vector<4x1024xf32>, vector<2x1024xf32> -> vector<2x1024xf32>
    %252 = arith.addf %248, %251 : vector<2x1024xf32>
    %c0_251 = arith.constant 0 : index
    %c0_252 = arith.constant 0 : index
    %253 = vector.load %arg14[%c0_251, %c0_252] : memref<1x1024xf32, #tpu.memory_space<vmem>>, vector<1x1024xf32>
    %254 = vector.broadcast %253 : vector<1x1024xf32> to vector<2x1024xf32>
    %255 = arith.addf %252, %254 : vector<2x1024xf32>
    %cst_253 = arith.constant 0.000000e+00 : f32
    %256 = vector.broadcast %cst_253 : f32 to vector<2x1024xf32>
    %257 = arith.maximumf %255, %256 : vector<2x1024xf32>
    %c0_254 = arith.constant 0 : index
    %c0_255 = arith.constant 0 : index
    %258 = vector.load %arg15[%c0_254, %c0_255] : memref<1024x256xf32, #tpu.memory_space<vmem>>, vector<1024x256xf32>
    %cst_256 = arith.constant dense<0.000000e+00> : vector<2x256xf32>
    %259 = tpu.matmul %257, %258, %cst_256 {dimension_numbers = #tpu.dot_dimension_numbers<[1], [0], [0], [1], [0, 0, 1, 1], [], []>} : vector<2x1024xf32>, vector<1024x256xf32>, vector<2x256xf32> -> vector<2x256xf32>
    %c0_257 = arith.constant 0 : index
    %c0_258 = arith.constant 0 : index
    %260 = vector.load %arg16[%c0_257, %c0_258] : memref<1x256xf32, #tpu.memory_space<vmem>>, vector<1x256xf32>
    %261 = vector.broadcast %260 : vector<1x256xf32> to vector<2x256xf32>
    %262 = arith.addf %259, %261 : vector<2x256xf32>
    %c0_259 = arith.constant 0 : index
    %c0_260 = arith.constant 0 : index
    %c0_261 = arith.constant 0 : index
    %263 = vector.load %arg17[%c0_259, %c0_260, %c0_261] : memref<2x256x512xf32, #tpu.memory_space<vmem>>, vector<1x256x512xf32>
    %264 = vector.shape_cast %263 : vector<1x256x512xf32> to vector<256x512xf32>
    %cst_262 = arith.constant dense<0.000000e+00> : vector<2x512xf32>
    %265 = tpu.matmul %262, %264, %cst_262 {dimension_numbers = #tpu.dot_dimension_numbers<[1], [0], [0], [1], [0, 0, 1, 1], [], []>} : vector<2x256xf32>, vector<256x512xf32>, vector<2x512xf32> -> vector<2x512xf32>
    %c0_263 = arith.constant 0 : index
    %c0_264 = arith.constant 0 : index
    %c0_265 = arith.constant 0 : index
    %266 = vector.load %arg18[%c0_263, %c0_264, %c0_265] : memref<2x1x512xf32, #tpu.memory_space<vmem>>, vector<1x1x512xf32>
    %267 = vector.shape_cast %266 : vector<1x1x512xf32> to vector<1x512xf32>
    %268 = vector.broadcast %267 : vector<1x512xf32> to vector<2x512xf32>
    %269 = arith.addf %265, %268 : vector<2x512xf32>
    %cst_266 = arith.constant 0.000000e+00 : f32
    %270 = vector.broadcast %cst_266 : f32 to vector<2x512xf32>
    %271 = arith.maximumf %269, %270 : vector<2x512xf32>
    %c0_267 = arith.constant 0 : index
    %c0_268 = arith.constant 0 : index
    %c0_269 = arith.constant 0 : index
    %272 = vector.load %arg19[%c0_267, %c0_268, %c0_269] : memref<2x512x512xf32, #tpu.memory_space<vmem>>, vector<1x512x512xf32>
    %273 = vector.shape_cast %272 : vector<1x512x512xf32> to vector<512x512xf32>
    %cst_270 = arith.constant dense<0.000000e+00> : vector<2x512xf32>
    %274 = tpu.matmul %271, %273, %cst_270 {dimension_numbers = #tpu.dot_dimension_numbers<[1], [0], [0], [1], [0, 0, 1, 1], [], []>} : vector<2x512xf32>, vector<512x512xf32>, vector<2x512xf32> -> vector<2x512xf32>
    %c0_271 = arith.constant 0 : index
    %c0_272 = arith.constant 0 : index
    %c0_273 = arith.constant 0 : index
    %275 = vector.load %arg20[%c0_271, %c0_272, %c0_273] : memref<2x1x512xf32, #tpu.memory_space<vmem>>, vector<1x1x512xf32>
    %276 = vector.shape_cast %275 : vector<1x1x512xf32> to vector<1x512xf32>
    %277 = vector.broadcast %276 : vector<1x512xf32> to vector<2x512xf32>
    %278 = arith.addf %274, %277 : vector<2x512xf32>
    %cst_274 = arith.constant 0.000000e+00 : f32
    %279 = vector.broadcast %cst_274 : f32 to vector<2x512xf32>
    %280 = arith.maximumf %278, %279 : vector<2x512xf32>
    %c0_275 = arith.constant 0 : index
    %c0_276 = arith.constant 0 : index
    %c0_277 = arith.constant 0 : index
    %281 = vector.load %arg21[%c0_275, %c0_276, %c0_277] : memref<2x512x512xf32, #tpu.memory_space<vmem>>, vector<1x512x512xf32>
    %282 = vector.shape_cast %281 : vector<1x512x512xf32> to vector<512x512xf32>
    %cst_278 = arith.constant dense<0.000000e+00> : vector<2x512xf32>
    %283 = tpu.matmul %280, %282, %cst_278 {dimension_numbers = #tpu.dot_dimension_numbers<[1], [0], [0], [1], [0, 0, 1, 1], [], []>} : vector<2x512xf32>, vector<512x512xf32>, vector<2x512xf32> -> vector<2x512xf32>
    %c0_279 = arith.constant 0 : index
    %c0_280 = arith.constant 0 : index
    %c0_281 = arith.constant 0 : index
    %284 = vector.load %arg22[%c0_279, %c0_280, %c0_281] : memref<2x1x512xf32, #tpu.memory_space<vmem>>, vector<1x1x512xf32>
    %285 = vector.shape_cast %284 : vector<1x1x512xf32> to vector<1x512xf32>
    %286 = vector.broadcast %285 : vector<1x512xf32> to vector<2x512xf32>
    %287 = arith.addf %283, %286 : vector<2x512xf32>
    %cst_282 = arith.constant 0.000000e+00 : f32
    %288 = vector.broadcast %cst_282 : f32 to vector<2x512xf32>
    %289 = arith.maximumf %287, %288 : vector<2x512xf32>
    %c0_283 = arith.constant 0 : index
    %c0_284 = arith.constant 0 : index
    %c0_285 = arith.constant 0 : index
    %290 = vector.load %arg23[%c0_283, %c0_284, %c0_285] : memref<2x512x1xf32, #tpu.memory_space<vmem>>, vector<1x512x1xf32>
    %291 = vector.shape_cast %290 : vector<1x512x1xf32> to vector<512x1xf32>
    %cst_286 = arith.constant dense<0.000000e+00> : vector<2x1xf32>
    %292 = tpu.matmul %289, %291, %cst_286 {dimension_numbers = #tpu.dot_dimension_numbers<[1], [0], [0], [1], [0, 0, 1, 1], [], []>} : vector<2x512xf32>, vector<512x1xf32>, vector<2x1xf32> -> vector<2x1xf32>
    %c0_287 = arith.constant 0 : index
    %c0_288 = arith.constant 0 : index
    %c0_289 = arith.constant 0 : index
    %293 = vector.load %arg24[%c0_287, %c0_288, %c0_289] : memref<2x1x1xf32, #tpu.memory_space<vmem>>, vector<1x1x1xf32>
    %294 = vector.shape_cast %293 : vector<1x1x1xf32> to vector<1x1xf32>
    %295 = vector.broadcast %294 : vector<1x1xf32> to vector<2x1xf32>
    %296 = arith.addf %292, %295 : vector<2x1xf32>
    %c0_290 = arith.constant 0 : index
    %c0_291 = arith.constant 0 : index
    %297 = vector.load %arg25[%c0_290, %c0_291] : memref<2x2xf32, #tpu.memory_space<vmem>>, vector<2x1xf32>
    tpu.vector_store %arg25[%c0_290, %c0_291], %296 {strides = array<i32>} : memref<2x2xf32, #tpu.memory_space<vmem>>, vector<2x1xf32>,
    %c1_292 = arith.constant 1 : index
    %c0_293 = arith.constant 0 : index
    %c0_294 = arith.constant 0 : index
    %298 = vector.load %arg17[%c1_292, %c0_293, %c0_294] : memref<2x256x512xf32, #tpu.memory_space<vmem>>, vector<1x256x512xf32>
    %299 = vector.shape_cast %298 : vector<1x256x512xf32> to vector<256x512xf32>
    %cst_295 = arith.constant dense<0.000000e+00> : vector<2x512xf32>
    %300 = tpu.matmul %262, %299, %cst_295 {dimension_numbers = #tpu.dot_dimension_numbers<[1], [0], [0], [1], [0, 0, 1, 1], [], []>} : vector<2x256xf32>, vector<256x512xf32>, vector<2x512xf32> -> vector<2x512xf32>
    %c1_296 = arith.constant 1 : index
    %c0_297 = arith.constant 0 : index
    %c0_298 = arith.constant 0 : index
    %301 = vector.load %arg18[%c1_296, %c0_297, %c0_298] : memref<2x1x512xf32, #tpu.memory_space<vmem>>, vector<1x1x512xf32>
    %302 = vector.shape_cast %301 : vector<1x1x512xf32> to vector<1x512xf32>
    %303 = vector.broadcast %302 : vector<1x512xf32> to vector<2x512xf32>
    %304 = arith.addf %300, %303 : vector<2x512xf32>
    %cst_299 = arith.constant 0.000000e+00 : f32
    %305 = vector.broadcast %cst_299 : f32 to vector<2x512xf32>
    %306 = arith.maximumf %304, %305 : vector<2x512xf32>
    %c1_300 = arith.constant 1 : index
    %c0_301 = arith.constant 0 : index
    %c0_302 = arith.constant 0 : index
    %307 = vector.load %arg19[%c1_300, %c0_301, %c0_302] : memref<2x512x512xf32, #tpu.memory_space<vmem>>, vector<1x512x512xf32>
    %308 = vector.shape_cast %307 : vector<1x512x512xf32> to vector<512x512xf32>
    %cst_303 = arith.constant dense<0.000000e+00> : vector<2x512xf32>
    %309 = tpu.matmul %306, %308, %cst_303 {dimension_numbers = #tpu.dot_dimension_numbers<[1], [0], [0], [1], [0, 0, 1, 1], [], []>} : vector<2x512xf32>, vector<512x512xf32>, vector<2x512xf32> -> vector<2x512xf32>
    %c1_304 = arith.constant 1 : index
    %c0_305 = arith.constant 0 : index
    %c0_306 = arith.constant 0 : index
    %310 = vector.load %arg20[%c1_304, %c0_305, %c0_306] : memref<2x1x512xf32, #tpu.memory_space<vmem>>, vector<1x1x512xf32>
    %311 = vector.shape_cast %310 : vector<1x1x512xf32> to vector<1x512xf32>
    %312 = vector.broadcast %311 : vector<1x512xf32> to vector<2x512xf32>
    %313 = arith.addf %309, %312 : vector<2x512xf32>
    %cst_307 = arith.constant 0.000000e+00 : f32
    %314 = vector.broadcast %cst_307 : f32 to vector<2x512xf32>
    %315 = arith.maximumf %313, %314 : vector<2x512xf32>
    %c1_308 = arith.constant 1 : index
    %c0_309 = arith.constant 0 : index
    %c0_310 = arith.constant 0 : index
    %316 = vector.load %arg21[%c1_308, %c0_309, %c0_310] : memref<2x512x512xf32, #tpu.memory_space<vmem>>, vector<1x512x512xf32>
    %317 = vector.shape_cast %316 : vector<1x512x512xf32> to vector<512x512xf32>
    %cst_311 = arith.constant dense<0.000000e+00> : vector<2x512xf32>
    %318 = tpu.matmul %315, %317, %cst_311 {dimension_numbers = #tpu.dot_dimension_numbers<[1], [0], [0], [1], [0, 0, 1, 1], [], []>} : vector<2x512xf32>, vector<512x512xf32>, vector<2x512xf32> -> vector<2x512xf32>
    %c1_312 = arith.constant 1 : index
    %c0_313 = arith.constant 0 : index
    %c0_314 = arith.constant 0 : index
    %319 = vector.load %arg22[%c1_312, %c0_313, %c0_314] : memref<2x1x512xf32, #tpu.memory_space<vmem>>, vector<1x1x512xf32>
    %320 = vector.shape_cast %319 : vector<1x1x512xf32> to vector<1x512xf32>
    %321 = vector.broadcast %320 : vector<1x512xf32> to vector<2x512xf32>
    %322 = arith.addf %318, %321 : vector<2x512xf32>
    %cst_315 = arith.constant 0.000000e+00 : f32
    %323 = vector.broadcast %cst_315 : f32 to vector<2x512xf32>
    %324 = arith.maximumf %322, %323 : vector<2x512xf32>
    %c1_316 = arith.constant 1 : index
    %c0_317 = arith.constant 0 : index
    %c0_318 = arith.constant 0 : index
    %325 = vector.load %arg23[%c1_316, %c0_317, %c0_318] : memref<2x512x1xf32, #tpu.memory_space<vmem>>, vector<1x512x1xf32>
    %326 = vector.shape_cast %325 : vector<1x512x1xf32> to vector<512x1xf32>
    %cst_319 = arith.constant dense<0.000000e+00> : vector<2x1xf32>
    %327 = tpu.matmul %324, %326, %cst_319 {dimension_numbers = #tpu.dot_dimension_numbers<[1], [0], [0], [1], [0, 0, 1, 1], [], []>} : vector<2x512xf32>, vector<512x1xf32>, vector<2x1xf32> -> vector<2x1xf32>
    %c1_320 = arith.constant 1 : index
    %c0_321 = arith.constant 0 : index
    %c0_322 = arith.constant 0 : index
    %328 = vector.load %arg24[%c1_320, %c0_321, %c0_322] : memref<2x1x1xf32, #tpu.memory_space<vmem>>, vector<1x1x1xf32>
    %329 = vector.shape_cast %328 : vector<1x1x1xf32> to vector<1x1xf32>
    %330 = vector.broadcast %329 : vector<1x1xf32> to vector<2x1xf32>
    %331 = arith.addf %327, %330 : vector<2x1xf32>
    %c0_323 = arith.constant 0 : index
    %c1_324 = arith.constant 1 : index
    %332 = vector.load %arg25[%c0_323, %c1_324] : memref<2x2xf32, #tpu.memory_space<vmem>>, vector<2x1xf32>
    tpu.vector_store %arg25[%c0_323, %c1_324], %331 {strides = array<i32>} : memref<2x2xf32, #tpu.memory_space<vmem>>, vector<2x1xf32>,
    return
  }
}

</mosaic_0001>

<bundles_post_ra>
// kernel: two_head_cnn_forward.1
= control target key start
LH: loop header
LB: loop body
LE: loop exit
PB: predicated region body
PF: predicated region fallthrough
CT: control target
= control target key end

     0   :  { %s17319_s0 = inlined_call_operand.vmem [shape: f32[2,16,48], index: 0, kind: input, shape index: {}]   ;;  %s17320_s1 = inlined_call_operand.vmem [shape: f32[2,4], index: 1, kind: input, shape index: {}]   ;;  %s17321_s2 = inlined_call_operand.vmem [shape: f32[3,54,256], index: 2, kind: input, shape index: {}]   ;;  %s17322_s3 = inlined_call_operand.vmem [shape: f32[1,256], index: 3, kind: input, shape index: {}]   ;;  %s17323_s4 = inlined_call_operand.vmem [shape: f32[3,160,128], index: 4, kind: input, shape index: {}]   ;;  %s17324_s5 = inlined_call_operand.vmem [shape: f32[1,128], index: 5, kind: input, shape index: {}]   ;;  %s17325_s6 = inlined_call_operand.vmem [shape: f32[3,96,64], index: 6, kind: input, shape index: {}]   ;;  %s17326_s7 = inlined_call_operand.vmem [shape: f32[1,64], index: 7, kind: input, shape index: {}]   ;;  %s17327_s8 = inlined_call_operand.vmem [shape: f32[2,8,16], index: 8, kind: input, shape index: {}]   ;;  %s17328_s9 = inlined_call_operand.vmem [shape: f32[2,256,128], index: 9, kind: input, shape index: {}]   ;;  %s17329_s10 = inlined_call_operand.vmem [shape: f32[2,4,8], index: 10, kind: input, shape index: {}]   ;;  %s17330_s11 = inlined_call_operand.vmem [shape: f32[2,128,64], index: 11, kind: input, shape index: {}]   ;;  %s17331_s12 = inlined_call_operand.hbm [shape: f32[256,1024], index: 12, kind: input, shape index: {}]   ;;  %s17332_s13 = inlined_call_operand.vmem [shape: f32[4,1024], index: 13, kind: input, shape index: {}]   ;;  %s17333_s14 = inlined_call_operand.vmem [shape: f32[1,1024], index: 14, kind: input, shape index: {}]   ;;  %s17334_s15 = inlined_call_operand.hbm [shape: f32[1024,256], index: 15, kind: input, shape index: {}]   ;;  %s17335_s16 = inlined_call_operand.vmem [shape: f32[1,256], index: 16, kind: input, shape index: {}]   ;;  %s17336_s17 = inlined_call_operand.hbm [shape: f32[2,256,512], index: 17, kind: input, shape index: {}]   ;;  %s17337_s18 = inlined_call_operand.vmem [shape: f32[2,1,512], index: 18, kind: input, shape index: {}]   ;;  %s17338_s19 = inlined_call_operand.vmem [shape: f32[2,512,512], index: 19, kind: input, shape index: {}]   ;;  %s17339_s20 = inlined_call_operand.vmem [shape: f32[2,1,512], index: 20, kind: input, shape index: {}]   ;;  %s17340_s21 = inlined_call_operand.hbm [shape: f32[2,512,512], index: 21, kind: input, shape index: {}]   ;;  %s17341_s22 = inlined_call_operand.vmem [shape: f32[2,1,512], index: 22, kind: input, shape index: {}]   ;;  %s17342_s23 = inlined_call_operand.vmem [shape: f32[2,512,1], index: 23, kind: input, shape index: {}]   ;;  %s17343_s24 = inlined_call_operand.vmem [shape: f32[2,1,1], index: 24, kind: input, shape index: {}]   ;;  %s17344_s25 = inlined_call_operand.vmem [shape: f32[2,2], index: 25, kind: output, shape index: {}]  }
   0x1   :  { %17356 = sst [smem:[#allocation16_spill]] %s17319_s0 }
   0x2   :  { %17357 = sst [smem:[#allocation17_spill]] %s17320_s1 }
   0x3   :  { %17358 = sst [smem:[#allocation18_spill]] %s17321_s2 }
   0x4   :  { %17359 = sst [smem:[#allocation19_spill]] %s17322_s3 }
   0x5   :  { %17360 = sst [smem:[#allocation20_spill]] %s17323_s4 }
   0x6   :  { %17361 = sst [smem:[#allocation21_spill]] %s17324_s5 }
   0x7   :  { %17362 = sst [smem:[#allocation22_spill]] %s17325_s6 }
   0x8   :  { %17363 = sst [smem:[#allocation23_spill]] %s17326_s7 }
   0x9   :  { %17364 = sst [smem:[#allocation24_spill]] %s17327_s8 }
   0xa   :  { %17365 = sst [smem:[#allocation25_spill]] %s17328_s9 }
   0xb   :  { %30 = vsyncpa [#allocation7], 0 }
   0xc   :  { %31 = vsyncpa [#allocation9], 0 }
   0xd   :  { %32 = vsyncpa [#allocation12], 0  ;;  %s13136_s29 = smov [#allocation8]   ;;  %s13042_s7 = scalar_lea.hbm %s17334_s15, 32768 }
   0xe   :  { %s78_s2 = sshll.u32 %s13136_s29, 4  ;;  %p13043_p0 = scmp.ne.s32.totalorder %s17334_s15, %s13042_s7  ;;  %s79_s2 = int_to_ptr.vmem [resolvable:$true] %s78_s2 }
   0xf   :  { %p13046_p1 = scmp.lt.u32.totalorder %s13042_s7, %s17334_s15 }
  0x11   :  { %p13048_p2 = pnand %p13046_p1, %p13043_p0 }
  0x13   :  { %13051 = shalt.err (!%p13048_p2)
}
  0x14   :  { %s13052_s27 = scalar_lea.vmem %s79_s2, 32768  ;;  %p13057_p4 = scmp.lt.s32.totalorder %s79_s2, %s79_s2 }
  0x15   :  { %p13053_p3 = scmp.ne.s32.totalorder %s79_s2, %s13052_s27  ;;  %p13058_p5 = scmp.lt.s32.totalorder %s13052_s27, %s13052_s27 }
  0x17   :  { %p13059_p6 = por %p13058_p5, %p13057_p4 }
  0x19   :  { %p13060_p7 = pnand %p13059_p6, %p13053_p3 }
  0x1b   :  { %13063 = shalt.err (!%p13060_p7)
}
  0x1c   :  { %s13137_s4 = smov 256   ;;  %s13138_s28 = smov 16  }
  0x1d   :  { %84 = dma.hbm_to_vmem [thread:$0]  %s17334_s15, 32768, %s79_s2, [#allocation9], %s13137_s4, %s13137_s4, %s13138_s28  }
  0x1e   :  { %s13139_s0 = smov [#allocation6]   ;;  %s13064_s7 = scalar_lea.hbm %s17331_s12, 32768 }
  0x1f   :  { %s62_s29 = sshll.u32 %s13139_s0, 4  ;;  %p13065_p8 = scmp.ne.s32.totalorder %s17331_s12, %s13064_s7  ;;  %s63_s29 = int_to_ptr.vmem [resolvable:$true] %s62_s29 }
  0x20   :  { %p13068_p9 = scmp.lt.u32.totalorder %s13064_s7, %s17331_s12 }
  0x22   :  { %p13070_p10 = pnand %p13068_p9, %p13065_p8 }
  0x24   :  { %13073 = shalt.err (!%p13070_p10)
}
  0x25   :  { %s13074_s27 = scalar_lea.vmem %s63_s29, 32768  ;;  %p13079_p12 = scmp.lt.s32.totalorder %s63_s29, %s63_s29 }
  0x26   :  { %p13075_p11 = scmp.ne.s32.totalorder %s63_s29, %s13074_s27  ;;  %p13080_p13 = scmp.lt.s32.totalorder %s13074_s27, %s13074_s27 }
  0x28   :  { %p13081_p0 = por %p13080_p13, %p13079_p12 }
  0x2a   :  { %p13082_p1 = pnand %p13081_p0, %p13075_p11 }
  0x2c   :  { %13085 = shalt.err (!%p13082_p1)
}
  0x2d   :  { %s13140_s15 = smov 1024   ;;  %s17354_s2 = smov 64  }
  0x2e   :  { %68 = dma.hbm_to_vmem [thread:$0]  %s17331_s12, 32768, %s63_s29, [#allocation7], %s13140_s15, %s13140_s15, %s17354_s2  }
  0x2f   :  { %s13142_s5 = smov [#allocation10]   ;;  %s13086_s7 = scalar_lea.hbm %s17336_s17, 32768 }
  0x30   :  { %s92_s0 = sshll.u32 %s13142_s5, 4  ;;  %p13087_p2 = scmp.ne.s32.totalorder %s17336_s17, %s13086_s7  ;;  %s93_s0 = int_to_ptr.vmem [resolvable:$true] %s92_s0 }
  0x31   :  { %p13090_p3 = scmp.lt.u32.totalorder %s13086_s7, %s17336_s17 }
  0x33   :  { %p13092_p4 = pnand %p13090_p3, %p13087_p2 }
  0x35   :  { %13095 = shalt.err (!%p13092_p4)
}
  0x36   :  { %s13096_s27 = scalar_lea.vmem %s93_s0, 32768  ;;  %p13101_p6 = scmp.lt.s32.totalorder %s93_s0, %s93_s0 }
  0x37   :  { %p13097_p5 = scmp.ne.s32.totalorder %s93_s0, %s13096_s27  ;;  %p13102_p7 = scmp.lt.s32.totalorder %s13096_s27, %s13096_s27 }
  0x39   :  { %p13103_p8 = por %p13102_p7, %p13101_p6 }
  0x3b   :  { %p13104_p9 = pnand %p13103_p8, %p13097_p5 }
  0x3d   :  { %13107 = shalt.err (!%p13104_p9)
}
  0x3e   :  { %s13143_s12 = smov 512   ;;  %s13144_s29 = smov 32  }
  0x3f   :  { %98 = dma.hbm_to_vmem [thread:$0]  %s17336_s17, 32768, %s93_s0, [#allocation9], %s13143_s12, %s13143_s12, %s13144_s29  }
  0x40   :  { %s13145_s9 = smov [#allocation11]   ;;  %s13108_s7 = scalar_lea.hbm %s17340_s21, 65536 }
  0x41   :  { %s110_s5 = sshll.u32 %s13145_s9, 4  ;;  %p13109_p10 = scmp.ne.s32.totalorder %s17340_s21, %s13108_s7  ;;  %s111_s5 = int_to_ptr.vmem [resolvable:$true] %s110_s5 }
  0x42   :  { %p13112_p11 = scmp.lt.u32.totalorder %s13108_s7, %s17340_s21 }
  0x44   :  { %p13114_p12 = pnand %p13112_p11, %p13109_p10 }
  0x46   :  { %13117 = shalt.err (!%p13114_p12)
}
  0x47   :  { %s13118_s27 = scalar_lea.vmem %s111_s5, 65536  ;;  %p13123_p0 = scmp.lt.s32.totalorder %s111_s5, %s111_s5 }
  0x48   :  { %p13119_p13 = scmp.ne.s32.totalorder %s111_s5, %s13118_s27  ;;  %p13124_p1 = scmp.lt.s32.totalorder %s13118_s27, %s13118_s27 }
  0x4a   :  { %p13125_p2 = por %p13124_p1, %p13123_p0 }
  0x4c   :  { %p13126_p3 = pnand %p13125_p2, %p13119_p13 }
  0x4e   :  { %13129 = shalt.err (!%p13126_p3)
}
  0x4f   :  { %116 = dma.hbm_to_vmem [thread:$0]  %s17340_s21, 65536, %s111_s5, [#allocation12], %s13143_s12, %s13143_s12, %s13144_s29  }
  0x50   :  { %13130 = dma.done.wait [#allocation7], 32768  }
  0x51   :  { %13131 = vsyncadd [#allocation7], 4294934528 }
  0x52   :  { %13132 = dma.done.wait [#allocation9], 65536  }
  0x53   :  { %13133 = vsyncadd [#allocation9], 4294901760 }
  0x54   :  { %13134 = dma.done.wait [#allocation12], 65536  }
  0x55   :  { %13135 = vsyncadd [#allocation12], 4294901760  ;;  %vm135_vm0 = vcmask 441344   ;;  %v13146_v0 = vmov 0.0   ;;  %vm138_vm1 = vcmask 435200   ;;  %s17366_s29 = sld [smem:[#allocation16_spill]] }
  0x56   :  { %136 = vst.msk [vmem:[#allocation2] sm:$0xff] %vm135_vm0, %v13146_v0  ;;  %137 = vst.msk [vmem:[#allocation2 + $0x8] sm:$0xff] %vm135_vm0, %v13146_v0  ;;  %276 = vmatprep.mubr.f32.mxu0 %v13146_v0  ;;  %s17367_s6 = sld [smem:[#allocation18_spill]]  ;;  %s13147_s30 = smov 3   ;;  %vm205_vm2 = vcmask 1045504   ;;  %vm176_vm3 = vcmask 416792  }
  0x57   :  { %140 = vst.msk [vmem:[#allocation2 + $0x18] sm:$0xff] %vm135_vm0, %v13146_v0  ;;  %141 = vst.msk [vmem:[#allocation2 + $0x20] sm:$0xff] %vm135_vm0, %v13146_v0  ;;  %s17368_s8 = sld [smem:[#allocation25_spill]]  ;;  %vm320_vm4 = vcmask 1046528   ;;  %s17369_s21 = sld [smem:[#allocation19_spill]]  ;;  %vm13149_vm5 = vmmov 0  }
  0x58   :  { %143 = vst [vmem:[#allocation3] sm:$0xff] %v13146_v0  ;;  %146 = vst [vmem:[#allocation3 + $0x10] sm:$0x3] %v13146_v0  ;;  %s17370_s4 = sld [smem:[#allocation24_spill]]  ;;  %vm744_vm6 = vcmask 130048   ;;  %s17371_s26 = sld [smem:[#allocation20_spill]] }
  0x59   :  { %149 = vst [vmem:[#allocation3 + $0x20] sm:$0xff] %v13146_v0  ;;  %151 = vst [vmem:[#allocation3 + $0x30] sm:$0x3] %v13146_v0  ;;  %vm144_vm7 = vcmask 261120   ;;  %vm147_vm8 = vcmask 254976   ;;  %vm1042_vm9 = vcmask 1047681  }
  0x5a   :  { %139 = vst.msk [vmem:[#allocation2 + $0x10] sm:$0x3] %vm138_vm1, %v13146_v0  ;;  %142 = vst.msk [vmem:[#allocation2 + $0x28] sm:$0x3] %vm138_vm1, %v13146_v0  ;;  %vm1044_vm10 = vcmask 130049   ;;  %vm1046_vm11 = vcmask 1040512  }
  0x5b   :  { %v156_v1 = vld [vmem:[%s17366_s29] sm:$0xff]  ;;  %v157_v2 = vld [vmem:[%s17366_s29 + $0x8] sm:$0xff]  ;;  %145 = vst.msk [vmem:[#allocation3 + $0x8] sm:$0xff] %vm144_vm7, %v13146_v0  ;;  %150 = vst.msk [vmem:[#allocation3 + $0x28] sm:$0xff] %vm144_vm7, %v13146_v0  ;;  %vm1048_vm12 = vcmask 122880   ;;  %s17372_s9 = sld [smem:[#allocation21_spill]] }
  0x5c   :  { %v186_v3 = vld [vmem:[%s17367_s6 + $0x8] sm:$0xff]  ;;  %164 = vrot.lane.b32.xlu0 %v156_v1, %s13147_s30  ;;  %v188_v4 = vld [vmem:[%s17367_s6 + $0x18] sm:$0xff]  ;;  %v185_v5 = vld [vmem:[%s17367_s6] sm:$0xff]  ;;  %148 = vst.msk [vmem:[#allocation3 + $0x18] sm:$0x3] %vm147_vm8, %v13146_v0  ;;  %vm1534_vm13 = vcmask 64512  }
  0x5d   :  { %v187_v6 = vld [vmem:[%s17367_s6 + $0x10] sm:$0xff]  ;;  %v10398_v7 = vpack.c.bf16 %v188_v4, %v186_v3  ;;  %v190_v9 = vld [vmem:[%s17367_s6 + $0x28] sm:$0xff]  ;;  %v192_v10 = vld [vmem:[%s17367_s6 + $0x38] sm:$0xff]  ;;  %152 = vst.msk [vmem:[#allocation3 + $0x38] sm:$0x3] %vm147_vm8, %v13146_v0  ;;  %vm153_vm14 = vcmask 783360  }
  0x5e   :  { %v10400_v8 = vpack.c.bf16 %v187_v6, %v185_v5  ;;  %v189_v11 = vld [vmem:[%s17367_s6 + $0x20] sm:$0xff]  ;;  %v10402_v12 = vpack.c.bf16 %v192_v10, %v190_v9  ;;  %v191_v13 = vld [vmem:[%s17367_s6 + $0x30] sm:$0xff]  ;;  %v194_v14 = vld [vmem:[%s17367_s6 + $0x48] sm:$0xff]  ;;  %vm1831_vm15 = vcmask 650368   ;;  %vm2103_vm1 = vcmask 516096   ;;  %s17375_s12 = smov 64  }
  0x5f   :  { %v196_v15 = vld [vmem:[%s17367_s6 + $0x58] sm:$0xff]  ;;  %10399 = vmatprep.subr.bf16.mxu0 %v10398_v7  ;;  %v10404_v16 = vpack.c.bf16 %v191_v13, %v189_v11  ;;  %v193_v18 = vld [vmem:[%s17367_s6 + $0x40] sm:$0xff]  ;;  %v195_v19 = vld [vmem:[%s17367_s6 + $0x50] sm:$0xff]  ;;  %s17376_s27 = sld [smem:[#allocation17_spill]]  ;;  %s13151_s2 = smov 1  }
  0x60   :  { %166 = vrot.lane.b32.xlu0 %v157_v2, %s13147_s30  ;;  %10401 = vmatpush1.bf16.msra.mxu0 %v10400_v8  ;;  %v10406_v17 = vpack.c.bf16 %v196_v15, %v194_v14  ;;  %v10408_v20 = vpack.c.bf16 %v195_v19, %v193_v18  ;;  %v198_v21 = vld [vmem:[%s17367_s6 + $0x68] sm:$0x3f]  ;;  %v8844_v22 = vld [vmem:[%s17367_s6 + $0x78] sm:$0xff]  ;;  %v197_v24 = vld [vmem:[%s17367_s6 + $0x60] sm:$0x3f] }
  0x61   :  { %10403 = vmatprep.subr.bf16.mxu0 %v10402_v12  ;;  %v8846_v23 = vld [vmem:[%s17367_s6 + $0x88] sm:$0xff]  ;;  %v544_v26 = vld [vmem:[%s17368_s8 + $0x80] sm:$0xff]  ;;  %v546_v31 = vld [vmem:[%s17368_s8 + $0x90] sm:$0xff] }
  0x62   :  { %v10410_v25 = vpack.c.bf16 %v8846_v23, %v8844_v22  ;;  %v545_v27 = vld [vmem:[%s17368_s8 + $0x88] sm:$0xff]  ;;  %v528_v28 = vld [vmem:[%s17368_s8] sm:$0xff]  ;;  %v547_v32 = vld [vmem:[%s17368_s8 + $0x98] sm:$0xff] }
  0x63   :  { %v10434_v29 = vpack.c.bf16 %v545_v27, %v544_v26  ;;  %v529_v30 = vld [vmem:[%s17368_s8 + $0x8] sm:$0xff]  ;;  %v10438_v34 = vpack.c.bf16 %v547_v32, %v546_v31  ;;  %v530_v35 = vld [vmem:[%s17368_s8 + $0x10] sm:$0xff]  ;;  %v531_v36 = vld [vmem:[%s17368_s8 + $0x18] sm:$0xff] }
  0x64   :  { %10405 = vmatpush1.bf16.msra.mxu0 %v10404_v16  ;;  %v10436_v33 = vpack.c.bf16 %v529_v30, %v528_v28  ;;  %v548_v37 = vld [vmem:[%s17368_s8 + $0xa0] sm:$0xff]  ;;  %v549_v38 = vld [vmem:[%s17368_s8 + $0xa8] sm:$0xff]  ;;  %v10440_v39 = vpack.c.bf16 %v531_v36, %v530_v35  ;;  %v550_v43 = vld [vmem:[%s17368_s8 + $0xb0] sm:$0xff] }
  0x65   :  { %10407 = vmatprep.subr.bf16.mxu0 %v10406_v17  ;;  %10435 = vmatprep.subr.bf16.mxu1 %v10434_v29  ;;  %v10442_v40 = vpack.c.bf16 %v549_v38, %v548_v37  ;;  %v532_v41 = vld [vmem:[%s17368_s8 + $0x20] sm:$0xff]  ;;  %v533_v42 = vld [vmem:[%s17368_s8 + $0x28] sm:$0xff]  ;;  %v551_v44 = vld [vmem:[%s17368_s8 + $0xb8] sm:$0xff] }
  0x66   :  { %10437 = vmatpush3.bf16.msra.mxu1 %v10436_v33  ;;  %v10444_v45 = vpack.c.bf16 %v533_v42, %v532_v41  ;;  %v10446_v46 = vpack.c.bf16 %v551_v44, %v550_v43  ;;  %v534_v47 = vld [vmem:[%s17368_s8 + $0x30] sm:$0xff]  ;;  %v535_v48 = vld [vmem:[%s17368_s8 + $0x38] sm:$0xff]  ;;  %v552_v49 = vld [vmem:[%s17368_s8 + $0xc0] sm:$0xff] }
  0x67   :  { %10439 = vmatprep.subr.bf16.mxu1 %v10438_v34  ;;  %v553_v50 = vld [vmem:[%s17368_s8 + $0xc8] sm:$0xff]  ;;  %v10448_v51 = vpack.c.bf16 %v535_v48, %v534_v47  ;;  %v536_v53 = vld [vmem:[%s17368_s8 + $0x40] sm:$0xff]  ;;  %v554_v55 = vld [vmem:[%s17368_s8 + $0xd0] sm:$0xff] }
  0x68   :  { %10409 = vmatpush1.bf16.msra.mxu0 %v10408_v20  ;;  %v10450_v52 = vpack.c.bf16 %v553_v50, %v552_v49  ;;  %v537_v54 = vld [vmem:[%s17368_s8 + $0x48] sm:$0xff]  ;;  %v555_v56 = vld [vmem:[%s17368_s8 + $0xd8] sm:$0xff]  ;;  %v538_v59 = vld [vmem:[%s17368_s8 + $0x50] sm:$0xff] }
  0x69   :  { %8839 = vmatprep.subr.msk.mxu0 %vm205_vm2, %v198_v21  ;;  %v10452_v57 = vpack.c.bf16 %v537_v54, %v536_v53  ;;  %v10454_v58 = vpack.c.bf16 %v555_v56, %v554_v55  ;;  %v539_v60 = vld [vmem:[%s17368_s8 + $0x58] sm:$0xff]  ;;  %v556_v61 = vld [vmem:[%s17368_s8 + $0xe0] sm:$0xff]  ;;  %v557_v62 = vld [vmem:[%s17368_s8 + $0xe8] sm:$0xff] }
  0x6a   :  { %10441 = vmatpush3.bf16.msra.mxu1 %v10440_v39  ;;  %v10456_v63 = vpack.c.bf16 %v539_v60, %v538_v59  ;;  %v10458_v1 = vpack.c.bf16 %v557_v62, %v556_v61  ;;  %v540_v2 = vld [vmem:[%s17368_s8 + $0x60] sm:$0xff]  ;;  %v541_v3 = vld [vmem:[%s17368_s8 + $0x68] sm:$0xff]  ;;  %v8843_v6 = vld [vmem:[%s17367_s6 + $0x70] sm:$0xff] }
  0x6b   :  { %10443 = vmatprep.subr.bf16.mxu1 %v10442_v40  ;;  %v10460_v4 = vpack.c.bf16 %v541_v3, %v540_v2  ;;  %v8845_v7 = vld [vmem:[%s17367_s6 + $0x80] sm:$0xff]  ;;  %v8848_v9 = vld [vmem:[%s17367_s6 + $0x98] sm:$0xff]  ;;  %v8850_v10 = vld [vmem:[%s17367_s6 + $0xa8] sm:$0xff]  ;;  %v290_v3 = vlaneseq }
  0x6c   :  { %8840 = vmatpush1.msk.msra.mxu0 %vm205_vm2, %v197_v24  ;;  %v10412_v11 = vpack.c.bf16 %v8845_v7, %v8843_v6  ;;  %v10414_v12 = vpack.c.bf16 %v8850_v10, %v8848_v9  ;;  %v8847_v13 = vld [vmem:[%s17367_s6 + $0x90] sm:$0xff]  ;;  %v8849_v14 = vld [vmem:[%s17367_s6 + $0xa0] sm:$0xff]  ;;  %v8852_v16 = vld [vmem:[%s17367_s6 + $0xb8] sm:$0xff] }
  0x6d   :  { %10411 = vmatprep.subr.bf16.mxu0 %v10410_v25  ;;  %v8854_v17 = vld [vmem:[%s17367_s6 + $0xc8] sm:$0xff]  ;;  %v10416_v18 = vpack.c.bf16 %v8849_v14, %v8847_v13  ;;  %v8851_v20 = vld [vmem:[%s17367_s6 + $0xb0] sm:$0xff]  ;;  %v8853_v21 = vld [vmem:[%s17367_s6 + $0xc0] sm:$0xff] }
  0x6e   :  { %10445 = vmatpush3.bf16.msra.mxu1 %v10444_v45  ;;  %v10418_v19 = vpack.c.bf16 %v8854_v17, %v8852_v16  ;;  %v10420_v23 = vpack.c.bf16 %v8853_v21, %v8851_v20  ;;  %v8856_v24 = vld [vmem:[%s17367_s6 + $0xd8] sm:$0x3f]  ;;  %v8862_v25 = vld [vmem:[%s17367_s6 + $0xe8] sm:$0xff]  ;;  %v8861_v27 = vld [vmem:[%s17367_s6 + $0xe0] sm:$0xff] }
  0x6f   :  { %10447 = vmatprep.subr.bf16.mxu1 %v10446_v46  ;;  %v8864_v26 = vld [vmem:[%s17367_s6 + $0xf8] sm:$0xff]  ;;  %v8863_v28 = vld [vmem:[%s17367_s6 + $0xf0] sm:$0xff]  ;;  %v8866_v30 = vld [vmem:[%s17367_s6 + $0x108] sm:$0xff] }
  0x70   :  { %v8868_v31 = vld [vmem:[%s17367_s6 + $0x118] sm:$0xff]  ;;  %v8855_v32 = vld [vmem:[%s17367_s6 + $0xd0] sm:$0x3f]  ;;  %v10422_v33 = vpack.c.bf16 %v8864_v26, %v8862_v25  ;;  %v10424_v36 = vpack.c.bf16 %v8863_v28, %v8861_v27  ;;  %v8865_v38 = vld [vmem:[%s17367_s6 + $0x100] sm:$0xff] }
  0x71   :  { %v10426_v37 = vpack.c.bf16 %v8868_v31, %v8866_v30  ;;  %v8867_v39 = vld [vmem:[%s17367_s6 + $0x110] sm:$0xff]  ;;  %v8870_v42 = vld [vmem:[%s17367_s6 + $0x128] sm:$0xff]  ;;  %v8872_v43 = vld [vmem:[%s17367_s6 + $0x138] sm:$0xff] }
  0x72   :  { %10449 = vmatpush3.bf16.msra.mxu1 %v10448_v51  ;;  %v10428_v44 = vpack.c.bf16 %v8867_v39, %v8865_v38  ;;  %v10430_v45 = vpack.c.bf16 %v8872_v43, %v8870_v42  ;;  %v8869_v46 = vld [vmem:[%s17367_s6 + $0x120] sm:$0xff]  ;;  %v8871_v47 = vld [vmem:[%s17367_s6 + $0x130] sm:$0xff]  ;;  %v8874_v50 = vld [vmem:[%s17367_s6 + $0x148] sm:$0x3f] }
  0x73   :  { %10451 = vmatprep.subr.bf16.mxu1 %v10450_v52  ;;  %v10432_v49 = vpack.c.bf16 %v8871_v47, %v8869_v46  ;;  %v8873_v52 = vld [vmem:[%s17367_s6 + $0x140] sm:$0x3f]  ;;  %v542_v60 = vld [vmem:[%s17368_s8 + $0x70] sm:$0xff]  ;;  %v543_v61 = vld [vmem:[%s17368_s8 + $0x78] sm:$0xff] }
  0x74   :  { %v10464_v62 = vpack.c.bf16 %v543_v61, %v542_v60  ;;  %v184_v6 = vld [vmem:[%s17369_s21] sm:$0x3]  ;;  %v8897_v13 = vld [vmem:[%s17368_s8 + $0x190] sm:$0xff]  ;;  %v8898_v14 = vld [vmem:[%s17368_s8 + $0x198] sm:$0xff] }
  0x75   :  { %v8879_v10 = vld [vmem:[%s17368_s8 + $0x100] sm:$0xff]  ;;  %v8881_v20 = vld [vmem:[%s17368_s8 + $0x110] sm:$0xff]  ;;  %v8882_v21 = vld [vmem:[%s17368_s8 + $0x118] sm:$0xff] }
  0x76   :  { %10453 = vmatpush3.bf16.msra.mxu1 %v10452_v57  ;;  %v558_v57 = vld [vmem:[%s17368_s8 + $0xf0] sm:$0xff]  ;;  %v10472_v27 = vpack.c.bf16 %v8882_v21, %v8881_v20  ;;  %v8883_v30 = vld [vmem:[%s17368_s8 + $0x120] sm:$0xff]  ;;  %v8884_v31 = vld [vmem:[%s17368_s8 + $0x128] sm:$0xff] }
  0x77   :  { %10455 = vmatprep.subr.bf16.mxu1 %v10454_v58  ;;  %v559_v58 = vld [vmem:[%s17368_s8 + $0xf8] sm:$0xff]  ;;  %v8903_v38 = vld [vmem:[%s17368_s8 + $0x1c0] sm:$0xff]  ;;  %v8904_v39 = vld [vmem:[%s17368_s8 + $0x1c8] sm:$0xff] }
  0x78   :  { %v10462_v59 = vpack.c.bf16 %v559_v58, %v558_v57  ;;  %v8887_v42 = vld [vmem:[%s17368_s8 + $0x140] sm:$0xff]  ;;  %v8888_v43 = vld [vmem:[%s17368_s8 + $0x148] sm:$0xff]  ;;  %v8910_v57 = vld [vmem:[%s17368_s8 + $0x1f8] sm:$0xff] }
  0x79   :  { %v10484_v46 = vpack.c.bf16 %v8888_v43, %v8887_v42  ;;  %v8893_v60 = vld [vmem:[%s17368_s8 + $0x170] sm:$0xff]  ;;  %v8894_v61 = vld [vmem:[%s17368_s8 + $0x178] sm:$0xff]  ;;  %v1055_v20 = vld [vmem:[%s17371_s26] sm:$0xff] }
  0x7a   :  { %10457 = vmatpush3.bf16.msra.mxu1 %v10456_v63  ;;  %v8895_v63 = vld [vmem:[%s17368_s8 + $0x180] sm:$0xff]  ;;  %v1056_v21 = vld [vmem:[%s17371_s26 + $0x8] sm:$0xff] }
  0x7b   :  { %10459 = vmatprep.subr.bf16.mxu1 %v10458_v1  ;;  %v8896_v1 = vld [vmem:[%s17368_s8 + $0x188] sm:$0xff] }
  0x7c   :  { %v10466_v2 = vpack.c.bf16 %v8896_v1, %v8895_v63  ;;  %v13148_v63 = vmov 0.0|0.0  }
  0x7e   :  { %10461 = vmatpush3.bf16.msra.mxu1 %v10460_v4  ;;  %v13611_v4 = vshrl.u32 %v290_v3, 7 }
  0x7f   :  { %10463 = vmatprep.subr.bf16.mxu1 %v10462_v59 }
  0x80   :  { %v13620_v7 = vsub.s32 0, %v13611_v4 }
  0x82   :  { %10465 = vmatpush3.bf16.msra.mxu1 %v10464_v62  ;;  %v293_v9 = vrot.slane %v184_v6, %v13620_v7  ;;  %v10496_v62 = vpack.c.bf16 %v8894_v61, %v8893_v60 }
  0x83   :  { %10467 = vmatprep.subr.bf16.mxu1 %v10466_v2 }
  0xce   :  { %v165_v5 = vpop.permute.xlu0 %164 }
  0xcf   :  { %177 = vst.msk [vmem:[#allocation2 + $0x1] sm:$0xff] %vm176_vm3, %v165_v5  ;;  %v13614_v5 = vsub.s32 1, %v13611_v4 }
  0xd2   :  { %v167_v8 = vpop.permute.xlu0 %166 }
  0xd3   :  { %178 = vst.msk [vmem:[#allocation2 + $0x9] sm:$0xff] %vm176_vm3, %v167_v8  ;;  %v297_v8 = vrot.slane %v184_v6, %v13614_v5 }
  0xd6   :  { %v13509_v15 = vld [vmem:[#allocation2] sm:$0xff] }
  0xd7   :  { %8841 = vmatmul.mubr.msk.f32.vlgmr.msra.gmra.mrb[0].mxu0 %vm135_vm0, %v13509_v15  ;;  %v321_v35 = vrot.slane %v13509_v15, 1  ;;  %v432_v53 = vrot.slane %v13509_v15, 2 }
  0xd8   :  { %10413 = vmatpush1.bf16.msra.mxu0 %v10412_v11  ;;  %282 = vmatprep.mubr.f32.mxu0 %v13146_v0  ;;  %v8880_v11 = vld [vmem:[%s17368_s8 + $0x108] sm:$0xff] }
  0xd9   :  { %10415 = vmatprep.subr.bf16.mxu0 %v10414_v12  ;;  %v10468_v17 = vpack.c.bf16 %v8880_v11, %v8879_v10  ;;  %v743_v11 = vld [vmem:[%s17370_s4] sm:$0xff] }
  0xda   :  { %v182_v22 = vld [vmem:[#allocation2 + $0x8] sm:$0xff]  ;;  %v183_v34 = vld [vmem:[#allocation2 + $0x10] sm:$0x3] }
  0xdb   :  { %8842 = vmatmul.mubr.msk.f32.gmra.mrb[2].mxu0 %vm135_vm0, %v182_v22  ;;  %v322_v29 = vrot.slane %v182_v22, 1  ;;  %v324_v41 = vrot.slane %v183_v34, 1  ;;  %v433_v51 = vrot.slane %v182_v22, 2  ;;  %v435_v55 = vrot.slane %v183_v34, 2 }
  0xdc   :  { %10417 = vmatpush1.bf16.msra.mxu0 %v10416_v18  ;;  %400 = vmatprep.mubr.f32.mxu0 %v13146_v0  ;;  %v10476_v34 = vpack.c.bf16 %v8884_v31, %v8883_v30  ;;  %v1063_v31 = vld [vmem:[%s17371_s26 + $0x40] sm:$0xff] }
  0xdd   :  { %10419 = vmatprep.subr.bf16.mxu0 %v10418_v19  ;;  %v323_v40 = vsel %vm320_vm4, %v321_v35, %v322_v29  ;;  %v325_v48 = vsel %vm320_vm4, %v322_v29, %v324_v41  ;;  %v434_v54 = vsel %vm205_vm2, %v432_v53, %v433_v51  ;;  %v436_v56 = vsel %vm205_vm2, %v433_v51, %v435_v55  ;;  %v8908_v51 = vld [vmem:[%s17368_s8 + $0x1e8] sm:$0xff] }
  0xde   :  { %v10470_v19 = vpack.c.bf16 %v8898_v14, %v8897_v13  ;;  %v10482_v41 = vpack.c.bf16 %v8904_v39, %v8903_v38  ;;  %v8892_v55 = vld [vmem:[%s17368_s8 + $0x168] sm:$0xff] }
  0xdf   :  { %v1068_v38 = vld [vmem:[%s17371_s26 + $0x68] sm:$0xff] }
  0xe0   :  { %10421 = vmatpush1.bf16.msra.mxu0 %v10420_v23  ;;  %v8899_v23 = vld [vmem:[%s17368_s8 + $0x1a0] sm:$0xff] }
  0xe1   :  { %8857 = vmatprep.subr.msk.mxu0 %vm205_vm2, %v8856_v24  ;;  %v8900_v24 = vld [vmem:[%s17368_s8 + $0x1a8] sm:$0xff] }
  0xe2   :  { %v10474_v29 = vpack.c.bf16 %v8900_v24, %v8899_v23  ;;  %v10511_v23 = vpack.c.bf16 %v1056_v21, %v1055_v20  ;;  %v1058_v24 = vld [vmem:[%s17371_s26 + $0x18] sm:$0xff]  ;;  %v1372_v21 = vld [vmem:[%s17330_s11 + $0x60] sm:$0xff] }
  0xe4   :  { %8858 = vmatpush1.msk.msra.mxu0 %vm205_vm2, %v8855_v32  ;;  %v8901_v32 = vld [vmem:[%s17368_s8 + $0x1b0] sm:$0xff] }
  0xe5   :  { %8859 = vmatmul.mubr.msk.f32.vlgmr.msra.gmra.mrb[0].mxu0 %vm135_vm0, %v323_v40  ;;  %10423 = vmatprep.subr.bf16.mxu0 %v10422_v33  ;;  %v8902_v33 = vld [vmem:[%s17368_s8 + $0x1b8] sm:$0xff] }
  0xe6   :  { %10425 = vmatpush1.bf16.msra.mxu0 %v10424_v36  ;;  %406 = vmatprep.mubr.f32.mxu0 %v13146_v0  ;;  %v10478_v35 = vpack.c.bf16 %v8902_v33, %v8901_v32  ;;  %v8885_v36 = vld [vmem:[%s17368_s8 + $0x130] sm:$0xff]  ;;  %v1064_v32 = vld [vmem:[%s17371_s26 + $0x48] sm:$0xff] }
  0xe7   :  { %10427 = vmatprep.subr.bf16.mxu0 %v10426_v37  ;;  %v8886_v37 = vld [vmem:[%s17368_s8 + $0x138] sm:$0xff]  ;;  %v10523_v33 = vpack.c.bf16 %v1064_v32, %v1063_v31 }
  0xe8   :  { %v10480_v40 = vpack.c.bf16 %v8886_v37, %v8885_v36  ;;  %v1067_v37 = vld [vmem:[%s17371_s26 + $0x60] sm:$0xff]  ;;  %v8921_v31 = vld [vmem:[%s17371_s26 + $0xb8] sm:$0xff] }
  0xe9   :  { %8860 = vmatmul.mubr.msk.f32.gmra.mrb[2].mxu0 %vm135_vm0, %v325_v48  ;;  %v8889_v48 = vld [vmem:[%s17368_s8 + $0x150] sm:$0xff]  ;;  %v10529_v39 = vpack.c.bf16 %v1068_v38, %v1067_v37 }
  0xea   :  { %10429 = vmatpush1.bf16.msra.mxu0 %v10428_v44  ;;  %511 = vmatprep.mubr.f32.mxu0 %v13146_v0  ;;  %v8905_v44 = vld [vmem:[%s17368_s8 + $0x1d0] sm:$0xff] }
  0xeb   :  { %10431 = vmatprep.subr.bf16.mxu0 %v10430_v45  ;;  %v8906_v45 = vld [vmem:[%s17368_s8 + $0x1d8] sm:$0xff] }
  0xec   :  { %v10486_v47 = vpack.c.bf16 %v8906_v45, %v8905_v44 }
  0xee   :  { %10433 = vmatpush1.bf16.msra.mxu0 %v10432_v49  ;;  %v8890_v49 = vld [vmem:[%s17368_s8 + $0x158] sm:$0xff] }
  0xef   :  { %8875 = vmatprep.subr.msk.mxu0 %vm205_vm2, %v8874_v50  ;;  %v8907_v50 = vld [vmem:[%s17368_s8 + $0x1e0] sm:$0xff] }
  0xf0   :  { %v10490_v53 = vpack.c.bf16 %v8908_v51, %v8907_v50 }
  0xf2   :  { %8876 = vmatpush1.msk.msra.mxu0 %vm205_vm2, %v8873_v52  ;;  %v10488_v52 = vpack.c.bf16 %v8890_v49, %v8889_v48  ;;  %v1071_v48 = vld [vmem:[%s17371_s26 + $0x80] sm:$0xff]  ;;  %v1072_v49 = vld [vmem:[%s17371_s26 + $0x88] sm:$0xff] }
  0xf3   :  { %8877 = vmatmul.mubr.msk.f32.vlgmr.msra.gmra.mrb[0].mxu0 %vm135_vm0, %v434_v54  ;;  %v8891_v54 = vld [vmem:[%s17368_s8 + $0x160] sm:$0xff]  ;;  %10498 = vmatprep.subr.bf16.mxu0 %v13148_v63  ;;  %v10535_v50 = vpack.c.bf16 %v1072_v49, %v1071_v48  ;;  %v8928_v48 = vld [vmem:[%s17371_s26 + $0xf0] sm:$0xff]  ;;  %v8929_v49 = vld [vmem:[%s17371_s26 + $0xf8] sm:$0xff] }
  0xf4   :  { %517 = vmatprep.mubr.f32.mxu0 %v13146_v0  ;;  %v10492_v58 = vpack.c.bf16 %v8892_v55, %v8891_v54 }
  0xf7   :  { %8878 = vmatmul.mubr.msk.f32.gmra.mrb[2].mxu0 %vm135_vm0, %v436_v56  ;;  %v8909_v56 = vld [vmem:[%s17368_s8 + $0x1f0] sm:$0xff] }
  0xf8   :  { %v10494_v59 = vpack.c.bf16 %v8910_v57, %v8909_v56  ;;  %10004 = vmatprep.mubr.msk.f32.mxu0 %vm13149_vm5, %v13146_v0 }
 0x1c6   :  { %v513_v12 = vpop.f32.mrb[0].mxu0 }
 0x1c7   :  { %v515_v15 = vpop.f32.mrb[1].mxu0  ;;  %v13636_v18 = vadd.f32 %v513_v12, %v293_v9  ;;  %v8912_v12 = vld [vmem:[%s17370_s4 + $0x8] sm:$0xff] }
 0x1c8   :  { %v12927_v16 = vadd.f32 %v515_v15, %v297_v8 }
 0x1ca   :  { %v519_v22 = vpop.f32.mrb[2].mxu0  ;;  %624 = vmatprep.mubr.f32.mxu1 %v12927_v16 }
 0x1cb   :  { %v521_v25 = vpop.f32.mrb[3].mxu0  ;;  %625 = vmatmul.mubr.f32.vlgmr.msra.gmra.mrb[0].mxu1 %v13636_v18  ;;  %v12928_v28 = vadd.f32 %v519_v22, %v293_v9  ;;  %v1057_v22 = vld [vmem:[%s17371_s26 + $0x10] sm:$0xff] }
 0x1cc   :  { %v12929_v26 = vadd.f32 %v521_v25, %v297_v8  ;;  %10469 = vmatpush3.bf16.msra.mxu1 %v10468_v17  ;;  %v10514_v25 = vpack.c.bf16 %v1058_v24, %v1057_v22  ;;  %v1373_v22 = vld [vmem:[%s17330_s11 + $0x68] sm:$0xff]  ;;  %v1374_v24 = vld [vmem:[%s17330_s11 + $0x70] sm:$0xff] }
 0x1cd   :  { %10471 = vmatprep.subr.bf16.mxu1 %v10470_v19 }
 0x1ce   :  { %629 = vmatprep.mubr.f32.mxu1 %v12929_v26 }
 0x1cf   :  { %630 = vmatmul.mubr.f32.gmra.mrb[2].mxu1 %v12928_v28 }
 0x1d0   :  { %10473 = vmatpush3.bf16.msra.mxu1 %v10472_v27  ;;  %732 = vmatprep.mubr.f32.mxu1 %v12927_v16  ;;  %v1060_v27 = vld [vmem:[%s17371_s26 + $0x28] sm:$0xff] }
 0x1d1   :  { %10475 = vmatprep.subr.bf16.mxu1 %v10474_v29  ;;  %v1062_v29 = vld [vmem:[%s17371_s26 + $0x38] sm:$0xff] }
 0x1d4   :  { %10477 = vmatpush3.bf16.msra.mxu1 %v10476_v34  ;;  %v1065_v34 = vld [vmem:[%s17371_s26 + $0x50] sm:$0xff] }
 0x1d5   :  { %10479 = vmatprep.subr.bf16.mxu1 %v10478_v35  ;;  %v1066_v35 = vld [vmem:[%s17371_s26 + $0x58] sm:$0xff] }
 0x1d6   :  { %v10526_v36 = vpack.c.bf16 %v1066_v35, %v1065_v34 }
 0x1d8   :  { %10481 = vmatpush3.bf16.msra.mxu1 %v10480_v40  ;;  %v1069_v40 = vld [vmem:[%s17371_s26 + $0x70] sm:$0xff] }
 0x1d9   :  { %10483 = vmatprep.subr.bf16.mxu1 %v10482_v41  ;;  %v1070_v41 = vld [vmem:[%s17371_s26 + $0x78] sm:$0xff] }
 0x1da   :  { %v10532_v42 = vpack.c.bf16 %v1070_v41, %v1069_v40  ;;  %v8923_v40 = vld [vmem:[%s17371_s26 + $0xc8] sm:$0xff] }
 0x1dc   :  { %10485 = vmatpush3.bf16.msra.mxu1 %v10484_v46 }
 0x1dd   :  { %10487 = vmatprep.subr.bf16.mxu1 %v10486_v47 }
 0x1e0   :  { %10489 = vmatpush3.bf16.msra.mxu1 %v10488_v52  ;;  %v1073_v52 = vld [vmem:[%s17371_s26 + $0x90] sm:$0xff] }
 0x1e1   :  { %10491 = vmatprep.subr.bf16.mxu1 %v10490_v53  ;;  %v1074_v53 = vld [vmem:[%s17371_s26 + $0x98] sm:$0xff] }
 0x1e2   :  { %v10538_v55 = vpack.c.bf16 %v1074_v53, %v1073_v52  ;;  %v8931_v52 = vld [vmem:[%s17371_s26 + $0x108] sm:$0xff] }
 0x1e4   :  { %10493 = vmatpush3.bf16.msra.mxu1 %v10492_v58 }
 0x1e5   :  { %10495 = vmatprep.subr.bf16.mxu1 %v10494_v59 }
 0x1e8   :  { %10497 = vmatpush3.bf16.msra.mxu1 %v10496_v62  ;;  %v1360_v62 = vld [vmem:[%s17330_s11] sm:$0xff] }
 0x1e9   :  { %10600 = vmatprep.subr.bf16.mxu1 %v13148_v63 }
 0x1eb   :  { %733 = vmatmul.mubr.f32.vlgmr.msra.gmra.mrb[4].mxu1 %v13636_v18 }
 0x1ec   :  { %737 = vmatprep.mubr.f32.mxu1 %v12929_v26  ;;  %v1059_v26 = vld [vmem:[%s17371_s26 + $0x20] sm:$0xff] }
 0x1ef   :  { %738 = vmatmul.mubr.f32.gmra.mrb[6].mxu1 %v12928_v28  ;;  %v10517_v28 = vpack.c.bf16 %v1060_v27, %v1059_v26 }
 0x1f0   :  { %10060 = vmatprep.mubr.msk.f32.mxu1 %vm13149_vm5, %v13146_v0 }
 0x29e   :  { %v9554_v1 = vpop.f32.mrb[0].mxu1 }
 0x29f   :  { %v9555_v2 = vpop.f32.mrb[1].mxu1 }
 0x2a0   :  { %v9556_v3 = vadd.f32 %v9555_v2, %v9554_v1  ;;  %v1361_v1 = vld [vmem:[%s17330_s11 + $0x8] sm:$0xff]  ;;  %v1362_v2 = vld [vmem:[%s17330_s11 + $0x10] sm:$0xff] }
 0x2a2   :  { %v9557_v6 = vpop.f32.mrb[2].mxu1 }
 0x2a3   :  { %v9558_v8 = vpop.f32.mrb[3].mxu1 }
 0x2a4   :  { %v9559_v9 = vadd.f32 %v9558_v8, %v9557_v6  ;;  %v1363_v6 = vld [vmem:[%s17330_s11 + $0x18] sm:$0xff] }
 0x2a5   :  { %v10604_v8 = vpack.c.bf16 %v1363_v6, %v1362_v2  ;;  %v8939_v2 = vld [vmem:[%s17371_s26 + $0x140] sm:$0xff] }
 0x2a6   :  { %v10499_v10 = vpack.c.bf16 %v9559_v9, %v9556_v3  ;;  %v10601_v3 = vpack.c.bf16 %v1361_v1, %v1360_v62  ;;  %v1364_v9 = vld [vmem:[%s17330_s11 + $0x20] sm:$0xff] }
 0x2a8   :  { %10500 = vmatpush3.bf16.msra.mxu0 %v10499_v10  ;;  %10602 = vmatpush3.bf16.msra.mxu1 %v10601_v3  ;;  %v8940_v3 = vld [vmem:[%s17371_s26 + $0x148] sm:$0xff] }
 0x2a9   :  { %10501 = vmatprep.subr.bf16.mxu0 %v13148_v63  ;;  %10603 = vmatprep.subr.bf16.mxu1 %v13148_v63 }
 0x2ab   :  { %10005 = vmatmul.mubr.msk.f32.vlgmr.msra.gmra.mrb[4].mxu0 %vm744_vm6, %v743_v11 }
 0x2ac   :  { %10503 = vmatpush3.bf16.msra.mxu0 %v10499_v10  ;;  %10011 = vmatprep.mubr.msk.f32.mxu0 %vm13149_vm5, %v13146_v0  ;;  %v1365_v10 = vld [vmem:[%s17330_s11 + $0x28] sm:$0xff] }
 0x2ad   :  { %10504 = vmatprep.subr.bf16.mxu0 %v13148_v63  ;;  %10605 = vmatpush3.bf16.msra.mxu1 %v10604_v8 }
 0x2ae   :  { %10606 = vmatprep.subr.bf16.mxu1 %v13148_v63 }
 0x2af   :  { %10012 = vmatmul.mubr.msk.f32.vlgmr.msra.gmra.mrb[6].mxu0 %vm744_vm6, %v8912_v12 }
 0x2b0   :  { %10018 = vmatprep.mubr.msk.f32.mxu0 %vm13149_vm5, %v13146_v0 }
 0x2be   :  { %v9592_v13 = vpop.f32.mrb[4].mxu1 }
 0x2bf   :  { %v9593_v14 = vpop.f32.mrb[5].mxu1 }
 0x2c0   :  { %v9594_v15 = vadd.f32 %v9593_v14, %v9592_v13  ;;  %v1367_v13 = vld [vmem:[%s17330_s11 + $0x38] sm:$0xff] }
 0x2c2   :  { %v9595_v16 = vpop.f32.mrb[6].mxu1 }
 0x2c3   :  { %v9596_v17 = vpop.f32.mrb[7].mxu1 }
 0x2c4   :  { %v9597_v18 = vadd.f32 %v9596_v17, %v9595_v16  ;;  %v1369_v16 = vld [vmem:[%s17330_s11 + $0x48] sm:$0xff] }
 0x2c6   :  { %v10505_v19 = vpack.c.bf16 %v9597_v18, %v9594_v15  ;;  %v1368_v15 = vld [vmem:[%s17330_s11 + $0x40] sm:$0xff]  ;;  %v1370_v18 = vld [vmem:[%s17330_s11 + $0x50] sm:$0xff] }
 0x2c7   :  { %v10613_v17 = vpack.c.bf16 %v1369_v16, %v1368_v15 }
 0x2c8   :  { %10506 = vmatpush3.bf16.msra.mxu0 %v10505_v19 }
 0x2c9   :  { %10507 = vmatprep.subr.bf16.mxu0 %v13148_v63 }
 0x2cb   :  { %10019 = vmatmul.mubr.msk.f32.vlgmr.msra.gmra.mrb[8].mxu0 %vm744_vm6, %v743_v11  ;;  %v10607_v11 = vpack.c.bf16 %v1365_v10, %v1364_v9 }
 0x2cc   :  { %10509 = vmatpush3.bf16.msra.mxu0 %v10505_v19  ;;  %10025 = vmatprep.mubr.msk.f32.mxu0 %vm13149_vm5, %v13146_v0  ;;  %v1061_v0 = vld [vmem:[%s17371_s26 + $0x30] sm:$0xff]  ;;  %v1371_v19 = vld [vmem:[%s17330_s11 + $0x58] sm:$0xff] }
 0x2cd   :  { %10510 = vmatprep.subr.bf16.mxu0 %v13148_v63  ;;  %v10520_v30 = vpack.c.bf16 %v1062_v29, %v1061_v0  ;;  %10608 = vmatpush3.bf16.msra.mxu1 %v10607_v11  ;;  %v10616_v20 = vpack.c.bf16 %v1371_v19, %v1370_v18  ;;  %v8919_v0 = vld [vmem:[%s17371_s26 + $0xa8] sm:$0xff]  ;;  %v10571_v11 = vpack.c.bf16 %v8940_v3, %v8939_v2  ;;  %v8971_v2 = vld [vmem:[%s17330_s11 + $0xd8] sm:$0xff] }
 0x2ce   :  { %10609 = vmatprep.subr.bf16.mxu1 %v13148_v63  ;;  %v8944_v18 = vld [vmem:[%s17371_s26 + $0x168] sm:$0xff] }
 0x2cf   :  { %10026 = vmatmul.mubr.msk.f32.vlgmr.msra.gmra.mrb[10].mxu0 %vm744_vm6, %v8912_v12  ;;  %v1366_v12 = vld [vmem:[%s17330_s11 + $0x30] sm:$0xff] }
 0x2d0   :  { %10512 = vmatpush1.bf16.msra.mxu0 %v10511_v23  ;;  %v10610_v14 = vpack.c.bf16 %v1367_v13, %v1366_v12  ;;  %v10619_v23 = vpack.c.bf16 %v1373_v22, %v1372_v21  ;;  %v8941_v12 = vld [vmem:[%s17371_s26 + $0x150] sm:$0xff]  ;;  %v8942_v13 = vld [vmem:[%s17371_s26 + $0x158] sm:$0xff] }
 0x2d1   :  { %10513 = vmatprep.subr.bf16.mxu0 %v13148_v63  ;;  %v10574_v16 = vpack.c.bf16 %v8942_v13, %v8941_v12  ;;  %v8946_v21 = vld [vmem:[%s17371_s26 + $0x178] sm:$0xff]  ;;  %v158_v13 = vld [vmem:[%s17366_s29 + $0x10] sm:$0xff] }
 0x2d2   :  { %10611 = vmatpush3.bf16.msra.mxu1 %v10610_v14 }
 0x2d3   :  { %10612 = vmatprep.subr.bf16.mxu1 %v13148_v63 }
 0x2d4   :  { %10515 = vmatpush1.bf16.msra.mxu0 %v10514_v25  ;;  %v1375_v25 = vld [vmem:[%s17330_s11 + $0x78] sm:$0xff] }
 0x2d5   :  { %10516 = vmatprep.subr.bf16.mxu0 %v13148_v63  ;;  %v10622_v26 = vpack.c.bf16 %v1375_v25, %v1374_v24  ;;  %v8948_v24 = vld [vmem:[%s17371_s26 + $0x188] sm:$0xff] }
 0x2d6   :  { %10614 = vmatpush3.bf16.msra.mxu1 %v10613_v17  ;;  %v8943_v17 = vld [vmem:[%s17371_s26 + $0x160] sm:$0xff] }
 0x2d7   :  { %10615 = vmatprep.subr.bf16.mxu1 %v13148_v63  ;;  %v10577_v19 = vpack.c.bf16 %v8944_v18, %v8943_v17  ;;  %v1533_v17 = vld [vmem:[%s17329_s10] sm:$0xf] }
 0x2d8   :  { %10518 = vmatpush1.bf16.msra.mxu0 %v10517_v28  ;;  %v8918_v28 = vld [vmem:[%s17371_s26 + $0xa0] sm:$0xff] }
 0x2d9   :  { %10519 = vmatprep.subr.bf16.mxu0 %v13148_v63  ;;  %v10541_v29 = vpack.c.bf16 %v8919_v0, %v8918_v28  ;;  %v8951_v0 = vld [vmem:[%s17371_s26 + $0x1a0] sm:$0xff] }
 0x2da   :  { %10617 = vmatpush3.bf16.msra.mxu1 %v10616_v20  ;;  %v8945_v20 = vld [vmem:[%s17371_s26 + $0x170] sm:$0xff] }
 0x2db   :  { %10618 = vmatprep.subr.bf16.mxu1 %v13148_v63  ;;  %v10580_v22 = vpack.c.bf16 %v8946_v21, %v8945_v20  ;;  %v2134_v20 = vld [vmem:[%s17367_s6] sm:$0xff]  ;;  %v2136_v21 = vld [vmem:[%s17367_s6 + $0x10] sm:$0xff] }
 0x2dc   :  { %10521 = vmatpush1.bf16.msra.mxu0 %v10520_v30  ;;  %v8920_v30 = vld [vmem:[%s17371_s26 + $0xb0] sm:$0xff] }
 0x2dd   :  { %10522 = vmatprep.subr.bf16.mxu0 %v13148_v63  ;;  %v10544_v37 = vpack.c.bf16 %v8921_v31, %v8920_v30  ;;  %v8953_v31 = vld [vmem:[%s17371_s26 + $0x1b0] sm:$0xff] }
 0x2de   :  { %10620 = vmatpush3.bf16.msra.mxu1 %v10619_v23  ;;  %v8947_v23 = vld [vmem:[%s17371_s26 + $0x180] sm:$0xff] }
 0x2df   :  { %10621 = vmatprep.subr.bf16.mxu1 %v13148_v63  ;;  %v10583_v25 = vpack.c.bf16 %v8948_v24, %v8947_v23  ;;  %v2139_v23 = vld [vmem:[%s17367_s6 + $0x28] sm:$0xff]  ;;  %v2141_v24 = vld [vmem:[%s17367_s6 + $0x38] sm:$0xff] }
 0x2e0   :  { %10524 = vmatpush1.bf16.msra.mxu0 %v10523_v33 }
 0x2e1   :  { %10525 = vmatprep.subr.bf16.mxu0 %v13148_v63 }
 0x2e2   :  { %10623 = vmatpush3.bf16.msra.mxu1 %v10622_v26  ;;  %v8949_v26 = vld [vmem:[%s17371_s26 + $0x190] sm:$0xff] }
 0x2e3   :  { %10624 = vmatprep.subr.bf16.mxu1 %v13148_v63 }
 0x2e4   :  { %10527 = vmatpush1.bf16.msra.mxu0 %v10526_v36 }
 0x2e5   :  { %10528 = vmatprep.subr.bf16.mxu0 %v13148_v63 }
 0x2e8   :  { %10530 = vmatpush1.bf16.msra.mxu0 %v10529_v39  ;;  %v8922_v39 = vld [vmem:[%s17371_s26 + $0xc0] sm:$0xff] }
 0x2e9   :  { %10531 = vmatprep.subr.bf16.mxu0 %v13148_v63  ;;  %v10547_v41 = vpack.c.bf16 %v8923_v40, %v8922_v39  ;;  %v8958_v39 = vld [vmem:[%s17371_s26 + $0x1d8] sm:$0xff] }
 0x2ec   :  { %10533 = vmatpush1.bf16.msra.mxu0 %v10532_v42  ;;  %v8924_v42 = vld [vmem:[%s17371_s26 + $0xd0] sm:$0xff] }
 0x2ed   :  { %10534 = vmatprep.subr.bf16.mxu0 %v13148_v63 }
 0x2f0   :  { %10536 = vmatpush1.bf16.msra.mxu0 %v10535_v50  ;;  %v10556_v50 = vpack.c.bf16 %v8929_v49, %v8928_v48 }
 0x2f1   :  { %10537 = vmatprep.subr.bf16.mxu0 %v13148_v63 }
 0x2f4   :  { %10539 = vmatpush1.bf16.msra.mxu0 %v10538_v55  ;;  %v8933_v55 = vld [vmem:[%s17371_s26 + $0x118] sm:$0xff] }
 0x2f5   :  { %10540 = vmatprep.subr.bf16.mxu0 %v13148_v63 }
 0x37e   :  { %v814_v43 = vpop.f32.mrb[4].mxu0 }
 0x37f   :  { %v10006_v44 = vpop.f32.mrb[5].mxu0 }
 0x382   :  { %v889_v45 = vpop.f32.mrb[6].mxu0 }
 0x383   :  { %v893_v46 = vmax.f32 %v814_v43, %v889_v45  ;;  %v10013_v47 = vpop.f32.mrb[7].mxu0  ;;  %v8925_v43 = vld [vmem:[%s17371_s26 + $0xd8] sm:$0xff]  ;;  %v8926_v45 = vld [vmem:[%s17371_s26 + $0xe0] sm:$0xff] }
 0x384   :  { %v10550_v44 = vpack.c.bf16 %v8925_v43, %v8924_v42  ;;  %v14044_v43 = vld [vmem:[#allocation3 + $0x20] sm:$0xff] }
 0x385   :  { %154 = vst.msk [vmem:[#allocation4] sm:$0x3f] %vm153_vm14, %v14044_v43  ;;  %155 = vst.msk [vmem:[#allocation4 + $0x8] sm:$0x3f] %vm153_vm14, %v14044_v43 }
 0x39e   :  { %v960_v51 = vpop.f32.mrb[8].mxu0 }
 0x39f   :  { %v10020_v54 = vpop.f32.mrb[9].mxu0 }
 0x3a0   :  { %v8932_v54 = vld [vmem:[%s17371_s26 + $0x110] sm:$0xff] }
 0x3a2   :  { %v1030_v56 = vpop.f32.mrb[10].mxu0 }
 0x3a3   :  { %v1034_v57 = vmax.f32 %v960_v51, %v1030_v56  ;;  %v10027_v58 = vpop.f32.mrb[11].mxu0  ;;  %v8930_v51 = vld [vmem:[%s17371_s26 + $0x100] sm:$0xff]  ;;  %v10562_v56 = vpack.c.bf16 %v8933_v55, %v8932_v54  ;;  %v8965_v55 = vld [vmem:[%s17330_s11 + $0xa8] sm:$0xff] }
 0x3a4   :  { %v10559_v53 = vpack.c.bf16 %v8931_v52, %v8930_v51  ;;  %v8935_v58 = vld [vmem:[%s17371_s26 + $0x128] sm:$0xff]  ;;  %v8962_v51 = vld [vmem:[%s17330_s11 + $0x90] sm:$0xff]  ;;  %v8963_v52 = vld [vmem:[%s17330_s11 + $0x98] sm:$0xff] }
 0x3a5   :  { %v1035_v59 = vmax.f32 %v893_v46, %v1034_v57  ;;  %v8927_v46 = vld [vmem:[%s17371_s26 + $0xe8] sm:$0xff]  ;;  %v8934_v57 = vld [vmem:[%s17371_s26 + $0x120] sm:$0xff] }
 0x3a6   :  { %v10553_v47 = vpack.c.bf16 %v8927_v46, %v8926_v45  ;;  %v8960_v45 = vld [vmem:[%s17330_s11 + $0x80] sm:$0xff] }
 0x3a7   :  { %v1036_v60 = vmax.f32 %v1035_v59, 0.0  ;;  %v10565_v59 = vpack.c.bf16 %v8935_v58, %v8934_v57  ;;  %v8917_v46 = vld [vmem:[%s17372_s9] ss:$0 sm:$0xff]  ;;  %v8966_v57 = vld [vmem:[%s17330_s11 + $0xb0] sm:$0xff]  ;;  %v8967_v58 = vld [vmem:[%s17330_s11 + $0xb8] sm:$0xff] }
 0x3a8   :  { %v8964_v54 = vld [vmem:[%s17330_s11 + $0xa0] sm:$0xff] }
 0x3a9   :  { %v1038_v61 = vrot.slane %v1036_v60, 7  ;;  %v8936_v60 = vld [vmem:[%s17371_s26 + $0x130] sm:$0xff] }
 0x3ab   :  { %1039 = vrot.lane.b32.xlu1 %v1038_v61, %s13138_s28  ;;  %v8937_v61 = vld [vmem:[%s17371_s26 + $0x138] sm:$0xff] }
 0x3ac   :  { %v10568_v1 = vpack.c.bf16 %v8937_v61, %v8936_v60  ;;  %v8968_v60 = vld [vmem:[%s17330_s11 + $0xc0] sm:$0xff]  ;;  %v8969_v61 = vld [vmem:[%s17330_s11 + $0xc8] sm:$0xff] }
 0x3af   :  { %168 = vrot.lane.b32.xlu1 %v158_v13, %s13147_s30  ;;  %v9040_v13 = vld [vmem:[%s17367_s6 + $0x118] sm:$0xff] }
 0x41d   :  { %v1040_v27 = vpop.permute.xlu1 %1039 }
 0x41e   :  { %1043 = vst.msk [vmem:[#allocation3] sm:$0xfe] %vm1042_vm9, %v1040_v27 }
 0x41f   :  { %1045 = vst.msk [vmem:[#allocation3 + $0x8] sm:$0xfe] %vm1044_vm10, %v1040_v27 }
 0x420   :  { %1047 = vst.msk [vmem:[#allocation3 + $0x10] sm:$0x1] %vm1046_vm11, %v1040_v27 }
 0x421   :  { %1049 = vst.msk [vmem:[#allocation3 + $0x18] sm:$0x1] %vm1048_vm12, %v1040_v27  ;;  %v8950_v27 = vld [vmem:[%s17371_s26 + $0x198] sm:$0xff] }
 0x422   :  { %v10586_v28 = vpack.c.bf16 %v8950_v27, %v8949_v26  ;;  %v10704_v26 = vpack.c.bf16 %v2136_v21, %v2134_v20  ;;  %v10706_v27 = vpack.c.bf16 %v2141_v24, %v2139_v23  ;;  %v9037_v20 = vld [vmem:[%s17367_s6 + $0x100] sm:$0xff]  ;;  %v9039_v21 = vld [vmem:[%s17367_s6 + $0x110] sm:$0xff]  ;;  %v9044_v23 = vld [vmem:[%s17367_s6 + $0x138] sm:$0xff] }
 0x423   :  { %v10732_v24 = vpack.c.bf16 %v9039_v21, %v9037_v20  ;;  %v9071_v20 = vld [vmem:[%s17368_s8 + $0x1a0] sm:$0xff]  ;;  %v9072_v21 = vld [vmem:[%s17368_s8 + $0x1a8] sm:$0xff] }
 0x425   :  { %v13895_v33 = vld [vmem:[#allocation3] sm:$0xff] }
 0x426   :  { %v13893_v32 = vld [vmem:[#allocation3 + $0x8] sm:$0xff]  ;;  %v1179_v6 = vrot.slane %v13895_v33, 1 }
 0x427   :  { %8916 = vmatprep.mubr.msk.f32.mxu0 %vm144_vm7, %v13893_v32  ;;  %v1182_v35 = vrot.slane %v13893_v32, 1  ;;  %v13962_v62 = vld [vmem:[#allocation3 + $0x10] sm:$0x3]  ;;  %v1283_v9 = vrot.slane %v13893_v32, 2  ;;  %v8954_v32 = vld [vmem:[%s17371_s26 + $0x1b8] sm:$0xff] }
 0x428   :  { %v13897_v34 = vld [vmem:[#allocation3 + $0x18] sm:$0x3]  ;;  %1143 = vmatmul.mubr.f32.vlgmr.msra.gmra.mrb[12].mxu0 %v13895_v33  ;;  %v1180_v8 = vrot.slane %v13962_v62, 1  ;;  %v1281_v42 = vrot.slane %v13962_v62, 2  ;;  %v10637_v62 = vpack.c.bf16 %v8969_v61, %v8968_v60  ;;  %v9023_v60 = vld [vmem:[%s17367_s6 + $0xb0] sm:$0xff]  ;;  %v9025_v61 = vld [vmem:[%s17367_s6 + $0xc0] sm:$0xff] }
 0x429   :  { %v1183_v36 = vrot.slane %v13897_v34, 1  ;;  %10542 = vmatpush1.bf16.msra.mxu0 %v10541_v29  ;;  %v1284_v10 = vrot.slane %v13897_v34, 2  ;;  %v8952_v29 = vld [vmem:[%s17371_s26 + $0x1a8] sm:$0xff]  ;;  %v10592_v34 = vpack.c.bf16 %v8954_v32, %v8953_v31 }
 0x42a   :  { %10543 = vmatprep.subr.bf16.mxu0 %v13148_v63  ;;  %v1181_v14 = vsel %vm320_vm4, %v1179_v6, %v1180_v8  ;;  %v10589_v30 = vpack.c.bf16 %v8952_v29, %v8951_v0  ;;  %v8972_v6 = vld [vmem:[%s17330_s11 + $0xe0] sm:$0xff]  ;;  %v8973_v8 = vld [vmem:[%s17330_s11 + $0xe8] sm:$0xff]  ;;  %v2140_v0 = vld [vmem:[%s17367_s6 + $0x30] sm:$0xff] }
 0x42b   :  { %v1184_v38 = vsel %vm320_vm4, %v1182_v35, %v1183_v36  ;;  %v1285_v15 = vsel %vm205_vm2, %v1283_v9, %v1284_v10  ;;  %v8955_v35 = vld [vmem:[%s17371_s26 + $0x1c0] sm:$0xff]  ;;  %v8956_v36 = vld [vmem:[%s17371_s26 + $0x1c8] sm:$0xff]  ;;  %v10643_v9 = vpack.c.bf16 %v8973_v8, %v8972_v6  ;;  %v8974_v10 = vld [vmem:[%s17330_s11 + $0xf0] sm:$0xff] }
 0x42c   :  { %8938 = vmatprep.mubr.msk.f32.mxu0 %vm144_vm7, %v1184_v38  ;;  %v8957_v38 = vld [vmem:[%s17371_s26 + $0x1d0] sm:$0xff]  ;;  %v2143_v29 = vld [vmem:[%s17367_s6 + $0x48] sm:$0xff]  ;;  %v9036_v8 = vld [vmem:[%s17367_s6 + $0xf8] sm:$0xff] }
 0x42d   :  { %10545 = vmatpush1.bf16.msra.mxu0 %v10544_v37  ;;  %v10595_v37 = vpack.c.bf16 %v8956_v36, %v8955_v35  ;;  %v10598_v40 = vpack.c.bf16 %v8958_v39, %v8957_v38  ;;  %v2144_v35 = vld [vmem:[%s17367_s6 + $0x50] sm:$0xff]  ;;  %v9016_v38 = vld [vmem:[%s17367_s6 + $0x78] sm:$0xff]  ;;  %v9018_v39 = vld [vmem:[%s17367_s6 + $0x88] sm:$0xff] }
 0x42e   :  { %10546 = vmatprep.subr.bf16.mxu0 %v13148_v63  ;;  %v9034_v6 = vld [vmem:[%s17367_s6 + $0xe8] sm:$0xff] }
 0x431   :  { %10548 = vmatpush1.bf16.msra.mxu0 %v10547_v41  ;;  %v1280_v41 = vrot.slane %v13895_v33, 2  ;;  %v8961_v33 = vld [vmem:[%s17330_s11 + $0x88] sm:$0xff] }
 0x432   :  { %10549 = vmatprep.subr.bf16.mxu0 %v13148_v63  ;;  %v10625_v48 = vpack.c.bf16 %v8961_v33, %v8960_v45  ;;  %v9015_v45 = vld [vmem:[%s17367_s6 + $0x70] sm:$0xff]  ;;  %v9017_v33 = vld [vmem:[%s17367_s6 + $0x80] sm:$0xff] }
 0x435   :  { %10551 = vmatpush1.bf16.msra.mxu0 %v10550_v44  ;;  %v1282_v44 = vsel %vm205_vm2, %v1280_v41, %v1281_v42  ;;  %v10714_v41 = vpack.c.bf16 %v9018_v39, %v9016_v38  ;;  %v169_v42 = vpop.permute.xlu1 %168 }
 0x436   :  { %10552 = vmatprep.subr.bf16.mxu0 %v13148_v63  ;;  %179 = vst.msk [vmem:[#allocation2 + $0x19] sm:$0xff] %vm176_vm3, %v169_v42 }
 0x439   :  { %10554 = vmatpush1.bf16.msra.mxu0 %v10553_v47 }
 0x43a   :  { %10555 = vmatprep.subr.bf16.mxu0 %v13148_v63 }
 0x43d   :  { %10557 = vmatpush1.bf16.msra.mxu0 %v10556_v50 }
 0x43e   :  { %10558 = vmatprep.subr.bf16.mxu0 %v13148_v63 }
 0x441   :  { %10560 = vmatpush1.bf16.msra.mxu0 %v10559_v53  ;;  %v10628_v53 = vpack.c.bf16 %v8963_v52, %v8962_v51  ;;  %v10716_v51 = vpack.c.bf16 %v9017_v33, %v9015_v45 }
 0x442   :  { %10561 = vmatprep.subr.bf16.mxu0 %v13148_v63 }
 0x445   :  { %10563 = vmatpush1.bf16.msra.mxu0 %v10562_v56  ;;  %v10631_v56 = vpack.c.bf16 %v8965_v55, %v8964_v54  ;;  %v9021_v54 = vld [vmem:[%s17367_s6 + $0xa0] sm:$0xff]  ;;  %v9024_v55 = vld [vmem:[%s17367_s6 + $0xb8] sm:$0xff] }
 0x446   :  { %10564 = vmatprep.subr.bf16.mxu0 %v13148_v63 }
 0x449   :  { %10566 = vmatpush1.bf16.msra.mxu0 %v10565_v59  ;;  %v10634_v59 = vpack.c.bf16 %v8967_v58, %v8966_v57 }
 0x44a   :  { %10567 = vmatprep.subr.bf16.mxu0 %v13148_v63 }
 0x44d   :  { %10569 = vmatpush1.bf16.msra.mxu0 %v10568_v1  ;;  %v8970_v1 = vld [vmem:[%s17330_s11 + $0xd0] sm:$0xff] }
 0x44e   :  { %10570 = vmatprep.subr.bf16.mxu0 %v13148_v63  ;;  %v10640_v3 = vpack.c.bf16 %v8971_v2, %v8970_v1 }
 0x450   :  { %1253 = vmatmul.mubr.f32.vlgmr.msra.gmra.mrb[12].mxu0 %v1181_v14  ;;  %v159_v14 = vld [vmem:[%s17366_s29 + $0x18] sm:$0xff]  ;;  %s17373_s29 = sld [smem:[#allocation22_spill]] }
 0x451   :  { %10572 = vmatpush1.bf16.msra.mxu0 %v10571_v11  ;;  %8959 = vmatprep.mubr.msk.f32.mxu0 %vm144_vm7, %v1285_v15  ;;  %v8975_v11 = vld [vmem:[%s17330_s11 + $0xf8] sm:$0xff]  ;;  %v2135_v15 = vld [vmem:[%s17367_s6 + $0x8] sm:$0xff] }
 0x452   :  { %10573 = vmatprep.subr.bf16.mxu0 %v13148_v63  ;;  %v10646_v12 = vpack.c.bf16 %v8975_v11, %v8974_v10  ;;  %170 = vrot.lane.b32.xlu0 %v159_v14, %s13147_s30  ;;  %v9035_v10 = vld [vmem:[%s17367_s6 + $0xf0] sm:$0xff] }
 0x453   :  { %v9027_v14 = vld [vmem:[%s17367_s6 + $0xd0] sm:$0x3f] }
 0x455   :  { %10575 = vmatpush1.bf16.msra.mxu0 %v10574_v16  ;;  %v2137_v16 = vld [vmem:[%s17367_s6 + $0x18] sm:$0xff] }
 0x456   :  { %10576 = vmatprep.subr.bf16.mxu0 %v13148_v63  ;;  %v1836_v38 = vld [vmem:[%s17373_s29 + $0x8] sm:$0xff]  ;;  %v1837_v39 = vld [vmem:[%s17373_s29 + $0x10] sm:$0xff] }
 0x457   :  { %v1840_v45 = vld [vmem:[%s17373_s29 + $0x28] sm:$0xff] }
 0x459   :  { %10578 = vmatpush1.bf16.msra.mxu0 %v10577_v19  ;;  %v10702_v19 = vpack.c.bf16 %v2137_v16, %v2135_v15  ;;  %v10726_v15 = vpack.c.bf16 %v9036_v8, %v9034_v6  ;;  %v9067_v8 = vld [vmem:[%s17368_s8 + $0x180] sm:$0xff] }
 0x45a   :  { %10579 = vmatprep.subr.bf16.mxu0 %v13148_v63 }
 0x45d   :  { %10581 = vmatpush1.bf16.msra.mxu0 %v10580_v22 }
 0x45e   :  { %10582 = vmatprep.subr.bf16.mxu0 %v13148_v63 }
 0x461   :  { %10584 = vmatpush1.bf16.msra.mxu0 %v10583_v25  ;;  %v8977_v25 = vld [vmem:[%s17329_s10 + $0x4] sm:$0xf] }
 0x462   :  { %10585 = vmatprep.subr.bf16.mxu0 %v13148_v63 }
 0x465   :  { %10587 = vmatpush1.bf16.msra.mxu0 %v10586_v28  ;;  %v2138_v28 = vld [vmem:[%s17367_s6 + $0x20] sm:$0xff] }
 0x466   :  { %10588 = vmatprep.subr.bf16.mxu0 %v13148_v63  ;;  %v10708_v31 = vpack.c.bf16 %v2140_v0, %v2138_v28  ;;  %v9043_v28 = vld [vmem:[%s17367_s6 + $0x130] sm:$0xff] }
 0x469   :  { %10590 = vmatpush1.bf16.msra.mxu0 %v10589_v30  ;;  %v2145_v30 = vld [vmem:[%s17367_s6 + $0x58] sm:$0xff] }
 0x46a   :  { %10591 = vmatprep.subr.bf16.mxu0 %v13148_v63  ;;  %v10710_v32 = vpack.c.bf16 %v2145_v30, %v2143_v29 }
 0x46d   :  { %10593 = vmatpush1.bf16.msra.mxu0 %v10592_v34  ;;  %v2142_v34 = vld [vmem:[%s17367_s6 + $0x40] sm:$0xff] }
 0x46e   :  { %10594 = vmatprep.subr.bf16.mxu0 %v13148_v63  ;;  %v10712_v36 = vpack.c.bf16 %v2144_v35, %v2142_v34 }
 0x471   :  { %10596 = vmatpush1.bf16.msra.mxu0 %v10595_v37  ;;  %v2147_v37 = vld [vmem:[%s17367_s6 + $0x68] sm:$0x3f] }
 0x472   :  { %10597 = vmatprep.subr.bf16.mxu0 %v13148_v63 }
 0x475   :  { %10599 = vmatpush1.bf16.msra.mxu0 %v10598_v40  ;;  %v2146_v40 = vld [vmem:[%s17367_s6 + $0x60] sm:$0x3f] }
 0x476   :  { %10098 = vmatprep.subr.mxu0 %v14044_v43 }
 0x478   :  { %1354 = vmatmul.mubr.f32.vlgmr.msra.gmra.mrb[12].mxu0 %v1282_v44 }
 0x479   :  { %10100 = vmatprep.mubr.msk.f32.mxu0 %vm13149_vm5, %v14044_v43 }
 0x4c4   :  { %v171_v44 = vpop.permute.xlu0 %170 }
 0x4c5   :  { %180 = vst.msk [vmem:[#allocation2 + $0x21] sm:$0xff] %vm176_vm3, %v171_v44  ;;  %v1839_v44 = vld [vmem:[%s17373_s29 + $0x20] sm:$0xff]  ;;  %vm2118_vm3 = vcmask 1040896  }
 0x4c6   :  { %v10655_v33 = vpack.c.bf16 %v1840_v45, %v1839_v44  ;;  %v9079_v45 = vld [vmem:[%s17368_s8 + $0x1e0] sm:$0xff] }
 0x4cc   :  { %v14219_v58 = vld [vmem:[#allocation2 + $0x20] sm:$0xff]  ;;  %v2132_v11 = vld [vmem:[#allocation2 + $0x28] sm:$0x3] }
 0x4cd   :  { %v2268_v2 = vrot.slane %v14219_v58, 1  ;;  %v2378_v30 = vrot.slane %v14219_v58, 2  ;;  %v2380_v35 = vrot.slane %v2132_v11, 2 }
 0x54b   :  { %v1355_v47 = vpop.f32.mrb[12].mxu0 }
 0x54c   :  { %v12930_v49 = vadd.f32 %v8917_v46, %v1355_v47  ;;  %v1357_v50 = vpop.f32.mrb[13].mxu0  ;;  %v9020_v46 = vld [vmem:[%s17367_s6 + $0x98] sm:$0xff]  ;;  %v9022_v47 = vld [vmem:[%s17367_s6 + $0xa8] sm:$0xff] }
 0x54d   :  { %v14197_v50 = vld [vmem:[#allocation2 + $0x18] sm:$0xff]  ;;  %v10718_v52 = vpack.c.bf16 %v9022_v47, %v9020_v46  ;;  %v1841_v46 = vld [vmem:[%s17373_s29 + $0x30] sm:$0xff] }
 0x54e   :  { %10061 = vmatmul.mubr.f32.vlgmr.msra.gmra.mrb[8].mxu1 %v12930_v49  ;;  %v2267_v1 = vrot.slane %v14197_v50, 1  ;;  %v2377_v29 = vrot.slane %v14197_v50, 2  ;;  %v1842_v47 = vld [vmem:[%s17373_s29 + $0x38] sm:$0xff] }
 0x54f   :  { %10626 = vmatpush3.bf16.msra.mxu1 %v10625_v48  ;;  %10095 = vmatprep.mubr.msk.f32.mxu1 %vm13149_vm5, %v14044_v43 }
 0x550   :  { %10627 = vmatprep.subr.bf16.mxu1 %v13148_v63  ;;  %v2269_v16 = vsel %vm320_vm4, %v2267_v1, %v2268_v2  ;;  %v2379_v34 = vsel %vm205_vm2, %v2377_v29, %v2378_v30  ;;  %v9058_v29 = vld [vmem:[%s17368_s8 + $0x138] sm:$0xff] }
 0x553   :  { %10629 = vmatpush3.bf16.msra.mxu1 %v10628_v53  ;;  %v9019_v53 = vld [vmem:[%s17367_s6 + $0x90] sm:$0xff] }
 0x554   :  { %10630 = vmatprep.subr.bf16.mxu1 %v13148_v63  ;;  %v10720_v57 = vpack.c.bf16 %v9021_v54, %v9019_v53  ;;  %v1843_v54 = vld [vmem:[%s17373_s29 + $0x40] sm:$0xff] }
 0x557   :  { %10632 = vmatpush3.bf16.msra.mxu1 %v10631_v56  ;;  %v9026_v56 = vld [vmem:[%s17367_s6 + $0xc8] sm:$0xff] }
 0x558   :  { %10633 = vmatprep.subr.bf16.mxu1 %v13148_v63 }
 0x55b   :  { %10635 = vmatpush3.bf16.msra.mxu1 %v10634_v59  ;;  %v10722_v59 = vpack.c.bf16 %v9026_v56, %v9024_v55  ;;  %v1844_v55 = vld [vmem:[%s17373_s29 + $0x48] sm:$0xff] }
 0x55c   :  { %10636 = vmatprep.subr.bf16.mxu1 %v13148_v63  ;;  %v10661_v56 = vpack.c.bf16 %v1844_v55, %v1843_v54  ;;  %v9065_v54 = vld [vmem:[%s17368_s8 + $0x170] sm:$0xff]  ;;  %v9066_v55 = vld [vmem:[%s17368_s8 + $0x178] sm:$0xff] }
 0x55f   :  { %10638 = vmatpush3.bf16.msra.mxu1 %v10637_v62  ;;  %v10724_v62 = vpack.c.bf16 %v9025_v61, %v9023_v60 }
 0x560   :  { %10639 = vmatprep.subr.bf16.mxu1 %v13148_v63 }
 0x563   :  { %10641 = vmatpush3.bf16.msra.mxu1 %v10640_v3  ;;  %v9028_v3 = vld [vmem:[%s17367_s6 + $0xd8] sm:$0x3f] }
 0x564   :  { %10642 = vmatprep.subr.bf16.mxu1 %v13148_v63 }
 0x567   :  { %10644 = vmatpush3.bf16.msra.mxu1 %v10643_v9  ;;  %v9033_v9 = vld [vmem:[%s17367_s6 + $0xe0] sm:$0xff] }
 0x568   :  { %10645 = vmatprep.subr.bf16.mxu1 %v13148_v63 }
 0x56b   :  { %10647 = vmatpush3.bf16.msra.mxu1 %v10646_v12  ;;  %v9038_v12 = vld [vmem:[%s17367_s6 + $0x108] sm:$0xff] }
 0x56c   :  { %10108 = vmatprep.subr.mxu1 %v14044_v43 }
 0x56e   :  { %10096 = vmatmul.mubr.f32.vlgmr.msra.gmra.mrb[10].mxu1 %v12930_v49 }
 0x56f   :  { %10110 = vmatprep.mubr.msk.f32.mxu1 %vm13149_vm5, %v14044_v43 }
 0x621   :  { %v1442_v18 = vpop.f32.mrb[8].mxu1 }
 0x622   :  { %v10062_v22 = vpop.f32.mrb[9].mxu1  ;;  %10099 = vmatpush3.msra.mxu0 %v1442_v18 }
 0x623   :  { %10103 = vmatprep.subr.mxu0 %v14044_v43  ;;  %10101 = vmatmul.mubr.msk.f32.vlgmr.msra.gmra.mrb[14].mxu0 %vm1534_vm13, %v1533_v17  ;;  %v9042_v22 = vld [vmem:[%s17367_s6 + $0x128] sm:$0xff] }
 0x624   :  { %10104 = vmatpush3.msra.mxu0 %v1442_v18  ;;  %10105 = vmatprep.mubr.msk.f32.mxu0 %vm13149_vm5, %v14044_v43  ;;  %v2270_v18 = vrot.slane %v2132_v11, 1  ;;  %v9051_v11 = vld [vmem:[%s17368_s8 + $0x100] sm:$0xff] }
 0x625   :  { %10703 = vmatprep.subr.bf16.mxu0 %v10702_v19  ;;  %v10730_v19 = vpack.c.bf16 %v9040_v13, %v9038_v12  ;;  %v9052_v12 = vld [vmem:[%s17368_s8 + $0x108] sm:$0xff] }
 0x626   :  { %v10772_v13 = vpack.c.bf16 %v9052_v12, %v9051_v11  ;;  %v8985_v12 = vld [vmem:[%s17373_s29 + $0x70] sm:$0xff] }
 0x627   :  { %10106 = vmatmul.mubr.msk.f32.vlgmr.msra.gmra.mrb[16].mxu0 %vm1534_vm13, %v8977_v25 }
 0x628   :  { %10705 = vmatpush1.bf16.msra.mxu0 %v10704_v26  ;;  %2224 = vmatprep.mubr.f32.mxu0 %v14044_v43  ;;  %v10734_v26 = vpack.c.bf16 %v9044_v23, %v9042_v22  ;;  %v10778_v22 = vpack.c.bf16 %v9072_v21, %v9071_v20  ;;  %v9055_v23 = vld [vmem:[%s17368_s8 + $0x120] sm:$0xff]  ;;  %v8990_v20 = vld [vmem:[%s17373_s29 + $0x98] sm:$0xff] }
 0x629   :  { %10707 = vmatprep.subr.bf16.mxu0 %v10706_v27  ;;  %v9041_v27 = vld [vmem:[%s17367_s6 + $0x120] sm:$0xff] }
 0x62a   :  { %v10736_v0 = vpack.c.bf16 %v9043_v28, %v9041_v27  ;;  %v9074_v27 = vld [vmem:[%s17368_s8 + $0x1b8] sm:$0xff] }
 0x62c   :  { %10709 = vmatpush1.bf16.msra.mxu0 %v10708_v31  ;;  %v9046_v31 = vld [vmem:[%s17367_s6 + $0x148] sm:$0x3f] }
 0x62d   :  { %10711 = vmatprep.subr.bf16.mxu0 %v10710_v32  ;;  %v9045_v32 = vld [vmem:[%s17367_s6 + $0x140] sm:$0x3f]  ;;  %s17374_s6 = sld [smem:[#allocation23_spill]] }
 0x630   :  { %10713 = vmatpush1.bf16.msra.mxu0 %v10712_v36  ;;  %v2381_v36 = vsel %vm205_vm2, %v2378_v30, %v2380_v35  ;;  %v9059_v35 = vld [vmem:[%s17368_s8 + $0x140] sm:$0xff] }
 0x631   :  { %9011 = vmatprep.subr.msk.mxu0 %vm205_vm2, %v2147_v37  ;;  %v1835_v37 = vld [vmem:[%s17373_s29] sm:$0xff] }
 0x634   :  { %9012 = vmatpush1.msk.msra.mxu0 %vm205_vm2, %v2146_v40  ;;  %v10649_v40 = vpack.c.bf16 %v1836_v38, %v1835_v37  ;;  %v9077_v38 = vld [vmem:[%s17368_s8 + $0x1d0] sm:$0xff] }
 0x635   :  { %10715 = vmatprep.subr.bf16.mxu0 %v10714_v41  ;;  %9013 = vmatmul.mubr.msk.f32.vlgmr.msra.gmra.mrb[18].mxu0 %vm135_vm0, %v14197_v50  ;;  %v1838_v41 = vld [vmem:[%s17373_s29 + $0x18] sm:$0xff] }
 0x636   :  { %10717 = vmatpush1.bf16.msra.mxu0 %v10716_v51  ;;  %2230 = vmatprep.mubr.f32.mxu0 %v14044_v43  ;;  %v10652_v42 = vpack.c.bf16 %v1838_v41, %v1837_v39  ;;  %v9078_v39 = vld [vmem:[%s17368_s8 + $0x1d8] sm:$0xff]  ;;  %v9061_v41 = vld [vmem:[%s17368_s8 + $0x150] sm:$0xff] }
 0x637   :  { %10719 = vmatprep.subr.bf16.mxu0 %v10718_v52 }
 0x639   :  { %9014 = vmatmul.mubr.msk.f32.gmra.mrb[20].mxu0 %vm135_vm0, %v14219_v58  ;;  %v1846_v58 = vld [vmem:[%s17373_s29 + $0x58] sm:$0xff] }
 0x63a   :  { %10721 = vmatpush1.bf16.msra.mxu0 %v10720_v57  ;;  %2346 = vmatprep.mubr.f32.mxu0 %v14044_v43  ;;  %v1845_v57 = vld [vmem:[%s17373_s29 + $0x50] sm:$0xff] }
 0x63b   :  { %10723 = vmatprep.subr.bf16.mxu0 %v10722_v59  ;;  %v10664_v59 = vpack.c.bf16 %v1846_v58, %v1845_v57 }
 0x63e   :  { %10725 = vmatpush1.bf16.msra.mxu0 %v10724_v62 }
 0x63f   :  { %9029 = vmatprep.subr.msk.mxu0 %vm205_vm2, %v9028_v3 }
 0x641   :  { %v1529_v48 = vpop.f32.mrb[10].mxu1 }
 0x642   :  { %v10097_v49 = vpop.f32.mrb[11].mxu1  ;;  %10109 = vmatpush3.msra.mxu1 %v1529_v48  ;;  %9030 = vmatpush1.msk.msra.mxu0 %vm205_vm2, %v9027_v14  ;;  %v9069_v14 = vld [vmem:[%s17368_s8 + $0x190] sm:$0xff] }
 0x643   :  { %10111 = vmatmul.mubr.msk.f32.vlgmr.msra.gmra.mrb[12].mxu1 %vm1534_vm13, %v1533_v17  ;;  %10113 = vmatprep.subr.mxu1 %v14044_v43  ;;  %v10728_v17 = vpack.c.bf16 %v9035_v10, %v9033_v9  ;;  %v9068_v9 = vld [vmem:[%s17368_s8 + $0x188] sm:$0xff] }
 0x644   :  { %10114 = vmatpush3.msra.mxu1 %v1529_v48  ;;  %10115 = vmatprep.mubr.msk.f32.mxu1 %vm13149_vm5, %v14044_v43  ;;  %v10658_v48 = vpack.c.bf16 %v1842_v47, %v1841_v46  ;;  %v10770_v10 = vpack.c.bf16 %v9068_v9, %v9067_v8  ;;  %v9063_v47 = vld [vmem:[%s17368_s8 + $0x160] sm:$0xff] }
 0x645   :  { %10648 = vmatprep.subr.bf16.mxu1 %v13148_v63  ;;  %10727 = vmatprep.subr.bf16.mxu0 %v10726_v15  ;;  %v9070_v15 = vld [vmem:[%s17368_s8 + $0x198] sm:$0xff]  ;;  %v8983_v9 = vld [vmem:[%s17373_s29 + $0x60] sm:$0xff] }
 0x646   :  { %9031 = vmatmul.mubr.msk.f32.vlgmr.msra.gmra.mrb[18].mxu0 %vm135_vm0, %v2269_v16  ;;  %v10774_v16 = vpack.c.bf16 %v9070_v15, %v9069_v14 }
 0x647   :  { %10116 = vmatmul.mubr.msk.f32.vlgmr.msra.gmra.mrb[14].mxu1 %vm1534_vm13, %v8977_v25  ;;  %10729 = vmatpush1.bf16.msra.mxu0 %v10728_v17  ;;  %v2271_v25 = vsel %vm320_vm4, %v2268_v2, %v2270_v18  ;;  %v9053_v17 = vld [vmem:[%s17368_s8 + $0x110] sm:$0xff]  ;;  %v9054_v18 = vld [vmem:[%s17368_s8 + $0x118] sm:$0xff] }
 0x648   :  { %10142 = vmatprep.mubr.msk.f32.mxu1 %vm13149_vm5, %v14044_v43  ;;  %2352 = vmatprep.mubr.f32.mxu0 %v14044_v43 }
 0x649   :  { %10731 = vmatprep.subr.bf16.mxu0 %v10730_v19  ;;  %10650 = vmatpush3.bf16.msra.mxu1 %v10649_v40  ;;  %v10776_v19 = vpack.c.bf16 %v9054_v18, %v9053_v17  ;;  %v10790_v40 = vpack.c.bf16 %v9078_v39, %v9077_v38  ;;  %v8988_v17 = vld [vmem:[%s17373_s29 + $0x88] sm:$0xff]  ;;  %v9002_v38 = vld [vmem:[%s17373_s29 + $0xf0] sm:$0xff]  ;;  %v9003_v39 = vld [vmem:[%s17373_s29 + $0xf8] sm:$0xff] }
 0x64a   :  { %9032 = vmatmul.mubr.msk.f32.gmra.mrb[20].mxu0 %vm135_vm0, %v2271_v25  ;;  %10651 = vmatprep.subr.bf16.mxu1 %v13148_v63 }
 0x64b   :  { %10733 = vmatpush1.bf16.msra.mxu0 %v10732_v24  ;;  %2456 = vmatprep.mubr.f32.mxu0 %v14044_v43  ;;  %v9056_v24 = vld [vmem:[%s17368_s8 + $0x128] sm:$0xff] }
 0x64c   :  { %10735 = vmatprep.subr.bf16.mxu0 %v10734_v26  ;;  %v10780_v25 = vpack.c.bf16 %v9056_v24, %v9055_v23  ;;  %v9073_v26 = vld [vmem:[%s17368_s8 + $0x1b0] sm:$0xff]  ;;  %v8992_v23 = vld [vmem:[%s17373_s29 + $0xa8] sm:$0xff] }
 0x64d   :  { %10653 = vmatpush3.bf16.msra.mxu1 %v10652_v42  ;;  %v10782_v28 = vpack.c.bf16 %v9074_v27, %v9073_v26  ;;  %v9062_v42 = vld [vmem:[%s17368_s8 + $0x158] sm:$0xff] }
 0x64e   :  { %10654 = vmatprep.subr.bf16.mxu1 %v13148_v63  ;;  %v10792_v44 = vpack.c.bf16 %v9062_v42, %v9061_v41  ;;  %v8994_v26 = vld [vmem:[%s17373_s29 + $0xb8] sm:$0xff]  ;;  %v9004_v41 = vld [vmem:[%s17373_s29 + $0x100] sm:$0xff]  ;;  %v9005_v42 = vld [vmem:[%s17373_s29 + $0x108] sm:$0xff] }
 0x64f   :  { %10737 = vmatpush1.bf16.msra.mxu0 %v10736_v0  ;;  %v9057_v0 = vld [vmem:[%s17368_s8 + $0x130] sm:$0xff] }
 0x650   :  { %9047 = vmatprep.subr.msk.mxu0 %vm205_vm2, %v9046_v31  ;;  %v10784_v30 = vpack.c.bf16 %v9058_v29, %v9057_v0  ;;  %v9075_v31 = vld [vmem:[%s17368_s8 + $0x1c0] sm:$0xff]  ;;  %v8997_v0 = vld [vmem:[%s17373_s29 + $0xc8] sm:$0xff] }
 0x651   :  { %10656 = vmatpush3.bf16.msra.mxu1 %v10655_v33  ;;  %v9080_v33 = vld [vmem:[%s17368_s8 + $0x1e8] sm:$0xff] }
 0x652   :  { %10657 = vmatprep.subr.bf16.mxu1 %v13148_v63  ;;  %v10794_v46 = vpack.c.bf16 %v9080_v33, %v9079_v45  ;;  %v9006_v45 = vld [vmem:[%s17373_s29 + $0x110] sm:$0xff]  ;;  %v9007_v33 = vld [vmem:[%s17373_s29 + $0x118] sm:$0xff] }
 0x653   :  { %9048 = vmatpush1.msk.msra.mxu0 %vm205_vm2, %v9045_v32  ;;  %v9076_v32 = vld [vmem:[%s17368_s8 + $0x1c8] sm:$0xff] }
 0x654   :  { %9049 = vmatmul.mubr.msk.f32.vlgmr.msra.gmra.mrb[18].mxu0 %vm135_vm0, %v2379_v34  ;;  %10771 = vmatprep.subr.bf16.mxu0 %v10770_v10  ;;  %v10786_v34 = vpack.c.bf16 %v9076_v32, %v9075_v31  ;;  %v8984_v10 = vld [vmem:[%s17373_s29 + $0x68] sm:$0xff]  ;;  %v8998_v31 = vld [vmem:[%s17373_s29 + $0xd0] sm:$0xff]  ;;  %v8999_v32 = vld [vmem:[%s17373_s29 + $0xd8] sm:$0xff] }
 0x655   :  { %2462 = vmatprep.mubr.f32.mxu0 %v14044_v43  ;;  %10659 = vmatpush3.bf16.msra.mxu1 %v10658_v48  ;;  %v9064_v48 = vld [vmem:[%s17368_s8 + $0x168] sm:$0xff]  ;;  %v10667_v11 = vpack.c.bf16 %v8984_v10, %v8983_v9  ;;  %v2495_v10 = vld [vmem:[%s17368_s8 + $0xb0] sm:$0xff] }
 0x656   :  { %10660 = vmatprep.subr.bf16.mxu1 %v13148_v63  ;;  %10773 = vmatpush3.bf16.msra.mxu0 %v10772_v13  ;;  %v8986_v13 = vld [vmem:[%s17373_s29 + $0x78] sm:$0xff]  ;;  %v2478_v9 = vld [vmem:[%s17368_s8 + $0x28] sm:$0xff] }
 0x657   :  { %10775 = vmatprep.subr.bf16.mxu0 %v10774_v16  ;;  %v10670_v15 = vpack.c.bf16 %v8986_v13, %v8985_v12  ;;  %v8987_v16 = vld [vmem:[%s17373_s29 + $0x80] sm:$0xff]  ;;  %v2479_v13 = vld [vmem:[%s17368_s8 + $0x30] sm:$0xff] }
 0x658   :  { %9050 = vmatmul.mubr.msk.f32.gmra.mrb[20].mxu0 %vm135_vm0, %v2381_v36  ;;  %v9060_v36 = vld [vmem:[%s17368_s8 + $0x148] sm:$0xff]  ;;  %vm1847_vm0 = vcmask 785408   ;;  %v10673_v18 = vpack.c.bf16 %v8988_v17, %v8987_v16 }
 0x659   :  { %10662 = vmatpush3.bf16.msra.mxu1 %v10661_v56  ;;  %v10788_v37 = vpack.c.bf16 %v9060_v36, %v9059_v35  ;;  %v9000_v35 = vld [vmem:[%s17373_s29 + $0xe0] sm:$0xff]  ;;  %v9001_v36 = vld [vmem:[%s17373_s29 + $0xe8] sm:$0xff] }
 0x65a   :  { %10663 = vmatprep.subr.bf16.mxu1 %v13148_v63  ;;  %10777 = vmatpush3.bf16.msra.mxu0 %v10776_v19  ;;  %v8989_v19 = vld [vmem:[%s17373_s29 + $0x90] sm:$0xff]  ;;  %v2498_v16 = vld [vmem:[%s17368_s8 + $0xc8] sm:$0xff] }
 0x65b   :  { %10779 = vmatprep.subr.bf16.mxu0 %v10778_v22  ;;  %v10676_v21 = vpack.c.bf16 %v8990_v20, %v8989_v19  ;;  %v8991_v22 = vld [vmem:[%s17373_s29 + $0xa0] sm:$0xff]  ;;  %v2482_v20 = vld [vmem:[%s17368_s8 + $0x48] sm:$0xff] }
 0x65c   :  { %v10679_v24 = vpack.c.bf16 %v8992_v23, %v8991_v22  ;;  %v2481_v19 = vld [vmem:[%s17368_s8 + $0x40] sm:$0xff]  ;;  %v2500_v22 = vld [vmem:[%s17368_s8 + $0xd8] sm:$0xff] }
 0x65d   :  { %10665 = vmatpush3.bf16.msra.mxu1 %v10664_v59  ;;  %v10800_v59 = vpack.c.bf16 %v9066_v55, %v9065_v54  ;;  %v10756_v23 = vpack.c.bf16 %v2482_v20, %v2481_v19  ;;  %v3000_v19 = vld [vmem:[%s17371_s26 + $0x30] sm:$0xff]  ;;  %v3001_v20 = vld [vmem:[%s17371_s26 + $0x38] sm:$0xff] }
 0x65e   :  { %10666 = vmatprep.subr.bf16.mxu1 %v13148_v63  ;;  %10781 = vmatpush3.bf16.msra.mxu0 %v10780_v25  ;;  %v8993_v25 = vld [vmem:[%s17373_s29 + $0xb0] sm:$0xff] }
 0x65f   :  { %10783 = vmatprep.subr.bf16.mxu0 %v10782_v28  ;;  %v10682_v27 = vpack.c.bf16 %v8994_v26, %v8993_v25  ;;  %v8996_v28 = vld [vmem:[%s17373_s29 + $0xc0] sm:$0xff]  ;;  %v2483_v25 = vld [vmem:[%s17368_s8 + $0x50] sm:$0xff]  ;;  %v2484_v26 = vld [vmem:[%s17368_s8 + $0x58] sm:$0xff] }
 0x660   :  { %v10685_v29 = vpack.c.bf16 %v8997_v0, %v8996_v28  ;;  %v2502_v28 = vld [vmem:[%s17368_s8 + $0xe8] sm:$0xff]  ;;  %v10760_v0 = vpack.c.bf16 %v2484_v26, %v2483_v25  ;;  %v3004_v25 = vld [vmem:[%s17371_s26 + $0x50] sm:$0xff]  ;;  %v3005_v26 = vld [vmem:[%s17371_s26 + $0x58] sm:$0xff] }
 0x662   :  { %10785 = vmatpush3.bf16.msra.mxu0 %v10784_v30 }
 0x663   :  { %10787 = vmatprep.subr.bf16.mxu0 %v10786_v34  ;;  %v10688_v34 = vpack.c.bf16 %v8999_v32, %v8998_v31  ;;  %v2486_v31 = vld [vmem:[%s17368_s8 + $0x68] sm:$0xff]  ;;  %v2503_v32 = vld [vmem:[%s17368_s8 + $0xf0] sm:$0xff] }
 0x666   :  { %10789 = vmatpush3.bf16.msra.mxu0 %v10788_v37  ;;  %v10691_v37 = vpack.c.bf16 %v9001_v36, %v9000_v35 }
 0x667   :  { %10791 = vmatprep.subr.bf16.mxu0 %v10790_v40  ;;  %v10694_v40 = vpack.c.bf16 %v9003_v39, %v9002_v38  ;;  %v2488_v38 = vld [vmem:[%s17368_s8 + $0x78] sm:$0xff] }
 0x66a   :  { %10793 = vmatpush3.bf16.msra.mxu0 %v10792_v44  ;;  %v10697_v44 = vpack.c.bf16 %v9005_v42, %v9004_v41 }
 0x66b   :  { %10795 = vmatprep.subr.bf16.mxu0 %v10794_v46  ;;  %v2489_v46 = vld [vmem:[%s17368_s8 + $0x80] sm:$0xff] }
 0x6f6   :  { %v1604_v49 = vpop.f32.mrb[14].mxu0 }
 0x6f7   :  { %v10102_v50 = vpop.f32.mrb[15].mxu0 }
 0x6f8   :  { %v9081_v50 = vld [vmem:[%s17368_s8 + $0x1f0] sm:$0xff] }
 0x6fa   :  { %v1679_v51 = vpop.f32.mrb[16].mxu0 }
 0x6fb   :  { %v1683_v52 = vmax.f32 %v1604_v49, %v1679_v51  ;;  %v10107_v53 = vpop.f32.mrb[17].mxu0  ;;  %v10796_v49 = vpack.c.bf16 %v9064_v48, %v9063_v47  ;;  %v9082_v51 = vld [vmem:[%s17368_s8 + $0x1f8] sm:$0xff]  ;;  %v2490_v47 = vld [vmem:[%s17368_s8 + $0x88] sm:$0xff]  ;;  %v10700_v48 = vpack.c.bf16 %v9007_v33, %v9006_v45 }
 0x6fc   :  { %v10798_v53 = vpack.c.bf16 %v9082_v51, %v9081_v50  ;;  %v2473_v50 = vld [vmem:[%s17368_s8] sm:$0xff]  ;;  %v2474_v51 = vld [vmem:[%s17368_s8 + $0x8] sm:$0xff] }
 0x6fd   :  { %10797 = vmatpush3.bf16.msra.mxu0 %v10796_v49  ;;  %v10738_v49 = vpack.c.bf16 %v2490_v47, %v2489_v46  ;;  %v10740_v54 = vpack.c.bf16 %v2474_v51, %v2473_v50 }
 0x6fe   :  { %10799 = vmatprep.subr.bf16.mxu0 %v10798_v53  ;;  %v2492_v53 = vld [vmem:[%s17368_s8 + $0x98] sm:$0xff] }
 0x701   :  { %10801 = vmatpush3.bf16.msra.mxu0 %v10800_v59  ;;  %v2493_v59 = vld [vmem:[%s17368_s8 + $0xa0] sm:$0xff] }
 0x702   :  { %10808 = vmatprep.subr.bf16.mxu0 %v13148_v63 }
 0x716   :  { %v1750_v60 = vpop.f32.mrb[12].mxu1 }
 0x717   :  { %v10112_v61 = vpop.f32.mrb[13].mxu1 }
 0x71a   :  { %v1820_v62 = vpop.f32.mrb[14].mxu1 }
 0x71b   :  { %v1824_v1 = vmax.f32 %v1750_v60, %v1820_v62  ;;  %v10117_v2 = vpop.f32.mrb[15].mxu1 }
 0x71d   :  { %v1825_v3 = vmax.f32 %v1683_v52, %v1824_v1  ;;  %v2133_v52 = vld [vmem:[%s17369_s21] sm:$0x3] }
 0x71e   :  { %v2241_v56 = vrot.slane %v2133_v52, %v13620_v7  ;;  %v2245_v58 = vrot.slane %v2133_v52, %v13614_v5  ;;  %v2491_v52 = vld [vmem:[%s17368_s8 + $0x90] sm:$0xff] }
 0x71f   :  { %v1826_v6 = vmax.f32 %v1825_v3, 0.0 }
 0x721   :  { %1828 = vrot.lane.b32.xlu1 %v1826_v6, %s13138_s28 }
 0x727   :  { %v2458_v57 = vpop.f32.mrb[18].mxu0 }
 0x728   :  { %v2460_v60 = vpop.f32.mrb[19].mxu0  ;;  %v14446_v61 = vadd.f32 %v2458_v57, %v2241_v56  ;;  %v2475_v57 = vld [vmem:[%s17368_s8 + $0x10] sm:$0xff] }
 0x729   :  { %v14448_v62 = vadd.f32 %v2460_v60, %v2245_v58  ;;  %v2494_v60 = vld [vmem:[%s17368_s8 + $0xa8] sm:$0xff] }
 0x72b   :  { %v2464_v1 = vpop.f32.mrb[20].mxu0  ;;  %2676 = vmatprep.mubr.f32.mxu0 %v14448_v62 }
 0x72c   :  { %v14452_v2 = vadd.f32 %v2464_v1, %v2241_v56  ;;  %v2466_v3 = vpop.f32.mrb[21].mxu0  ;;  %2677 = vmatmul.mubr.f32.vlgmr.msra.gmra.mrb[22].mxu0 %v14446_v61  ;;  %v10742_v56 = vpack.c.bf16 %v2492_v53, %v2491_v52 }
 0x72d   :  { %v14455_v6 = vadd.f32 %v2466_v3, %v2245_v58  ;;  %v2476_v58 = vld [vmem:[%s17368_s8 + $0x18] sm:$0xff]  ;;  %v10746_v3 = vpack.c.bf16 %v2494_v60, %v2493_v59 }
 0x72e   :  { %v10744_v1 = vpack.c.bf16 %v2476_v58, %v2475_v57 }
 0x72f   :  { %2681 = vmatprep.mubr.f32.mxu0 %v14455_v6 }
 0x730   :  { %2682 = vmatmul.mubr.f32.gmra.mrb[24].mxu0 %v14452_v2 }
 0x731   :  { %10217 = vmatprep.mubr.msk.f32.mxu0 %vm13149_vm5, %v14044_v43 }
 0x793   :  { %v1829_v8 = vpop.permute.xlu1 %1828 }
 0x794   :  { %1832 = vst.msk [vmem:[#allocation4 + $0x1] sm:$0xf] %vm1831_vm15, %v1829_v8  ;;  %v2477_v8 = vld [vmem:[%s17368_s8 + $0x20] sm:$0xff] }
 0x79b   :  { %v14474_v14 = vld [vmem:[#allocation4] sm:$0x3f] }
 0x79c   :  { %10143 = vmatmul.mubr.msk.f32.vlgmr.msra.gmra.mrb[16].mxu1 %vm1847_vm0, %v14474_v14  ;;  %v1941_v30 = vrot.slane %v14474_v14, 1  ;;  %v2028_v55 = vrot.slane %v14474_v14, 2  ;;  %v2480_v14 = vld [vmem:[%s17368_s8 + $0x38] sm:$0xff] }
 0x79d   :  { %10668 = vmatpush3.bf16.msra.mxu1 %v10667_v11  ;;  %10169 = vmatprep.mubr.msk.f32.mxu1 %vm13149_vm5, %v14044_v43  ;;  %v2496_v11 = vld [vmem:[%s17368_s8 + $0xb8] sm:$0xff]  ;;  %v10752_v17 = vpack.c.bf16 %v2480_v14, %v2479_v13 }
 0x79e   :  { %10669 = vmatprep.subr.bf16.mxu1 %v13148_v63  ;;  %v10750_v12 = vpack.c.bf16 %v2496_v11, %v2495_v10  ;;  %v2994_v11 = vld [vmem:[%s17371_s26] sm:$0xff]  ;;  %v2997_v14 = vld [vmem:[%s17371_s26 + $0x18] sm:$0xff] }
 0x7a1   :  { %10671 = vmatpush3.bf16.msra.mxu1 %v10670_v15  ;;  %v2497_v15 = vld [vmem:[%s17368_s8 + $0xc0] sm:$0xff] }
 0x7a2   :  { %10672 = vmatprep.subr.bf16.mxu1 %v13148_v63 }
 0x7a5   :  { %10674 = vmatpush3.bf16.msra.mxu1 %v10673_v18  ;;  %v10754_v18 = vpack.c.bf16 %v2498_v16, %v2497_v15  ;;  %v2998_v16 = vld [vmem:[%s17371_s26 + $0x20] sm:$0xff] }
 0x7a6   :  { %10675 = vmatprep.subr.bf16.mxu1 %v13148_v63 }
 0x7a9   :  { %10677 = vmatpush3.bf16.msra.mxu1 %v10676_v21  ;;  %v2499_v21 = vld [vmem:[%s17368_s8 + $0xd0] sm:$0xff] }
 0x7aa   :  { %10678 = vmatprep.subr.bf16.mxu1 %v13148_v63 }
 0x7ad   :  { %10680 = vmatpush3.bf16.msra.mxu1 %v10679_v24  ;;  %v10758_v24 = vpack.c.bf16 %v2500_v22, %v2499_v21  ;;  %v10824_v21 = vpack.c.bf16 %v3001_v20, %v3000_v19  ;;  %v3002_v22 = vld [vmem:[%s17371_s26 + $0x40] sm:$0xff] }
 0x7ae   :  { %10681 = vmatprep.subr.bf16.mxu1 %v13148_v63 }
 0x7b1   :  { %10683 = vmatpush3.bf16.msra.mxu1 %v10682_v27  ;;  %v2501_v27 = vld [vmem:[%s17368_s8 + $0xe0] sm:$0xff] }
 0x7b2   :  { %10684 = vmatprep.subr.bf16.mxu1 %v13148_v63 }
 0x7b4   :  { %10170 = vmatmul.mubr.msk.f32.vlgmr.msra.gmra.mrb[16].mxu1 %vm1847_vm0, %v1941_v30  ;;  %v2485_v30 = vld [vmem:[%s17368_s8 + $0x60] sm:$0xff] }
 0x7b5   :  { %10686 = vmatpush3.bf16.msra.mxu1 %v10685_v29  ;;  %10196 = vmatprep.mubr.msk.f32.mxu1 %vm13149_vm5, %v14044_v43  ;;  %v10762_v29 = vpack.c.bf16 %v2502_v28, %v2501_v27  ;;  %v10764_v35 = vpack.c.bf16 %v2486_v31, %v2485_v30  ;;  %v10830_v27 = vpack.c.bf16 %v3005_v26, %v3004_v25  ;;  %v3006_v28 = vld [vmem:[%s17371_s26 + $0x60] sm:$0xff]  ;;  %v3008_v30 = vld [vmem:[%s17371_s26 + $0x70] sm:$0xff]  ;;  %v3009_v31 = vld [vmem:[%s17371_s26 + $0x78] sm:$0xff] }
 0x7b6   :  { %10687 = vmatprep.subr.bf16.mxu1 %v13148_v63  ;;  %v9093_v25 = vld [vmem:[%s17371_s26 + $0xb8] sm:$0xff] }
 0x7b9   :  { %10689 = vmatpush3.bf16.msra.mxu1 %v10688_v34  ;;  %v2504_v34 = vld [vmem:[%s17368_s8 + $0xf8] sm:$0xff] }
 0x7ba   :  { %10690 = vmatprep.subr.bf16.mxu1 %v13148_v63  ;;  %v10766_v36 = vpack.c.bf16 %v2504_v34, %v2503_v32  ;;  %v10836_v32 = vpack.c.bf16 %v3009_v31, %v3008_v30 }
 0x7bd   :  { %10692 = vmatpush3.bf16.msra.mxu1 %v10691_v37  ;;  %v2487_v37 = vld [vmem:[%s17368_s8 + $0x70] sm:$0xff] }
 0x7be   :  { %10693 = vmatprep.subr.bf16.mxu1 %v13148_v63  ;;  %v10768_v39 = vpack.c.bf16 %v2488_v38, %v2487_v37  ;;  %v3011_v37 = vld [vmem:[%s17371_s26 + $0x88] sm:$0xff] }
 0x7c1   :  { %10695 = vmatpush3.bf16.msra.mxu1 %v10694_v40 }
 0x7c2   :  { %10696 = vmatprep.subr.bf16.mxu1 %v13148_v63 }
 0x7c5   :  { %10698 = vmatpush3.bf16.msra.mxu1 %v10697_v44 }
 0x7c6   :  { %10699 = vmatprep.subr.bf16.mxu1 %v13148_v63 }
 0x7c9   :  { %10701 = vmatpush3.bf16.msra.mxu1 %v10700_v48  ;;  %v8982_v48 = vld [vmem:[%s17374_s6] ss:$0 sm:$0xff] }
 0x7ca   :  { %10739 = vmatprep.subr.bf16.mxu1 %v10738_v49 }
 0x7cc   :  { %10197 = vmatmul.mubr.msk.f32.vlgmr.msra.gmra.mrb[16].mxu1 %vm1847_vm0, %v2028_v55 }
 0x7cd   :  { %10741 = vmatpush3.bf16.msra.mxu1 %v10740_v54  ;;  %2569 = vmatprep.mubr.f32.mxu1 %v14448_v62  ;;  %v10748_v62 = vpack.c.bf16 %v2478_v9, %v2477_v8  ;;  %v9084_v8 = vld [vmem:[%s17370_s4 + $0x8] sm:$0xff] }
 0x7ce   :  { %10743 = vmatprep.subr.bf16.mxu1 %v10742_v56 }
 0x7d1   :  { %10745 = vmatpush3.bf16.msra.mxu1 %v10744_v1 }
 0x7d2   :  { %10747 = vmatprep.subr.bf16.mxu1 %v10746_v3 }
 0x7d5   :  { %10749 = vmatpush3.bf16.msra.mxu1 %v10748_v62  ;;  %v2995_v62 = vld [vmem:[%s17371_s26 + $0x8] sm:$0xff] }
 0x7d6   :  { %10751 = vmatprep.subr.bf16.mxu1 %v10750_v12  ;;  %v2996_v12 = vld [vmem:[%s17371_s26 + $0x10] sm:$0xff]  ;;  %v10815_v13 = vpack.c.bf16 %v2995_v62, %v2994_v11  ;;  %v3308_v62 = vld [vmem:[%s17330_s11 + $0x58] sm:$0xff] }
 0x7d7   :  { %v10818_v15 = vpack.c.bf16 %v2997_v14, %v2996_v12  ;;  %v3307_v11 = vld [vmem:[%s17330_s11 + $0x50] sm:$0xff]  ;;  %v3310_v14 = vld [vmem:[%s17330_s11 + $0x68] sm:$0xff] }
 0x7d8   :  { %v10920_v12 = vpack.c.bf16 %v3308_v62, %v3307_v11 }
 0x7d9   :  { %10753 = vmatpush3.bf16.msra.mxu1 %v10752_v17  ;;  %v2999_v17 = vld [vmem:[%s17371_s26 + $0x28] sm:$0xff] }
 0x7da   :  { %10755 = vmatprep.subr.bf16.mxu1 %v10754_v18  ;;  %v10821_v18 = vpack.c.bf16 %v2999_v17, %v2998_v16  ;;  %v3311_v16 = vld [vmem:[%s17330_s11 + $0x70] sm:$0xff]  ;;  %v3312_v17 = vld [vmem:[%s17330_s11 + $0x78] sm:$0xff] }
 0x7dd   :  { %10757 = vmatpush3.bf16.msra.mxu1 %v10756_v23  ;;  %v3003_v23 = vld [vmem:[%s17371_s26 + $0x48] sm:$0xff] }
 0x7de   :  { %10759 = vmatprep.subr.bf16.mxu1 %v10758_v24  ;;  %v10827_v24 = vpack.c.bf16 %v3003_v23, %v3002_v22  ;;  %v9091_v22 = vld [vmem:[%s17371_s26 + $0xa8] sm:$0xff] }
 0x7e1   :  { %10761 = vmatpush3.bf16.msra.mxu1 %v10760_v0  ;;  %v3007_v0 = vld [vmem:[%s17371_s26 + $0x68] sm:$0xff] }
 0x7e2   :  { %10763 = vmatprep.subr.bf16.mxu1 %v10762_v29  ;;  %v10833_v29 = vpack.c.bf16 %v3007_v0, %v3006_v28 }
 0x7e5   :  { %10765 = vmatpush3.bf16.msra.mxu1 %v10764_v35 }
 0x7e6   :  { %10767 = vmatprep.subr.bf16.mxu1 %v10766_v36  ;;  %v3010_v36 = vld [vmem:[%s17371_s26 + $0x80] sm:$0xff] }
 0x7e7   :  { %v10839_v38 = vpack.c.bf16 %v3011_v37, %v3010_v36  ;;  %v9096_v36 = vld [vmem:[%s17371_s26 + $0xd0] sm:$0xff]  ;;  %v9097_v37 = vld [vmem:[%s17371_s26 + $0xd8] sm:$0xff] }
 0x7e9   :  { %10769 = vmatpush3.bf16.msra.mxu1 %v10768_v39 }
 0x7ea   :  { %10802 = vmatprep.subr.bf16.mxu1 %v13148_v63 }
 0x7ec   :  { %2570 = vmatmul.mubr.f32.vlgmr.msra.gmra.mrb[18].mxu1 %v14446_v61  ;;  %v2687_v61 = vld [vmem:[%s17370_s4] sm:$0xff] }
 0x7ed   :  { %2574 = vmatprep.mubr.f32.mxu1 %v14455_v6 }
 0x7f0   :  { %2575 = vmatmul.mubr.f32.gmra.mrb[20].mxu1 %v14452_v2  ;;  %v13150_v2 = vmov 1983009808  }
 0x7f1   :  { %10203 = vmatprep.mubr.msk.f32.mxu1 %vm13149_vm5, %v14044_v43  ;;  %v2107_v6 = vunpack.c.l.s4 %v13150_v2 }
 0x7f3   :  { %v2108_v47 = vunpack.c.0.s8 %v2107_v6 }
 0x7f5   :  { %v14669_v51 = vsub.s32 %v2108_v47, %v13611_v4 }
 0x7ff   :  { %v9761_v40 = vpop.f32.mrb[22].mxu0 }
 0x800   :  { %v9762_v41 = vpop.f32.mrb[23].mxu0 }
 0x801   :  { %v9763_v45 = vadd.f32 %v9762_v41, %v9761_v40 }
 0x803   :  { %v9764_v42 = vpop.f32.mrb[24].mxu0 }
 0x804   :  { %v9765_v44 = vpop.f32.mrb[25].mxu0 }
 0x805   :  { %v9766_v33 = vadd.f32 %v9765_v44, %v9764_v42  ;;  %v3012_v42 = vld [vmem:[%s17371_s26 + $0x90] sm:$0xff]  ;;  %v3013_v44 = vld [vmem:[%s17371_s26 + $0x98] sm:$0xff] }
 0x807   :  { %v10809_v46 = vpack.c.bf16 %v9766_v33, %v9763_v45  ;;  %v10842_v45 = vpack.c.bf16 %v3013_v44, %v3012_v42  ;;  %v9100_v42 = vld [vmem:[%s17371_s26 + $0xf0] sm:$0xff]  ;;  %v9101_v44 = vld [vmem:[%s17371_s26 + $0xf8] sm:$0xff] }
 0x809   :  { %10810 = vmatpush3.bf16.msra.mxu0 %v10809_v46 }
 0x80a   :  { %10814 = vmatprep.subr.bf16.mxu0 %v13148_v63 }
 0x80c   :  { %10218 = vmatmul.mubr.msk.f32.vlgmr.msra.gmra.mrb[26].mxu0 %vm744_vm6, %v2687_v61 }
 0x80d   :  { %10816 = vmatpush1.bf16.msra.mxu0 %v10815_v13  ;;  %v3309_v13 = vld [vmem:[%s17330_s11 + $0x60] sm:$0xff] }
 0x80e   :  { %10817 = vmatprep.subr.bf16.mxu0 %v13148_v63 }
 0x811   :  { %10819 = vmatpush1.bf16.msra.mxu0 %v10818_v15  ;;  %v10923_v15 = vpack.c.bf16 %v3310_v14, %v3309_v13  ;;  %v9115_v13 = vld [vmem:[%s17371_s26 + $0x160] sm:$0xff]  ;;  %v9116_v14 = vld [vmem:[%s17371_s26 + $0x168] sm:$0xff] }
 0x812   :  { %10820 = vmatprep.subr.bf16.mxu0 %v13148_v63 }
 0x815   :  { %10822 = vmatpush1.bf16.msra.mxu0 %v10821_v18  ;;  %v10926_v18 = vpack.c.bf16 %v3312_v17, %v3311_v16  ;;  %v9117_v16 = vld [vmem:[%s17371_s26 + $0x170] sm:$0xff]  ;;  %v9118_v17 = vld [vmem:[%s17371_s26 + $0x178] sm:$0xff] }
 0x816   :  { %10823 = vmatprep.subr.bf16.mxu0 %v13148_v63 }
 0x819   :  { %10825 = vmatpush1.bf16.msra.mxu0 %v10824_v21  ;;  %v9090_v21 = vld [vmem:[%s17371_s26 + $0xa0] sm:$0xff] }
 0x81a   :  { %10826 = vmatprep.subr.bf16.mxu0 %v13148_v63  ;;  %v10845_v23 = vpack.c.bf16 %v9091_v22, %v9090_v21  ;;  %v9121_v22 = vld [vmem:[%s17371_s26 + $0x190] sm:$0xff] }
 0x81d   :  { %10828 = vmatpush1.bf16.msra.mxu0 %v10827_v24  ;;  %v9092_v24 = vld [vmem:[%s17371_s26 + $0xb0] sm:$0xff] }
 0x81e   :  { %10829 = vmatprep.subr.bf16.mxu0 %v13148_v63  ;;  %v10848_v30 = vpack.c.bf16 %v9093_v25, %v9092_v24  ;;  %v9123_v25 = vld [vmem:[%s17371_s26 + $0x1a0] sm:$0xff] }
 0x821   :  { %10831 = vmatpush1.bf16.msra.mxu0 %v10830_v27 }
 0x822   :  { %10832 = vmatprep.subr.bf16.mxu0 %v13148_v63 }
 0x825   :  { %10834 = vmatpush1.bf16.msra.mxu0 %v10833_v29 }
 0x826   :  { %10835 = vmatprep.subr.bf16.mxu0 %v13148_v63 }
 0x829   :  { %10837 = vmatpush1.bf16.msra.mxu0 %v10836_v32  ;;  %v9094_v32 = vld [vmem:[%s17371_s26 + $0xc0] sm:$0xff] }
 0x82a   :  { %10838 = vmatprep.subr.bf16.mxu0 %v13148_v63 }
 0x82d   :  { %10840 = vmatpush1.bf16.msra.mxu0 %v10839_v38  ;;  %v10854_v38 = vpack.c.bf16 %v9097_v37, %v9096_v36  ;;  %v9130_v36 = vld [vmem:[%s17371_s26 + $0x1d8] sm:$0xff] }
 0x82e   :  { %10841 = vmatprep.subr.bf16.mxu0 %v13148_v63 }
 0x831   :  { %10843 = vmatpush1.bf16.msra.mxu0 %v10842_v45  ;;  %v10860_v45 = vpack.c.bf16 %v9101_v44, %v9100_v42  ;;  %v9133_v42 = vld [vmem:[%s17330_s11 + $0x88] sm:$0xff] }
 0x832   :  { %10844 = vmatprep.subr.bf16.mxu0 %v13148_v63 }
 0x89f   :  { %v2097_v49 = vpop.f32.mrb[16].mxu1 }
 0x8a0   :  { %v12931_v50 = vadd.f32 %v8982_v48, %v2097_v49  ;;  %v10198_v52 = vpop.f32.mrb[17].mxu1  ;;  %v3297_v49 = vld [vmem:[%s17330_s11] sm:$0xff] }
 0x8a1   :  { %v3299_v52 = vld [vmem:[%s17330_s11 + $0x10] sm:$0xff] }
 0x8a2   :  { %v2102_v53 = vmax.f32 %v12931_v50, 0.0  ;;  %v3298_v50 = vld [vmem:[%s17330_s11 + $0x8] sm:$0xff] }
 0x8a4   :  { %2104 = vst.msk [vmem:[#allocation5] sm:$0x1] %vm2103_vm1, %v2102_v53  ;;  %v14673_v54 = vrot.slane %v2102_v53, %v14669_v51  ;;  %v10905_v53 = vpack.c.bf16 %v3298_v50, %v3297_v49  ;;  %v9107_v49 = vld [vmem:[%s17371_s26 + $0x128] sm:$0xff] }
 0x8a6   :  { %v14677_v55 = vcombine.high %v14673_v54, %v14673_v54  ;;  %v9009_v48 = vrot.slane %v14673_v54, 9 }
 0x8a8   :  { %2122 = vst.msk [vmem:[#allocation5 + $0x2] sm:$0x1] %vm2103_vm1, %v14677_v55 }
 0x8bf   :  { %v9723_v56 = vpop.f32.mrb[18].mxu1 }
 0x8c0   :  { %v9724_v57 = vpop.f32.mrb[19].mxu1 }
 0x8c1   :  { %v9725_v58 = vadd.f32 %v9724_v57, %v9723_v56  ;;  %v3300_v56 = vld [vmem:[%s17330_s11 + $0x18] sm:$0xff]  ;;  %v3301_v57 = vld [vmem:[%s17330_s11 + $0x20] sm:$0xff] }
 0x8c2   :  { %v10908_v54 = vpack.c.bf16 %v3300_v56, %v3299_v52  ;;  %v9108_v52 = vld [vmem:[%s17371_s26 + $0x130] sm:$0xff] }
 0x8c3   :  { %v9726_v59 = vpop.f32.mrb[20].mxu1 }
 0x8c4   :  { %v9727_v60 = vpop.f32.mrb[21].mxu1 }
 0x8c5   :  { %v9728_v1 = vadd.f32 %v9727_v60, %v9726_v59  ;;  %v3303_v60 = vld [vmem:[%s17330_s11 + $0x30] sm:$0xff] }
 0x8c7   :  { %v10803_v3 = vpack.c.bf16 %v9728_v1, %v9725_v58  ;;  %v3302_v58 = vld [vmem:[%s17330_s11 + $0x28] sm:$0xff]  ;;  %v3304_v1 = vld [vmem:[%s17330_s11 + $0x38] sm:$0xff] }
 0x8c8   :  { %v10911_v59 = vpack.c.bf16 %v3302_v58, %v3301_v57  ;;  %v9111_v57 = vld [vmem:[%s17371_s26 + $0x140] sm:$0xff]  ;;  %v9112_v58 = vld [vmem:[%s17371_s26 + $0x148] sm:$0xff] }
 0x8c9   :  { %10804 = vmatpush3.bf16.msra.mxu1 %v10803_v3 }
 0x8ca   :  { %10805 = vmatprep.subr.bf16.mxu1 %v13148_v63 }
 0x8cc   :  { %10204 = vmatmul.mubr.msk.f32.vlgmr.msra.gmra.mrb[22].mxu1 %vm744_vm6, %v2687_v61 }
 0x8cd   :  { %10807 = vmatpush3.bf16.msra.mxu1 %v10803_v3  ;;  %10210 = vmatprep.mubr.msk.f32.mxu1 %vm13149_vm5, %v14044_v43  ;;  %v10914_v3 = vpack.c.bf16 %v3304_v1, %v3303_v60 }
 0x8ce   :  { %10811 = vmatprep.subr.bf16.mxu1 %v13148_v63 }
 0x8d0   :  { %10211 = vmatmul.mubr.msk.f32.vlgmr.msra.gmra.mrb[24].mxu1 %vm744_vm6, %v9084_v8 }
 0x8d1   :  { %10813 = vmatpush3.bf16.msra.mxu1 %v10809_v46  ;;  %10224 = vmatprep.mubr.msk.f32.mxu1 %vm13149_vm5, %v14044_v43 }
 0x8d2   :  { %10904 = vmatprep.subr.bf16.mxu1 %v13148_v63 }
 0x8d4   :  { %10225 = vmatmul.mubr.msk.f32.vlgmr.msra.gmra.mrb[26].mxu1 %vm744_vm6, %v9084_v8  ;;  %v3305_v8 = vld [vmem:[%s17330_s11 + $0x40] sm:$0xff]  ;;  %vm8830_vm6 = vcmask 9224  }
 0x8d5   :  { %10259 = vmatprep.mubr.msk.f32.mxu1 %vm13149_vm5, %v14044_v43  ;;  %10906 = vmatpush3.bf16.msra.mxu1 %v10905_v53  ;;  %v9109_v53 = vld [vmem:[%s17371_s26 + $0x138] sm:$0xff] }
 0x8d6   :  { %10907 = vmatprep.subr.bf16.mxu1 %v13148_v63 }
 0x8d9   :  { %10909 = vmatpush3.bf16.msra.mxu1 %v10908_v54  ;;  %v10872_v54 = vpack.c.bf16 %v9109_v53, %v9108_v52  ;;  %v9139_v52 = vld [vmem:[%s17330_s11 + $0xb8] sm:$0xff] }
 0x8da   :  { %10910 = vmatprep.subr.bf16.mxu1 %v13148_v63 }
 0x8dd   :  { %10912 = vmatpush3.bf16.msra.mxu1 %v10911_v59 }
 0x8de   :  { %10913 = vmatprep.subr.bf16.mxu1 %v13148_v63 }
 0x8df   :  { %v2902_v9 = vpop.f32.mrb[26].mxu0 }
 0x8e0   :  { %v10219_v10 = vpop.f32.mrb[27].mxu0 }
 0x8e1   :  { %10915 = vmatpush3.bf16.msra.mxu1 %v10914_v3 }
 0x8e2   :  { %10916 = vmatprep.subr.bf16.mxu1 %v13148_v63 }
 0x99f   :  { %v2757_v34 = vpop.f32.mrb[22].mxu1 }
 0x9a0   :  { %v10205_v35 = vpop.f32.mrb[23].mxu1 }
 0x9a3   :  { %v2831_v39 = vpop.f32.mrb[24].mxu1 }
 0x9a4   :  { %v2835_v40 = vmax.f32 %v2757_v34, %v2831_v39  ;;  %v10212_v41 = vpop.f32.mrb[25].mxu1  ;;  %v9095_v34 = vld [vmem:[%s17371_s26 + $0xc8] sm:$0xff]  ;;  %v9098_v39 = vld [vmem:[%s17371_s26 + $0xe0] sm:$0xff] }
 0x9a5   :  { %v10851_v35 = vpack.c.bf16 %v9095_v34, %v9094_v32  ;;  %v9128_v32 = vld [vmem:[%s17371_s26 + $0x1c8] sm:$0xff] }
 0x9a7   :  { %v2972_v33 = vpop.f32.mrb[26].mxu1 }
 0x9a8   :  { %v2976_v46 = vmax.f32 %v2902_v9, %v2972_v33  ;;  %v10226_v61 = vpop.f32.mrb[27].mxu1  ;;  %v3306_v9 = vld [vmem:[%s17330_s11 + $0x48] sm:$0xff]  ;;  %v9102_v33 = vld [vmem:[%s17371_s26 + $0x100] sm:$0xff] }
 0x9a9   :  { %v10917_v10 = vpack.c.bf16 %v3306_v9, %v3305_v8  ;;  %v10875_v8 = vpack.c.bf16 %v9112_v58, %v9111_v57  ;;  %v9113_v9 = vld [vmem:[%s17371_s26 + $0x150] sm:$0xff] }
 0x9aa   :  { %v2977_v2 = vmax.f32 %v2835_v40, %v2976_v46  ;;  %v9099_v40 = vld [vmem:[%s17371_s26 + $0xe8] sm:$0xff]  ;;  %v9142_v58 = vld [vmem:[%s17330_s11 + $0xd0] sm:$0xff] }
 0x9ab   :  { %10918 = vmatpush3.bf16.msra.mxu1 %v10917_v10  ;;  %v10857_v41 = vpack.c.bf16 %v9099_v40, %v9098_v39  ;;  %v9103_v46 = vld [vmem:[%s17371_s26 + $0x108] sm:$0xff]  ;;  %v9114_v10 = vld [vmem:[%s17371_s26 + $0x158] sm:$0xff] }
 0x9ac   :  { %v2978_v6 = vmax.f32 %v2977_v2, 0.0  ;;  %10919 = vmatprep.subr.bf16.mxu1 %v13148_v63  ;;  %v10863_v61 = vpack.c.bf16 %v9103_v46, %v9102_v33  ;;  %v9104_v2 = vld [vmem:[%s17371_s26 + $0x110] sm:$0xff] }
 0x9ae   :  { %v2980_v47 = vrot.slane %v2978_v6, 7  ;;  %v9105_v6 = vld [vmem:[%s17371_s26 + $0x118] sm:$0xff] }
 0x9af   :  { %10921 = vmatpush3.bf16.msra.mxu1 %v10920_v12  ;;  %v10878_v12 = vpack.c.bf16 %v9114_v10, %v9113_v9  ;;  %v9146_v9 = vld [vmem:[%s17330_s11 + $0xf0] sm:$0xff]  ;;  %v9147_v10 = vld [vmem:[%s17330_s11 + $0xf8] sm:$0xff] }
 0x9b0   :  { %2981 = vrot.lane.b32.xlu0 %v2980_v47, %s13138_s28  ;;  %10922 = vmatprep.subr.bf16.mxu1 %v13148_v63  ;;  %v10866_v47 = vpack.c.bf16 %v9105_v6, %v9104_v2  ;;  %v9135_v2 = vld [vmem:[%s17330_s11 + $0x98] sm:$0xff] }
 0x9b3   :  { %10924 = vmatpush3.bf16.msra.mxu1 %v10923_v15  ;;  %v10881_v15 = vpack.c.bf16 %v9116_v14, %v9115_v13  ;;  %v9149_v14 = vld [vmem:[%s17329_s10 + $0x4] sm:$0xf] }
 0x9b4   :  { %2115 = vrot.lane.b32.xlu0 %v9009_v48, %s17375_s12  ;;  %10925 = vmatprep.subr.bf16.mxu1 %v13148_v63  ;;  %v9106_v48 = vld [vmem:[%s17371_s26 + $0x120] sm:$0xff] }
 0x9b5   :  { %v10869_v50 = vpack.c.bf16 %v9107_v49, %v9106_v48  ;;  %v9137_v48 = vld [vmem:[%s17330_s11 + $0xa8] sm:$0xff] }
 0x9b7   :  { %10927 = vmatpush3.bf16.msra.mxu1 %v10926_v18  ;;  %v10884_v18 = vpack.c.bf16 %v9118_v17, %v9117_v16  ;;  %v3769_v17 = vld [vmem:[%s17373_s29] sm:$0xff] }
 0x9b8   :  { %10928 = vmatprep.subr.bf16.mxu1 %v13148_v63 }
 0xa22   :  { %v2982_v19 = vpop.permute.xlu0 %2981 }
 0xa23   :  { %2985 = vst.msk [vmem:[#allocation3 + $0x20] sm:$0xfe] %vm1042_vm9, %v2982_v19 }
 0xa24   :  { %2986 = vst.msk [vmem:[#allocation3 + $0x28] sm:$0xfe] %vm1044_vm10, %v2982_v19 }
 0xa25   :  { %2987 = vst.msk [vmem:[#allocation3 + $0x30] sm:$0x1] %vm1046_vm11, %v2982_v19 }
 0xa26   :  { %2988 = vst.msk [vmem:[#allocation3 + $0x38] sm:$0x1] %vm1048_vm12, %v2982_v19  ;;  %v2116_v20 = vpop.permute.xlu0 %2115  ;;  %v9119_v19 = vld [vmem:[%s17371_s26 + $0x180] sm:$0xff] }
 0xa27   :  { %2119 = vst.msk [vmem:[#allocation5] sm:$0x1] %vm2118_vm3, %v2116_v20  ;;  %v9120_v20 = vld [vmem:[%s17371_s26 + $0x188] sm:$0xff] }
 0xa28   :  { %v10887_v21 = vpack.c.bf16 %v9120_v20, %v9119_v19  ;;  %v3771_v19 = vld [vmem:[%s17373_s29 + $0x10] sm:$0xff] }
 0xa2a   :  { %v14844_v27 = vld [vmem:[#allocation3 + $0x20] sm:$0xff] }
 0xa2b   :  { %v14842_v26 = vld [vmem:[#allocation3 + $0x28] sm:$0xff]  ;;  %v3117_v59 = vrot.slane %v14844_v27, 1 }
 0xa2c   :  { %9088 = vmatprep.mubr.msk.f32.mxu0 %vm144_vm7, %v14842_v26  ;;  %v3120_v0 = vrot.slane %v14842_v26, 1  ;;  %v14911_v56 = vld [vmem:[#allocation3 + $0x30] sm:$0x3]  ;;  %v3220_v1 = vrot.slane %v14842_v26, 2  ;;  %v9124_v26 = vld [vmem:[%s17371_s26 + $0x1a8] sm:$0xff] }
 0xa2d   :  { %v14846_v28 = vld [vmem:[#allocation3 + $0x38] sm:$0x3]  ;;  %3082 = vmatmul.mubr.f32.vlgmr.msra.gmra.mrb[28].mxu0 %v14844_v27  ;;  %v3118_v60 = vrot.slane %v14911_v56, 1  ;;  %v3218_v39 = vrot.slane %v14911_v56, 2  ;;  %v9140_v56 = vld [vmem:[%s17330_s11 + $0xc0] sm:$0xff] }
 0xa2e   :  { %v3121_v29 = vrot.slane %v14846_v28, 1  ;;  %10846 = vmatpush1.bf16.msra.mxu0 %v10845_v23  ;;  %v3221_v3 = vrot.slane %v14846_v28, 2  ;;  %v9122_v23 = vld [vmem:[%s17371_s26 + $0x198] sm:$0xff]  ;;  %v10893_v28 = vpack.c.bf16 %v9124_v26, %v9123_v25  ;;  %v3775_v26 = vld [vmem:[%s17373_s29 + $0x30] sm:$0xff] }
 0xa2f   :  { %10847 = vmatprep.subr.bf16.mxu0 %v13148_v63  ;;  %v3119_v11 = vsel %vm320_vm4, %v3117_v59, %v3118_v60  ;;  %v10890_v24 = vpack.c.bf16 %v9122_v23, %v9121_v22  ;;  %v9143_v59 = vld [vmem:[%s17330_s11 + $0xd8] sm:$0xff]  ;;  %v3773_v23 = vld [vmem:[%s17373_s29 + $0x20] sm:$0xff] }
 0xa30   :  { %v3122_v31 = vsel %vm320_vm4, %v3120_v0, %v3121_v29  ;;  %v3222_v62 = vsel %vm205_vm2, %v3220_v1, %v3221_v3  ;;  %v9125_v0 = vld [vmem:[%s17371_s26 + $0x1b0] sm:$0xff]  ;;  %v9126_v29 = vld [vmem:[%s17371_s26 + $0x1b8] sm:$0xff]  ;;  %v10944_v60 = vpack.c.bf16 %v9143_v59, %v9142_v58  ;;  %v9144_v1 = vld [vmem:[%s17330_s11 + $0xe0] sm:$0xff]  ;;  %vm4328_vm4 = vcmask 31744  }
 0xa31   :  { %9110 = vmatprep.mubr.msk.f32.mxu0 %vm144_vm7, %v3122_v31  ;;  %v9127_v31 = vld [vmem:[%s17371_s26 + $0x1c0] sm:$0xff]  ;;  %v9145_v3 = vld [vmem:[%s17330_s11 + $0xe8] sm:$0xff]  ;;  %v9161_v58 = vld [vmem:[%s17373_s29 + $0x90] sm:$0xff] }
 0xa32   :  { %10849 = vmatpush1.bf16.msra.mxu0 %v10848_v30  ;;  %v10896_v30 = vpack.c.bf16 %v9126_v29, %v9125_v0  ;;  %v10899_v34 = vpack.c.bf16 %v9128_v32, %v9127_v31  ;;  %v9162_v59 = vld [vmem:[%s17373_s29 + $0x98] sm:$0xff] }
 0xa33   :  { %10850 = vmatprep.subr.bf16.mxu0 %v13148_v63 }
 0xa36   :  { %10852 = vmatpush1.bf16.msra.mxu0 %v10851_v35  ;;  %v9129_v35 = vld [vmem:[%s17371_s26 + $0x1d0] sm:$0xff] }
 0xa37   :  { %10853 = vmatprep.subr.bf16.mxu0 %v13148_v63  ;;  %v10902_v37 = vpack.c.bf16 %v9130_v36, %v9129_v35  ;;  %v3777_v35 = vld [vmem:[%s17373_s29 + $0x40] sm:$0xff]  ;;  %v3778_v36 = vld [vmem:[%s17373_s29 + $0x48] sm:$0xff] }
 0xa3a   :  { %10855 = vmatpush1.bf16.msra.mxu0 %v10854_v38  ;;  %v3217_v38 = vrot.slane %v14844_v27, 2  ;;  %v9089_v27 = vld [vmem:[%s17372_s9] ss:$0 sm:$0xff] }
 0xa3b   :  { %10856 = vmatprep.subr.bf16.mxu0 %v13148_v63 }
 0xa3c   :  { %v3219_v40 = vsel %vm205_vm2, %v3217_v38, %v3218_v39  ;;  %v3779_v38 = vld [vmem:[%s17373_s29 + $0x50] sm:$0xff]  ;;  %v3780_v39 = vld [vmem:[%s17373_s29 + $0x58] sm:$0xff]  ;;  %vm4332_vm2 = vcmask 1043456  }
 0xa3e   :  { %10858 = vmatpush1.bf16.msra.mxu0 %v10857_v41  ;;  %v9132_v41 = vld [vmem:[%s17330_s11 + $0x80] sm:$0xff] }
 0xa3f   :  { %10859 = vmatprep.subr.bf16.mxu0 %v13148_v63 }
 0xa42   :  { %10861 = vmatpush1.bf16.msra.mxu0 %v10860_v45  ;;  %v10929_v45 = vpack.c.bf16 %v9133_v42, %v9132_v41  ;;  %v10968_v41 = vpack.c.bf16 %v3780_v39, %v3779_v38  ;;  %v4319_v38 = vld [vmem:[%s17332_s13 + $0x18] sm:$0xff] }
 0xa43   :  { %10862 = vmatprep.subr.bf16.mxu0 %v13148_v63  ;;  %v4327_v39 = vcombine.high %v4319_v38, %v4319_v38 }
 0xa46   :  { %10864 = vmatpush1.bf16.msra.mxu0 %v10863_v61  ;;  %v9134_v61 = vld [vmem:[%s17330_s11 + $0x90] sm:$0xff] }
 0xa47   :  { %10865 = vmatprep.subr.bf16.mxu0 %v13148_v63  ;;  %v10932_v6 = vpack.c.bf16 %v9135_v2, %v9134_v61  ;;  %v9010_v61 = vrot.slane %v14677_v55, 9  ;;  %v9157_v55 = vld [vmem:[%s17373_s29 + $0x70] sm:$0xff] }
 0xa4a   :  { %10867 = vmatpush1.bf16.msra.mxu0 %v10866_v47  ;;  %v9136_v47 = vld [vmem:[%s17330_s11 + $0xa0] sm:$0xff] }
 0xa4b   :  { %10868 = vmatprep.subr.bf16.mxu0 %v13148_v63  ;;  %v10935_v49 = vpack.c.bf16 %v9137_v48, %v9136_v47  ;;  %v9156_v47 = vld [vmem:[%s17373_s29 + $0x68] sm:$0xff] }
 0xa4e   :  { %10870 = vmatpush1.bf16.msra.mxu0 %v10869_v50  ;;  %v9138_v50 = vld [vmem:[%s17330_s11 + $0xb0] sm:$0xff] }
 0xa4f   :  { %10871 = vmatprep.subr.bf16.mxu0 %v13148_v63  ;;  %v10938_v53 = vpack.c.bf16 %v9139_v52, %v9138_v50  ;;  %v9158_v50 = vld [vmem:[%s17373_s29 + $0x78] sm:$0xff] }
 0xa52   :  { %10873 = vmatpush1.bf16.msra.mxu0 %v10872_v54  ;;  %v9141_v54 = vld [vmem:[%s17330_s11 + $0xc8] sm:$0xff] }
 0xa53   :  { %10874 = vmatprep.subr.bf16.mxu0 %v13148_v63  ;;  %v10941_v57 = vpack.c.bf16 %v9141_v54, %v9140_v56  ;;  %v9159_v56 = vld [vmem:[%s17373_s29 + $0x80] sm:$0xff]  ;;  %v9160_v54 = vld [vmem:[%s17373_s29 + $0x88] sm:$0xff] }
 0xa55   :  { %3191 = vmatmul.mubr.f32.vlgmr.msra.gmra.mrb[28].mxu0 %v3119_v11  ;;  %v10950_v11 = vpack.c.bf16 %v9147_v10, %v9146_v9  ;;  %v9165_v9 = vld [vmem:[%s17373_s29 + $0xb0] sm:$0xff]  ;;  %v9166_v10 = vld [vmem:[%s17373_s29 + $0xb8] sm:$0xff] }
 0xa56   :  { %10876 = vmatpush1.bf16.msra.mxu0 %v10875_v8  ;;  %9131 = vmatprep.mubr.msk.f32.mxu0 %vm144_vm7, %v3222_v62  ;;  %v10947_v8 = vpack.c.bf16 %v9145_v3, %v9144_v1  ;;  %v3469_v62 = vld [vmem:[%s17329_s10] sm:$0xf]  ;;  %v9164_v3 = vld [vmem:[%s17373_s29 + $0xa8] sm:$0xff] }
 0xa57   :  { %10877 = vmatprep.subr.bf16.mxu0 %v13148_v63  ;;  %v9163_v1 = vld [vmem:[%s17373_s29 + $0xa0] sm:$0xff] }
 0xa5a   :  { %10879 = vmatpush1.bf16.msra.mxu0 %v10878_v12 }
 0xa5b   :  { %10880 = vmatprep.subr.bf16.mxu0 %v13148_v63 }
 0xa5e   :  { %10882 = vmatpush1.bf16.msra.mxu0 %v10881_v15 }
 0xa5f   :  { %10883 = vmatprep.subr.bf16.mxu0 %v13148_v63 }
 0xa62   :  { %10885 = vmatpush1.bf16.msra.mxu0 %v10884_v18  ;;  %v3770_v18 = vld [vmem:[%s17373_s29 + $0x8] sm:$0xff] }
 0xa63   :  { %10886 = vmatprep.subr.bf16.mxu0 %v13148_v63  ;;  %v10953_v20 = vpack.c.bf16 %v3770_v18, %v3769_v17  ;;  %v9172_v18 = vld [vmem:[%s17373_s29 + $0xe0] sm:$0xff] }
 0xa66   :  { %10888 = vmatpush1.bf16.msra.mxu0 %v10887_v21  ;;  %v3772_v21 = vld [vmem:[%s17373_s29 + $0x18] sm:$0xff] }
 0xa67   :  { %10889 = vmatprep.subr.bf16.mxu0 %v13148_v63  ;;  %v10956_v22 = vpack.c.bf16 %v3772_v21, %v3771_v19  ;;  %v9173_v19 = vld [vmem:[%s17373_s29 + $0xe8] sm:$0xff]  ;;  %v9174_v21 = vld [vmem:[%s17373_s29 + $0xf0] sm:$0xff] }
 0xa6a   :  { %10891 = vmatpush1.bf16.msra.mxu0 %v10890_v24  ;;  %v3774_v24 = vld [vmem:[%s17373_s29 + $0x28] sm:$0xff] }
 0xa6b   :  { %10892 = vmatprep.subr.bf16.mxu0 %v13148_v63  ;;  %v10959_v25 = vpack.c.bf16 %v3774_v24, %v3773_v23  ;;  %v9176_v24 = vld [vmem:[%s17373_s29 + $0x100] sm:$0xff] }
 0xa6e   :  { %10894 = vmatpush1.bf16.msra.mxu0 %v10893_v28  ;;  %v3776_v28 = vld [vmem:[%s17373_s29 + $0x38] sm:$0xff] }
 0xa6f   :  { %10895 = vmatprep.subr.bf16.mxu0 %v13148_v63  ;;  %v10962_v0 = vpack.c.bf16 %v3776_v28, %v3775_v26  ;;  %v9178_v28 = vld [vmem:[%s17373_s29 + $0x110] sm:$0xff] }
 0xa72   :  { %10897 = vmatpush1.bf16.msra.mxu0 %v10896_v30 }
 0xa73   :  { %10898 = vmatprep.subr.bf16.mxu0 %v13148_v63 }
 0xa76   :  { %10900 = vmatpush1.bf16.msra.mxu0 %v10899_v34 }
 0xa77   :  { %10901 = vmatprep.subr.bf16.mxu0 %v13148_v63 }
 0xa7a   :  { %10903 = vmatpush1.bf16.msra.mxu0 %v10902_v37  ;;  %v10965_v37 = vpack.c.bf16 %v3778_v36, %v3777_v35  ;;  %v4318_v36 = vld [vmem:[%s17332_s13 + $0x10] sm:$0xff] }
 0xa7d   :  { %3291 = vmatmul.mubr.f32.vlgmr.msra.gmra.mrb[28].mxu0 %v3219_v40 }
 0xa7e   :  { %4413 = vmatprep.mubr.f32.mxu0 %v14044_v43 }
 0xb50   :  { %v3292_v44 = vpop.f32.mrb[28].mxu0 }
 0xb51   :  { %v12936_v33 = vadd.f32 %v9089_v27, %v3292_v44  ;;  %v3294_v46 = vpop.f32.mrb[29].mxu0 }
 0xb53   :  { %10260 = vmatmul.mubr.f32.vlgmr.msra.gmra.mrb[28].mxu1 %v12936_v33 }
 0xb54   :  { %10930 = vmatpush3.bf16.msra.mxu1 %v10929_v45  ;;  %10294 = vmatprep.mubr.msk.f32.mxu1 %vm13149_vm5, %v14044_v43 }
 0xb55   :  { %10931 = vmatprep.subr.bf16.mxu1 %v13148_v63 }
 0xb58   :  { %10933 = vmatpush3.bf16.msra.mxu1 %v10932_v6  ;;  %v9155_v6 = vld [vmem:[%s17373_s29 + $0x60] sm:$0xff] }
 0xb59   :  { %10934 = vmatprep.subr.bf16.mxu1 %v13148_v63 }
 0xb5c   :  { %10936 = vmatpush3.bf16.msra.mxu1 %v10935_v49  ;;  %v10971_v49 = vpack.c.bf16 %v9156_v47, %v9155_v6  ;;  %v4083_v6 = vld [vmem:[#allocation6 + $0xc0] sm:$0xff]  ;;  %v4092_v47 = vld [vmem:[#allocation6 + $0x108] sm:$0xff] }
 0xb5d   :  { %10937 = vmatprep.subr.bf16.mxu1 %v13148_v63 }
 0xb60   :  { %10939 = vmatpush3.bf16.msra.mxu1 %v10938_v53  ;;  %v10974_v53 = vpack.c.bf16 %v9158_v50, %v9157_v55  ;;  %v4091_v50 = vld [vmem:[#allocation6 + $0x100] sm:$0xff] }
 0xb61   :  { %10940 = vmatprep.subr.bf16.mxu1 %v13148_v63 }
 0xb64   :  { %10942 = vmatpush3.bf16.msra.mxu1 %v10941_v57  ;;  %v10977_v57 = vpack.c.bf16 %v9160_v54, %v9159_v56  ;;  %v4116_v56 = vld [vmem:[#allocation6 + $0x1c8] sm:$0xff] }
 0xb65   :  { %10943 = vmatprep.subr.bf16.mxu1 %v13148_v63 }
 0xb68   :  { %10945 = vmatpush3.bf16.msra.mxu1 %v10944_v60  ;;  %v10980_v60 = vpack.c.bf16 %v9162_v59, %v9161_v58  ;;  %v4115_v58 = vld [vmem:[#allocation6 + $0x1c0] sm:$0xff]  ;;  %v4124_v59 = vld [vmem:[#allocation6 + $0x208] sm:$0xff] }
 0xb69   :  { %10946 = vmatprep.subr.bf16.mxu1 %v13148_v63 }
 0xb6c   :  { %10948 = vmatpush3.bf16.msra.mxu1 %v10947_v8  ;;  %v10983_v8 = vpack.c.bf16 %v9164_v3, %v9163_v1 }
 0xb6d   :  { %10949 = vmatprep.subr.bf16.mxu1 %v13148_v63 }
 0xb70   :  { %10951 = vmatpush3.bf16.msra.mxu1 %v10950_v11  ;;  %v10986_v11 = vpack.c.bf16 %v9166_v10, %v9165_v9  ;;  %v4131_v9 = vld [vmem:[#allocation6 + $0x240] sm:$0xff]  ;;  %v4140_v10 = vld [vmem:[#allocation6 + $0x288] sm:$0xff] }
 0xb71   :  { %10297 = vmatprep.subr.mxu1 %v14044_v43 }
 0xb73   :  { %10295 = vmatmul.mubr.f32.vlgmr.msra.gmra.mrb[30].mxu1 %v12936_v33 }
 0xb74   :  { %10299 = vmatprep.mubr.msk.f32.mxu1 %vm13149_vm5, %v14044_v43 }
 0xc26   :  { %v3379_v12 = vpop.f32.mrb[28].mxu1 }
 0xc27   :  { %v10261_v13 = vpop.f32.mrb[29].mxu1  ;;  %10298 = vmatpush3.msra.mxu1 %v3379_v12 }
 0xc28   :  { %10302 = vmatprep.subr.mxu1 %v14044_v43  ;;  %10300 = vmatmul.mubr.msk.f32.vlgmr.msra.gmra.mrb[32].mxu1 %vm1534_vm13, %v3469_v62 }
 0xc29   :  { %10303 = vmatpush3.msra.mxu1 %v3379_v12  ;;  %10304 = vmatprep.mubr.msk.f32.mxu1 %vm13149_vm5, %v14044_v43  ;;  %v9169_v12 = vld [vmem:[%s17373_s29 + $0xc8] sm:$0xff] }
 0xc2a   :  { %10307 = vmatprep.subr.mxu1 %v14044_v43 }
 0xc2c   :  { %10305 = vmatmul.mubr.msk.f32.vlgmr.msra.gmra.mrb[34].mxu1 %vm1534_vm13, %v9149_v14 }
 0xc2d   :  { %10309 = vmatprep.mubr.msk.f32.mxu1 %vm13149_vm5, %v14044_v43 }
 0xc46   :  { %v3465_v15 = vpop.f32.mrb[30].mxu1 }
 0xc47   :  { %v10296_v16 = vpop.f32.mrb[31].mxu1  ;;  %10308 = vmatpush3.msra.mxu1 %v3465_v15 }
 0xc48   :  { %10310 = vmatmul.mubr.msk.f32.vlgmr.msra.gmra.mrb[36].mxu1 %vm1534_vm13, %v3469_v62  ;;  %10312 = vmatprep.subr.mxu1 %v14044_v43  ;;  %v9168_v62 = vld [vmem:[%s17373_s29 + $0xc0] sm:$0xff]  ;;  %v9171_v16 = vld [vmem:[%s17373_s29 + $0xd8] sm:$0xff] }
 0xc49   :  { %10313 = vmatpush3.msra.mxu1 %v3465_v15  ;;  %10314 = vmatprep.mubr.msk.f32.mxu1 %vm13149_vm5, %v14044_v43  ;;  %v10989_v13 = vpack.c.bf16 %v9169_v12, %v9168_v62  ;;  %v9170_v15 = vld [vmem:[%s17373_s29 + $0xd0] sm:$0xff] }
 0xc4a   :  { %10952 = vmatprep.subr.bf16.mxu1 %v13148_v63  ;;  %v10992_v17 = vpack.c.bf16 %v9171_v16, %v9170_v15  ;;  %v4156_v15 = vld [vmem:[#allocation6 + $0x308] sm:$0xff] }
 0xc4b   :  { %v4164_v16 = vld [vmem:[#allocation6 + $0x348] sm:$0xff] }
 0xc4c   :  { %10315 = vmatmul.mubr.msk.f32.vlgmr.msra.gmra.mrb[38].mxu1 %vm1534_vm13, %v9149_v14 }
 0xc4d   :  { %10341 = vmatprep.mubr.msk.f32.mxu1 %vm13149_vm5, %v14044_v43  ;;  %10954 = vmatpush3.bf16.msra.mxu1 %v10953_v20  ;;  %v10995_v20 = vpack.c.bf16 %v9173_v19, %v9172_v18  ;;  %v11030_v18 = vpack.c.bf16 %v4164_v16, %v4156_v15  ;;  %v4155_v19 = vld [vmem:[#allocation6 + $0x300] sm:$0xff]  ;;  %v13039_v16 = vld [vmem:[%s17374_s6] ss:$0 sm:$0xff] }
 0xc4e   :  { %10955 = vmatprep.subr.bf16.mxu1 %v13148_v63 }
 0xc51   :  { %10957 = vmatpush3.bf16.msra.mxu1 %v10956_v22  ;;  %v9175_v22 = vld [vmem:[%s17373_s29 + $0xf8] sm:$0xff] }
 0xc52   :  { %10958 = vmatprep.subr.bf16.mxu1 %v13148_v63  ;;  %v10998_v23 = vpack.c.bf16 %v9175_v22, %v9174_v21  ;;  %v4172_v21 = vld [vmem:[#allocation6 + $0x388] sm:$0xff] }
 0xc53   :  { %v4180_v22 = vld [vmem:[#allocation6 + $0x3c8] sm:$0xff] }
 0xc55   :  { %10960 = vmatpush3.bf16.msra.mxu1 %v10959_v25  ;;  %v9177_v25 = vld [vmem:[%s17373_s29 + $0x108] sm:$0xff] }
 0xc56   :  { %10961 = vmatprep.subr.bf16.mxu1 %v13148_v63  ;;  %v11001_v26 = vpack.c.bf16 %v9177_v25, %v9176_v24  ;;  %v11034_v24 = vpack.c.bf16 %v4180_v22, %v4172_v21  ;;  %v4171_v25 = vld [vmem:[#allocation6 + $0x380] sm:$0xff]  ;;  %v4062_v22 = vld [vmem:[#allocation6 + $0x18] sm:$0xff] }
 0xc59   :  { %10963 = vmatpush3.bf16.msra.mxu1 %v10962_v0  ;;  %v9179_v0 = vld [vmem:[%s17373_s29 + $0x118] sm:$0xff] }
 0xc5a   :  { %10964 = vmatprep.subr.bf16.mxu1 %v13148_v63 }
 0xc5d   :  { %10966 = vmatpush3.bf16.msra.mxu1 %v10965_v37  ;;  %v4326_v37 = vcombine.high %v4318_v36, %v4318_v36 }
 0xc5e   :  { %10967 = vmatprep.subr.bf16.mxu1 %v13148_v63 }
 0xc61   :  { %10969 = vmatpush3.bf16.msra.mxu1 %v10968_v41  ;;  %v4068_v41 = vld [vmem:[#allocation6 + $0x48] sm:$0xff] }
 0xc62   :  { %10970 = vmatprep.subr.bf16.mxu1 %v13148_v63 }
 0xcfb   :  { %v3539_v29 = vpop.f32.mrb[32].mxu1 }
 0xcfc   :  { %v10301_v30 = vpop.f32.mrb[33].mxu1 }
 0xcff   :  { %v3613_v31 = vpop.f32.mrb[34].mxu1 }
 0xd00   :  { %v3617_v32 = vmax.f32 %v3539_v29, %v3613_v31  ;;  %v10306_v34 = vpop.f32.mrb[35].mxu1  ;;  %v11004_v29 = vpack.c.bf16 %v9179_v0, %v9178_v28  ;;  %v4316_v31 = vld [vmem:[%s17332_s13] sm:$0xff]  ;;  %v4188_v28 = vld [vmem:[#allocation6 + $0x408] sm:$0xff] }
 0xd01   :  { %v4324_v34 = vcombine.high %v4316_v31, %v4316_v31  ;;  %v4196_v0 = vld [vmem:[#allocation6 + $0x448] sm:$0xff] }
 0xd03   :  { %9183 = vmatprep.subr.msk.mxu0 %vm4332_vm2, %v4324_v34  ;;  %v4204_v34 = vld [vmem:[#allocation6 + $0x488] sm:$0xff] }
 0xd04   :  { %9184 = vmatpush1.msk.msra.mxu0 %vm4332_vm2, %v4316_v31  ;;  %v4187_v31 = vld [vmem:[#allocation6 + $0x400] sm:$0xff] }
 0xd1b   :  { %v3684_v40 = vpop.f32.mrb[36].mxu1 }
 0xd1c   :  { %v10311_v42 = vpop.f32.mrb[37].mxu1 }
 0xd1f   :  { %v3754_v27 = vpop.f32.mrb[38].mxu1 }
 0xd20   :  { %v3758_v44 = vmax.f32 %v3684_v40, %v3754_v27  ;;  %v10316_v45 = vpop.f32.mrb[39].mxu1  ;;  %v4060_v40 = vld [vmem:[#allocation6 + $0x8] sm:$0xff]  ;;  %v4059_v27 = vld [vmem:[#allocation6] sm:$0xff] }
 0xd21   :  { %v11006_v42 = vpack.c.bf16 %v4068_v41, %v4060_v40  ;;  %v4076_v45 = vld [vmem:[#allocation6 + $0x88] sm:$0xff] }
 0xd22   :  { %v3759_v33 = vmax.f32 %v3617_v32, %v3758_v44  ;;  %v4317_v32 = vld [vmem:[%s17332_s13 + $0x8] sm:$0xff] }
 0xd23   :  { %v4325_v35 = vcombine.high %v4317_v32, %v4317_v32  ;;  %v4067_v44 = vld [vmem:[#allocation6 + $0x40] sm:$0xff]  ;;  %v4228_v40 = vld [vmem:[#allocation6 + $0x548] sm:$0xff] }
 0xd24   :  { %v3760_v46 = vmax.f32 %v3759_v33, 0.0  ;;  %v4084_v33 = vld [vmem:[#allocation6 + $0xc8] sm:$0xff] }
 0xd25   :  { %9186 = vmatprep.subr.msk.mxu0 %vm4332_vm2, %v4325_v35  ;;  %v4212_v35 = vld [vmem:[#allocation6 + $0x4c8] sm:$0xff] }
 0xd26   :  { %3762 = vrot.lane.b32.xlu1 %v3760_v46, %s13138_s28  ;;  %v11008_v46 = vpack.c.bf16 %v4067_v44, %v4059_v27  ;;  %v4219_v27 = vld [vmem:[#allocation6 + $0x500] sm:$0xff] }
 0xd27   :  { %v4227_v44 = vld [vmem:[#allocation6 + $0x540] sm:$0xff] }
 0xd2a   :  { %2125 = vrot.lane.b32.xlu1 %v9010_v61, %s17375_s12  ;;  %v11010_v61 = vpack.c.bf16 %v4084_v33, %v4076_v45  ;;  %v4236_v45 = vld [vmem:[#allocation6 + $0x588] sm:$0xff] }
 0xd2b   :  { %v4244_v33 = vld [vmem:[#allocation6 + $0x5c8] sm:$0xff] }
 0xd98   :  { %v3763_v2 = vpop.permute.xlu1 %3762 }
 0xd99   :  { %3766 = vst.msk [vmem:[#allocation4 + $0x9] sm:$0xf] %vm1831_vm15, %v3763_v2  ;;  %v4075_v2 = vld [vmem:[#allocation6 + $0x80] sm:$0xff] }
 0xd9c   :  { %v2126_v48 = vpop.permute.xlu1 %2125 }
 0xd9d   :  { %2128 = vst.msk [vmem:[#allocation5 + $0x2] sm:$0x1] %vm2118_vm3, %v2126_v48  ;;  %v4100_v48 = vld [vmem:[#allocation6 + $0x148] sm:$0xff] }
 0xd9e   :  { %v11014_v55 = vpack.c.bf16 %v4100_v48, %v4092_v47  ;;  %v4252_v47 = vld [vmem:[#allocation6 + $0x608] sm:$0xff] }
 0xd9f   :  { %v4260_v48 = vld [vmem:[#allocation6 + $0x648] sm:$0xff] }
 0xda0   :  { %v3767_v52 = vld [vmem:[#allocation4 + $0x8] sm:$0x3f] }
 0xda1   :  { %10342 = vmatmul.mubr.msk.f32.vlgmr.msra.gmra.mrb[40].mxu1 %vm1847_vm0, %v3767_v52  ;;  %v3873_v14 = vrot.slane %v3767_v52, 1  ;;  %v3959_v30 = vrot.slane %v3767_v52, 2  ;;  %v4099_v52 = vld [vmem:[#allocation6 + $0x140] sm:$0xff] }
 0xda2   :  { %10972 = vmatpush3.bf16.msra.mxu1 %v10971_v49  ;;  %10368 = vmatprep.mubr.msk.f32.mxu1 %vm13149_vm5, %v14044_v43  ;;  %v11012_v49 = vpack.c.bf16 %v4083_v6, %v4075_v2  ;;  %v11016_v54 = vpack.c.bf16 %v4099_v52, %v4091_v50  ;;  %v4235_v2 = vld [vmem:[#allocation6 + $0x580] sm:$0xff] }
 0xda3   :  { %10973 = vmatprep.subr.bf16.mxu1 %v13148_v63  ;;  %v4243_v6 = vld [vmem:[#allocation6 + $0x5c0] sm:$0xff] }
 0xda4   :  { %v4251_v50 = vld [vmem:[#allocation6 + $0x600] sm:$0xff] }
 0xda5   :  { %v4259_v52 = vld [vmem:[#allocation6 + $0x640] sm:$0xff] }
 0xda6   :  { %10975 = vmatpush3.bf16.msra.mxu1 %v10974_v53  ;;  %v4108_v53 = vld [vmem:[#allocation6 + $0x188] sm:$0xff] }
 0xda7   :  { %10976 = vmatprep.subr.bf16.mxu1 %v13148_v63 }
 0xdaa   :  { %10978 = vmatpush3.bf16.msra.mxu1 %v10977_v57  ;;  %v4107_v57 = vld [vmem:[#allocation6 + $0x180] sm:$0xff] }
 0xdab   :  { %10979 = vmatprep.subr.bf16.mxu1 %v13148_v63  ;;  %v11020_v1 = vpack.c.bf16 %v4115_v58, %v4107_v57  ;;  %v4267_v57 = vld [vmem:[#allocation6 + $0x680] sm:$0xff] }
 0xdac   :  { %v4275_v58 = vld [vmem:[#allocation6 + $0x6c0] sm:$0xff] }
 0xdae   :  { %10981 = vmatpush3.bf16.msra.mxu1 %v10980_v60  ;;  %v4132_v60 = vld [vmem:[#allocation6 + $0x248] sm:$0xff] }
 0xdaf   :  { %10982 = vmatprep.subr.bf16.mxu1 %v13148_v63  ;;  %v11022_v3 = vpack.c.bf16 %v4132_v60, %v4124_v59  ;;  %v11060_v59 = vpack.c.bf16 %v4275_v58, %v4267_v57  ;;  %v4284_v60 = vld [vmem:[#allocation6 + $0x708] sm:$0xff]  ;;  %v4141_v57 = vld [vmem:[#allocation6 + $0x290] sm:$0xff] }
 0xdb0   :  { %v4149_v58 = vld [vmem:[#allocation6 + $0x2d0] sm:$0xff] }
 0xdb2   :  { %10984 = vmatpush3.bf16.msra.mxu1 %v10983_v8  ;;  %v4123_v8 = vld [vmem:[#allocation6 + $0x200] sm:$0xff] }
 0xdb3   :  { %10985 = vmatprep.subr.bf16.mxu1 %v13148_v63  ;;  %v11024_v62 = vpack.c.bf16 %v4131_v9, %v4123_v8  ;;  %v4283_v8 = vld [vmem:[#allocation6 + $0x700] sm:$0xff] }
 0xdb4   :  { %v4291_v9 = vld [vmem:[#allocation6 + $0x740] sm:$0xff] }
 0xdb6   :  { %10987 = vmatpush3.bf16.msra.mxu1 %v10986_v11  ;;  %v4148_v11 = vld [vmem:[#allocation6 + $0x2c8] sm:$0xff] }
 0xdb7   :  { %10988 = vmatprep.subr.bf16.mxu1 %v13148_v63  ;;  %v11026_v12 = vpack.c.bf16 %v4148_v11, %v4140_v10  ;;  %v4300_v10 = vld [vmem:[#allocation6 + $0x788] sm:$0xff]  ;;  %v11064_v11 = vpack.c.bf16 %v4291_v9, %v4283_v8  ;;  %v4157_v8 = vld [vmem:[#allocation6 + $0x310] sm:$0xff] }
 0xdb8   :  { %v4165_v9 = vld [vmem:[#allocation6 + $0x350] sm:$0xff] }
 0xdb9   :  { %10369 = vmatmul.mubr.msk.f32.vlgmr.msra.gmra.mrb[40].mxu1 %vm1847_vm0, %v3873_v14  ;;  %v4147_v14 = vld [vmem:[#allocation6 + $0x2c0] sm:$0xff] }
 0xdba   :  { %10990 = vmatpush3.bf16.msra.mxu1 %v10989_v13  ;;  %10395 = vmatprep.mubr.msk.f32.mxu1 %vm13149_vm5, %v14044_v43  ;;  %v4139_v13 = vld [vmem:[#allocation6 + $0x280] sm:$0xff]  ;;  %vm7177_vm5 = vcmask 1024  }
 0xdbb   :  { %10991 = vmatprep.subr.bf16.mxu1 %v13148_v63 }
 0xdbe   :  { %10993 = vmatpush3.bf16.msra.mxu1 %v10992_v17  ;;  %v11028_v17 = vpack.c.bf16 %v4147_v14, %v4139_v13  ;;  %v4307_v13 = vld [vmem:[#allocation6 + $0x7c0] sm:$0xff] }
 0xdbf   :  { %10994 = vmatprep.subr.bf16.mxu1 %v13148_v63 }
 0xdc2   :  { %10996 = vmatpush3.bf16.msra.mxu1 %v10995_v20  ;;  %v4163_v20 = vld [vmem:[#allocation6 + $0x340] sm:$0xff] }
 0xdc3   :  { %10997 = vmatprep.subr.bf16.mxu1 %v13148_v63 }
 0xdc6   :  { %10999 = vmatpush3.bf16.msra.mxu1 %v10998_v23  ;;  %v11032_v23 = vpack.c.bf16 %v4163_v20, %v4155_v19 }
 0xdc7   :  { %11000 = vmatprep.subr.bf16.mxu1 %v13148_v63 }
 0xdca   :  { %11002 = vmatpush3.bf16.msra.mxu1 %v11001_v26  ;;  %v4179_v26 = vld [vmem:[#allocation6 + $0x3c0] sm:$0xff] }
 0xdcb   :  { %11003 = vmatprep.subr.bf16.mxu1 %v13148_v63  ;;  %v4315_v63 = vld [vmem:[%s17376_s27] sm:$0x3] }
 0xdcc   :  { %9185 = vmatmul.mubr.msk.f32.vlgmr.msra.gmra.mrb[30].mxu0 %vm4328_vm4, %v4315_v63 }
 0xdcd   :  { %9187 = vmatpush1.msk.msra.mxu0 %vm4332_vm2, %v4317_v32  ;;  %4484 = vmatprep.mubr.f32.mxu0 %v14044_v43  ;;  %v4195_v32 = vld [vmem:[#allocation6 + $0x440] sm:$0xff] }
 0xdce   :  { %11005 = vmatpush3.bf16.msra.mxu1 %v11004_v29  ;;  %9189 = vmatprep.subr.msk.mxu0 %vm4332_vm2, %v4326_v37  ;;  %v11036_v29 = vpack.c.bf16 %v4179_v26, %v4171_v25  ;;  %v4203_v37 = vld [vmem:[#allocation6 + $0x480] sm:$0xff] }
 0xdd0   :  { %9188 = vmatmul.mubr.msk.f32.vlgmr.msra.gmra.mrb[32].mxu0 %vm4328_vm4, %v4315_v63 }
 0xdd1   :  { %10396 = vmatmul.mubr.msk.f32.vlgmr.msra.gmra.mrb[40].mxu1 %vm1847_vm0, %v3959_v30  ;;  %9190 = vmatpush1.msk.msra.mxu0 %vm4332_vm2, %v4318_v36  ;;  %v11038_v30 = vpack.c.bf16 %v4196_v0, %v4188_v28  ;;  %v11040_v36 = vpack.c.bf16 %v4195_v32, %v4187_v31  ;;  %v4078_v31 = vld [vmem:[#allocation6 + $0x98] sm:$0xff] }
 0xdd2   :  { %4555 = vmatprep.mubr.f32.mxu0 %v14044_v43  ;;  %9192 = vmatprep.subr.msk.mxu0 %vm4332_vm2, %v4327_v39  ;;  %v4220_v39 = vld [vmem:[#allocation6 + $0x508] sm:$0xff]  ;;  %v4086_v32 = vld [vmem:[#allocation6 + $0xd8] sm:$0xff] }
 0xdd4   :  { %9191 = vmatmul.mubr.msk.f32.vlgmr.msra.gmra.mrb[34].mxu0 %vm4328_vm4, %v4315_v63 }
 0xdd5   :  { %9193 = vmatpush1.msk.msra.mxu0 %vm4332_vm2, %v4319_v38  ;;  %4626 = vmatprep.mubr.f32.mxu0 %v14044_v43  ;;  %v11018_v43 = vpack.c.bf16 %v4116_v56, %v4108_v53  ;;  %v4211_v38 = vld [vmem:[#allocation6 + $0x4c0] sm:$0xff]  ;;  %v11056_v53 = vpack.c.bf16 %v4259_v52, %v4251_v50  ;;  %v4268_v56 = vld [vmem:[#allocation6 + $0x688] sm:$0xff]  ;;  %v4125_v50 = vld [vmem:[#allocation6 + $0x210] sm:$0xff] }
 0xdd6   :  { %11007 = vmatprep.subr.bf16.mxu0 %v11006_v42  ;;  %v11044_v41 = vpack.c.bf16 %v4211_v38, %v4203_v37  ;;  %v11046_v42 = vpack.c.bf16 %v4228_v40, %v4220_v39  ;;  %v4077_v37 = vld [vmem:[#allocation6 + $0x90] sm:$0xff]  ;;  %v4094_v39 = vld [vmem:[#allocation6 + $0x118] sm:$0xff] }
 0xdd7   :  { %v4085_v38 = vld [vmem:[#allocation6 + $0xd0] sm:$0xff]  ;;  %v4102_v40 = vld [vmem:[#allocation6 + $0x158] sm:$0xff] }
 0xdd8   :  { %9194 = vmatmul.mubr.msk.f32.vlgmr.msra.gmra.mrb[36].mxu0 %vm4328_vm4, %v4315_v63  ;;  %v11042_v63 = vpack.c.bf16 %v4212_v35, %v4204_v34  ;;  %v4133_v52 = vld [vmem:[#allocation6 + $0x250] sm:$0xff] }
 0xdd9   :  { %11009 = vmatpush1.bf16.msra.mxu0 %v11008_v46  ;;  %v11048_v46 = vpack.c.bf16 %v4227_v44, %v4219_v27  ;;  %v4093_v27 = vld [vmem:[#allocation6 + $0x110] sm:$0xff] }
 0xdda   :  { %11011 = vmatprep.subr.bf16.mxu0 %v11010_v61  ;;  %v11050_v61 = vpack.c.bf16 %v4244_v33, %v4236_v45  ;;  %v4101_v44 = vld [vmem:[#allocation6 + $0x150] sm:$0xff]  ;;  %v4110_v45 = vld [vmem:[#allocation6 + $0x198] sm:$0xff] }
 0xddb   :  { %v4118_v33 = vld [vmem:[#allocation6 + $0x1d8] sm:$0xff] }
 0xddd   :  { %11013 = vmatpush1.bf16.msra.mxu0 %v11012_v49  ;;  %v11052_v49 = vpack.c.bf16 %v4243_v6, %v4235_v2  ;;  %v4109_v2 = vld [vmem:[#allocation6 + $0x190] sm:$0xff] }
 0xdde   :  { %11015 = vmatprep.subr.bf16.mxu0 %v11014_v55  ;;  %v11054_v55 = vpack.c.bf16 %v4260_v48, %v4252_v47  ;;  %v4117_v6 = vld [vmem:[#allocation6 + $0x1d0] sm:$0xff]  ;;  %v4126_v47 = vld [vmem:[#allocation6 + $0x218] sm:$0xff] }
 0xddf   :  { %v4134_v48 = vld [vmem:[#allocation6 + $0x258] sm:$0xff] }
 0xde1   :  { %11017 = vmatpush1.bf16.msra.mxu0 %v11016_v54  ;;  %v4276_v54 = vld [vmem:[#allocation6 + $0x6c8] sm:$0xff] }
 0xde2   :  { %11019 = vmatprep.subr.bf16.mxu0 %v11018_v43  ;;  %v11058_v43 = vpack.c.bf16 %v4276_v54, %v4268_v56  ;;  %v4150_v56 = vld [vmem:[#allocation6 + $0x2d8] sm:$0xff]  ;;  %v11088_v54 = vpack.c.bf16 %v4133_v52, %v4125_v50 }
 0xde3   :  { %v5001_v50 = vld [vmem:[#allocation8 + $0x78] sm:$0xff] }
 0xde5   :  { %11021 = vmatpush1.bf16.msra.mxu0 %v11020_v1  ;;  %v4292_v1 = vld [vmem:[#allocation6 + $0x748] sm:$0xff] }
 0xde6   :  { %11023 = vmatprep.subr.bf16.mxu0 %v11022_v3  ;;  %v11062_v3 = vpack.c.bf16 %v4292_v1, %v4284_v60  ;;  %v4166_v60 = vld [vmem:[#allocation6 + $0x358] sm:$0xff]  ;;  %v11092_v1 = vpack.c.bf16 %v4149_v58, %v4141_v57  ;;  %v4237_v58 = vld [vmem:[#allocation6 + $0x590] sm:$0xff] }
 0xde9   :  { %11025 = vmatpush1.bf16.msra.mxu0 %v11024_v62  ;;  %v4308_v62 = vld [vmem:[#allocation6 + $0x7c8] sm:$0xff] }
 0xdea   :  { %11027 = vmatprep.subr.bf16.mxu0 %v11026_v12  ;;  %v4299_v12 = vld [vmem:[#allocation6 + $0x780] sm:$0xff]  ;;  %v11066_v15 = vpack.c.bf16 %v4308_v62, %v4300_v10  ;;  %v4174_v10 = vld [vmem:[#allocation6 + $0x398] sm:$0xff]  ;;  %v11096_v62 = vpack.c.bf16 %v4165_v9, %v4157_v8 }
 0xdeb   :  { %v11068_v19 = vpack.c.bf16 %v4307_v13, %v4299_v12  ;;  %v4173_v13 = vld [vmem:[#allocation6 + $0x390] sm:$0xff]  ;;  %v5005_v8 = vld [vmem:[#allocation8 + $0x98] sm:$0xff] }
 0xded   :  { %11029 = vmatpush1.bf16.msra.mxu0 %v11028_v17 }
 0xdee   :  { %11031 = vmatprep.subr.bf16.mxu0 %v11030_v18 }
 0xdf1   :  { %11033 = vmatpush1.bf16.msra.mxu0 %v11032_v23  ;;  %v4070_v23 = vld [vmem:[#allocation6 + $0x58] sm:$0xff] }
 0xdf2   :  { %11035 = vmatprep.subr.bf16.mxu0 %v11034_v24  ;;  %v11070_v24 = vpack.c.bf16 %v4070_v23, %v4062_v22 }
 0xdf5   :  { %11037 = vmatpush1.bf16.msra.mxu0 %v11036_v29 }
 0xdf6   :  { %11039 = vmatprep.subr.bf16.mxu0 %v11038_v30  ;;  %v4069_v30 = vld [vmem:[#allocation6 + $0x50] sm:$0xff] }
 0xdf9   :  { %11041 = vmatpush1.bf16.msra.mxu0 %v11040_v36 }
 0xdfa   :  { %11043 = vmatprep.subr.bf16.mxu0 %v11042_v63  ;;  %v11074_v63 = vpack.c.bf16 %v4086_v32, %v4078_v31  ;;  %v4990_v31 = vld [vmem:[#allocation8 + $0x20] sm:$0xff]  ;;  %v4992_v32 = vld [vmem:[#allocation8 + $0x30] sm:$0xff] }
 0xdfd   :  { %11045 = vmatpush1.bf16.msra.mxu0 %v11044_v41  ;;  %v11076_v41 = vpack.c.bf16 %v4085_v38, %v4077_v37  ;;  %v4205_v38 = vld [vmem:[#allocation6 + $0x490] sm:$0xff] }
 0xdfe   :  { %11047 = vmatprep.subr.bf16.mxu0 %v11046_v42  ;;  %v11078_v42 = vpack.c.bf16 %v4102_v40, %v4094_v39  ;;  %v4213_v39 = vld [vmem:[#allocation6 + $0x4d0] sm:$0xff]  ;;  %v4222_v40 = vld [vmem:[#allocation6 + $0x518] sm:$0xff] }
 0xe01   :  { %11049 = vmatpush1.bf16.msra.mxu0 %v11048_v46  ;;  %v11080_v46 = vpack.c.bf16 %v4101_v44, %v4093_v27  ;;  %v4997_v27 = vld [vmem:[#allocation8 + $0x58] sm:$0xff] }
 0xe02   :  { %11051 = vmatprep.subr.bf16.mxu0 %v11050_v61  ;;  %v11082_v61 = vpack.c.bf16 %v4118_v33, %v4110_v45  ;;  %v4994_v45 = vld [vmem:[#allocation8 + $0x40] sm:$0xff]  ;;  %v4996_v33 = vld [vmem:[#allocation8 + $0x50] sm:$0xff] }
 0xe05   :  { %11053 = vmatpush1.bf16.msra.mxu0 %v11052_v49  ;;  %v11084_v49 = vpack.c.bf16 %v4117_v6, %v4109_v2  ;;  %v4221_v6 = vld [vmem:[#allocation6 + $0x510] sm:$0xff] }
 0xe06   :  { %11055 = vmatprep.subr.bf16.mxu0 %v11054_v55  ;;  %v11086_v55 = vpack.c.bf16 %v4134_v48, %v4126_v47  ;;  %v4229_v47 = vld [vmem:[#allocation6 + $0x550] sm:$0xff]  ;;  %v4238_v48 = vld [vmem:[#allocation6 + $0x598] sm:$0xff] }
 0xe09   :  { %11057 = vmatpush1.bf16.msra.mxu0 %v11056_v53  ;;  %v4142_v53 = vld [vmem:[#allocation6 + $0x298] sm:$0xff] }
 0xe0a   :  { %11059 = vmatprep.subr.bf16.mxu0 %v11058_v43  ;;  %v11090_v43 = vpack.c.bf16 %v4150_v56, %v4142_v53  ;;  %v4998_v53 = vld [vmem:[#allocation8 + $0x60] sm:$0xff]  ;;  %v5000_v56 = vld [vmem:[#allocation8 + $0x70] sm:$0xff] }
 0xe0d   :  { %11061 = vmatpush1.bf16.msra.mxu0 %v11060_v59  ;;  %v4158_v59 = vld [vmem:[#allocation6 + $0x318] sm:$0xff] }
 0xe0e   :  { %11063 = vmatprep.subr.bf16.mxu0 %v11062_v3  ;;  %v11094_v3 = vpack.c.bf16 %v4166_v60, %v4158_v59  ;;  %v4245_v59 = vld [vmem:[#allocation6 + $0x5d0] sm:$0xff]  ;;  %v4254_v60 = vld [vmem:[#allocation6 + $0x618] sm:$0xff] }
 0xe11   :  { %11065 = vmatpush1.bf16.msra.mxu0 %v11064_v11  ;;  %v4182_v11 = vld [vmem:[#allocation6 + $0x3d8] sm:$0xff] }
 0xe12   :  { %11067 = vmatprep.subr.bf16.mxu0 %v11066_v15  ;;  %v11098_v12 = vpack.c.bf16 %v4182_v11, %v4174_v10  ;;  %v4190_v15 = vld [vmem:[#allocation6 + $0x418] sm:$0xff]  ;;  %v5002_v10 = vld [vmem:[#allocation8 + $0x80] sm:$0xff]  ;;  %v5004_v11 = vld [vmem:[#allocation8 + $0x90] sm:$0xff] }
 0xe15   :  { %11069 = vmatpush1.bf16.msra.mxu0 %v11068_v19 }
 0xe16   :  { %11071 = vmatprep.subr.bf16.mxu0 %v11070_v24 }
 0xea4   :  { %v4028_v14 = vpop.f32.mrb[40].mxu1 }
 0xea5   :  { %v12937_v17 = vadd.f32 %v13039_v16, %v4028_v14  ;;  %v10397_v18 = vpop.f32.mrb[41].mxu1  ;;  %v4181_v14 = vld [vmem:[#allocation6 + $0x3d0] sm:$0xff]  ;;  %v4198_v16 = vld [vmem:[#allocation6 + $0x458] sm:$0xff] }
 0xea6   :  { %v4989_v18 = vld [vmem:[#allocation8 + $0x18] sm:$0xff]  ;;  %v11100_v22 = vpack.c.bf16 %v4181_v14, %v4173_v13  ;;  %v11102_v24 = vpack.c.bf16 %v4198_v16, %v4190_v15  ;;  %v4253_v14 = vld [vmem:[#allocation6 + $0x610] sm:$0xff] }
 0xea7   :  { %v4033_v20 = vmax.f32 %v12937_v17, 0.0  ;;  %v4987_v17 = vld [vmem:[#allocation8 + $0x8] sm:$0xff]  ;;  %v4261_v15 = vld [vmem:[#allocation6 + $0x650] sm:$0xff]  ;;  %v4270_v16 = vld [vmem:[#allocation6 + $0x698] sm:$0xff] }
 0xea8   :  { %v11262_v19 = vpack.c.bf16 %v4989_v18, %v4987_v17  ;;  %v4278_v17 = vld [vmem:[#allocation6 + $0x6d8] sm:$0xff]  ;;  %v5007_v18 = vld [vmem:[#allocation8 + $0xa8] sm:$0xff] }
 0xea9   :  { %4034 = vst.msk [vmem:[#allocation5 + $0x1] sm:$0x1] %vm2103_vm1, %v4033_v20  ;;  %v4042_v21 = vrot.slane %v4033_v20, %v14669_v51  ;;  %v4061_v51 = vld [vmem:[#allocation6 + $0x10] sm:$0xff]  ;;  %v4986_v20 = vld [vmem:[#allocation8] sm:$0xff] }
 0xeaa   :  { %v11072_v36 = vpack.c.bf16 %v4069_v30, %v4061_v51  ;;  %11263 = vmatprep.subr.bf16.mxu1 %v11262_v19  ;;  %v4993_v51 = vld [vmem:[#allocation8 + $0x38] sm:$0xff] }
 0xeab   :  { %v9181_v25 = vrot.slane %v4042_v21, 9  ;;  %v4049_v26 = vcombine.high %v4042_v21, %v4042_v21  ;;  %v4988_v21 = vld [vmem:[#allocation8 + $0x10] sm:$0xff]  ;;  %v5009_v19 = vld [vmem:[#allocation8 + $0xb8] sm:$0xff] }
 0xeac   :  { %v11264_v23 = vpack.c.bf16 %v4988_v21, %v4986_v20  ;;  %v11282_v20 = vpack.c.bf16 %v5009_v19, %v5007_v18  ;;  %v5006_v21 = vld [vmem:[#allocation8 + $0xa0] sm:$0xff]  ;;  %v4104_v18 = vld [vmem:[#allocation6 + $0x168] sm:$0xff] }
 0xead   :  { %4045 = vrot.lane.b32.xlu0 %v9181_v25, %s17375_s12  ;;  %v9182_v28 = vrot.slane %v4049_v26, 9  ;;  %4051 = vst.msk [vmem:[#allocation5 + $0x3] sm:$0x1] %vm2103_vm1, %v4049_v26  ;;  %v4189_v25 = vld [vmem:[#allocation6 + $0x410] sm:$0xff]  ;;  %v5027_v19 = vld [vmem:[#allocation8 + $0x148] sm:$0xff] }
 0xeae   :  { %v4197_v26 = vld [vmem:[#allocation6 + $0x450] sm:$0xff]  ;;  %11265 = vmatpush1.bf16.msra.mxu1 %v11264_v23  ;;  %v11120_v23 = vpack.c.bf16 %v4261_v15, %v4253_v14  ;;  %v4079_v15 = vld [vmem:[#allocation6 + $0xa0] sm:$0xff] }
 0xeaf   :  { %4054 = vrot.lane.b32.xlu1 %v9182_v28, %s17375_s12  ;;  %v4206_v28 = vld [vmem:[#allocation6 + $0x498] sm:$0xff] }
 0xf1f   :  { %v4046_v0 = vpop.permute.xlu0 %4045 }
 0xf20   :  { %4048 = vst.msk [vmem:[#allocation5 + $0x1] sm:$0x1] %vm2118_vm3, %v4046_v0  ;;  %v4214_v0 = vld [vmem:[#allocation6 + $0x4d8] sm:$0xff] }
 0xf21   :  { %v4055_v29 = vpop.permute.xlu1 %4054  ;;  %v11106_v37 = vpack.c.bf16 %v4214_v0, %v4206_v28  ;;  %v4277_v28 = vld [vmem:[#allocation6 + $0x6d0] sm:$0xff]  ;;  %v4286_v0 = vld [vmem:[#allocation6 + $0x718] sm:$0xff] }
 0xf22   :  { %4057 = vst.msk [vmem:[#allocation5 + $0x3] sm:$0x1] %vm2118_vm3, %v4055_v29  ;;  %v4991_v29 = vld [vmem:[#allocation8 + $0x28] sm:$0xff] }
 0xf23   :  { %v11266_v30 = vpack.c.bf16 %v4993_v51, %v4991_v29  ;;  %v4294_v29 = vld [vmem:[#allocation6 + $0x758] sm:$0xff]  ;;  %v5011_v51 = vld [vmem:[#allocation8 + $0xc8] sm:$0xff] }
 0xf25   :  { %11267 = vmatprep.subr.bf16.mxu1 %v11266_v30  ;;  %v5013_v30 = vld [vmem:[#allocation8 + $0xd8] sm:$0xff] }
 0xf29   :  { %v15257_v34 = vld.sshfl [vmem:[#allocation5] sm:$0x33 pattern:$0x76325410] }
 0xf2a   :  { %v15261_v35 = vcombine.high %v15257_v34, %v15257_v34 }
 0xf2c   :  { %4708 = vmatprep.mubr.f32.mxu0 %v15261_v35 }
 0xf2d   :  { %4709 = vmatmul.mubr.f32.vlgmr.msra.gmra.mrb[30].mxu0 %v15257_v34 }
 0xf2e   :  { %11073 = vmatpush1.bf16.msra.mxu0 %v11072_v36  ;;  %4779 = vmatprep.mubr.f32.mxu0 %v15261_v35  ;;  %v11104_v36 = vpack.c.bf16 %v4197_v26, %v4189_v25  ;;  %v11122_v25 = vpack.c.bf16 %v4278_v17, %v4270_v16  ;;  %v4269_v26 = vld [vmem:[#allocation6 + $0x690] sm:$0xff]  ;;  %v4087_v16 = vld [vmem:[#allocation6 + $0xe0] sm:$0xff]  ;;  %v4096_v17 = vld [vmem:[#allocation6 + $0x128] sm:$0xff] }
 0xf2f   :  { %11075 = vmatprep.subr.bf16.mxu0 %v11074_v63  ;;  %v11268_v63 = vpack.c.bf16 %v4992_v32, %v4990_v31  ;;  %v11286_v31 = vpack.c.bf16 %v5013_v30, %v5011_v51  ;;  %v5010_v32 = vld [vmem:[#allocation8 + $0xc0] sm:$0xff]  ;;  %v5032_v51 = vld [vmem:[#allocation8 + $0x170] sm:$0xff]  ;;  %v11142_v30 = vpack.c.bf16 %v4104_v18, %v4096_v17  ;;  %v4176_v18 = vld [vmem:[#allocation6 + $0x3a8] sm:$0xff] }
 0xf30   :  { %v4167_v17 = vld [vmem:[#allocation6 + $0x360] sm:$0xff] }
 0xf31   :  { %11269 = vmatpush1.bf16.msra.mxu1 %v11268_v63  ;;  %v11124_v63 = vpack.c.bf16 %v4277_v28, %v4269_v26  ;;  %v11140_v26 = vpack.c.bf16 %v4087_v16, %v4079_v15  ;;  %v4159_v16 = vld [vmem:[#allocation6 + $0x320] sm:$0xff] }
 0xf32   :  { %11077 = vmatpush1.bf16.msra.mxu0 %v11076_v41  ;;  %v4230_v41 = vld [vmem:[#allocation6 + $0x558] sm:$0xff] }
 0xf33   :  { %11079 = vmatprep.subr.bf16.mxu0 %v11078_v42  ;;  %v4995_v42 = vld [vmem:[#allocation8 + $0x48] sm:$0xff]  ;;  %v11110_v2 = vpack.c.bf16 %v4230_v41, %v4222_v40  ;;  %v4293_v40 = vld [vmem:[#allocation6 + $0x750] sm:$0xff]  ;;  %v4302_v41 = vld [vmem:[#allocation6 + $0x798] sm:$0xff] }
 0xf34   :  { %v11270_v44 = vpack.c.bf16 %v4997_v27, %v4995_v42  ;;  %v4310_v42 = vld [vmem:[#allocation6 + $0x7d8] sm:$0xff]  ;;  %v5015_v27 = vld [vmem:[#allocation8 + $0xe8] sm:$0xff] }
 0xf36   :  { %11081 = vmatpush1.bf16.msra.mxu0 %v11080_v46  ;;  %v11108_v46 = vpack.c.bf16 %v4213_v39, %v4205_v38  ;;  %11271 = vmatprep.subr.bf16.mxu1 %v11270_v44  ;;  %v11126_v38 = vpack.c.bf16 %v4294_v29, %v4286_v0  ;;  %v4285_v39 = vld [vmem:[#allocation6 + $0x710] sm:$0xff]  ;;  %v5017_v44 = vld [vmem:[#allocation8 + $0xf8] sm:$0xff]  ;;  %v5030_v29 = vld [vmem:[#allocation8 + $0x160] sm:$0xff] }
 0xf37   :  { %11083 = vmatprep.subr.bf16.mxu0 %v11082_v61  ;;  %v11272_v61 = vpack.c.bf16 %v4996_v33, %v4994_v45  ;;  %v11290_v45 = vpack.c.bf16 %v5017_v44, %v5015_v27  ;;  %v5014_v33 = vld [vmem:[#allocation8 + $0xe0] sm:$0xff]  ;;  %v5033_v0 = vld [vmem:[#allocation8 + $0x178] sm:$0xff]  ;;  %v5039_v44 = vld [vmem:[#allocation8 + $0x1a8] sm:$0xff] }
 0xf39   :  { %11273 = vmatpush1.bf16.msra.mxu1 %v11272_v61  ;;  %v11128_v61 = vpack.c.bf16 %v4293_v40, %v4285_v39  ;;  %v11308_v39 = vpack.c.bf16 %v5032_v51, %v5030_v29  ;;  %v4183_v29 = vld [vmem:[#allocation6 + $0x3e0] sm:$0xff]  ;;  %v4192_v51 = vld [vmem:[#allocation6 + $0x428] sm:$0xff] }
 0xf3a   :  { %11085 = vmatpush1.bf16.msra.mxu0 %v11084_v49  ;;  %v4246_v49 = vld [vmem:[#allocation6 + $0x5d8] sm:$0xff] }
 0xf3b   :  { %11087 = vmatprep.subr.bf16.mxu0 %v11086_v55  ;;  %v4999_v55 = vld [vmem:[#allocation8 + $0x68] sm:$0xff]  ;;  %v11114_v57 = vpack.c.bf16 %v4246_v49, %v4238_v48  ;;  %v4309_v48 = vld [vmem:[#allocation6 + $0x7d0] sm:$0xff] }
 0xf3c   :  { %v11274_v52 = vpack.c.bf16 %v5001_v50, %v4999_v55  ;;  %v4064_v49 = vld [vmem:[#allocation6 + $0x28] sm:$0xff] }
 0xf3d   :  { %v4072_v55 = vld [vmem:[#allocation6 + $0x68] sm:$0xff] }
 0xf3e   :  { %11089 = vmatpush1.bf16.msra.mxu0 %v11088_v54  ;;  %v11112_v54 = vpack.c.bf16 %v4229_v47, %v4221_v6  ;;  %11275 = vmatprep.subr.bf16.mxu1 %v11274_v52  ;;  %v11130_v6 = vpack.c.bf16 %v4310_v42, %v4302_v41  ;;  %v4301_v47 = vld [vmem:[#allocation6 + $0x790] sm:$0xff]  ;;  %v5019_v50 = vld [vmem:[#allocation8 + $0x108] sm:$0xff]  ;;  %v5021_v52 = vld [vmem:[#allocation8 + $0x118] sm:$0xff] }
 0xf3f   :  { %11091 = vmatprep.subr.bf16.mxu0 %v11090_v43  ;;  %v11276_v43 = vpack.c.bf16 %v5000_v56, %v4998_v53  ;;  %v11294_v53 = vpack.c.bf16 %v5021_v52, %v5019_v50  ;;  %v5018_v56 = vld [vmem:[#allocation8 + $0x100] sm:$0xff]  ;;  %v5036_v42 = vld [vmem:[#allocation8 + $0x190] sm:$0xff]  ;;  %v5043_v52 = vld [vmem:[#allocation8 + $0x1c8] sm:$0xff] }
 0xf40   :  { %v5034_v41 = vld [vmem:[#allocation8 + $0x180] sm:$0xff] }
 0xf41   :  { %11277 = vmatpush1.bf16.msra.mxu1 %v11276_v43  ;;  %v11132_v43 = vpack.c.bf16 %v4309_v48, %v4301_v47  ;;  %v11312_v47 = vpack.c.bf16 %v5036_v42, %v5034_v41  ;;  %v4216_v41 = vld [vmem:[#allocation6 + $0x4e8] sm:$0xff] }
 0xf42   :  { %11093 = vmatpush1.bf16.msra.mxu0 %v11092_v1  ;;  %v4262_v1 = vld [vmem:[#allocation6 + $0x658] sm:$0xff] }
 0xf43   :  { %11095 = vmatprep.subr.bf16.mxu0 %v11094_v3  ;;  %v5003_v3 = vld [vmem:[#allocation8 + $0x88] sm:$0xff]  ;;  %v11118_v13 = vpack.c.bf16 %v4262_v1, %v4254_v60  ;;  %v4071_v60 = vld [vmem:[#allocation6 + $0x60] sm:$0xff] }
 0xf44   :  { %v11278_v9 = vpack.c.bf16 %v5005_v8, %v5003_v3  ;;  %v4080_v1 = vld [vmem:[#allocation6 + $0xa8] sm:$0xff] }
 0xf45   :  { %v4088_v3 = vld [vmem:[#allocation6 + $0xe8] sm:$0xff] }
 0xf46   :  { %11097 = vmatpush1.bf16.msra.mxu0 %v11096_v62  ;;  %v11116_v62 = vpack.c.bf16 %v4245_v59, %v4237_v58  ;;  %11279 = vmatprep.subr.bf16.mxu1 %v11278_v9  ;;  %v11134_v58 = vpack.c.bf16 %v4072_v55, %v4064_v49  ;;  %v4063_v59 = vld [vmem:[#allocation6 + $0x20] sm:$0xff]  ;;  %v5023_v8 = vld [vmem:[#allocation8 + $0x128] sm:$0xff]  ;;  %v5025_v9 = vld [vmem:[#allocation8 + $0x138] sm:$0xff]  ;;  %v11138_v14 = vpack.c.bf16 %v4088_v3, %v4080_v1 }
 0xf47   :  { %11099 = vmatprep.subr.bf16.mxu0 %v11098_v12  ;;  %v11280_v12 = vpack.c.bf16 %v5004_v11, %v5002_v10  ;;  %v11298_v10 = vpack.c.bf16 %v5025_v9, %v5023_v8  ;;  %v5022_v11 = vld [vmem:[#allocation8 + $0x120] sm:$0xff]  ;;  %v5040_v55 = vld [vmem:[#allocation8 + $0x1b0] sm:$0xff] }
 0xf48   :  { %v5038_v49 = vld [vmem:[#allocation8 + $0x1a0] sm:$0xff]  ;;  %v5044_v3 = vld [vmem:[#allocation8 + $0x1d0] sm:$0xff] }
 0xf49   :  { %11281 = vmatpush1.bf16.msra.mxu1 %v11280_v12  ;;  %v11136_v12 = vpack.c.bf16 %v4071_v60, %v4063_v59  ;;  %v11316_v59 = vpack.c.bf16 %v5040_v55, %v5038_v49  ;;  %v5042_v1 = vld [vmem:[#allocation8 + $0x1c0] sm:$0xff]  ;;  %v4248_v49 = vld [vmem:[#allocation6 + $0x5e8] sm:$0xff] }
 0xf4a   :  { %11101 = vmatpush1.bf16.msra.mxu0 %v11100_v22  ;;  %v5008_v22 = vld [vmem:[#allocation8 + $0xb0] sm:$0xff]  ;;  %11283 = vmatprep.subr.bf16.mxu1 %v11282_v20  ;;  %v5029_v20 = vld [vmem:[#allocation8 + $0x158] sm:$0xff] }
 0xf4b   :  { %11103 = vmatprep.subr.bf16.mxu0 %v11102_v24  ;;  %v11284_v24 = vpack.c.bf16 %v5008_v22, %v5006_v21  ;;  %v4095_v21 = vld [vmem:[#allocation6 + $0x120] sm:$0xff]  ;;  %v11302_v22 = vpack.c.bf16 %v5029_v20, %v5027_v19  ;;  %v4184_v19 = vld [vmem:[#allocation6 + $0x3e8] sm:$0xff] }
 0xf4c   :  { %v5047_v20 = vld [vmem:[#allocation8 + $0x1e8] sm:$0xff] }
 0xf4d   :  { %11285 = vmatpush1.bf16.msra.mxu1 %v11284_v24  ;;  %v5028_v24 = vld [vmem:[#allocation8 + $0x150] sm:$0xff] }
 0xf4e   :  { %11105 = vmatpush1.bf16.msra.mxu0 %v11104_v36  ;;  %v5012_v36 = vld [vmem:[#allocation8 + $0xd0] sm:$0xff]  ;;  %11287 = vmatprep.subr.bf16.mxu1 %v11286_v31  ;;  %v4103_v31 = vld [vmem:[#allocation6 + $0x160] sm:$0xff] }
 0xf4f   :  { %11107 = vmatprep.subr.bf16.mxu0 %v11106_v37  ;;  %v11288_v37 = vpack.c.bf16 %v5012_v36, %v5010_v32  ;;  %v5035_v36 = vld [vmem:[#allocation8 + $0x188] sm:$0xff]  ;;  %v11144_v27 = vpack.c.bf16 %v4103_v31, %v4095_v21  ;;  %v5049_v21 = vld [vmem:[#allocation8 + $0x1f8] sm:$0xff] }
 0xf50   :  { %v5051_v31 = vld [vmem:[#allocation8 + $0x208] sm:$0xff] }
 0xf51   :  { %11289 = vmatpush1.bf16.msra.mxu1 %v11288_v37  ;;  %v4112_v37 = vld [vmem:[#allocation6 + $0x1a8] sm:$0xff] }
 0xf52   :  { %11109 = vmatpush1.bf16.msra.mxu0 %v11108_v46  ;;  %v5016_v46 = vld [vmem:[#allocation8 + $0xf0] sm:$0xff]  ;;  %11291 = vmatprep.subr.bf16.mxu1 %v11290_v45  ;;  %v5041_v45 = vld [vmem:[#allocation8 + $0x1b8] sm:$0xff] }
 0xf53   :  { %11111 = vmatprep.subr.bf16.mxu0 %v11110_v2  ;;  %v11292_v2 = vpack.c.bf16 %v5016_v46, %v5014_v33  ;;  %v4111_v46 = vld [vmem:[#allocation6 + $0x1a0] sm:$0xff]  ;;  %v11314_v48 = vpack.c.bf16 %v5041_v45, %v5039_v44 }
 0xf54   :  { %v4207_v44 = vld [vmem:[#allocation6 + $0x4a0] sm:$0xff] }
 0xf55   :  { %11293 = vmatpush1.bf16.msra.mxu1 %v11292_v2  ;;  %v4128_v2 = vld [vmem:[#allocation6 + $0x228] sm:$0xff]  ;;  %v4215_v45 = vld [vmem:[#allocation6 + $0x4e0] sm:$0xff] }
 0xf56   :  { %11113 = vmatpush1.bf16.msra.mxu0 %v11112_v54  ;;  %v5020_v54 = vld [vmem:[#allocation8 + $0x110] sm:$0xff]  ;;  %11295 = vmatprep.subr.bf16.mxu1 %v11294_v53  ;;  %v5045_v53 = vld [vmem:[#allocation8 + $0x1d8] sm:$0xff] }
 0xf57   :  { %11115 = vmatprep.subr.bf16.mxu0 %v11114_v57  ;;  %v11296_v57 = vpack.c.bf16 %v5020_v54, %v5018_v56  ;;  %v4127_v54 = vld [vmem:[#allocation6 + $0x220] sm:$0xff]  ;;  %v11318_v60 = vpack.c.bf16 %v5045_v53, %v5043_v52 }
 0xf58   :  { %v4239_v52 = vld [vmem:[#allocation6 + $0x5a0] sm:$0xff] }
 0xf59   :  { %11297 = vmatpush1.bf16.msra.mxu1 %v11296_v57  ;;  %v4144_v57 = vld [vmem:[#allocation6 + $0x2a8] sm:$0xff]  ;;  %v4247_v53 = vld [vmem:[#allocation6 + $0x5e0] sm:$0xff] }
 0xf5a   :  { %11117 = vmatpush1.bf16.msra.mxu0 %v11116_v62  ;;  %v5024_v62 = vld [vmem:[#allocation8 + $0x130] sm:$0xff]  ;;  %11299 = vmatprep.subr.bf16.mxu1 %v11298_v10  ;;  %v4143_v10 = vld [vmem:[#allocation6 + $0x2a0] sm:$0xff] }
 0xf5b   :  { %11119 = vmatprep.subr.bf16.mxu0 %v11118_v13  ;;  %v11300_v13 = vpack.c.bf16 %v5024_v62, %v5022_v11  ;;  %v4151_v11 = vld [vmem:[#allocation6 + $0x2e0] sm:$0xff]  ;;  %v4160_v62 = vld [vmem:[#allocation6 + $0x328] sm:$0xff] }
 0xf5d   :  { %11301 = vmatpush1.bf16.msra.mxu1 %v11300_v13  ;;  %v11320_v13 = vpack.c.bf16 %v5044_v3, %v5042_v1  ;;  %v4280_v1 = vld [vmem:[#allocation6 + $0x6e8] sm:$0xff] }
 0xf5e   :  { %11121 = vmatpush1.bf16.msra.mxu0 %v11120_v23  ;;  %v5026_v23 = vld [vmem:[#allocation8 + $0x140] sm:$0xff]  ;;  %11303 = vmatprep.subr.bf16.mxu1 %v11302_v22  ;;  %v11322_v22 = vpack.c.bf16 %v5049_v21, %v5047_v20 }
 0xf5f   :  { %11123 = vmatprep.subr.bf16.mxu0 %v11122_v25  ;;  %v5031_v25 = vld [vmem:[#allocation8 + $0x168] sm:$0xff]  ;;  %v11304_v28 = vpack.c.bf16 %v5028_v24, %v5026_v23  ;;  %v5046_v23 = vld [vmem:[#allocation8 + $0x1e0] sm:$0xff]  ;;  %v5048_v24 = vld [vmem:[#allocation8 + $0x1f0] sm:$0xff] }
 0xf60   :  { %v11306_v32 = vpack.c.bf16 %v5033_v0, %v5031_v25  ;;  %v11160_v25 = vpack.c.bf16 %v4167_v17, %v4159_v16  ;;  %v4175_v0 = vld [vmem:[#allocation6 + $0x3a0] sm:$0xff]  ;;  %v4304_v16 = vld [vmem:[#allocation6 + $0x7a8] sm:$0xff] }
 0xf61   :  { %11305 = vmatpush1.bf16.msra.mxu1 %v11304_v28  ;;  %v11162_v28 = vpack.c.bf16 %v4184_v19, %v4176_v18  ;;  %v4312_v17 = vld [vmem:[#allocation6 + $0x7e8] sm:$0xff]  ;;  %v4303_v20 = vld [vmem:[#allocation6 + $0x7a0] sm:$0xff] }
 0xf62   :  { %11125 = vmatpush1.bf16.msra.mxu0 %v11124_v63  ;;  %v5037_v63 = vld [vmem:[#allocation8 + $0x198] sm:$0xff]  ;;  %11307 = vmatprep.subr.bf16.mxu1 %v11306_v32  ;;  %v11194_v19 = vpack.c.bf16 %v4312_v17, %v4304_v16  ;;  %v4311_v21 = vld [vmem:[#allocation6 + $0x7e0] sm:$0xff] }
 0xf63   :  { %11127 = vmatprep.subr.bf16.mxu0 %v11126_v38  ;;  %v4120_v38 = vld [vmem:[#allocation6 + $0x1e8] sm:$0xff]  ;;  %v11310_v40 = vpack.c.bf16 %v5037_v63, %v5035_v36  ;;  %v5053_v32 = vld [vmem:[#allocation8 + $0x218] sm:$0xff]  ;;  %v11164_v63 = vpack.c.bf16 %v4183_v29, %v4175_v0 }
 0xf64   :  { %v11146_v33 = vpack.c.bf16 %v4120_v38, %v4112_v37  ;;  %v11326_v36 = vpack.c.bf16 %v5053_v32, %v5051_v31  ;;  %v4191_v38 = vld [vmem:[#allocation6 + $0x420] sm:$0xff]  ;;  %v4082_v0 = vld [vmem:[#allocation6 + $0xb8] sm:$0xff]  ;;  %v4081_v31 = vld [vmem:[#allocation6 + $0xb0] sm:$0xff] }
 0xf65   :  { %11309 = vmatpush1.bf16.msra.mxu1 %v11308_v39  ;;  %v4199_v39 = vld [vmem:[#allocation6 + $0x460] sm:$0xff]  ;;  %v4090_v29 = vld [vmem:[#allocation6 + $0xf8] sm:$0xff]  ;;  %v4089_v32 = vld [vmem:[#allocation6 + $0xf0] sm:$0xff] }
 0xf66   :  { %11129 = vmatpush1.bf16.msra.mxu0 %v11128_v61  ;;  %v4119_v61 = vld [vmem:[#allocation6 + $0x1e0] sm:$0xff]  ;;  %11311 = vmatprep.subr.bf16.mxu1 %v11310_v40  ;;  %v4208_v40 = vld [vmem:[#allocation6 + $0x4a8] sm:$0xff]  ;;  %v11168_v42 = vpack.c.bf16 %v4199_v39, %v4191_v38  ;;  %v4097_v39 = vld [vmem:[#allocation6 + $0x130] sm:$0xff] }
 0xf67   :  { %11131 = vmatprep.subr.bf16.mxu0 %v11130_v6  ;;  %v4136_v6 = vld [vmem:[#allocation6 + $0x268] sm:$0xff]  ;;  %v11148_v50 = vpack.c.bf16 %v4119_v61, %v4111_v46  ;;  %v11172_v61 = vpack.c.bf16 %v4215_v45, %v4207_v44  ;;  %v4113_v45 = vld [vmem:[#allocation6 + $0x1b0] sm:$0xff]  ;;  %v4218_v16 = vld [vmem:[#allocation6 + $0x4f8] sm:$0xff] }
 0xf68   :  { %v11150_v56 = vpack.c.bf16 %v4136_v6, %v4128_v2  ;;  %v4232_v46 = vld [vmem:[#allocation6 + $0x568] sm:$0xff]  ;;  %v4223_v6 = vld [vmem:[#allocation6 + $0x520] sm:$0xff] }
 0xf69   :  { %11313 = vmatpush1.bf16.msra.mxu1 %v11312_v47  ;;  %v4231_v47 = vld [vmem:[#allocation6 + $0x560] sm:$0xff] }
 0xf6a   :  { %11133 = vmatpush1.bf16.msra.mxu0 %v11132_v43  ;;  %v4135_v43 = vld [vmem:[#allocation6 + $0x260] sm:$0xff]  ;;  %11315 = vmatprep.subr.bf16.mxu1 %v11314_v48  ;;  %v4240_v48 = vld [vmem:[#allocation6 + $0x5a8] sm:$0xff]  ;;  %v11176_v55 = vpack.c.bf16 %v4231_v47, %v4223_v6  ;;  %v4137_v6 = vld [vmem:[#allocation6 + $0x270] sm:$0xff] }
 0xf6b   :  { %11135 = vmatprep.subr.bf16.mxu0 %v11134_v58  ;;  %v4152_v58 = vld [vmem:[#allocation6 + $0x2e8] sm:$0xff]  ;;  %v11152_v8 = vpack.c.bf16 %v4135_v43, %v4127_v54  ;;  %v11180_v43 = vpack.c.bf16 %v4247_v53, %v4239_v52  ;;  %v4146_v47 = vld [vmem:[#allocation6 + $0x2b8] sm:$0xff]  ;;  %v4153_v52 = vld [vmem:[#allocation6 + $0x2f0] sm:$0xff] }
 0xf6c   :  { %v11154_v9 = vpack.c.bf16 %v4152_v58, %v4144_v57  ;;  %v4264_v54 = vld [vmem:[#allocation6 + $0x668] sm:$0xff]  ;;  %v4255_v58 = vld [vmem:[#allocation6 + $0x620] sm:$0xff]  ;;  %v4162_v53 = vld [vmem:[#allocation6 + $0x338] sm:$0xff] }
 0xf6d   :  { %4780 = vmatmul.mubr.f32.vlgmr.msra.gmra.mrb[32].mxu0 %v15257_v34  ;;  %11317 = vmatpush1.bf16.msra.mxu1 %v11316_v59  ;;  %v4263_v59 = vld [vmem:[#allocation6 + $0x660] sm:$0xff] }
 0xf6e   :  { %11137 = vmatpush1.bf16.msra.mxu0 %v11136_v12  ;;  %4850 = vmatprep.mubr.f32.mxu0 %v15261_v35  ;;  %v4168_v12 = vld [vmem:[#allocation6 + $0x368] sm:$0xff]  ;;  %v11184_v3 = vpack.c.bf16 %v4263_v59, %v4255_v58  ;;  %v4169_v58 = vld [vmem:[#allocation6 + $0x370] sm:$0xff]  ;;  %v4178_v59 = vld [vmem:[#allocation6 + $0x3b8] sm:$0xff] }
 0xf6f   :  { %11139 = vmatprep.subr.bf16.mxu0 %v11138_v14  ;;  %11319 = vmatprep.subr.bf16.mxu1 %v11318_v60  ;;  %v11156_v14 = vpack.c.bf16 %v4151_v11, %v4143_v10  ;;  %v11158_v15 = vpack.c.bf16 %v4168_v12, %v4160_v62  ;;  %v4272_v60 = vld [vmem:[#allocation6 + $0x6a8] sm:$0xff]  ;;  %v4279_v10 = vld [vmem:[#allocation6 + $0x6e0] sm:$0xff] }
 0xf70   :  { %v4288_v11 = vld [vmem:[#allocation6 + $0x728] sm:$0xff] }
 0xf71   :  { %11321 = vmatpush1.bf16.msra.mxu1 %v11320_v13  ;;  %v4296_v62 = vld [vmem:[#allocation6 + $0x768] sm:$0xff] }
 0xf72   :  { %11141 = vmatpush1.bf16.msra.mxu0 %v11140_v26  ;;  %v11324_v26 = vpack.c.bf16 %v5048_v24, %v5046_v23  ;;  %11323 = vmatprep.subr.bf16.mxu1 %v11322_v22  ;;  %v11190_v13 = vpack.c.bf16 %v4296_v62, %v4288_v11  ;;  %v4066_v22 = vld [vmem:[#allocation6 + $0x38] sm:$0xff]  ;;  %v11196_v24 = vpack.c.bf16 %v4311_v21, %v4303_v20  ;;  %v4217_v20 = vld [vmem:[#allocation6 + $0x4f0] sm:$0xff] }
 0xf73   :  { %11143 = vmatprep.subr.bf16.mxu0 %v11142_v30  ;;  %v4200_v30 = vld [vmem:[#allocation6 + $0x468] sm:$0xff]  ;;  %v4074_v23 = vld [vmem:[#allocation6 + $0x78] sm:$0xff] }
 0xf74   :  { %v11166_v37 = vpack.c.bf16 %v4200_v30, %v4192_v51  ;;  %v11202_v30 = vpack.c.bf16 %v4090_v29, %v4082_v0  ;;  %v4202_v11 = vld [vmem:[#allocation6 + $0x478] sm:$0xff] }
 0xf75   :  { %11325 = vmatpush1.bf16.msra.mxu1 %v11324_v26  ;;  %v4065_v26 = vld [vmem:[#allocation6 + $0x30] sm:$0xff]  ;;  %v4226_v21 = vld [vmem:[#allocation6 + $0x538] sm:$0xff] }
 0xf76   :  { %11145 = vmatpush1.bf16.msra.mxu0 %v11144_v27  ;;  %11327 = vmatprep.subr.bf16.mxu1 %v11326_v36  ;;  %v11170_v27 = vpack.c.bf16 %v4216_v41, %v4208_v40  ;;  %v4098_v36 = vld [vmem:[#allocation6 + $0x138] sm:$0xff]  ;;  %v4105_v40 = vld [vmem:[#allocation6 + $0x170] sm:$0xff] }
 0xf77   :  { %11147 = vmatprep.subr.bf16.mxu0 %v11146_v33  ;;  %v4224_v33 = vld [vmem:[#allocation6 + $0x528] sm:$0xff]  ;;  %v4114_v41 = vld [vmem:[#allocation6 + $0x1b8] sm:$0xff] }
 0xf78   :  { %v11174_v2 = vpack.c.bf16 %v4232_v46, %v4224_v33  ;;  %v4121_v33 = vld [vmem:[#allocation6 + $0x1f0] sm:$0xff]  ;;  %v4130_v46 = vld [vmem:[#allocation6 + $0x238] sm:$0xff] }
 0xf79   :  { %v4250_v0 = vld [vmem:[#allocation6 + $0x5f8] sm:$0xff] }
 0xf7a   :  { %11149 = vmatpush1.bf16.msra.mxu0 %v11148_v50  ;;  %v11178_v50 = vpack.c.bf16 %v4248_v49, %v4240_v48  ;;  %v4154_v48 = vld [vmem:[#allocation6 + $0x2f8] sm:$0xff] }
 0xf7b   :  { %11151 = vmatprep.subr.bf16.mxu0 %v11150_v56  ;;  %v4256_v56 = vld [vmem:[#allocation6 + $0x628] sm:$0xff] }
 0xf7c   :  { %v11182_v57 = vpack.c.bf16 %v4264_v54, %v4256_v56  ;;  %v4170_v56 = vld [vmem:[#allocation6 + $0x378] sm:$0xff] }
 0xf7e   :  { %11153 = vmatpush1.bf16.msra.mxu0 %v11152_v8  ;;  %v11186_v8 = vpack.c.bf16 %v4280_v1, %v4272_v60  ;;  %v4186_v60 = vld [vmem:[#allocation6 + $0x3f8] sm:$0xff] }
 0xf7f   :  { %11155 = vmatprep.subr.bf16.mxu0 %v11154_v9  ;;  %v4271_v9 = vld [vmem:[#allocation6 + $0x6a0] sm:$0xff] }
 0xf80   :  { %v11188_v12 = vpack.c.bf16 %v4279_v10, %v4271_v9  ;;  %v4185_v9 = vld [vmem:[#allocation6 + $0x3f0] sm:$0xff]  ;;  %v4194_v10 = vld [vmem:[#allocation6 + $0x438] sm:$0xff] }
 0xf82   :  { %11157 = vmatpush1.bf16.msra.mxu0 %v11156_v14  ;;  %v4287_v14 = vld [vmem:[#allocation6 + $0x720] sm:$0xff] }
 0xf83   :  { %11159 = vmatprep.subr.bf16.mxu0 %v11158_v15  ;;  %v4295_v15 = vld [vmem:[#allocation6 + $0x760] sm:$0xff] }
 0xf84   :  { %v11192_v18 = vpack.c.bf16 %v4295_v15, %v4287_v14  ;;  %v4201_v14 = vld [vmem:[#allocation6 + $0x470] sm:$0xff]  ;;  %v4210_v15 = vld [vmem:[#allocation6 + $0x4b8] sm:$0xff] }
 0xf86   :  { %11161 = vmatpush1.bf16.msra.mxu0 %v11160_v25  ;;  %v11198_v25 = vpack.c.bf16 %v4074_v23, %v4066_v22  ;;  %v4234_v22 = vld [vmem:[#allocation6 + $0x578] sm:$0xff] }
 0xf87   :  { %11163 = vmatprep.subr.bf16.mxu0 %v11162_v28  ;;  %v4073_v28 = vld [vmem:[#allocation6 + $0x70] sm:$0xff] }
 0xf88   :  { %v11200_v51 = vpack.c.bf16 %v4073_v28, %v4065_v26  ;;  %v4233_v26 = vld [vmem:[#allocation6 + $0x570] sm:$0xff]  ;;  %v4242_v28 = vld [vmem:[#allocation6 + $0x5b8] sm:$0xff] }
 0xf8a   :  { %11165 = vmatpush1.bf16.msra.mxu0 %v11164_v63  ;;  %v4106_v63 = vld [vmem:[#allocation6 + $0x178] sm:$0xff] }
 0xf8b   :  { %11167 = vmatprep.subr.bf16.mxu0 %v11166_v37  ;;  %v11204_v37 = vpack.c.bf16 %v4089_v32, %v4081_v31  ;;  %v11206_v38 = vpack.c.bf16 %v4106_v63, %v4098_v36  ;;  %v4249_v31 = vld [vmem:[#allocation6 + $0x5f0] sm:$0xff]  ;;  %v4258_v32 = vld [vmem:[#allocation6 + $0x638] sm:$0xff] }
 0xf8c   :  { %v4266_v36 = vld [vmem:[#allocation6 + $0x678] sm:$0xff] }
 0xf8e   :  { %11169 = vmatpush1.bf16.msra.mxu0 %v11168_v42  ;;  %v4122_v42 = vld [vmem:[#allocation6 + $0x1f8] sm:$0xff] }
 0xf8f   :  { %11171 = vmatprep.subr.bf16.mxu0 %v11170_v27  ;;  %v11208_v27 = vpack.c.bf16 %v4105_v40, %v4097_v39  ;;  %v11210_v44 = vpack.c.bf16 %v4122_v42, %v4114_v41  ;;  %v4265_v39 = vld [vmem:[#allocation6 + $0x670] sm:$0xff]  ;;  %v4274_v40 = vld [vmem:[#allocation6 + $0x6b8] sm:$0xff] }
 0xf90   :  { %v4282_v41 = vld [vmem:[#allocation6 + $0x6f8] sm:$0xff] }
 0xf92   :  { %11173 = vmatpush1.bf16.msra.mxu0 %v11172_v61  ;;  %v4138_v61 = vld [vmem:[#allocation6 + $0x278] sm:$0xff] }
 0xf93   :  { %11175 = vmatprep.subr.bf16.mxu0 %v11174_v2  ;;  %v11214_v2 = vpack.c.bf16 %v4138_v61, %v4130_v46  ;;  %v4298_v46 = vld [vmem:[#allocation6 + $0x778] sm:$0xff] }
 0xf96   :  { %11177 = vmatpush1.bf16.msra.mxu0 %v11176_v55  ;;  %v11218_v55 = vpack.c.bf16 %v4154_v48, %v4146_v47  ;;  %v4314_v47 = vld [vmem:[#allocation6 + $0x7f8] sm:$0xff] }
 0xf97   :  { %11179 = vmatprep.subr.bf16.mxu0 %v11178_v50  ;;  %v4145_v50 = vld [vmem:[#allocation6 + $0x2b0] sm:$0xff] }
 0xf98   :  { %v11220_v54 = vpack.c.bf16 %v4153_v52, %v4145_v50  ;;  %v4313_v50 = vld [vmem:[#allocation6 + $0x7f0] sm:$0xff] }
 0xf9a   :  { %11181 = vmatpush1.bf16.msra.mxu0 %v11180_v43  ;;  %v11222_v43 = vpack.c.bf16 %v4170_v56, %v4162_v53  ;;  %v13040_v53 = vld.sshfl [vmem:[#allocation5] sm:$0x33 pattern:$0x76325410] }
 0xf9b   :  { %11183 = vmatprep.subr.bf16.mxu0 %v11182_v57  ;;  %v4161_v57 = vld [vmem:[#allocation6 + $0x330] sm:$0xff]  ;;  %v15273_v56 = vld [vmem:[%s17333_s14] sm:$0xff] }
 0xf9c   :  { %v11224_v1 = vpack.c.bf16 %v4169_v58, %v4161_v57 }
 0xf9e   :  { %11185 = vmatpush1.bf16.msra.mxu0 %v11184_v3  ;;  %v11226_v3 = vpack.c.bf16 %v4186_v60, %v4178_v59  ;;  %v5050_v60 = vld [vmem:[#allocation8 + $0x200] sm:$0xff] }
 0xf9f   :  { %11187 = vmatprep.subr.bf16.mxu0 %v11186_v8  ;;  %v4177_v8 = vld [vmem:[#allocation6 + $0x3b0] sm:$0xff] }
 0xfa0   :  { %v11228_v62 = vpack.c.bf16 %v4185_v9, %v4177_v8  ;;  %v5055_v8 = vld [vmem:[#allocation8 + $0x228] sm:$0xff]  ;;  %v5057_v9 = vld [vmem:[#allocation8 + $0x238] sm:$0xff] }
 0xfa2   :  { %11189 = vmatpush1.bf16.msra.mxu0 %v11188_v12  ;;  %v11230_v12 = vpack.c.bf16 %v4202_v11, %v4194_v10 }
 0xfa3   :  { %11191 = vmatprep.subr.bf16.mxu0 %v11190_v13  ;;  %v4193_v13 = vld [vmem:[#allocation6 + $0x430] sm:$0xff] }
 0xfa4   :  { %v11232_v17 = vpack.c.bf16 %v4201_v14, %v4193_v13  ;;  %v5054_v13 = vld [vmem:[#allocation8 + $0x220] sm:$0xff]  ;;  %v5056_v14 = vld [vmem:[#allocation8 + $0x230] sm:$0xff] }
 0xfa6   :  { %11193 = vmatpush1.bf16.msra.mxu0 %v11192_v18  ;;  %v11234_v18 = vpack.c.bf16 %v4218_v16, %v4210_v15  ;;  %v5059_v15 = vld [vmem:[#allocation8 + $0x248] sm:$0xff]  ;;  %v5061_v16 = vld [vmem:[#allocation8 + $0x258] sm:$0xff] }
 0xfa7   :  { %11195 = vmatprep.subr.bf16.mxu0 %v11194_v19  ;;  %v4209_v19 = vld [vmem:[#allocation6 + $0x4b0] sm:$0xff] }
 0xfa8   :  { %v11236_v23 = vpack.c.bf16 %v4217_v20, %v4209_v19  ;;  %v5058_v19 = vld [vmem:[#allocation8 + $0x240] sm:$0xff]  ;;  %v5060_v20 = vld [vmem:[#allocation8 + $0x250] sm:$0xff] }
 0xfaa   :  { %11197 = vmatpush1.bf16.msra.mxu0 %v11196_v24  ;;  %v11238_v24 = vpack.c.bf16 %v4234_v22, %v4226_v21  ;;  %v5063_v21 = vld [vmem:[#allocation8 + $0x268] sm:$0xff]  ;;  %v5065_v22 = vld [vmem:[#allocation8 + $0x278] sm:$0xff] }
 0xfab   :  { %11199 = vmatprep.subr.bf16.mxu0 %v11198_v25  ;;  %v4225_v25 = vld [vmem:[#allocation6 + $0x530] sm:$0xff] }
 0xfac   :  { %v11240_v29 = vpack.c.bf16 %v4233_v26, %v4225_v25  ;;  %v5062_v25 = vld [vmem:[#allocation8 + $0x260] sm:$0xff]  ;;  %v5064_v26 = vld [vmem:[#allocation8 + $0x270] sm:$0xff] }
 0xfad   :  { %4851 = vmatmul.mubr.f32.vlgmr.msra.gmra.mrb[34].mxu0 %v15257_v34  ;;  %v11212_v34 = vpack.c.bf16 %v4121_v33, %v4113_v45  ;;  %v4281_v45 = vld [vmem:[#allocation6 + $0x6f0] sm:$0xff]  ;;  %v4290_v33 = vld [vmem:[#allocation6 + $0x738] sm:$0xff] }
 0xfae   :  { %11201 = vmatpush1.bf16.msra.mxu0 %v11200_v51  ;;  %4921 = vmatprep.mubr.f32.mxu0 %v15261_v35  ;;  %v4129_v35 = vld [vmem:[#allocation6 + $0x230] sm:$0xff]  ;;  %v11242_v51 = vpack.c.bf16 %v4250_v0, %v4242_v28  ;;  %v5067_v28 = vld [vmem:[#allocation8 + $0x288] sm:$0xff]  ;;  %v5069_v0 = vld [vmem:[#allocation8 + $0x298] sm:$0xff] }
 0xfaf   :  { %11203 = vmatprep.subr.bf16.mxu0 %v11202_v30  ;;  %v11216_v49 = vpack.c.bf16 %v4137_v6, %v4129_v35  ;;  %v4241_v30 = vld [vmem:[#allocation6 + $0x5b0] sm:$0xff]  ;;  %v4306_v6 = vld [vmem:[#allocation6 + $0x7b8] sm:$0xff] }
 0xfb0   :  { %v11244_v63 = vpack.c.bf16 %v4249_v31, %v4241_v30  ;;  %v4297_v35 = vld [vmem:[#allocation6 + $0x770] sm:$0xff]  ;;  %v5066_v30 = vld [vmem:[#allocation8 + $0x280] sm:$0xff] }
 0xfb1   :  { %v5068_v31 = vld [vmem:[#allocation8 + $0x290] sm:$0xff] }
 0xfb2   :  { %11205 = vmatpush1.bf16.msra.mxu0 %v11204_v37  ;;  %v11246_v37 = vpack.c.bf16 %v4266_v36, %v4258_v32  ;;  %v5071_v32 = vld [vmem:[#allocation8 + $0x2a8] sm:$0xff]  ;;  %v5073_v36 = vld [vmem:[#allocation8 + $0x2b8] sm:$0xff] }
 0xfb3   :  { %11207 = vmatprep.subr.bf16.mxu0 %v11206_v38  ;;  %v4257_v38 = vld [vmem:[#allocation6 + $0x630] sm:$0xff] }
 0xfb4   :  { %v11248_v42 = vpack.c.bf16 %v4265_v39, %v4257_v38  ;;  %v5070_v38 = vld [vmem:[#allocation8 + $0x2a0] sm:$0xff]  ;;  %v5072_v39 = vld [vmem:[#allocation8 + $0x2b0] sm:$0xff] }
 0xfb6   :  { %11209 = vmatpush1.bf16.msra.mxu0 %v11208_v27  ;;  %v11250_v27 = vpack.c.bf16 %v4282_v41, %v4274_v40  ;;  %v5075_v40 = vld [vmem:[#allocation8 + $0x2c8] sm:$0xff]  ;;  %v5077_v41 = vld [vmem:[#allocation8 + $0x2d8] sm:$0xff] }
 0xfb7   :  { %11211 = vmatprep.subr.bf16.mxu0 %v11210_v44  ;;  %v4273_v44 = vld [vmem:[#allocation6 + $0x6b0] sm:$0xff] }
 0xfb8   :  { %v11252_v61 = vpack.c.bf16 %v4281_v45, %v4273_v44  ;;  %v5074_v44 = vld [vmem:[#allocation8 + $0x2c0] sm:$0xff]  ;;  %v5076_v45 = vld [vmem:[#allocation8 + $0x2d0] sm:$0xff] }
 0xfba   :  { %11213 = vmatpush1.bf16.msra.mxu0 %v11212_v34  ;;  %v11254_v34 = vpack.c.bf16 %v4298_v46, %v4290_v33  ;;  %v5079_v33 = vld [vmem:[#allocation8 + $0x2e8] sm:$0xff]  ;;  %v5081_v46 = vld [vmem:[#allocation8 + $0x2f8] sm:$0xff] }
 0xfbb   :  { %11215 = vmatprep.subr.bf16.mxu0 %v11214_v2  ;;  %v4289_v2 = vld [vmem:[#allocation6 + $0x730] sm:$0xff] }
 0xfbc   :  { %v11256_v48 = vpack.c.bf16 %v4297_v35, %v4289_v2  ;;  %v5078_v2 = vld [vmem:[#allocation8 + $0x2e0] sm:$0xff]  ;;  %v5080_v35 = vld [vmem:[#allocation8 + $0x2f0] sm:$0xff] }
 0xfbe   :  { %11217 = vmatpush1.bf16.msra.mxu0 %v11216_v49  ;;  %v11258_v49 = vpack.c.bf16 %v4314_v47, %v4306_v6  ;;  %v5083_v6 = vld [vmem:[#allocation8 + $0x308] sm:$0xff]  ;;  %v5085_v47 = vld [vmem:[#allocation8 + $0x318] sm:$0xff] }
 0xfbf   :  { %11219 = vmatprep.subr.bf16.mxu0 %v11218_v55  ;;  %v4305_v55 = vld [vmem:[#allocation6 + $0x7b0] sm:$0xff] }
 0xfc0   :  { %v11260_v52 = vpack.c.bf16 %v4313_v50, %v4305_v55  ;;  %v5082_v55 = vld [vmem:[#allocation8 + $0x300] sm:$0xff]  ;;  %v5084_v50 = vld [vmem:[#allocation8 + $0x310] sm:$0xff] }
 0xfc2   :  { %11221 = vmatpush1.bf16.msra.mxu0 %v11220_v54  ;;  %v4933_v54 = vrot.slane %v15273_v56, %v13620_v7 }
 0xfc3   :  { %11223 = vmatprep.subr.bf16.mxu0 %v11222_v43  ;;  %v4937_v43 = vrot.slane %v15273_v56, %v13614_v5 }
 0xfc6   :  { %11225 = vmatpush1.bf16.msra.mxu0 %v11224_v1  ;;  %v5052_v1 = vld [vmem:[#allocation8 + $0x210] sm:$0xff] }
 0xfc7   :  { %11227 = vmatprep.subr.bf16.mxu0 %v11226_v3  ;;  %v11328_v11 = vpack.c.bf16 %v5052_v1, %v5050_v60  ;;  %v5093_v60 = vld [vmem:[#allocation8 + $0x358] sm:$0xff] }
 0xfca   :  { %11229 = vmatpush1.bf16.msra.mxu0 %v11228_v62 }
 0xfcb   :  { %11231 = vmatprep.subr.bf16.mxu0 %v11230_v12  ;;  %v11330_v12 = vpack.c.bf16 %v5057_v9, %v5055_v8  ;;  %v5090_v8 = vld [vmem:[#allocation8 + $0x340] sm:$0xff]  ;;  %v5092_v9 = vld [vmem:[#allocation8 + $0x350] sm:$0xff] }
 0xfce   :  { %11233 = vmatpush1.bf16.msra.mxu0 %v11232_v17  ;;  %v11332_v17 = vpack.c.bf16 %v5056_v14, %v5054_v13  ;;  %v5094_v13 = vld [vmem:[#allocation8 + $0x360] sm:$0xff]  ;;  %v5096_v14 = vld [vmem:[#allocation8 + $0x370] sm:$0xff] }
 0xfcf   :  { %11235 = vmatprep.subr.bf16.mxu0 %v11234_v18  ;;  %v11334_v18 = vpack.c.bf16 %v5061_v16, %v5059_v15  ;;  %v5099_v15 = vld [vmem:[#allocation8 + $0x388] sm:$0xff]  ;;  %v5101_v16 = vld [vmem:[#allocation8 + $0x398] sm:$0xff] }
 0xfd2   :  { %11237 = vmatpush1.bf16.msra.mxu0 %v11236_v23  ;;  %v11336_v23 = vpack.c.bf16 %v5060_v20, %v5058_v19  ;;  %v5098_v19 = vld [vmem:[#allocation8 + $0x380] sm:$0xff]  ;;  %v5100_v20 = vld [vmem:[#allocation8 + $0x390] sm:$0xff] }
 0xfd3   :  { %11239 = vmatprep.subr.bf16.mxu0 %v11238_v24  ;;  %v11338_v24 = vpack.c.bf16 %v5065_v22, %v5063_v21  ;;  %v5103_v21 = vld [vmem:[#allocation8 + $0x3a8] sm:$0xff]  ;;  %v5105_v22 = vld [vmem:[#allocation8 + $0x3b8] sm:$0xff] }
 0xfd6   :  { %11241 = vmatpush1.bf16.msra.mxu0 %v11240_v29  ;;  %v11340_v29 = vpack.c.bf16 %v5064_v26, %v5062_v25  ;;  %v5102_v25 = vld [vmem:[#allocation8 + $0x3a0] sm:$0xff]  ;;  %v5104_v26 = vld [vmem:[#allocation8 + $0x3b0] sm:$0xff] }
 0xfd7   :  { %11243 = vmatprep.subr.bf16.mxu0 %v11242_v51  ;;  %v11342_v51 = vpack.c.bf16 %v5069_v0, %v5067_v28  ;;  %v5107_v28 = vld [vmem:[#allocation8 + $0x3c8] sm:$0xff]  ;;  %v5109_v0 = vld [vmem:[#allocation8 + $0x3d8] sm:$0xff] }
 0xfda   :  { %11245 = vmatpush1.bf16.msra.mxu0 %v11244_v63  ;;  %v11344_v63 = vpack.c.bf16 %v5068_v31, %v5066_v30  ;;  %v15280_v30 = vsub.s32 2, %v13611_v4  ;;  %v5106_v31 = vld [vmem:[#allocation8 + $0x3c0] sm:$0xff] }
 0xfdb   :  { %11247 = vmatprep.subr.bf16.mxu0 %v11246_v37  ;;  %v11346_v37 = vpack.c.bf16 %v5073_v36, %v5071_v32  ;;  %v5108_v32 = vld [vmem:[#allocation8 + $0x3d0] sm:$0xff]  ;;  %v15283_v36 = vsub.s32 3, %v13611_v4 }
 0xfde   :  { %11249 = vmatpush1.bf16.msra.mxu0 %v11248_v42  ;;  %v11348_v42 = vpack.c.bf16 %v5072_v39, %v5070_v38  ;;  %v11384_v38 = vpack.c.bf16 %v5108_v32, %v5106_v31  ;;  %v4941_v39 = vrot.slane %v15273_v56, %v15280_v30  ;;  %v5558_v31 = vld [vmem:[#allocation10 + $0xa0] sm:$0xff] }
 0xfdf   :  { %11251 = vmatprep.subr.bf16.mxu0 %v11250_v27  ;;  %v11350_v27 = vpack.c.bf16 %v5077_v41, %v5075_v40  ;;  %v5110_v41 = vld [vmem:[#allocation8 + $0x3e0] sm:$0xff] }
 0xfe2   :  { %11253 = vmatpush1.bf16.msra.mxu0 %v11252_v61  ;;  %v11352_v61 = vpack.c.bf16 %v5076_v45, %v5074_v44  ;;  %v5115_v44 = vld [vmem:[#allocation8 + $0x408] sm:$0xff]  ;;  %v5117_v45 = vld [vmem:[#allocation8 + $0x418] sm:$0xff] }
 0xfe3   :  { %11255 = vmatprep.subr.bf16.mxu0 %v11254_v34  ;;  %v11354_v34 = vpack.c.bf16 %v5081_v46, %v5079_v33 }
 0xfe6   :  { %11257 = vmatpush1.bf16.msra.mxu0 %v11256_v48  ;;  %v11356_v48 = vpack.c.bf16 %v5080_v35, %v5078_v2  ;;  %v11390_v2 = vpack.c.bf16 %v5117_v45, %v5115_v44  ;;  %v5114_v35 = vld [vmem:[#allocation8 + $0x400] sm:$0xff]  ;;  %v5135_v45 = vld [vmem:[#allocation8 + $0x4a8] sm:$0xff] }
 0xfe7   :  { %11259 = vmatprep.subr.bf16.mxu0 %v11258_v49  ;;  %v11358_v49 = vpack.c.bf16 %v5085_v47, %v5083_v6  ;;  %v5116_v6 = vld [vmem:[#allocation8 + $0x410] sm:$0xff]  ;;  %v5566_v44 = vld [vmem:[#allocation10 + $0xe0] sm:$0xff] }
 0xfea   :  { %11261 = vmatpush1.bf16.msra.mxu0 %v11260_v52  ;;  %v5087_v52 = vld [vmem:[#allocation8 + $0x328] sm:$0xff] }
 0xfed   :  { %4922 = vmatmul.mubr.f32.vlgmr.msra.gmra.mrb[36].mxu0 %v13040_v53  ;;  %v5089_v53 = vld [vmem:[#allocation8 + $0x338] sm:$0xff] }
0x1000   :  { %v4710_v57 = vpop.f32.mrb[30].mxu0 }
0x1001   :  { %v4970_v58 = vadd.f32 %v4933_v54, %v4710_v57  ;;  %v4712_v59 = vpop.f32.mrb[31].mxu0  ;;  %v11360_v54 = vpack.c.bf16 %v5084_v50, %v5082_v55  ;;  %v5086_v57 = vld [vmem:[#allocation8 + $0x320] sm:$0xff]  ;;  %v11392_v50 = vpack.c.bf16 %v5116_v6, %v5114_v35  ;;  %v5575_v35 = vld [vmem:[#allocation10 + $0x128] sm:$0xff] }
0x1002   :  { %v4971_v3 = vadd.f32 %v4937_v43, %v4712_v59  ;;  %v11362_v43 = vpack.c.bf16 %v5089_v53, %v5087_v52  ;;  %v5091_v59 = vld [vmem:[#allocation8 + $0x348] sm:$0xff] }
0x1003   :  { %v4978_v62 = vmax.f32 %v4970_v58, 0.0  ;;  %v5088_v58 = vld [vmem:[#allocation8 + $0x330] sm:$0xff] }
0x1004   :  { %v4979_v10 = vmax.f32 %v4971_v3, 0.0  ;;  %v11364_v1 = vpack.c.bf16 %v5088_v58, %v5086_v57  ;;  %v11366_v3 = vpack.c.bf16 %v5093_v60, %v5091_v59  ;;  %v5123_v57 = vld [vmem:[#allocation8 + $0x448] sm:$0xff]  ;;  %v5125_v58 = vld [vmem:[#allocation8 + $0x458] sm:$0xff] }
0x1005   :  { %v5539_v59 = vld [vmem:[#allocation10 + $0x8] sm:$0xff] }
0x1006   :  { %5318 = vmatprep.mubr.f32.mxu1 %v4979_v10  ;;  %v5095_v10 = vld [vmem:[#allocation8 + $0x368] sm:$0xff] }
0x1007   :  { %5319 = vmatmul.mubr.f32.vlgmr.msra.gmra.mrb[42].mxu1 %v4978_v62  ;;  %v11368_v62 = vpack.c.bf16 %v5092_v9, %v5090_v8  ;;  %v5543_v60 = vld [vmem:[#allocation10 + $0x28] sm:$0xff]  ;;  %v5538_v8 = vld [vmem:[#allocation10] sm:$0xff] }
0x1008   :  { %11329 = vmatpush1.bf16.msra.mxu1 %v11328_v11  ;;  %v5097_v11 = vld [vmem:[#allocation8 + $0x378] sm:$0xff]  ;;  %v5542_v9 = vld [vmem:[#allocation10 + $0x20] sm:$0xff] }
0x1009   :  { %11331 = vmatprep.subr.bf16.mxu1 %v11330_v12  ;;  %v11370_v12 = vpack.c.bf16 %v5097_v11, %v5095_v10  ;;  %v11398_v10 = vpack.c.bf16 %v5125_v58, %v5123_v57  ;;  %v5122_v11 = vld [vmem:[#allocation8 + $0x440] sm:$0xff]  ;;  %v5579_v57 = vld [vmem:[#allocation10 + $0x148] sm:$0xff] }
0x100a   :  { %v5583_v58 = vld [vmem:[#allocation10 + $0x168] sm:$0xff] }
0x100c   :  { %11333 = vmatpush1.bf16.msra.mxu1 %v11332_v17  ;;  %v11372_v17 = vpack.c.bf16 %v5096_v14, %v5094_v13  ;;  %v5547_v13 = vld [vmem:[#allocation10 + $0x48] sm:$0xff] }
0x100d   :  { %11335 = vmatprep.subr.bf16.mxu1 %v11334_v18  ;;  %v11374_v18 = vpack.c.bf16 %v5101_v16, %v5099_v15  ;;  %v5127_v14 = vld [vmem:[#allocation8 + $0x468] sm:$0xff]  ;;  %v5129_v15 = vld [vmem:[#allocation8 + $0x478] sm:$0xff] }
0x100e   :  { %v5551_v16 = vld [vmem:[#allocation10 + $0x68] sm:$0xff] }
0x1010   :  { %11337 = vmatpush1.bf16.msra.mxu1 %v11336_v23  ;;  %v11376_v23 = vpack.c.bf16 %v5100_v20, %v5098_v19  ;;  %v5550_v19 = vld [vmem:[#allocation10 + $0x60] sm:$0xff] }
0x1011   :  { %11339 = vmatprep.subr.bf16.mxu1 %v11338_v24  ;;  %v11378_v24 = vpack.c.bf16 %v5105_v22, %v5103_v21  ;;  %v5555_v22 = vld [vmem:[#allocation10 + $0x88] sm:$0xff] }
0x1014   :  { %11341 = vmatpush1.bf16.msra.mxu1 %v11340_v29  ;;  %v11380_v29 = vpack.c.bf16 %v5104_v26, %v5102_v25  ;;  %v5126_v25 = vld [vmem:[#allocation8 + $0x460] sm:$0xff]  ;;  %v5128_v26 = vld [vmem:[#allocation8 + $0x470] sm:$0xff] }
0x1015   :  { %11343 = vmatprep.subr.bf16.mxu1 %v11342_v51  ;;  %v11382_v51 = vpack.c.bf16 %v5109_v0, %v5107_v28  ;;  %v5554_v0 = vld [vmem:[#allocation10 + $0x80] sm:$0xff] }
0x1016   :  { %v11528_v32 = vpack.c.bf16 %v5558_v31, %v5554_v0  ;;  %v5148_v0 = vld [vmem:[#allocation8 + $0x510] sm:$0xff]  ;;  %v5598_v31 = vld [vmem:[#allocation10 + $0x1e0] sm:$0xff] }
0x1018   :  { %11345 = vmatpush1.bf16.msra.mxu1 %v11344_v63  ;;  %v5111_v63 = vld [vmem:[#allocation8 + $0x3e8] sm:$0xff] }
0x1019   :  { %11347 = vmatprep.subr.bf16.mxu1 %v11346_v37  ;;  %v5113_v37 = vld [vmem:[#allocation8 + $0x3f8] sm:$0xff] }
0x101a   :  { %v11386_v40 = vpack.c.bf16 %v5113_v37, %v5111_v63  ;;  %v11404_v63 = vpack.c.bf16 %v5128_v26, %v5126_v25  ;;  %v5130_v37 = vld [vmem:[#allocation8 + $0x480] sm:$0xff]  ;;  %v5595_v25 = vld [vmem:[#allocation10 + $0x1c8] sm:$0xff] }
0x101b   :  { %v5599_v26 = vld [vmem:[#allocation10 + $0x1e8] sm:$0xff] }
0x101c   :  { %11349 = vmatpush1.bf16.msra.mxu1 %v11348_v42  ;;  %v5112_v42 = vld [vmem:[#allocation8 + $0x3f0] sm:$0xff] }
0x101d   :  { %11351 = vmatprep.subr.bf16.mxu1 %v11350_v27  ;;  %v4945_v27 = vrot.slane %v15273_v56, %v15283_v36  ;;  %v11388_v46 = vpack.c.bf16 %v5112_v42, %v5110_v41  ;;  %v5132_v41 = vld [vmem:[#allocation8 + $0x490] sm:$0xff] }
0x1020   :  { %11353 = vmatpush1.bf16.msra.mxu1 %v11352_v61 }
0x1021   :  { %11355 = vmatprep.subr.bf16.mxu1 %v11354_v34 }
0x1024   :  { %11357 = vmatpush1.bf16.msra.mxu1 %v11356_v48  ;;  %v5119_v48 = vld [vmem:[#allocation8 + $0x428] sm:$0xff] }
0x1025   :  { %11359 = vmatprep.subr.bf16.mxu1 %v11358_v49  ;;  %v5121_v49 = vld [vmem:[#allocation8 + $0x438] sm:$0xff] }
0x1026   :  { %v11394_v53 = vpack.c.bf16 %v5121_v49, %v5119_v48  ;;  %v5570_v49 = vld [vmem:[#allocation10 + $0x100] sm:$0xff] }
0x1028   :  { %11361 = vmatpush1.bf16.msra.mxu1 %v11360_v54  ;;  %v5118_v54 = vld [vmem:[#allocation8 + $0x420] sm:$0xff] }
0x1029   :  { %11363 = vmatprep.subr.bf16.mxu1 %v11362_v43  ;;  %v5120_v43 = vld [vmem:[#allocation8 + $0x430] sm:$0xff] }
0x102c   :  { %11365 = vmatpush1.bf16.msra.mxu1 %v11364_v1  ;;  %v11396_v1 = vpack.c.bf16 %v5120_v43, %v5118_v54  ;;  %v5138_v43 = vld [vmem:[#allocation8 + $0x4c0] sm:$0xff] }
0x102d   :  { %11367 = vmatprep.subr.bf16.mxu1 %v11366_v3  ;;  %v11518_v3 = vpack.c.bf16 %v5543_v60, %v5539_v59  ;;  %v5140_v60 = vld [vmem:[#allocation8 + $0x4d0] sm:$0xff] }
0x102f   :  { %11519 = vmatprep.subr.bf16.mxu0 %v11518_v3  ;;  %v5578_v3 = vld [vmem:[#allocation10 + $0x140] sm:$0xff] }
0x1030   :  { %11369 = vmatpush1.bf16.msra.mxu1 %v11368_v62  ;;  %v5124_v62 = vld [vmem:[#allocation8 + $0x450] sm:$0xff] }
0x1031   :  { %11371 = vmatprep.subr.bf16.mxu1 %v11370_v12  ;;  %v11520_v12 = vpack.c.bf16 %v5542_v9, %v5538_v8  ;;  %v11400_v20 = vpack.c.bf16 %v5124_v62, %v5122_v11  ;;  %v5582_v8 = vld [vmem:[#allocation10 + $0x160] sm:$0xff]  ;;  %v5143_v9 = vld [vmem:[#allocation8 + $0x4e8] sm:$0xff]  ;;  %v11416_v62 = vpack.c.bf16 %v5140_v60, %v5138_v43 }
0x1032   :  { %v11540_v11 = vpack.c.bf16 %v5582_v8, %v5578_v3  ;;  %v5623_v60 = vld [vmem:[#allocation10 + $0x2a8] sm:$0xff]  ;;  %v5160_v3 = vld [vmem:[#allocation8 + $0x570] sm:$0xff] }
0x1033   :  { %11521 = vmatpush1.bf16.msra.mxu0 %v11520_v12  ;;  %v5142_v12 = vld [vmem:[#allocation8 + $0x4e0] sm:$0xff] }
0x1034   :  { %11373 = vmatpush1.bf16.msra.mxu1 %v11372_v17  ;;  %v11522_v17 = vpack.c.bf16 %v5551_v16, %v5547_v13  ;;  %v5587_v13 = vld [vmem:[#allocation10 + $0x188] sm:$0xff]  ;;  %v5144_v16 = vld [vmem:[#allocation8 + $0x4f0] sm:$0xff] }
0x1035   :  { %11375 = vmatprep.subr.bf16.mxu1 %v11374_v18  ;;  %v5546_v18 = vld [vmem:[#allocation10 + $0x40] sm:$0xff] }
0x1036   :  { %v11524_v21 = vpack.c.bf16 %v5550_v19, %v5546_v18  ;;  %11523 = vmatprep.subr.bf16.mxu0 %v11522_v17  ;;  %v5586_v18 = vld [vmem:[#allocation10 + $0x180] sm:$0xff] }
0x1037   :  { %v5590_v19 = vld [vmem:[#allocation10 + $0x1a0] sm:$0xff] }
0x1038   :  { %11377 = vmatpush1.bf16.msra.mxu1 %v11376_v23  ;;  %v5559_v23 = vld [vmem:[#allocation10 + $0xa8] sm:$0xff]  ;;  %11525 = vmatpush1.bf16.msra.mxu0 %v11524_v21  ;;  %v5149_v21 = vld [vmem:[#allocation8 + $0x518] sm:$0xff] }
0x1039   :  { %11379 = vmatprep.subr.bf16.mxu1 %v11378_v24  ;;  %v11402_v24 = vpack.c.bf16 %v5129_v15, %v5127_v14  ;;  %v11526_v28 = vpack.c.bf16 %v5559_v23, %v5555_v22  ;;  %v5591_v14 = vld [vmem:[#allocation10 + $0x1a8] sm:$0xff]  ;;  %v11544_v22 = vpack.c.bf16 %v5590_v19, %v5586_v18  ;;  %v11420_v23 = vpack.c.bf16 %v5144_v16, %v5142_v12  ;;  %v5164_v18 = vld [vmem:[#allocation8 + $0x590] sm:$0xff] }
0x103a   :  { %v11542_v17 = vpack.c.bf16 %v5591_v14, %v5587_v13  ;;  %v5162_v14 = vld [vmem:[#allocation8 + $0x580] sm:$0xff]  ;;  %v5631_v16 = vld [vmem:[#allocation10 + $0x2e8] sm:$0xff] }
0x103b   :  { %11527 = vmatprep.subr.bf16.mxu0 %v11526_v28 }
0x103c   :  { %11381 = vmatpush1.bf16.msra.mxu1 %v11380_v29  ;;  %v5131_v29 = vld [vmem:[#allocation8 + $0x488] sm:$0xff]  ;;  %11529 = vmatpush1.bf16.msra.mxu0 %v11528_v32 }
0x103d   :  { %11383 = vmatprep.subr.bf16.mxu1 %v11382_v51  ;;  %v5133_v51 = vld [vmem:[#allocation8 + $0x498] sm:$0xff]  ;;  %v5151_v32 = vld [vmem:[#allocation8 + $0x528] sm:$0xff] }
0x1040   :  { %v4781_v33 = vpop.f32.mrb[32].mxu0  ;;  %11385 = vmatpush1.bf16.msra.mxu1 %v11384_v38  ;;  %v5563_v38 = vld [vmem:[#allocation10 + $0xc8] sm:$0xff] }
0x1041   :  { %v4972_v61 = vadd.f32 %v4941_v39, %v4781_v33  ;;  %v4783_v34 = vpop.f32.mrb[33].mxu0  ;;  %11387 = vmatprep.subr.bf16.mxu1 %v11386_v40  ;;  %v5567_v39 = vld [vmem:[#allocation10 + $0xe8] sm:$0xff]  ;;  %v11406_v40 = vpack.c.bf16 %v5133_v51, %v5131_v29  ;;  %v5137_v33 = vld [vmem:[#allocation8 + $0x4b8] sm:$0xff]  ;;  %v11546_v29 = vpack.c.bf16 %v5599_v26, %v5595_v25  ;;  %v5594_v51 = vld [vmem:[#allocation10 + $0x1c0] sm:$0xff]  ;;  %v11440_v25 = vpack.c.bf16 %v5164_v18, %v5162_v14 }
0x1042   :  { %v4973_v47 = vadd.f32 %v4945_v27, %v4783_v34  ;;  %v11530_v42 = vpack.c.bf16 %v5567_v39, %v5563_v38  ;;  %v5562_v27 = vld [vmem:[#allocation10 + $0xc0] sm:$0xff]  ;;  %v11410_v6 = vpack.c.bf16 %v5137_v33, %v5135_v45 }
0x1043   :  { %v4980_v52 = vmax.f32 %v4972_v61, 0.0  ;;  %v11408_v61 = vpack.c.bf16 %v5132_v41, %v5130_v37  ;;  %v5134_v34 = vld [vmem:[#allocation8 + $0x4a0] sm:$0xff]  ;;  %v11548_v37 = vpack.c.bf16 %v5598_v31, %v5594_v51  ;;  %v5607_v41 = vld [vmem:[#allocation10 + $0x228] sm:$0xff]  ;;  %v5168_v51 = vld [vmem:[#allocation8 + $0x5b0] sm:$0xff] }
0x1044   :  { %v4981_v55 = vmax.f32 %v4973_v47, 0.0  ;;  %11389 = vmatpush1.bf16.msra.mxu1 %v11388_v46  ;;  %v11532_v46 = vpack.c.bf16 %v5566_v44, %v5562_v27  ;;  %11531 = vmatprep.subr.bf16.mxu0 %v11530_v42  ;;  %v5136_v47 = vld [vmem:[#allocation8 + $0x4b0] sm:$0xff]  ;;  %v5150_v39 = vld [vmem:[#allocation8 + $0x520] sm:$0xff] }
0x1045   :  { %11391 = vmatprep.subr.bf16.mxu1 %v11390_v2  ;;  %v5571_v2 = vld [vmem:[#allocation10 + $0x108] sm:$0xff]  ;;  %v11412_v54 = vpack.c.bf16 %v5136_v47, %v5134_v34  ;;  %v5152_v27 = vld [vmem:[#allocation8 + $0x530] sm:$0xff]  ;;  %v5602_v45 = vld [vmem:[#allocation10 + $0x200] sm:$0xff] }
0x1046   :  { %5389 = vmatprep.mubr.f32.mxu1 %v4981_v55  ;;  %v11534_v48 = vpack.c.bf16 %v5575_v35, %v5571_v2  ;;  %v5574_v55 = vld [vmem:[#allocation10 + $0x120] sm:$0xff]  ;;  %11533 = vmatpush1.bf16.msra.mxu0 %v11532_v46  ;;  %v5155_v46 = vld [vmem:[#allocation8 + $0x548] sm:$0xff]  ;;  %v11428_v2 = vpack.c.bf16 %v5152_v27, %v5150_v39 }
0x1047   :  { %5390 = vmatmul.mubr.f32.vlgmr.msra.gmra.mrb[42].mxu1 %v4980_v52  ;;  %v5141_v52 = vld [vmem:[#allocation8 + $0x4d8] sm:$0xff]  ;;  %v5606_v33 = vld [vmem:[#allocation10 + $0x220] sm:$0xff]  ;;  %v5615_v47 = vld [vmem:[#allocation10 + $0x268] sm:$0xff] }
0x1048   :  { %11393 = vmatpush1.bf16.msra.mxu1 %v11392_v50  ;;  %v5139_v50 = vld [vmem:[#allocation8 + $0x4c8] sm:$0xff]  ;;  %11535 = vmatprep.subr.bf16.mxu0 %v11534_v48  ;;  %v11552_v34 = vpack.c.bf16 %v5606_v33, %v5602_v45  ;;  %v5154_v35 = vld [vmem:[#allocation8 + $0x540] sm:$0xff]  ;;  %v4948_v45 = vsub.s32 4, %v13611_v4  ;;  %v5172_v33 = vld [vmem:[#allocation8 + $0x5d0] sm:$0xff] }
0x1049   :  { %11395 = vmatprep.subr.bf16.mxu1 %v11394_v53  ;;  %v11536_v53 = vpack.c.bf16 %v5574_v55, %v5570_v49  ;;  %v11414_v59 = vpack.c.bf16 %v5141_v52, %v5139_v50  ;;  %v5156_v49 = vld [vmem:[#allocation8 + $0x550] sm:$0xff]  ;;  %v5610_v50 = vld [vmem:[#allocation10 + $0x240] sm:$0xff]  ;;  %v5647_v27 = vld [vmem:[#allocation10 + $0x368] sm:$0xff] }
0x104a   :  { %v5614_v52 = vld [vmem:[#allocation10 + $0x260] sm:$0xff] }
0x104b   :  { %11537 = vmatpush1.bf16.msra.mxu0 %v11536_v53  ;;  %v5159_v53 = vld [vmem:[#allocation8 + $0x568] sm:$0xff]  ;;  %v11556_v43 = vpack.c.bf16 %v5614_v52, %v5610_v50  ;;  %v5166_v26 = vld [vmem:[#allocation8 + $0x5a0] sm:$0xff]  ;;  %v4949_v52 = vrot.slane %v15273_v56, %v4948_v45 }
0x104c   :  { %11397 = vmatpush1.bf16.msra.mxu1 %v11396_v1  ;;  %v11538_v1 = vpack.c.bf16 %v5583_v58, %v5579_v57  ;;  %v11432_v57 = vpack.c.bf16 %v5156_v49, %v5154_v35  ;;  %v5158_v58 = vld [vmem:[#allocation8 + $0x560] sm:$0xff]  ;;  %v5175_v35 = vld [vmem:[#allocation8 + $0x5e8] sm:$0xff] }
0x104d   :  { %11399 = vmatprep.subr.bf16.mxu1 %v11398_v10  ;;  %v5145_v10 = vld [vmem:[#allocation8 + $0x4f8] sm:$0xff]  ;;  %v11436_v13 = vpack.c.bf16 %v5160_v3, %v5158_v58  ;;  %v5174_v49 = vld [vmem:[#allocation8 + $0x5e0] sm:$0xff]  ;;  %v5655_v50 = vld [vmem:[#allocation10 + $0x3a8] sm:$0xff] }
0x104e   :  { %11539 = vmatprep.subr.bf16.mxu0 %v11538_v1  ;;  %v11418_v15 = vpack.c.bf16 %v5145_v10, %v5143_v9  ;;  %v5618_v9 = vld [vmem:[#allocation10 + $0x280] sm:$0xff] }
0x104f   :  { %11541 = vmatpush1.bf16.msra.mxu0 %v11540_v11  ;;  %v5622_v10 = vld [vmem:[#allocation10 + $0x2a0] sm:$0xff]  ;;  %v5163_v11 = vld [vmem:[#allocation8 + $0x588] sm:$0xff] }
0x1050   :  { %11401 = vmatpush1.bf16.msra.mxu1 %v11400_v20  ;;  %v5147_v20 = vld [vmem:[#allocation8 + $0x508] sm:$0xff]  ;;  %11543 = vmatprep.subr.bf16.mxu0 %v11542_v17  ;;  %v11560_v12 = vpack.c.bf16 %v5622_v10, %v5618_v9  ;;  %v5654_v58 = vld [vmem:[#allocation10 + $0x3a0] sm:$0xff] }
0x1051   :  { %11403 = vmatprep.subr.bf16.mxu1 %v11402_v24  ;;  %v5146_v24 = vld [vmem:[#allocation8 + $0x500] sm:$0xff]  ;;  %v11422_v28 = vpack.c.bf16 %v5149_v21, %v5147_v20 }
0x1052   :  { %v11424_v38 = vpack.c.bf16 %v5148_v0, %v5146_v24  ;;  %v5626_v20 = vld [vmem:[#allocation10 + $0x2c0] sm:$0xff]  ;;  %v5639_v0 = vld [vmem:[#allocation10 + $0x328] sm:$0xff] }
0x1053   :  { %11545 = vmatpush1.bf16.msra.mxu0 %v11544_v22  ;;  %v5630_v21 = vld [vmem:[#allocation10 + $0x2e0] sm:$0xff]  ;;  %v5167_v22 = vld [vmem:[#allocation8 + $0x5a8] sm:$0xff] }
0x1054   :  { %11405 = vmatpush1.bf16.msra.mxu1 %v11404_v63  ;;  %v5153_v63 = vld [vmem:[#allocation8 + $0x538] sm:$0xff]  ;;  %11547 = vmatprep.subr.bf16.mxu0 %v11546_v29  ;;  %v11564_v24 = vpack.c.bf16 %v5630_v21, %v5626_v20  ;;  %v5182_v20 = vld [vmem:[#allocation8 + $0x620] sm:$0xff]  ;;  %v5184_v21 = vld [vmem:[#allocation8 + $0x630] sm:$0xff] }
0x1055   :  { %11407 = vmatprep.subr.bf16.mxu1 %v11406_v40  ;;  %v5603_v40 = vld [vmem:[#allocation10 + $0x208] sm:$0xff]  ;;  %v11426_v42 = vpack.c.bf16 %v5153_v63, %v5151_v32  ;;  %v5634_v32 = vld [vmem:[#allocation10 + $0x300] sm:$0xff] }
0x1056   :  { %v11550_v44 = vpack.c.bf16 %v5607_v41, %v5603_v40  ;;  %v5638_v63 = vld [vmem:[#allocation10 + $0x320] sm:$0xff]  ;;  %v11444_v40 = vpack.c.bf16 %v5168_v51, %v5166_v26 }
0x1057   :  { %11549 = vmatpush1.bf16.msra.mxu0 %v11548_v37  ;;  %v5171_v37 = vld [vmem:[#allocation8 + $0x5c8] sm:$0xff]  ;;  %v11568_v39 = vpack.c.bf16 %v5638_v63, %v5634_v32  ;;  %v5170_v41 = vld [vmem:[#allocation8 + $0x5c0] sm:$0xff]  ;;  %v5192_v63 = vld [vmem:[#allocation8 + $0x670] sm:$0xff] }
0x1058   :  { %11409 = vmatpush1.bf16.msra.mxu1 %v11408_v61  ;;  %v5157_v61 = vld [vmem:[#allocation8 + $0x558] sm:$0xff]  ;;  %11551 = vmatprep.subr.bf16.mxu0 %v11550_v44  ;;  %v5186_v26 = vld [vmem:[#allocation8 + $0x640] sm:$0xff] }
0x1059   :  { %11411 = vmatprep.subr.bf16.mxu1 %v11410_v6  ;;  %v5611_v6 = vld [vmem:[#allocation10 + $0x248] sm:$0xff]  ;;  %v11430_v48 = vpack.c.bf16 %v5157_v61, %v5155_v46  ;;  %v5642_v61 = vld [vmem:[#allocation10 + $0x340] sm:$0xff] }
0x105a   :  { %v11554_v55 = vpack.c.bf16 %v5615_v47, %v5611_v6  ;;  %v5177_v6 = vld [vmem:[#allocation8 + $0x5f8] sm:$0xff]  ;;  %v5190_v32 = vld [vmem:[#allocation8 + $0x660] sm:$0xff] }
0x105b   :  { %11553 = vmatpush1.bf16.msra.mxu0 %v11552_v34  ;;  %v5646_v34 = vld [vmem:[#allocation10 + $0x360] sm:$0xff] }
0x105c   :  { %11413 = vmatpush1.bf16.msra.mxu1 %v11412_v54  ;;  %v5161_v54 = vld [vmem:[#allocation8 + $0x578] sm:$0xff]  ;;  %11555 = vmatprep.subr.bf16.mxu0 %v11554_v55  ;;  %v11572_v47 = vpack.c.bf16 %v5646_v34, %v5642_v61  ;;  %v5651_v55 = vld [vmem:[#allocation10 + $0x388] sm:$0xff]  ;;  %v5200_v61 = vld [vmem:[#allocation8 + $0x6b0] sm:$0xff] }
0x105d   :  { %11415 = vmatprep.subr.bf16.mxu1 %v11414_v59  ;;  %v5619_v59 = vld [vmem:[#allocation10 + $0x288] sm:$0xff]  ;;  %v11434_v1 = vpack.c.bf16 %v5161_v54, %v5159_v53  ;;  %v11450_v53 = vpack.c.bf16 %v5177_v6, %v5175_v35  ;;  %v5176_v54 = vld [vmem:[#allocation8 + $0x5f0] sm:$0xff] }
0x105e   :  { %v11558_v8 = vpack.c.bf16 %v5623_v60, %v5619_v59  ;;  %v5179_v60 = vld [vmem:[#allocation8 + $0x608] sm:$0xff]  ;;  %v11452_v9 = vpack.c.bf16 %v5176_v54, %v5174_v49  ;;  %v5208_v54 = vld [vmem:[#allocation8 + $0x6f0] sm:$0xff] }
0x105f   :  { %11557 = vmatpush1.bf16.msra.mxu0 %v11556_v43  ;;  %v11574_v43 = vpack.c.bf16 %v5655_v50, %v5651_v55  ;;  %v5203_v34 = vld [vmem:[#allocation8 + $0x6c8] sm:$0xff]  ;;  %v5209_v55 = vld [vmem:[#allocation8 + $0x6f8] sm:$0xff] }
0x1060   :  { %11417 = vmatpush1.bf16.msra.mxu1 %v11416_v62  ;;  %v5165_v62 = vld [vmem:[#allocation8 + $0x598] sm:$0xff]  ;;  %11559 = vmatprep.subr.bf16.mxu0 %v11558_v8  ;;  %v5207_v49 = vld [vmem:[#allocation8 + $0x6e8] sm:$0xff] }
0x1061   :  { %11419 = vmatprep.subr.bf16.mxu1 %v11418_v15  ;;  %v5627_v15 = vld [vmem:[#allocation10 + $0x2c8] sm:$0xff]  ;;  %v11438_v17 = vpack.c.bf16 %v5165_v62, %v5163_v11 }
0x1062   :  { %v11562_v19 = vpack.c.bf16 %v5631_v16, %v5627_v15  ;;  %v5183_v15 = vld [vmem:[#allocation8 + $0x628] sm:$0xff]  ;;  %v5185_v16 = vld [vmem:[#allocation8 + $0x638] sm:$0xff] }
0x1063   :  { %11561 = vmatpush1.bf16.msra.mxu0 %v11560_v12  ;;  %v5178_v12 = vld [vmem:[#allocation8 + $0x600] sm:$0xff] }
0x1064   :  { %11421 = vmatpush1.bf16.msra.mxu1 %v11420_v23  ;;  %v5169_v23 = vld [vmem:[#allocation8 + $0x5b8] sm:$0xff]  ;;  %11563 = vmatprep.subr.bf16.mxu0 %v11562_v19  ;;  %v11458_v19 = vpack.c.bf16 %v5185_v16, %v5183_v15  ;;  %v5218_v16 = vld [vmem:[#allocation8 + $0x740] sm:$0xff] }
0x1065   :  { %11423 = vmatprep.subr.bf16.mxu1 %v11422_v28  ;;  %v5635_v28 = vld [vmem:[#allocation10 + $0x308] sm:$0xff]  ;;  %v11442_v29 = vpack.c.bf16 %v5169_v23, %v5167_v22  ;;  %v5189_v23 = vld [vmem:[#allocation8 + $0x658] sm:$0xff] }
0x1066   :  { %v11566_v31 = vpack.c.bf16 %v5639_v0, %v5635_v28  ;;  %v5187_v22 = vld [vmem:[#allocation8 + $0x648] sm:$0xff]  ;;  %v5188_v28 = vld [vmem:[#allocation8 + $0x650] sm:$0xff] }
0x1067   :  { %11565 = vmatpush1.bf16.msra.mxu0 %v11564_v24  ;;  %v11460_v24 = vpack.c.bf16 %v5184_v21, %v5182_v20  ;;  %v5191_v0 = vld [vmem:[#allocation8 + $0x668] sm:$0xff]  ;;  %v11464_v51 = vpack.c.bf16 %v5188_v28, %v5186_v26  ;;  %v5222_v21 = vld [vmem:[#allocation8 + $0x760] sm:$0xff] }
0x1068   :  { %11425 = vmatpush1.bf16.msra.mxu1 %v11424_v38  ;;  %v5173_v38 = vld [vmem:[#allocation8 + $0x5d8] sm:$0xff]  ;;  %11567 = vmatprep.subr.bf16.mxu0 %v11566_v31  ;;  %v5226_v28 = vld [vmem:[#allocation8 + $0x780] sm:$0xff] }
0x1069   :  { %11427 = vmatprep.subr.bf16.mxu1 %v11426_v42  ;;  %v5643_v42 = vld [vmem:[#allocation10 + $0x348] sm:$0xff]  ;;  %v11446_v44 = vpack.c.bf16 %v5173_v38, %v5171_v37  ;;  %v5197_v38 = vld [vmem:[#allocation8 + $0x698] sm:$0xff] }
0x106a   :  { %v11570_v46 = vpack.c.bf16 %v5647_v27, %v5643_v42  ;;  %v5195_v37 = vld [vmem:[#allocation8 + $0x688] sm:$0xff]  ;;  %v5196_v42 = vld [vmem:[#allocation8 + $0x690] sm:$0xff] }
0x106b   :  { %11569 = vmatpush1.bf16.msra.mxu0 %v11568_v39  ;;  %v11468_v39 = vpack.c.bf16 %v5192_v63, %v5190_v32  ;;  %v5199_v27 = vld [vmem:[#allocation8 + $0x6a8] sm:$0xff]  ;;  %v5230_v63 = vld [vmem:[#allocation8 + $0x7a0] sm:$0xff] }
0x106c   :  { %11429 = vmatpush1.bf16.msra.mxu1 %v11428_v2  ;;  %v4952_v2 = vsub.s32 5, %v13611_v4  ;;  %11571 = vmatprep.subr.bf16.mxu0 %v11570_v46  ;;  %v5198_v46 = vld [vmem:[#allocation8 + $0x6a0] sm:$0xff] }
0x106d   :  { %11431 = vmatprep.subr.bf16.mxu1 %v11430_v48  ;;  %v11448_v48 = vpack.c.bf16 %v5172_v33, %v5170_v41  ;;  %v5194_v41 = vld [vmem:[#allocation8 + $0x680] sm:$0xff]  ;;  %v11476_v35 = vpack.c.bf16 %v5200_v61, %v5198_v46  ;;  %v5241_v46 = vld [vmem:[#allocation8 + $0x7f8] sm:$0xff] }
0x106e   :  { %v4953_v59 = vrot.slane %v15273_v56, %v4952_v2  ;;  %v11472_v45 = vpack.c.bf16 %v5196_v42, %v5194_v41  ;;  %v5205_v2 = vld [vmem:[#allocation8 + $0x6d8] sm:$0xff]  ;;  %v4956_v42 = vsub.s32 6, %v13611_v4 }
0x106f   :  { %11573 = vmatpush1.bf16.msra.mxu0 %v11572_v47  ;;  %v11478_v6 = vpack.c.bf16 %v5205_v2, %v5203_v34  ;;  %v5202_v47 = vld [vmem:[#allocation8 + $0x6c0] sm:$0xff] }
0x1070   :  { %11433 = vmatpush1.bf16.msra.mxu1 %v11432_v57  ;;  %v5650_v57 = vld [vmem:[#allocation10 + $0x380] sm:$0xff]  ;;  %11575 = vmatprep.subr.bf16.mxu0 %v11574_v43  ;;  %v5211_v43 = vld [vmem:[#allocation8 + $0x708] sm:$0xff] }
0x1071   :  { %11435 = vmatprep.subr.bf16.mxu1 %v11434_v1  ;;  %v5181_v1 = vld [vmem:[#allocation8 + $0x618] sm:$0xff]  ;;  %v11576_v3 = vpack.c.bf16 %v5654_v58, %v5650_v57 }
0x1072   :  { %v11454_v62 = vpack.c.bf16 %v5181_v1, %v5179_v60  ;;  %v5213_v57 = vld [vmem:[#allocation8 + $0x718] sm:$0xff]  ;;  %v5210_v60 = vld [vmem:[#allocation8 + $0x700] sm:$0xff]  ;;  %v5212_v1 = vld [vmem:[#allocation8 + $0x710] sm:$0xff] }
0x1073   :  { %11577 = vmatpush1.bf16.msra.mxu0 %v11576_v3  ;;  %v5215_v3 = vld [vmem:[#allocation8 + $0x728] sm:$0xff]  ;;  %v13041_v34 = vld [vmem:[%s17333_s14] sm:$0xff] }
0x1074   :  { %11437 = vmatpush1.bf16.msra.mxu1 %v11436_v13  ;;  %v5180_v13 = vld [vmem:[#allocation8 + $0x610] sm:$0xff]  ;;  %v4957_v2 = vrot.slane %v13041_v34, %v4956_v42 }
0x1075   :  { %11439 = vmatprep.subr.bf16.mxu1 %v11438_v17  ;;  %v11456_v56 = vpack.c.bf16 %v5180_v13, %v5178_v12  ;;  %v5219_v12 = vld [vmem:[#allocation8 + $0x748] sm:$0xff]  ;;  %v5221_v13 = vld [vmem:[#allocation8 + $0x758] sm:$0xff]  ;;  %v5592_v42 = vld [vmem:[#allocation10 + $0x1b0] sm:$0xff] }
0x1076   :  { %v11494_v15 = vpack.c.bf16 %v5221_v13, %v5219_v12  ;;  %v5561_v12 = vld [vmem:[#allocation10 + $0xb8] sm:$0xff] }
0x1078   :  { %11441 = vmatpush1.bf16.msra.mxu1 %v11440_v25  ;;  %v11462_v25 = vpack.c.bf16 %v5189_v23, %v5187_v22  ;;  %v5224_v22 = vld [vmem:[#allocation8 + $0x770] sm:$0xff]  ;;  %v5227_v23 = vld [vmem:[#allocation8 + $0x788] sm:$0xff] }
0x1079   :  { %11443 = vmatprep.subr.bf16.mxu1 %v11442_v29  ;;  %v5193_v29 = vld [vmem:[#allocation8 + $0x678] sm:$0xff] }
0x107a   :  { %v11466_v31 = vpack.c.bf16 %v5193_v29, %v5191_v0  ;;  %v5228_v0 = vld [vmem:[#allocation8 + $0x790] sm:$0xff]  ;;  %v5231_v29 = vld [vmem:[#allocation8 + $0x7a8] sm:$0xff] }
0x107c   :  { %11445 = vmatpush1.bf16.msra.mxu1 %v11444_v40  ;;  %v11470_v40 = vpack.c.bf16 %v5197_v38, %v5195_v37  ;;  %v5232_v37 = vld [vmem:[#allocation8 + $0x7b0] sm:$0xff]  ;;  %v5235_v38 = vld [vmem:[#allocation8 + $0x7c8] sm:$0xff] }
0x107d   :  { %11447 = vmatprep.subr.bf16.mxu1 %v11446_v44  ;;  %v5201_v44 = vld [vmem:[#allocation8 + $0x6b8] sm:$0xff] }
0x107e   :  { %v11474_v33 = vpack.c.bf16 %v5201_v44, %v5199_v27  ;;  %v5234_v27 = vld [vmem:[#allocation8 + $0x7c0] sm:$0xff]  ;;  %v5236_v44 = vld [vmem:[#allocation8 + $0x7d0] sm:$0xff] }
0x107f   :  { %v11512_v61 = vpack.c.bf16 %v5236_v44, %v5234_v27  ;;  %v5597_v27 = vld [vmem:[#allocation10 + $0x1d8] sm:$0xff] }
0x1080   :  { %v4852_v8 = vpop.f32.mrb[34].mxu0  ;;  %11449 = vmatpush1.bf16.msra.mxu1 %v11448_v48  ;;  %v5204_v48 = vld [vmem:[#allocation8 + $0x6d0] sm:$0xff]  ;;  %v5601_v44 = vld [vmem:[#allocation10 + $0x1f8] sm:$0xff] }
0x1081   :  { %v4974_v10 = vadd.f32 %v4949_v52, %v4852_v8  ;;  %v4854_v11 = vpop.f32.mrb[35].mxu0  ;;  %11451 = vmatprep.subr.bf16.mxu1 %v11450_v53  ;;  %v11480_v50 = vpack.c.bf16 %v5204_v48, %v5202_v47  ;;  %v11482_v52 = vpack.c.bf16 %v5209_v55, %v5207_v49  ;;  %v5206_v53 = vld [vmem:[#allocation8 + $0x6e0] sm:$0xff]  ;;  %v5217_v8 = vld [vmem:[#allocation8 + $0x738] sm:$0xff]  ;;  %v5240_v47 = vld [vmem:[#allocation8 + $0x7f0] sm:$0xff] }
0x1082   :  { %v4975_v14 = vadd.f32 %v4953_v59, %v4854_v11  ;;  %v11484_v58 = vpack.c.bf16 %v5208_v54, %v5206_v53  ;;  %v11486_v59 = vpack.c.bf16 %v5213_v57, %v5211_v43  ;;  %v5214_v11 = vld [vmem:[#allocation8 + $0x720] sm:$0xff]  ;;  %v5541_v49 = vld [vmem:[#allocation10 + $0x18] sm:$0xff]  ;;  %v5540_v43 = vld [vmem:[#allocation10 + $0x10] sm:$0xff] }
0x1083   :  { %v4982_v18 = vmax.f32 %v4974_v10, 0.0  ;;  %v11490_v10 = vpack.c.bf16 %v5217_v8, %v5215_v3  ;;  %v5545_v55 = vld [vmem:[#allocation10 + $0x38] sm:$0xff]  ;;  %v5544_v57 = vld [vmem:[#allocation10 + $0x30] sm:$0xff] }
0x1084   :  { %v4983_v17 = vmax.f32 %v4975_v14, 0.0  ;;  %11453 = vmatpush1.bf16.msra.mxu1 %v11452_v9  ;;  %v11488_v9 = vpack.c.bf16 %v5212_v1, %v5210_v60  ;;  %v11582_v54 = vpack.c.bf16 %v5545_v55, %v5541_v49  ;;  %v5553_v60 = vld [vmem:[#allocation10 + $0x78] sm:$0xff]  ;;  %v11584_v3 = vpack.c.bf16 %v5544_v57, %v5540_v43 }
0x1085   :  { %11455 = vmatprep.subr.bf16.mxu1 %v11454_v62  ;;  %v5216_v62 = vld [vmem:[#allocation8 + $0x730] sm:$0xff]  ;;  %v5613_v49 = vld [vmem:[#allocation10 + $0x258] sm:$0xff] }
0x1086   :  { %5460 = vmatprep.mubr.f32.mxu1 %v4983_v17  ;;  %v11492_v14 = vpack.c.bf16 %v5216_v62, %v5214_v11  ;;  %v5220_v17 = vld [vmem:[#allocation8 + $0x750] sm:$0xff]  ;;  %v5557_v62 = vld [vmem:[#allocation10 + $0x98] sm:$0xff] }
0x1087   :  { %5461 = vmatmul.mubr.f32.vlgmr.msra.gmra.mrb[42].mxu1 %v4982_v18  ;;  %v5225_v18 = vld [vmem:[#allocation8 + $0x778] sm:$0xff]  ;;  %v5552_v11 = vld [vmem:[#allocation10 + $0x70] sm:$0xff] }
0x1088   :  { %11457 = vmatpush1.bf16.msra.mxu1 %v11456_v56  ;;  %v5223_v56 = vld [vmem:[#allocation8 + $0x768] sm:$0xff]  ;;  %v5617_v55 = vld [vmem:[#allocation10 + $0x278] sm:$0xff] }
0x1089   :  { %11459 = vmatprep.subr.bf16.mxu1 %v11458_v19  ;;  %v11496_v19 = vpack.c.bf16 %v5220_v17, %v5218_v16  ;;  %v11498_v20 = vpack.c.bf16 %v5225_v18, %v5223_v56  ;;  %v5560_v16 = vld [vmem:[#allocation10 + $0xb0] sm:$0xff]  ;;  %v5565_v17 = vld [vmem:[#allocation10 + $0xd8] sm:$0xff] }
0x108a   :  { %v5569_v56 = vld [vmem:[#allocation10 + $0xf8] sm:$0xff] }
0x108b   :  { %v5625_v43 = vld [vmem:[#allocation10 + $0x2b8] sm:$0xff] }
0x108c   :  { %11461 = vmatpush1.bf16.msra.mxu1 %v11460_v24  ;;  %v5229_v24 = vld [vmem:[#allocation8 + $0x798] sm:$0xff] }
0x108d   :  { %11463 = vmatprep.subr.bf16.mxu1 %v11462_v25  ;;  %v11500_v25 = vpack.c.bf16 %v5224_v22, %v5222_v21  ;;  %v11502_v26 = vpack.c.bf16 %v5229_v24, %v5227_v23  ;;  %v5568_v21 = vld [vmem:[#allocation10 + $0xf0] sm:$0xff]  ;;  %v5573_v22 = vld [vmem:[#allocation10 + $0x118] sm:$0xff] }
0x108e   :  { %v5577_v23 = vld [vmem:[#allocation10 + $0x138] sm:$0xff] }
0x1090   :  { %11465 = vmatpush1.bf16.msra.mxu1 %v11464_v51  ;;  %v5233_v51 = vld [vmem:[#allocation8 + $0x7b8] sm:$0xff] }
0x1091   :  { %11467 = vmatprep.subr.bf16.mxu1 %v11466_v31  ;;  %v11504_v31 = vpack.c.bf16 %v5228_v0, %v5226_v28  ;;  %v11506_v32 = vpack.c.bf16 %v5233_v51, %v5231_v29  ;;  %v5576_v28 = vld [vmem:[#allocation10 + $0x130] sm:$0xff]  ;;  %v5581_v0 = vld [vmem:[#allocation10 + $0x158] sm:$0xff] }
0x1092   :  { %v5585_v29 = vld [vmem:[#allocation10 + $0x178] sm:$0xff] }
0x1094   :  { %11469 = vmatpush1.bf16.msra.mxu1 %v11468_v39  ;;  %v5237_v39 = vld [vmem:[#allocation8 + $0x7d8] sm:$0xff] }
0x1095   :  { %11471 = vmatprep.subr.bf16.mxu1 %v11470_v40  ;;  %v11508_v40 = vpack.c.bf16 %v5232_v37, %v5230_v63  ;;  %v11510_v41 = vpack.c.bf16 %v5237_v39, %v5235_v38  ;;  %v5584_v63 = vld [vmem:[#allocation10 + $0x170] sm:$0xff]  ;;  %v5589_v37 = vld [vmem:[#allocation10 + $0x198] sm:$0xff] }
0x1096   :  { %v5593_v38 = vld [vmem:[#allocation10 + $0x1b8] sm:$0xff] }
0x1098   :  { %11473 = vmatpush1.bf16.msra.mxu1 %v11472_v45  ;;  %v4960_v45 = vsub.s32 7, %v13611_v4 }
0x1099   :  { %11475 = vmatprep.subr.bf16.mxu1 %v11474_v33  ;;  %v5239_v33 = vld [vmem:[#allocation8 + $0x7e8] sm:$0xff] }
0x109a   :  { %v4961_v48 = vrot.slane %v13041_v34, %v4960_v45  ;;  %v5605_v34 = vld [vmem:[#allocation10 + $0x218] sm:$0xff] }
0x109c   :  { %11477 = vmatpush1.bf16.msra.mxu1 %v11476_v35  ;;  %v11514_v35 = vpack.c.bf16 %v5241_v46, %v5239_v33  ;;  %v11610_v33 = vpack.c.bf16 %v5601_v44, %v5597_v27  ;;  %v5596_v46 = vld [vmem:[#allocation10 + $0x1d0] sm:$0xff]  ;;  %v5835_v44 = vld [vmem:[%s17338_s19 + $0x8] sm:$0xff] }
0x109d   :  { %11479 = vmatprep.subr.bf16.mxu1 %v11478_v6  ;;  %v5238_v6 = vld [vmem:[#allocation8 + $0x7e0] sm:$0xff] }
0x10a0   :  { %11481 = vmatpush1.bf16.msra.mxu1 %v11480_v50 }
0x10a1   :  { %11483 = vmatprep.subr.bf16.mxu1 %v11482_v52  ;;  %v11516_v52 = vpack.c.bf16 %v5240_v47, %v5238_v6  ;;  %v5604_v47 = vld [vmem:[#allocation10 + $0x210] sm:$0xff] }
0x10a4   :  { %11485 = vmatpush1.bf16.msra.mxu1 %v11484_v58 }
0x10a5   :  { %11487 = vmatprep.subr.bf16.mxu1 %v11486_v59  ;;  %v5549_v59 = vld [vmem:[#allocation10 + $0x58] sm:$0xff] }
0x10a8   :  { %11489 = vmatpush1.bf16.msra.mxu1 %v11488_v9  ;;  %v11586_v9 = vpack.c.bf16 %v5553_v60, %v5549_v59  ;;  %v5620_v59 = vld [vmem:[#allocation10 + $0x290] sm:$0xff] }
0x10a9   :  { %11491 = vmatprep.subr.bf16.mxu1 %v11490_v10  ;;  %v5548_v10 = vld [vmem:[#allocation10 + $0x50] sm:$0xff] }
0x10aa   :  { %v11588_v13 = vpack.c.bf16 %v5552_v11, %v5548_v10  ;;  %v5624_v60 = vld [vmem:[#allocation10 + $0x2b0] sm:$0xff] }
0x10ab   :  { %v5628_v10 = vld [vmem:[#allocation10 + $0x2d0] sm:$0xff] }
0x10ac   :  { %11493 = vmatpush1.bf16.msra.mxu1 %v11492_v14  ;;  %v11590_v14 = vpack.c.bf16 %v5561_v12, %v5557_v62  ;;  %v5632_v11 = vld [vmem:[#allocation10 + $0x2f0] sm:$0xff]  ;;  %v5637_v62 = vld [vmem:[#allocation10 + $0x318] sm:$0xff] }
0x10ad   :  { %11495 = vmatprep.subr.bf16.mxu1 %v11494_v15  ;;  %v5556_v15 = vld [vmem:[#allocation10 + $0x90] sm:$0xff]  ;;  %v5641_v12 = vld [vmem:[#allocation10 + $0x338] sm:$0xff] }
0x10ae   :  { %v11592_v18 = vpack.c.bf16 %v5560_v16, %v5556_v15  ;;  %v5636_v15 = vld [vmem:[#allocation10 + $0x310] sm:$0xff] }
0x10af   :  { %v5640_v16 = vld [vmem:[#allocation10 + $0x330] sm:$0xff] }
0x10b0   :  { %11497 = vmatpush1.bf16.msra.mxu1 %v11496_v19  ;;  %v11594_v19 = vpack.c.bf16 %v5569_v56, %v5565_v17  ;;  %v5645_v17 = vld [vmem:[#allocation10 + $0x358] sm:$0xff] }
0x10b1   :  { %11499 = vmatprep.subr.bf16.mxu1 %v11498_v20  ;;  %v5564_v20 = vld [vmem:[#allocation10 + $0xd0] sm:$0xff]  ;;  %v5649_v56 = vld [vmem:[#allocation10 + $0x378] sm:$0xff] }
0x10b2   :  { %v11596_v24 = vpack.c.bf16 %v5568_v21, %v5564_v20  ;;  %v5644_v20 = vld [vmem:[#allocation10 + $0x350] sm:$0xff] }
0x10b3   :  { %v5648_v21 = vld [vmem:[#allocation10 + $0x370] sm:$0xff] }
0x10b4   :  { %11501 = vmatpush1.bf16.msra.mxu1 %v11500_v25  ;;  %v11598_v25 = vpack.c.bf16 %v5577_v23, %v5573_v22  ;;  %v5653_v22 = vld [vmem:[#allocation10 + $0x398] sm:$0xff] }
0x10b5   :  { %11503 = vmatprep.subr.bf16.mxu1 %v11502_v26  ;;  %v5572_v26 = vld [vmem:[#allocation10 + $0x110] sm:$0xff]  ;;  %v5657_v23 = vld [vmem:[#allocation10 + $0x3b8] sm:$0xff] }
0x10b6   :  { %v11600_v51 = vpack.c.bf16 %v5576_v28, %v5572_v26  ;;  %v5652_v26 = vld [vmem:[#allocation10 + $0x390] sm:$0xff] }
0x10b7   :  { %v5656_v28 = vld [vmem:[#allocation10 + $0x3b0] sm:$0xff] }
0x10b8   :  { %11505 = vmatpush1.bf16.msra.mxu1 %v11504_v31  ;;  %v11602_v31 = vpack.c.bf16 %v5585_v29, %v5581_v0  ;;  %v11640_v0 = vpack.c.bf16 %v5656_v28, %v5652_v26  ;;  %v5659_v29 = vld [vmem:[#allocation10 + $0x3c8] sm:$0xff] }
0x10b9   :  { %11507 = vmatprep.subr.bf16.mxu1 %v11506_v32  ;;  %v5580_v32 = vld [vmem:[#allocation10 + $0x150] sm:$0xff] }
0x10ba   :  { %v11604_v39 = vpack.c.bf16 %v5584_v63, %v5580_v32  ;;  %v5665_v63 = vld [vmem:[#allocation10 + $0x3f8] sm:$0xff] }
0x10bc   :  { %11509 = vmatpush1.bf16.msra.mxu1 %v11508_v40  ;;  %v11606_v40 = vpack.c.bf16 %v5593_v38, %v5589_v37  ;;  %v5658_v37 = vld [vmem:[#allocation10 + $0x3c0] sm:$0xff] }
0x10bd   :  { %11511 = vmatprep.subr.bf16.mxu1 %v11510_v41  ;;  %v5588_v41 = vld [vmem:[#allocation10 + $0x190] sm:$0xff]  ;;  %v5662_v38 = vld [vmem:[#allocation10 + $0x3e0] sm:$0xff] }
0x10be   :  { %v11608_v45 = vpack.c.bf16 %v5592_v42, %v5588_v41  ;;  %v5660_v41 = vld [vmem:[#allocation10 + $0x3d0] sm:$0xff] }
0x10bf   :  { %v5664_v42 = vld [vmem:[#allocation10 + $0x3f0] sm:$0xff] }
0x10c0   :  { %v4923_v50 = vpop.f32.mrb[36].mxu0  ;;  %11513 = vmatpush1.bf16.msra.mxu1 %v11512_v61  ;;  %v5600_v61 = vld [vmem:[#allocation10 + $0x1f0] sm:$0xff]  ;;  %v11644_v27 = vpack.c.bf16 %v5664_v42, %v5660_v41 }
0x10c1   :  { %v4976_v4 = vadd.f32 %v4957_v2, %v4923_v50  ;;  %v4925_v53 = vpop.f32.mrb[37].mxu0  ;;  %11515 = vmatprep.subr.bf16.mxu1 %v11514_v35  ;;  %v5609_v2 = vld [vmem:[#allocation10 + $0x238] sm:$0xff]  ;;  %v11612_v35 = vpack.c.bf16 %v5600_v61, %v5596_v46 }
0x10c2   :  { %v4977_v58 = vadd.f32 %v4961_v48, %v4925_v53  ;;  %v11614_v6 = vpack.c.bf16 %v5609_v2, %v5605_v34  ;;  %v5608_v48 = vld [vmem:[#allocation10 + $0x230] sm:$0xff]  ;;  %v5242_v2 = vld [vmem:[%s17335_s16] sm:$0x3] }
0x10c3   :  { %v4984_v8 = vmax.f32 %v4976_v4, 0.0  ;;  %v11616_v50 = vpack.c.bf16 %v5608_v48, %v5604_v47  ;;  %v5612_v4 = vld [vmem:[#allocation10 + $0x250] sm:$0xff]  ;;  %v5838_v47 = vld [vmem:[%s17338_s19 + $0x20] sm:$0xff]  ;;  %v5247_v48 = vrot.slane %v5242_v2, %v13620_v7 }
0x10c4   :  { %v4985_v1 = vmax.f32 %v4977_v58, 0.0  ;;  %11517 = vmatpush1.bf16.msra.mxu1 %v11516_v52  ;;  %v11618_v52 = vpack.c.bf16 %v5617_v55, %v5613_v49  ;;  %v5616_v53 = vld [vmem:[#allocation10 + $0x270] sm:$0xff] }
0x10c5   :  { %11583 = vmatprep.subr.bf16.mxu1 %v11582_v54  ;;  %v5621_v54 = vld [vmem:[#allocation10 + $0x298] sm:$0xff]  ;;  %v11620_v57 = vpack.c.bf16 %v5616_v53, %v5612_v4  ;;  %v5836_v49 = vld [vmem:[%s17338_s19 + $0x10] sm:$0xff]  ;;  %v5847_v4 = vld [vmem:[%s17338_s19 + $0x68] sm:$0xff] }
0x10c6   :  { %5531 = vmatprep.mubr.f32.mxu1 %v4985_v1  ;;  %v11622_v58 = vpack.c.bf16 %v5625_v43, %v5621_v54  ;;  %v5629_v1 = vld [vmem:[#allocation10 + $0x2d8] sm:$0xff]  ;;  %v5840_v55 = vld [vmem:[%s17338_s19 + $0x30] sm:$0xff] }
0x10c7   :  { %5532 = vmatmul.mubr.f32.vlgmr.msra.gmra.mrb[42].mxu1 %v4984_v8  ;;  %v11624_v8 = vpack.c.bf16 %v5624_v60, %v5620_v59  ;;  %v5841_v61 = vld [vmem:[%s17338_s19 + $0x38] sm:$0xff]  ;;  %v11776_v59 = vpack.c.bf16 %v5840_v55, %v5836_v49  ;;  %v5842_v60 = vld [vmem:[%s17338_s19 + $0x40] sm:$0xff] }
0x10c8   :  { %11585 = vmatpush1.bf16.msra.mxu1 %v11584_v3  ;;  %v5633_v3 = vld [vmem:[#allocation10 + $0x2f8] sm:$0xff] }
0x10c9   :  { %11587 = vmatprep.subr.bf16.mxu1 %v11586_v9  ;;  %v11626_v9 = vpack.c.bf16 %v5633_v3, %v5629_v1  ;;  %v5845_v53 = vld [vmem:[%s17338_s19 + $0x58] sm:$0xff]  ;;  %v5846_v1 = vld [vmem:[%s17338_s19 + $0x60] sm:$0xff] }
0x10ca   :  { %v5849_v54 = vld [vmem:[%s17338_s19 + $0x78] sm:$0xff]  ;;  %v5874_v49 = vld [vmem:[%s17338_s19 + $0x140] sm:$0xff] }
0x10cb   :  { %v5878_v55 = vld [vmem:[%s17338_s19 + $0x160] sm:$0xff] }
0x10cc   :  { %11589 = vmatpush1.bf16.msra.mxu1 %v11588_v13  ;;  %v11628_v13 = vpack.c.bf16 %v5632_v11, %v5628_v10  ;;  %v5844_v10 = vld [vmem:[%s17338_s19 + $0x50] sm:$0xff] }
0x10cd   :  { %11591 = vmatprep.subr.bf16.mxu1 %v11590_v14  ;;  %v11630_v14 = vpack.c.bf16 %v5641_v12, %v5637_v62  ;;  %v5848_v11 = vld [vmem:[%s17338_s19 + $0x70] sm:$0xff]  ;;  %v5851_v62 = vld [vmem:[%s17338_s19 + $0x88] sm:$0xff] }
0x10ce   :  { %v5855_v12 = vld [vmem:[%s17338_s19 + $0xa8] sm:$0xff] }
0x10d0   :  { %11593 = vmatpush1.bf16.msra.mxu1 %v11592_v18  ;;  %v11632_v18 = vpack.c.bf16 %v5640_v16, %v5636_v15  ;;  %v11652_v15 = vpack.c.bf16 %v5846_v1, %v5842_v60  ;;  %v11780_v16 = vpack.c.bf16 %v5848_v11, %v5844_v10  ;;  %v11668_v60 = vpack.c.bf16 %v5878_v55, %v5874_v49 }
0x10d1   :  { %11595 = vmatprep.subr.bf16.mxu1 %v11594_v19  ;;  %v11634_v19 = vpack.c.bf16 %v5649_v56, %v5645_v17  ;;  %v5850_v17 = vld [vmem:[%s17338_s19 + $0x80] sm:$0xff] }
0x10d2   :  { %v5854_v56 = vld [vmem:[%s17338_s19 + $0xa0] sm:$0xff] }
0x10d3   :  { %v11656_v26 = vpack.c.bf16 %v5854_v56, %v5850_v17 }
0x10d4   :  { %11597 = vmatpush1.bf16.msra.mxu1 %v11596_v24  ;;  %v11636_v24 = vpack.c.bf16 %v5648_v21, %v5644_v20  ;;  %v5852_v20 = vld [vmem:[%s17338_s19 + $0x90] sm:$0xff] }
0x10d5   :  { %11599 = vmatprep.subr.bf16.mxu1 %v11598_v25  ;;  %v11638_v25 = vpack.c.bf16 %v5657_v23, %v5653_v22  ;;  %v5856_v21 = vld [vmem:[%s17338_s19 + $0xb0] sm:$0xff]  ;;  %v5859_v22 = vld [vmem:[%s17338_s19 + $0xc8] sm:$0xff] }
0x10d6   :  { %v5863_v23 = vld [vmem:[%s17338_s19 + $0xe8] sm:$0xff]  ;;  %v11784_v28 = vpack.c.bf16 %v5856_v21, %v5852_v20 }
0x10d8   :  { %11601 = vmatpush1.bf16.msra.mxu1 %v11600_v51  ;;  %v5663_v51 = vld [vmem:[#allocation10 + $0x3e8] sm:$0xff] }
0x10d9   :  { %11603 = vmatprep.subr.bf16.mxu1 %v11602_v31  ;;  %v5661_v31 = vld [vmem:[#allocation10 + $0x3d8] sm:$0xff]  ;;  %v11578_v32 = vpack.c.bf16 %v5663_v51, %v5659_v29  ;;  %v11658_v51 = vpack.c.bf16 %v5863_v23, %v5859_v22  ;;  %v5892_v22 = vld [vmem:[%s17338_s19 + $0x1d0] sm:$0xff] }
0x10da   :  { %v5862_v29 = vld [vmem:[%s17338_s19 + $0xe0] sm:$0xff]  ;;  %v5896_v23 = vld [vmem:[%s17338_s19 + $0x1f0] sm:$0xff] }
0x10db   :  { %11579 = vmatprep.subr.bf16.mxu0 %v11578_v32  ;;  %v5860_v32 = vld [vmem:[%s17338_s19 + $0xd0] sm:$0xff] }
0x10dc   :  { %11605 = vmatpush1.bf16.msra.mxu1 %v11604_v39  ;;  %v11642_v39 = vpack.c.bf16 %v5665_v63, %v5661_v31  ;;  %v5864_v63 = vld [vmem:[%s17338_s19 + $0xf0] sm:$0xff] }
0x10dd   :  { %11607 = vmatprep.subr.bf16.mxu1 %v11606_v40  ;;  %v11580_v40 = vpack.c.bf16 %v5662_v38, %v5658_v37  ;;  %v5867_v37 = vld [vmem:[%s17338_s19 + $0x108] sm:$0xff]  ;;  %v11788_v42 = vpack.c.bf16 %v5864_v63, %v5860_v32 }
0x10de   :  { %v5871_v38 = vld [vmem:[%s17338_s19 + $0x128] sm:$0xff] }
0x10df   :  { %11581 = vmatpush1.bf16.msra.mxu0 %v11580_v40  ;;  %v5873_v40 = vld [vmem:[%s17338_s19 + $0x138] sm:$0xff] }
0x10e0   :  { %11609 = vmatpush1.bf16.msra.mxu1 %v11608_v45  ;;  %v5839_v45 = vld [vmem:[%s17338_s19 + $0x28] sm:$0xff] }
0x10e1   :  { %11611 = vmatprep.subr.bf16.mxu1 %v11610_v33  ;;  %v5837_v33 = vld [vmem:[%s17338_s19 + $0x18] sm:$0xff]  ;;  %v11646_v46 = vpack.c.bf16 %v5839_v45, %v5835_v44  ;;  %v5870_v44 = vld [vmem:[%s17338_s19 + $0x120] sm:$0xff]  ;;  %v11662_v45 = vpack.c.bf16 %v5871_v38, %v5867_v37  ;;  %v5900_v37 = vld [vmem:[%s17338_s19 + $0x210] sm:$0xff] }
0x10e2   :  { %v11774_v34 = vpack.c.bf16 %v5841_v61, %v5837_v33  ;;  %v5872_v61 = vld [vmem:[%s17338_s19 + $0x130] sm:$0xff] }
0x10e3   :  { %11647 = vmatprep.subr.bf16.mxu0 %v11646_v46  ;;  %v5868_v46 = vld [vmem:[%s17338_s19 + $0x110] sm:$0xff] }
0x10e4   :  { %11613 = vmatpush1.bf16.msra.mxu1 %v11612_v35  ;;  %v5251_v35 = vrot.slane %v5242_v2, %v13614_v5  ;;  %v5879_v2 = vld [vmem:[%s17338_s19 + $0x168] sm:$0xff]  ;;  %v5904_v38 = vld [vmem:[%s17338_s19 + $0x230] sm:$0xff] }
0x10e5   :  { %11615 = vmatprep.subr.bf16.mxu1 %v11614_v6  ;;  %v5834_v6 = vld [vmem:[%s17338_s19] sm:$0xff] }
0x10e8   :  { %11617 = vmatpush1.bf16.msra.mxu1 %v11616_v50  ;;  %v5843_v50 = vld [vmem:[%s17338_s19 + $0x48] sm:$0xff] }
0x10e9   :  { %11619 = vmatprep.subr.bf16.mxu1 %v11618_v52 }
0x10ec   :  { %11621 = vmatpush1.bf16.msra.mxu1 %v11620_v57 }
0x10ed   :  { %11623 = vmatprep.subr.bf16.mxu1 %v11622_v58  ;;  %v11648_v58 = vpack.c.bf16 %v5838_v47, %v5834_v6  ;;  %v5881_v6 = vld [vmem:[%s17338_s19 + $0x178] sm:$0xff] }
0x10f0   :  { %11625 = vmatpush1.bf16.msra.mxu1 %v11624_v8  ;;  %v11650_v8 = vpack.c.bf16 %v5847_v4, %v5843_v50  ;;  %v5876_v4 = vld [vmem:[%s17338_s19 + $0x150] sm:$0xff] }
0x10f1   :  { %11627 = vmatprep.subr.bf16.mxu1 %v11626_v9  ;;  %v11778_v9 = vpack.c.bf16 %v5849_v54, %v5845_v53  ;;  %v5880_v53 = vld [vmem:[%s17338_s19 + $0x170] sm:$0xff]  ;;  %v5883_v54 = vld [vmem:[%s17338_s19 + $0x188] sm:$0xff] }
0x10f2   :  { %v11796_v1 = vpack.c.bf16 %v5880_v53, %v5876_v4 }
0x10f4   :  { %11629 = vmatpush1.bf16.msra.mxu1 %v11628_v13  ;;  %v5853_v13 = vld [vmem:[%s17338_s19 + $0x98] sm:$0xff] }
0x10f5   :  { %11631 = vmatprep.subr.bf16.mxu1 %v11630_v14  ;;  %v5857_v14 = vld [vmem:[%s17338_s19 + $0xb8] sm:$0xff] }
0x10f8   :  { %11633 = vmatpush1.bf16.msra.mxu1 %v11632_v18  ;;  %v11654_v18 = vpack.c.bf16 %v5855_v12, %v5851_v62  ;;  %v5884_v62 = vld [vmem:[%s17338_s19 + $0x190] sm:$0xff] }
0x10f9   :  { %11635 = vmatprep.subr.bf16.mxu1 %v11634_v19  ;;  %v11782_v19 = vpack.c.bf16 %v5857_v14, %v5853_v13  ;;  %v5888_v12 = vld [vmem:[%s17338_s19 + $0x1b0] sm:$0xff]  ;;  %v5891_v13 = vld [vmem:[%s17338_s19 + $0x1c8] sm:$0xff] }
0x10fa   :  { %v5895_v14 = vld [vmem:[%s17338_s19 + $0x1e8] sm:$0xff]  ;;  %v11800_v56 = vpack.c.bf16 %v5888_v12, %v5884_v62 }
0x10fb   :  { %v11674_v20 = vpack.c.bf16 %v5895_v14, %v5891_v13  ;;  %v5924_v13 = vld [vmem:[%s17338_s19 + $0x2d0] sm:$0xff] }
0x10fc   :  { %11637 = vmatpush1.bf16.msra.mxu1 %v11636_v24  ;;  %v5861_v24 = vld [vmem:[%s17338_s19 + $0xd8] sm:$0xff]  ;;  %v5928_v14 = vld [vmem:[%s17338_s19 + $0x2f0] sm:$0xff] }
0x10fd   :  { %11639 = vmatprep.subr.bf16.mxu1 %v11638_v25  ;;  %v5865_v25 = vld [vmem:[%s17338_s19 + $0xf8] sm:$0xff] }
0x10fe   :  { %v11786_v31 = vpack.c.bf16 %v5865_v25, %v5861_v24  ;;  %v5899_v24 = vld [vmem:[%s17338_s19 + $0x208] sm:$0xff] }
0x10ff   :  { %v5903_v25 = vld [vmem:[%s17338_s19 + $0x228] sm:$0xff] }
0x1100   :  { %11641 = vmatpush1.bf16.msra.mxu1 %v11640_v0  ;;  %v5858_v0 = vld [vmem:[%s17338_s19 + $0xc0] sm:$0xff]  ;;  %v11678_v32 = vpack.c.bf16 %v5903_v25, %v5899_v24  ;;  %v5932_v24 = vld [vmem:[%s17338_s19 + $0x310] sm:$0xff] }
0x1101   :  { %11643 = vmatprep.subr.bf16.mxu1 %v11642_v39  ;;  %v5869_v39 = vld [vmem:[%s17338_s19 + $0x118] sm:$0xff]  ;;  %v11660_v41 = vpack.c.bf16 %v5862_v29, %v5858_v0  ;;  %v11804_v29 = vpack.c.bf16 %v5896_v23, %v5892_v22  ;;  %v5936_v25 = vld [vmem:[%s17338_s19 + $0x330] sm:$0xff] }
0x1102   :  { %v11790_v33 = vpack.c.bf16 %v5873_v40, %v5869_v39  ;;  %v5907_v39 = vld [vmem:[%s17338_s19 + $0x248] sm:$0xff] }
0x1103   :  { %v5911_v40 = vld [vmem:[%s17338_s19 + $0x268] sm:$0xff] }
0x1104   :  { %11645 = vmatpush1.bf16.msra.mxu1 %v11644_v27  ;;  %v5866_v27 = vld [vmem:[%s17338_s19 + $0x100] sm:$0xff] }
0x1105   :  { %11775 = vmatprep.subr.bf16.mxu1 %v11774_v34  ;;  %v5875_v34 = vld [vmem:[%s17338_s19 + $0x148] sm:$0xff]  ;;  %v11664_v47 = vpack.c.bf16 %v5870_v44, %v5866_v27  ;;  %v11808_v44 = vpack.c.bf16 %v5904_v38, %v5900_v37 }
0x1106   :  { %v11666_v50 = vpack.c.bf16 %v5879_v2, %v5875_v34  ;;  %v5908_v34 = vld [vmem:[%s17338_s19 + $0x250] sm:$0xff] }
0x1107   :  { %v5912_v2 = vld [vmem:[%s17338_s19 + $0x270] sm:$0xff] }
0x1108   :  { %v11812_v55 = vpack.c.bf16 %v5912_v2, %v5908_v34  ;;  %v5950_v2 = vld [vmem:[%s17338_s19 + $0x3a0] sm:$0xff] }
0x119a   :  { %v5533_v52 = vpop.f32.mrb[42].mxu1 }
0x119b   :  { %v5535_v43 = vpop.f32.mrb[43].mxu1  ;;  %v15347_v3 = vadd.f32 %v5533_v52, %v5247_v48  ;;  %v11792_v48 = vpack.c.bf16 %v5872_v61, %v5868_v46  ;;  %v11682_v46 = vpack.c.bf16 %v5911_v40, %v5907_v39  ;;  %v5940_v39 = vld [vmem:[%s17338_s19 + $0x350] sm:$0xff] }
0x119c   :  { %v15339_v57 = vadd.f32 %v5535_v43, %v5251_v35  ;;  %v5877_v35 = vld [vmem:[%s17338_s19 + $0x158] sm:$0xff]  ;;  %v5887_v43 = vld [vmem:[%s17338_s19 + $0x1a8] sm:$0xff]  ;;  %v5944_v40 = vld [vmem:[%s17338_s19 + $0x370] sm:$0xff] }
0x119d   :  { %v11794_v52 = vpack.c.bf16 %v5881_v6, %v5877_v35  ;;  %v11670_v10 = vpack.c.bf16 %v5887_v43, %v5883_v54  ;;  %v5915_v35 = vld [vmem:[%s17338_s19 + $0x288] sm:$0xff]  ;;  %v5916_v54 = vld [vmem:[%s17338_s19 + $0x290] sm:$0xff] }
0x119e   :  { %5752 = vmatprep.mubr.f32.mxu0 %v15339_v57  ;;  %5823 = vmatprep.mubr.f32.mxu1 %v15339_v57  ;;  %v5919_v6 = vld [vmem:[%s17338_s19 + $0x2a8] sm:$0xff]  ;;  %v5920_v43 = vld [vmem:[%s17338_s19 + $0x2b0] sm:$0xff] }
0x119f   :  { %5753 = vmatmul.mubr.f32.vlgmr.msra.gmra.mrb[38].mxu0 %v15347_v3  ;;  %5824 = vmatmul.mubr.f32.vlgmr.msra.gmra.mrb[44].mxu1 %v15347_v3  ;;  %v11686_v4 = vpack.c.bf16 %v5919_v6, %v5915_v35  ;;  %v5948_v35 = vld [vmem:[%s17338_s19 + $0x390] sm:$0xff] }
0x11a0   :  { %11649 = vmatpush1.bf16.msra.mxu0 %v11648_v58  ;;  %11777 = vmatpush1.bf16.msra.mxu1 %v11776_v59  ;;  %v5885_v58 = vld [vmem:[%s17338_s19 + $0x198] sm:$0xff]  ;;  %v5952_v6 = vld [vmem:[%s17338_s19 + $0x3b0] sm:$0xff] }
0x11a1   :  { %11651 = vmatprep.subr.bf16.mxu0 %v11650_v8  ;;  %11779 = vmatprep.subr.bf16.mxu1 %v11778_v9  ;;  %v5889_v59 = vld [vmem:[%s17338_s19 + $0x1b8] sm:$0xff]  ;;  %v5882_v8 = vld [vmem:[%s17338_s19 + $0x180] sm:$0xff] }
0x11a2   :  { %v5886_v9 = vld [vmem:[%s17338_s19 + $0x1a0] sm:$0xff]  ;;  %v11798_v11 = vpack.c.bf16 %v5889_v59, %v5885_v58  ;;  %v5923_v58 = vld [vmem:[%s17338_s19 + $0x2c8] sm:$0xff] }
0x11a3   :  { %v11672_v17 = vpack.c.bf16 %v5886_v9, %v5882_v8  ;;  %v5927_v59 = vld [vmem:[%s17338_s19 + $0x2e8] sm:$0xff]  ;;  %v11816_v9 = vpack.c.bf16 %v5920_v43, %v5916_v54  ;;  %v5958_v54 = vld [vmem:[%s17338_s19 + $0x3e0] sm:$0xff] }
0x11a4   :  { %11653 = vmatpush1.bf16.msra.mxu0 %v11652_v15  ;;  %11781 = vmatpush1.bf16.msra.mxu1 %v11780_v16  ;;  %v5893_v15 = vld [vmem:[%s17338_s19 + $0x1d8] sm:$0xff]  ;;  %v11690_v62 = vpack.c.bf16 %v5927_v59, %v5923_v58  ;;  %v5956_v59 = vld [vmem:[%s17338_s19 + $0x3d0] sm:$0xff] }
0x11a5   :  { %11655 = vmatprep.subr.bf16.mxu0 %v11654_v18  ;;  %11783 = vmatprep.subr.bf16.mxu1 %v11782_v19  ;;  %v5897_v16 = vld [vmem:[%s17338_s19 + $0x1f8] sm:$0xff]  ;;  %v5890_v18 = vld [vmem:[%s17338_s19 + $0x1c0] sm:$0xff] }
0x11a6   :  { %v5894_v19 = vld [vmem:[%s17338_s19 + $0x1e0] sm:$0xff]  ;;  %v11802_v21 = vpack.c.bf16 %v5897_v16, %v5893_v15  ;;  %v5931_v15 = vld [vmem:[%s17338_s19 + $0x308] sm:$0xff] }
0x11a7   :  { %v11676_v0 = vpack.c.bf16 %v5894_v19, %v5890_v18  ;;  %v5935_v16 = vld [vmem:[%s17338_s19 + $0x328] sm:$0xff]  ;;  %v11820_v19 = vpack.c.bf16 %v5928_v14, %v5924_v13  ;;  %v15710_v13 = vld [vmem:[%s17337_s18] sm:$0xf] }
0x11a8   :  { %11657 = vmatpush1.bf16.msra.mxu0 %v11656_v26  ;;  %11785 = vmatpush1.bf16.msra.mxu1 %v11784_v28  ;;  %v5901_v26 = vld [vmem:[%s17338_s19 + $0x218] sm:$0xff]  ;;  %v11694_v22 = vpack.c.bf16 %v5935_v16, %v5931_v15  ;;  %v5671_v14 = vrot.slane %v15710_v13, %v13620_v7  ;;  %v5675_v15 = vrot.slane %v15710_v13, %v13614_v5 }
0x11a9   :  { %11659 = vmatprep.subr.bf16.mxu0 %v11658_v51  ;;  %11787 = vmatprep.subr.bf16.mxu1 %v11786_v31  ;;  %v5905_v28 = vld [vmem:[%s17338_s19 + $0x238] sm:$0xff]  ;;  %v5898_v51 = vld [vmem:[%s17338_s19 + $0x200] sm:$0xff]  ;;  %v5683_v16 = vrot.slane %v15710_v13, %v15283_v36 }
0x11aa   :  { %v5902_v31 = vld [vmem:[%s17338_s19 + $0x220] sm:$0xff]  ;;  %v11806_v63 = vpack.c.bf16 %v5905_v28, %v5901_v26  ;;  %v5939_v26 = vld [vmem:[%s17338_s19 + $0x348] sm:$0xff] }
0x11ab   :  { %v11680_v27 = vpack.c.bf16 %v5902_v31, %v5898_v51  ;;  %v5943_v28 = vld [vmem:[%s17338_s19 + $0x368] sm:$0xff]  ;;  %v11824_v31 = vpack.c.bf16 %v5936_v25, %v5932_v24  ;;  %v5968_v24 = vld [vmem:[%s17338_s19 + $0x430] sm:$0xff] }
0x11ac   :  { %11661 = vmatpush1.bf16.msra.mxu0 %v11660_v41  ;;  %11789 = vmatpush1.bf16.msra.mxu1 %v11788_v42  ;;  %v5909_v41 = vld [vmem:[%s17338_s19 + $0x258] sm:$0xff]  ;;  %v11698_v37 = vpack.c.bf16 %v5943_v28, %v5939_v26  ;;  %v5971_v26 = vld [vmem:[%s17338_s19 + $0x448] sm:$0xff] }
0x11ad   :  { %11663 = vmatprep.subr.bf16.mxu0 %v11662_v45  ;;  %11791 = vmatprep.subr.bf16.mxu1 %v11790_v33  ;;  %v5913_v42 = vld [vmem:[%s17338_s19 + $0x278] sm:$0xff]  ;;  %v5906_v45 = vld [vmem:[%s17338_s19 + $0x240] sm:$0xff] }
0x11ae   :  { %v5910_v33 = vld [vmem:[%s17338_s19 + $0x260] sm:$0xff]  ;;  %v11810_v61 = vpack.c.bf16 %v5913_v42, %v5909_v41  ;;  %v5947_v41 = vld [vmem:[%s17338_s19 + $0x388] sm:$0xff] }
0x11af   :  { %v11684_v49 = vpack.c.bf16 %v5910_v33, %v5906_v45  ;;  %v5951_v42 = vld [vmem:[%s17338_s19 + $0x3a8] sm:$0xff]  ;;  %v11828_v33 = vpack.c.bf16 %v5944_v40, %v5940_v39  ;;  %v5972_v40 = vld [vmem:[%s17338_s19 + $0x450] sm:$0xff] }
0x11b0   :  { %11665 = vmatpush1.bf16.msra.mxu0 %v11664_v47  ;;  %11793 = vmatpush1.bf16.msra.mxu1 %v11792_v48  ;;  %v5917_v47 = vld [vmem:[%s17338_s19 + $0x298] sm:$0xff] }
0x11b1   :  { %11667 = vmatprep.subr.bf16.mxu0 %v11666_v50  ;;  %11795 = vmatprep.subr.bf16.mxu1 %v11794_v52  ;;  %v5921_v48 = vld [vmem:[%s17338_s19 + $0x2b8] sm:$0xff]  ;;  %v5914_v50 = vld [vmem:[%s17338_s19 + $0x280] sm:$0xff] }
0x11b2   :  { %v5918_v52 = vld [vmem:[%s17338_s19 + $0x2a0] sm:$0xff]  ;;  %v11814_v53 = vpack.c.bf16 %v5921_v48, %v5917_v47  ;;  %v11832_v48 = vpack.c.bf16 %v5952_v6, %v5948_v35 }
0x11b3   :  { %v11688_v8 = vpack.c.bf16 %v5918_v52, %v5914_v50  ;;  %v5957_v50 = vld [vmem:[%s17338_s19 + $0x3d8] sm:$0xff]  ;;  %v5978_v35 = vld [vmem:[%s17338_s19 + $0x480] sm:$0xff] }
0x11b4   :  { %11669 = vmatpush1.bf16.msra.mxu0 %v11668_v60  ;;  %11797 = vmatpush1.bf16.msra.mxu1 %v11796_v1  ;;  %v5925_v60 = vld [vmem:[%s17338_s19 + $0x2d8] sm:$0xff]  ;;  %v5982_v6 = vld [vmem:[%s17338_s19 + $0x4a0] sm:$0xff] }
0x11b5   :  { %11671 = vmatprep.subr.bf16.mxu0 %v11670_v10  ;;  %11799 = vmatprep.subr.bf16.mxu1 %v11798_v11  ;;  %v5929_v1 = vld [vmem:[%s17338_s19 + $0x2f8] sm:$0xff]  ;;  %v5922_v10 = vld [vmem:[%s17338_s19 + $0x2c0] sm:$0xff] }
0x11b6   :  { %v5926_v11 = vld [vmem:[%s17338_s19 + $0x2e0] sm:$0xff]  ;;  %v11818_v12 = vpack.c.bf16 %v5929_v1, %v5925_v60  ;;  %v5960_v60 = vld [vmem:[%s17338_s19 + $0x3f0] sm:$0xff] }
0x11b7   :  { %v11692_v18 = vpack.c.bf16 %v5926_v11, %v5922_v10  ;;  %v11836_v1 = vpack.c.bf16 %v5960_v60, %v5956_v59  ;;  %v5965_v10 = vld [vmem:[%s17338_s19 + $0x418] sm:$0xff]  ;;  %v5990_v59 = vld [vmem:[%s17338_s19 + $0x4e0] sm:$0xff] }
0x11b8   :  { %11673 = vmatpush1.bf16.msra.mxu0 %v11672_v17  ;;  %11801 = vmatpush1.bf16.msra.mxu1 %v11800_v56  ;;  %v5933_v17 = vld [vmem:[%s17338_s19 + $0x318] sm:$0xff] }
0x11b9   :  { %11675 = vmatprep.subr.bf16.mxu0 %v11674_v20  ;;  %11803 = vmatprep.subr.bf16.mxu1 %v11802_v21  ;;  %v5937_v56 = vld [vmem:[%s17338_s19 + $0x338] sm:$0xff]  ;;  %v5930_v20 = vld [vmem:[%s17338_s19 + $0x300] sm:$0xff] }
0x11ba   :  { %v5934_v21 = vld [vmem:[%s17338_s19 + $0x320] sm:$0xff]  ;;  %v11822_v23 = vpack.c.bf16 %v5937_v56, %v5933_v17 }
0x11bb   :  { %v11696_v51 = vpack.c.bf16 %v5934_v21, %v5930_v20 }
0x11bc   :  { %11677 = vmatpush1.bf16.msra.mxu0 %v11676_v0  ;;  %11805 = vmatpush1.bf16.msra.mxu1 %v11804_v29  ;;  %v5941_v0 = vld [vmem:[%s17338_s19 + $0x358] sm:$0xff] }
0x11bd   :  { %11679 = vmatprep.subr.bf16.mxu0 %v11678_v32  ;;  %11807 = vmatprep.subr.bf16.mxu1 %v11806_v63  ;;  %v5945_v29 = vld [vmem:[%s17338_s19 + $0x378] sm:$0xff]  ;;  %v5938_v32 = vld [vmem:[%s17338_s19 + $0x340] sm:$0xff] }
0x11be   :  { %v5942_v63 = vld [vmem:[%s17338_s19 + $0x360] sm:$0xff]  ;;  %v11826_v38 = vpack.c.bf16 %v5945_v29, %v5941_v0  ;;  %v5975_v0 = vld [vmem:[%s17338_s19 + $0x468] sm:$0xff]  ;;  %v5973_v29 = vld [vmem:[%s17338_s19 + $0x458] sm:$0xff] }
0x11bf   :  { %v11700_v45 = vpack.c.bf16 %v5942_v63, %v5938_v32 }
0x11c0   :  { %11681 = vmatpush1.bf16.msra.mxu0 %v11680_v27  ;;  %11809 = vmatpush1.bf16.msra.mxu1 %v11808_v44  ;;  %v5949_v27 = vld [vmem:[%s17338_s19 + $0x398] sm:$0xff] }
0x11c1   :  { %11683 = vmatprep.subr.bf16.mxu0 %v11682_v46  ;;  %11811 = vmatprep.subr.bf16.mxu1 %v11810_v61  ;;  %v5953_v44 = vld [vmem:[%s17338_s19 + $0x3b8] sm:$0xff]  ;;  %v5946_v46 = vld [vmem:[%s17338_s19 + $0x380] sm:$0xff]  ;;  %v11702_v61 = vpack.c.bf16 %v5951_v42, %v5947_v41  ;;  %v5976_v41 = vld [vmem:[%s17338_s19 + $0x470] sm:$0xff] }
0x11c2   :  { %v11830_v34 = vpack.c.bf16 %v5953_v44, %v5949_v27  ;;  %v11704_v47 = vpack.c.bf16 %v5950_v2, %v5946_v46  ;;  %v5979_v42 = vld [vmem:[%s17338_s19 + $0x488] sm:$0xff]  ;;  %v11714_v27 = vpack.c.bf16 %v5975_v0, %v5971_v26  ;;  %v5985_v46 = vld [vmem:[%s17338_s19 + $0x4b8] sm:$0xff]  ;;  %v11844_v2 = vpack.c.bf16 %v5976_v41, %v5972_v40  ;;  %v6002_v0 = vld [vmem:[%s17338_s19 + $0x540] sm:$0xff] }
0x11c3   :  { %v6017_v40 = vld [vmem:[%s17338_s19 + $0x5b8] sm:$0xff] }
0x11c4   :  { %11685 = vmatpush1.bf16.msra.mxu0 %v11684_v49  ;;  %11813 = vmatpush1.bf16.msra.mxu1 %v11812_v55  ;;  %v5955_v49 = vld [vmem:[%s17338_s19 + $0x3c8] sm:$0xff] }
0x11c5   :  { %11687 = vmatprep.subr.bf16.mxu0 %v11686_v4  ;;  %11815 = vmatprep.subr.bf16.mxu1 %v11814_v53  ;;  %v5959_v55 = vld [vmem:[%s17338_s19 + $0x3e8] sm:$0xff]  ;;  %v5961_v4 = vld [vmem:[%s17338_s19 + $0x3f8] sm:$0xff]  ;;  %v5954_v53 = vld [vmem:[%s17338_s19 + $0x3c0] sm:$0xff] }
0x11c6   :  { %v11706_v52 = vpack.c.bf16 %v5959_v55, %v5955_v49  ;;  %v11834_v43 = vpack.c.bf16 %v5961_v4, %v5957_v50  ;;  %v11708_v58 = vpack.c.bf16 %v5958_v54, %v5954_v53  ;;  %v5980_v49 = vld [vmem:[%s17338_s19 + $0x490] sm:$0xff]  ;;  %v5987_v50 = vld [vmem:[%s17338_s19 + $0x4c8] sm:$0xff]  ;;  %v5989_v4 = vld [vmem:[%s17338_s19 + $0x4d8] sm:$0xff]  ;;  %v11720_v54 = vpack.c.bf16 %v5982_v6, %v5978_v35 }
0x11c7   :  { %v5984_v55 = vld [vmem:[%s17338_s19 + $0x4b0] sm:$0xff]  ;;  %v5993_v53 = vld [vmem:[%s17338_s19 + $0x4f8] sm:$0xff] }
0x11c8   :  { %11689 = vmatpush1.bf16.msra.mxu0 %v11688_v8  ;;  %11817 = vmatpush1.bf16.msra.mxu1 %v11816_v9  ;;  %v5963_v8 = vld [vmem:[%s17338_s19 + $0x408] sm:$0xff]  ;;  %v6021_v35 = vld [vmem:[%s17338_s19 + $0x5d8] sm:$0xff] }
0x11c9   :  { %11691 = vmatprep.subr.bf16.mxu0 %v11690_v62  ;;  %11819 = vmatprep.subr.bf16.mxu1 %v11818_v12  ;;  %v5967_v9 = vld [vmem:[%s17338_s19 + $0x428] sm:$0xff]  ;;  %v5969_v62 = vld [vmem:[%s17338_s19 + $0x438] sm:$0xff] }
0x11ca   :  { %v11710_v11 = vpack.c.bf16 %v5967_v9, %v5963_v8  ;;  %v11838_v12 = vpack.c.bf16 %v5969_v62, %v5965_v10  ;;  %v5988_v8 = vld [vmem:[%s17338_s19 + $0x4d0] sm:$0xff]  ;;  %v5995_v10 = vld [vmem:[%s17338_s19 + $0x508] sm:$0xff]  ;;  %v5997_v62 = vld [vmem:[%s17338_s19 + $0x518] sm:$0xff] }
0x11cb   :  { %v5992_v9 = vld [vmem:[%s17338_s19 + $0x4f0] sm:$0xff]  ;;  %v6025_v6 = vld [vmem:[%s17338_s19 + $0x5f8] sm:$0xff] }
0x11cc   :  { %11693 = vmatpush1.bf16.msra.mxu0 %v11692_v18  ;;  %11821 = vmatpush1.bf16.msra.mxu1 %v11820_v19  ;;  %v5962_v18 = vld [vmem:[%s17338_s19 + $0x400] sm:$0xff] }
0x11cd   :  { %11695 = vmatprep.subr.bf16.mxu0 %v11694_v22  ;;  %11823 = vmatprep.subr.bf16.mxu1 %v11822_v23  ;;  %v5966_v22 = vld [vmem:[%s17338_s19 + $0x420] sm:$0xff]  ;;  %v5964_v23 = vld [vmem:[%s17338_s19 + $0x410] sm:$0xff] }
0x11ce   :  { %v11712_v32 = vpack.c.bf16 %v5966_v22, %v5962_v18  ;;  %v11840_v63 = vpack.c.bf16 %v5968_v24, %v5964_v23  ;;  %v6003_v22 = vld [vmem:[%s17338_s19 + $0x548] sm:$0xff]  ;;  %v6005_v24 = vld [vmem:[%s17338_s19 + $0x558] sm:$0xff] }
0x11cf   :  { %v6007_v23 = vld [vmem:[%s17338_s19 + $0x568] sm:$0xff] }
0x11d0   :  { %11697 = vmatpush1.bf16.msra.mxu0 %v11696_v51  ;;  %11825 = vmatpush1.bf16.msra.mxu1 %v11824_v31  ;;  %v5977_v51 = vld [vmem:[%s17338_s19 + $0x478] sm:$0xff] }
0x11d1   :  { %11699 = vmatprep.subr.bf16.mxu0 %v11698_v37  ;;  %11827 = vmatprep.subr.bf16.mxu1 %v11826_v38  ;;  %v5970_v37 = vld [vmem:[%s17338_s19 + $0x440] sm:$0xff]  ;;  %v11842_v44 = vpack.c.bf16 %v5977_v51, %v5973_v29  ;;  %v11730_v51 = vpack.c.bf16 %v6007_v23, %v6003_v22 }
0x11d2   :  { %v5974_v38 = vld [vmem:[%s17338_s19 + $0x460] sm:$0xff] }
0x11d3   :  { %v6006_v29 = vld [vmem:[%s17338_s19 + $0x560] sm:$0xff] }
0x11d4   :  { %11701 = vmatpush1.bf16.msra.mxu0 %v11700_v45  ;;  %11829 = vmatpush1.bf16.msra.mxu1 %v11828_v33  ;;  %v5983_v45 = vld [vmem:[%s17338_s19 + $0x4a8] sm:$0xff]  ;;  %v5981_v33 = vld [vmem:[%s17338_s19 + $0x498] sm:$0xff]  ;;  %v11732_v41 = vpack.c.bf16 %v6006_v29, %v6002_v0 }
0x11d5   :  { %11703 = vmatprep.subr.bf16.mxu0 %v11702_v61  ;;  %11831 = vmatprep.subr.bf16.mxu1 %v11830_v34  ;;  %v11716_v34 = vpack.c.bf16 %v5974_v38, %v5970_v37  ;;  %v6011_v37 = vld [vmem:[%s17338_s19 + $0x588] sm:$0xff]  ;;  %v6045_v0 = vld [vmem:[%s17338_s19 + $0x698] sm:$0xff] }
0x11d6   :  { %v6015_v38 = vld [vmem:[%s17338_s19 + $0x5a8] sm:$0xff]  ;;  %v6049_v29 = vld [vmem:[%s17338_s19 + $0x6b8] sm:$0xff] }
0x11d8   :  { %11705 = vmatpush1.bf16.msra.mxu0 %v11704_v47  ;;  %11833 = vmatpush1.bf16.msra.mxu1 %v11832_v48  ;;  %v11718_v47 = vpack.c.bf16 %v5983_v45, %v5979_v42  ;;  %v11846_v48 = vpack.c.bf16 %v5985_v46, %v5981_v33  ;;  %v11734_v45 = vpack.c.bf16 %v6015_v38, %v6011_v37  ;;  %v6012_v46 = vld [vmem:[%s17338_s19 + $0x590] sm:$0xff] }
0x11d9   :  { %11707 = vmatprep.subr.bf16.mxu0 %v11706_v52  ;;  %11835 = vmatprep.subr.bf16.mxu1 %v11834_v43  ;;  %v5991_v52 = vld [vmem:[%s17338_s19 + $0x4e8] sm:$0xff]  ;;  %v11848_v43 = vpack.c.bf16 %v5984_v55, %v5980_v49  ;;  %v6018_v49 = vld [vmem:[%s17338_s19 + $0x5c0] sm:$0xff]  ;;  %v11878_v38 = vpack.c.bf16 %v6049_v29, %v6045_v0  ;;  %v6076_v0 = vld [vmem:[%s17338_s19 + $0x790] sm:$0xff] }
0x11da   :  { %v11722_v60 = vpack.c.bf16 %v5991_v52, %v5987_v50  ;;  %v6022_v55 = vld [vmem:[%s17338_s19 + $0x5e0] sm:$0xff]  ;;  %v11866_v52 = vpack.c.bf16 %v6025_v6, %v6021_v35  ;;  %v6052_v35 = vld [vmem:[%s17338_s19 + $0x6d0] sm:$0xff] }
0x11db   :  { %v6056_v6 = vld [vmem:[%s17338_s19 + $0x6f0] sm:$0xff] }
0x11dc   :  { %11709 = vmatpush1.bf16.msra.mxu0 %v11708_v58  ;;  %11837 = vmatpush1.bf16.msra.mxu1 %v11836_v1  ;;  %v5986_v58 = vld [vmem:[%s17338_s19 + $0x4c0] sm:$0xff]  ;;  %v11850_v1 = vpack.c.bf16 %v5993_v53, %v5989_v4  ;;  %v6020_v4 = vld [vmem:[%s17338_s19 + $0x5d0] sm:$0xff] }
0x11dd   :  { %11711 = vmatprep.subr.bf16.mxu0 %v11710_v11  ;;  %11839 = vmatprep.subr.bf16.mxu1 %v11838_v12  ;;  %v5999_v11 = vld [vmem:[%s17338_s19 + $0x528] sm:$0xff]  ;;  %v6001_v12 = vld [vmem:[%s17338_s19 + $0x538] sm:$0xff]  ;;  %v6024_v53 = vld [vmem:[%s17338_s19 + $0x5f0] sm:$0xff] }
0x11de   :  { %v11726_v18 = vpack.c.bf16 %v5999_v11, %v5995_v10  ;;  %v6080_v29 = vld [vmem:[%s17338_s19 + $0x7b0] sm:$0xff] }
0x1272   :  { %v5754_v17 = vpop.f32.mrb[38].mxu0  ;;  %v15718_v56 = vpop.f32.mrb[44].mxu1 }
0x1273   :  { %v5755_v19 = vadd.f32 %v5754_v17, %v5671_v14  ;;  %v5756_v20 = vpop.f32.mrb[39].mxu0  ;;  %v5827_v21 = vpop.f32.mrb[45].mxu1  ;;  %v11724_v14 = vpack.c.bf16 %v5990_v59, %v5986_v58  ;;  %v5998_v17 = vld [vmem:[%s17338_s19 + $0x520] sm:$0xff]  ;;  %v6029_v58 = vld [vmem:[%s17338_s19 + $0x618] sm:$0xff] }
0x1274   :  { %v5757_v25 = vadd.f32 %v5756_v20, %v5675_v15  ;;  %v5828_v28 = vadd.f32 %v5827_v21, %v5683_v16  ;;  %v11852_v15 = vpack.c.bf16 %v5992_v9, %v5988_v8  ;;  %v5994_v16 = vld [vmem:[%s17338_s19 + $0x500] sm:$0xff]  ;;  %v5996_v20 = vld [vmem:[%s17338_s19 + $0x510] sm:$0xff]  ;;  %v6033_v59 = vld [vmem:[%s17338_s19 + $0x638] sm:$0xff] }
0x1275   :  { %v5830_v39 = vmax.f32 %v5755_v19, 0.0  ;;  %v11854_v19 = vpack.c.bf16 %v6001_v12, %v5997_v62  ;;  %v6000_v21 = vld [vmem:[%s17338_s19 + $0x530] sm:$0xff]  ;;  %v11728_v26 = vpack.c.bf16 %v5998_v17, %v5994_v16  ;;  %v6026_v8 = vld [vmem:[%s17338_s19 + $0x600] sm:$0xff]  ;;  %v11870_v11 = vpack.c.bf16 %v6033_v59, %v6029_v58  ;;  %v6037_v16 = vld [vmem:[%s17338_s19 + $0x658] sm:$0xff] }
0x1276   :  { %v5831_v31 = vmax.f32 %v5757_v25, 0.0  ;;  %v5833_v61 = vmax.f32 %v5828_v28, 0.0  ;;  %v6009_v25 = vld [vmem:[%s17338_s19 + $0x578] sm:$0xff]  ;;  %v11856_v28 = vpack.c.bf16 %v6000_v21, %v5996_v20  ;;  %v6030_v9 = vld [vmem:[%s17338_s19 + $0x620] sm:$0xff]  ;;  %v6028_v62 = vld [vmem:[%s17338_s19 + $0x610] sm:$0xff] }
0x1277   :  { %v6032_v12 = vld [vmem:[%s17338_s19 + $0x630] sm:$0xff]  ;;  %v6041_v17 = vld [vmem:[%s17338_s19 + $0x678] sm:$0xff]  ;;  %v6034_v20 = vld [vmem:[%s17338_s19 + $0x640] sm:$0xff] }
0x1278   :  { %6176 = vmatprep.mubr.f32.mxu0 %v5831_v31  ;;  %6318 = vmatprep.mubr.f32.mxu1 %v5831_v31  ;;  %v11858_v31 = vpack.c.bf16 %v6009_v25, %v6005_v24  ;;  %v6038_v21 = vld [vmem:[%s17338_s19 + $0x660] sm:$0xff]  ;;  %v11874_v23 = vpack.c.bf16 %v6041_v17, %v6037_v16  ;;  %v6036_v24 = vld [vmem:[%s17338_s19 + $0x650] sm:$0xff] }
0x1279   :  { %6177 = vmatmul.mubr.f32.vlgmr.msra.gmra.mrb[40].mxu0 %v5830_v39  ;;  %6319 = vmatmul.mubr.f32.vlgmr.msra.gmra.mrb[46].mxu1 %v5830_v39  ;;  %v6013_v39 = vld [vmem:[%s17338_s19 + $0x598] sm:$0xff]  ;;  %v6040_v25 = vld [vmem:[%s17338_s19 + $0x670] sm:$0xff] }
0x127a   :  { %11713 = vmatpush1.bf16.msra.mxu0 %v11712_v32  ;;  %11841 = vmatpush1.bf16.msra.mxu1 %v11840_v63  ;;  %v6004_v32 = vld [vmem:[%s17338_s19 + $0x550] sm:$0xff]  ;;  %v11862_v33 = vpack.c.bf16 %v6017_v40, %v6013_v39 }
0x127b   :  { %6247 = vmatprep.mubr.f32.mxu0 %v5833_v61  ;;  %6389 = vmatprep.mubr.f32.mxu1 %v5833_v61  ;;  %v6008_v63 = vld [vmem:[%s17338_s19 + $0x570] sm:$0xff] }
0x127c   :  { %11715 = vmatprep.subr.bf16.mxu0 %v11714_v27  ;;  %11843 = vmatprep.subr.bf16.mxu1 %v11842_v44  ;;  %v11860_v42 = vpack.c.bf16 %v6008_v63, %v6004_v32  ;;  %v6010_v27 = vld [vmem:[%s17338_s19 + $0x580] sm:$0xff]  ;;  %v6016_v61 = vld [vmem:[%s17338_s19 + $0x5b0] sm:$0xff] }
0x127d   :  { %v6014_v44 = vld [vmem:[%s17338_s19 + $0x5a0] sm:$0xff]  ;;  %v6044_v39 = vld [vmem:[%s17338_s19 + $0x690] sm:$0xff] }
0x127e   :  { %11717 = vmatpush1.bf16.msra.mxu0 %v11716_v34  ;;  %11845 = vmatpush1.bf16.msra.mxu1 %v11844_v2  ;;  %v6019_v34 = vld [vmem:[%s17338_s19 + $0x5c8] sm:$0xff]  ;;  %v6042_v32 = vld [vmem:[%s17338_s19 + $0x680] sm:$0xff]  ;;  %v6048_v40 = vld [vmem:[%s17338_s19 + $0x6b0] sm:$0xff] }
0x127f   :  { %11719 = vmatprep.subr.bf16.mxu0 %v11718_v47  ;;  %11847 = vmatprep.subr.bf16.mxu1 %v11846_v48  ;;  %v6023_v2 = vld [vmem:[%s17338_s19 + $0x5e8] sm:$0xff]  ;;  %v11736_v47 = vpack.c.bf16 %v6014_v44, %v6010_v27  ;;  %v11864_v48 = vpack.c.bf16 %v6016_v61, %v6012_v46  ;;  %v6046_v63 = vld [vmem:[%s17338_s19 + $0x6a0] sm:$0xff]  ;;  %v6053_v27 = vld [vmem:[%s17338_s19 + $0x6d8] sm:$0xff] }
0x1280   :  { %v11738_v50 = vpack.c.bf16 %v6023_v2, %v6019_v34  ;;  %v6057_v44 = vld [vmem:[%s17338_s19 + $0x6f8] sm:$0xff]  ;;  %v6050_v46 = vld [vmem:[%s17338_s19 + $0x6c0] sm:$0xff]  ;;  %v6060_v58 = vld [vmem:[%s17338_s19 + $0x710] sm:$0xff] }
0x1281   :  { %v6054_v61 = vld [vmem:[%s17338_s19 + $0x6e0] sm:$0xff]  ;;  %v11882_v2 = vpack.c.bf16 %v6057_v44, %v6053_v27  ;;  %v6064_v59 = vld [vmem:[%s17338_s19 + $0x730] sm:$0xff] }
0x1282   :  { %11721 = vmatpush1.bf16.msra.mxu0 %v11720_v54  ;;  %11849 = vmatpush1.bf16.msra.mxu1 %v11848_v43  ;;  %v6027_v54 = vld [vmem:[%s17338_s19 + $0x608] sm:$0xff]  ;;  %v6068_v16 = vld [vmem:[%s17338_s19 + $0x750] sm:$0xff] }
0x1283   :  { %11723 = vmatprep.subr.bf16.mxu0 %v11722_v60  ;;  %11851 = vmatprep.subr.bf16.mxu1 %v11850_v1  ;;  %v6031_v43 = vld [vmem:[%s17338_s19 + $0x628] sm:$0xff]  ;;  %v11740_v60 = vpack.c.bf16 %v6022_v55, %v6018_v49  ;;  %v11868_v1 = vpack.c.bf16 %v6024_v53, %v6020_v4  ;;  %v6061_v49 = vld [vmem:[%s17338_s19 + $0x718] sm:$0xff]  ;;  %v6058_v4 = vld [vmem:[%s17338_s19 + $0x700] sm:$0xff] }
0x1284   :  { %v11742_v10 = vpack.c.bf16 %v6031_v43, %v6027_v54  ;;  %v6065_v55 = vld [vmem:[%s17338_s19 + $0x738] sm:$0xff]  ;;  %v6062_v53 = vld [vmem:[%s17338_s19 + $0x720] sm:$0xff]  ;;  %v6072_v17 = vld [vmem:[%s17338_s19 + $0x770] sm:$0xff] }
0x1285   :  { %v11886_v43 = vpack.c.bf16 %v6065_v55, %v6061_v49  ;;  %v6084_v44 = vld [vmem:[%s17338_s19 + $0x7d0] sm:$0xff] }
0x1286   :  { %11725 = vmatpush1.bf16.msra.mxu0 %v11724_v14  ;;  %11853 = vmatpush1.bf16.msra.mxu1 %v11852_v15  ;;  %v6035_v14 = vld [vmem:[%s17338_s19 + $0x648] sm:$0xff]  ;;  %v6402_v55 = vld [vmem:[#allocation11 + $0x10] sm:$0xff] }
0x1287   :  { %11727 = vmatprep.subr.bf16.mxu0 %v11726_v18  ;;  %11855 = vmatprep.subr.bf16.mxu1 %v11854_v19  ;;  %v6039_v15 = vld [vmem:[%s17338_s19 + $0x668] sm:$0xff]  ;;  %v11744_v18 = vpack.c.bf16 %v6030_v9, %v6026_v8  ;;  %v11872_v19 = vpack.c.bf16 %v6032_v12, %v6028_v62  ;;  %v6069_v8 = vld [vmem:[%s17338_s19 + $0x758] sm:$0xff]  ;;  %v6066_v62 = vld [vmem:[%s17338_s19 + $0x740] sm:$0xff] }
0x1288   :  { %v11746_v22 = vpack.c.bf16 %v6039_v15, %v6035_v14  ;;  %v6073_v9 = vld [vmem:[%s17338_s19 + $0x778] sm:$0xff]  ;;  %v6070_v12 = vld [vmem:[%s17338_s19 + $0x760] sm:$0xff] }
0x1289   :  { %v11890_v15 = vpack.c.bf16 %v6073_v9, %v6069_v8  ;;  %v6410_v9 = vld [vmem:[#allocation11 + $0x50] sm:$0xff] }
0x128a   :  { %11729 = vmatpush1.bf16.msra.mxu0 %v11728_v26  ;;  %11857 = vmatpush1.bf16.msra.mxu1 %v11856_v28  ;;  %v6043_v26 = vld [vmem:[%s17338_s19 + $0x688] sm:$0xff] }
0x128b   :  { %11731 = vmatprep.subr.bf16.mxu0 %v11730_v51  ;;  %11859 = vmatprep.subr.bf16.mxu1 %v11858_v31  ;;  %v6047_v28 = vld [vmem:[%s17338_s19 + $0x6a8] sm:$0xff]  ;;  %v11748_v51 = vpack.c.bf16 %v6038_v21, %v6034_v20  ;;  %v11876_v31 = vpack.c.bf16 %v6040_v25, %v6036_v24  ;;  %v6077_v20 = vld [vmem:[%s17338_s19 + $0x798] sm:$0xff]  ;;  %v6074_v24 = vld [vmem:[%s17338_s19 + $0x780] sm:$0xff] }
0x128c   :  { %v11750_v37 = vpack.c.bf16 %v6047_v28, %v6043_v26  ;;  %v6081_v21 = vld [vmem:[%s17338_s19 + $0x7b8] sm:$0xff]  ;;  %v6078_v25 = vld [vmem:[%s17338_s19 + $0x7a0] sm:$0xff] }
0x128d   :  { %v11894_v28 = vpack.c.bf16 %v6081_v21, %v6077_v20  ;;  %v6418_v21 = vld [vmem:[#allocation11 + $0x90] sm:$0xff] }
0x128e   :  { %11733 = vmatpush1.bf16.msra.mxu0 %v11732_v41  ;;  %11861 = vmatpush1.bf16.msra.mxu1 %v11860_v42  ;;  %v6051_v41 = vld [vmem:[%s17338_s19 + $0x6c8] sm:$0xff] }
0x128f   :  { %11735 = vmatprep.subr.bf16.mxu0 %v11734_v45  ;;  %11863 = vmatprep.subr.bf16.mxu1 %v11862_v33  ;;  %v6055_v42 = vld [vmem:[%s17338_s19 + $0x6e8] sm:$0xff]  ;;  %v11752_v45 = vpack.c.bf16 %v6046_v63, %v6042_v32  ;;  %v11880_v33 = vpack.c.bf16 %v6048_v40, %v6044_v39  ;;  %v6085_v32 = vld [vmem:[%s17338_s19 + $0x7d8] sm:$0xff]  ;;  %v6082_v39 = vld [vmem:[%s17338_s19 + $0x7c0] sm:$0xff] }
0x1290   :  { %v11754_v34 = vpack.c.bf16 %v6055_v42, %v6051_v41  ;;  %v6089_v63 = vld [vmem:[%s17338_s19 + $0x7f8] sm:$0xff]  ;;  %v6086_v40 = vld [vmem:[%s17338_s19 + $0x7e0] sm:$0xff]  ;;  %v5679_v41 = vrot.slane %v15710_v13, %v15280_v30 }
0x1291   :  { %v11898_v27 = vpack.c.bf16 %v6089_v63, %v6085_v32  ;;  %v6426_v63 = vld [vmem:[#allocation11 + $0xd0] sm:$0xff] }
0x1292   :  { %11737 = vmatpush1.bf16.msra.mxu0 %v11736_v47  ;;  %11865 = vmatpush1.bf16.msra.mxu1 %v11864_v48  ;;  %v6059_v47 = vld [vmem:[%s17338_s19 + $0x708] sm:$0xff] }
0x1293   :  { %11739 = vmatprep.subr.bf16.mxu0 %v11738_v50  ;;  %11867 = vmatprep.subr.bf16.mxu1 %v11866_v52  ;;  %v6063_v48 = vld [vmem:[%s17338_s19 + $0x728] sm:$0xff]  ;;  %v11756_v50 = vpack.c.bf16 %v6054_v61, %v6050_v46  ;;  %v11884_v52 = vpack.c.bf16 %v6056_v6, %v6052_v35  ;;  %v6403_v61 = vld [vmem:[#allocation11 + $0x18] sm:$0xff] }
0x1294   :  { %v11758_v54 = vpack.c.bf16 %v6063_v48, %v6059_v47  ;;  %v6405_v46 = vld [vmem:[#allocation11 + $0x28] sm:$0xff]  ;;  %v6400_v35 = vld [vmem:[#allocation11] sm:$0xff]  ;;  %v5826_v47 = vadd.f32 %v15718_v56, %v5679_v41  ;;  %v6439_v41 = vld [vmem:[#allocation11 + $0x138] sm:$0xff] }
0x1295   :  { %v6404_v6 = vld [vmem:[#allocation11 + $0x20] sm:$0xff] }
0x1296   :  { %11741 = vmatpush1.bf16.msra.mxu0 %v11740_v60  ;;  %11869 = vmatpush1.bf16.msra.mxu1 %v11868_v1  ;;  %v6067_v60 = vld [vmem:[%s17338_s19 + $0x748] sm:$0xff] }
0x1297   :  { %11743 = vmatprep.subr.bf16.mxu0 %v11742_v10  ;;  %11871 = vmatprep.subr.bf16.mxu1 %v11870_v11  ;;  %v6071_v1 = vld [vmem:[%s17338_s19 + $0x768] sm:$0xff]  ;;  %v11760_v10 = vpack.c.bf16 %v6062_v53, %v6058_v4  ;;  %v11888_v11 = vpack.c.bf16 %v6064_v59, %v6060_v58  ;;  %v6411_v53 = vld [vmem:[#allocation11 + $0x58] sm:$0xff] }
0x1298   :  { %v11762_v14 = vpack.c.bf16 %v6071_v1, %v6067_v60  ;;  %v6413_v4 = vld [vmem:[#allocation11 + $0x68] sm:$0xff]  ;;  %v6408_v59 = vld [vmem:[#allocation11 + $0x40] sm:$0xff]  ;;  %v5832_v1 = vmax.f32 %v5826_v47, 0.0 }
0x1299   :  { %v6412_v60 = vld [vmem:[#allocation11 + $0x60] sm:$0xff] }
0x129a   :  { %11745 = vmatpush1.bf16.msra.mxu0 %v11744_v18  ;;  %11873 = vmatpush1.bf16.msra.mxu1 %v11872_v19  ;;  %v6075_v18 = vld [vmem:[%s17338_s19 + $0x788] sm:$0xff] }
0x129b   :  { %11747 = vmatprep.subr.bf16.mxu0 %v11746_v22  ;;  %11875 = vmatprep.subr.bf16.mxu1 %v11874_v23  ;;  %v6079_v19 = vld [vmem:[%s17338_s19 + $0x7a8] sm:$0xff]  ;;  %v11764_v22 = vpack.c.bf16 %v6070_v12, %v6066_v62  ;;  %v11892_v23 = vpack.c.bf16 %v6072_v17, %v6068_v16  ;;  %v6419_v12 = vld [vmem:[#allocation11 + $0x98] sm:$0xff] }
0x129c   :  { %v11766_v26 = vpack.c.bf16 %v6079_v19, %v6075_v18  ;;  %v6421_v62 = vld [vmem:[#allocation11 + $0xa8] sm:$0xff]  ;;  %v6416_v17 = vld [vmem:[#allocation11 + $0x80] sm:$0xff] }
0x129d   :  { %v6420_v18 = vld [vmem:[#allocation11 + $0xa0] sm:$0xff] }
0x129e   :  { %11749 = vmatpush1.bf16.msra.mxu0 %v11748_v51  ;;  %11877 = vmatpush1.bf16.msra.mxu1 %v11876_v31  ;;  %v6083_v51 = vld [vmem:[%s17338_s19 + $0x7c8] sm:$0xff] }
0x129f   :  { %11751 = vmatprep.subr.bf16.mxu0 %v11750_v37  ;;  %11879 = vmatprep.subr.bf16.mxu1 %v11878_v38  ;;  %v6087_v31 = vld [vmem:[%s17338_s19 + $0x7e8] sm:$0xff]  ;;  %v11768_v37 = vpack.c.bf16 %v6078_v25, %v6074_v24  ;;  %v11896_v38 = vpack.c.bf16 %v6080_v29, %v6076_v0  ;;  %v6427_v25 = vld [vmem:[#allocation11 + $0xd8] sm:$0xff] }
0x12a0   :  { %v11770_v42 = vpack.c.bf16 %v6087_v31, %v6083_v51  ;;  %v6429_v24 = vld [vmem:[#allocation11 + $0xe8] sm:$0xff]  ;;  %v6424_v29 = vld [vmem:[#allocation11 + $0xc0] sm:$0xff] }
0x12a1   :  { %v6428_v51 = vld [vmem:[#allocation11 + $0xe0] sm:$0xff] }
0x12a2   :  { %11753 = vmatpush1.bf16.msra.mxu0 %v11752_v45  ;;  %11881 = vmatpush1.bf16.msra.mxu1 %v11880_v33  ;;  %v6088_v45 = vld [vmem:[%s17338_s19 + $0x7f0] sm:$0xff] }
0x12a3   :  { %11755 = vmatprep.subr.bf16.mxu0 %v11754_v34  ;;  %11883 = vmatprep.subr.bf16.mxu1 %v11882_v2  ;;  %v6401_v33 = vld [vmem:[#allocation11 + $0x8] sm:$0xff]  ;;  %v6407_v34 = vld [vmem:[#allocation11 + $0x38] sm:$0xff]  ;;  %v11772_v2 = vpack.c.bf16 %v6086_v40, %v6082_v39  ;;  %v11900_v13 = vpack.c.bf16 %v6088_v45, %v6084_v44  ;;  %v6432_v44 = vld [vmem:[#allocation11 + $0x100] sm:$0xff] }
0x12a4   :  { %v11902_v48 = vpack.c.bf16 %v6405_v46, %v6401_v33  ;;  %v12030_v49 = vpack.c.bf16 %v6407_v34, %v6403_v61  ;;  %v6437_v39 = vld [vmem:[#allocation11 + $0x128] sm:$0xff]  ;;  %v6435_v40 = vld [vmem:[#allocation11 + $0x118] sm:$0xff]  ;;  %v6436_v45 = vld [vmem:[#allocation11 + $0x120] sm:$0xff] }
0x12a5   :  { %v12046_v46 = vpack.c.bf16 %v6439_v41, %v6435_v40  ;;  %v6434_v61 = vld [vmem:[#allocation11 + $0x110] sm:$0xff]  ;;  %v11920_v47 = vpack.c.bf16 %v6436_v45, %v6432_v44  ;;  %v6473_v40 = vld [vmem:[#allocation11 + $0x248] sm:$0xff] }
0x12a6   :  { %11757 = vmatpush1.bf16.msra.mxu0 %v11756_v50  ;;  %11885 = vmatpush1.bf16.msra.mxu1 %v11884_v52  ;;  %v6406_v50 = vld [vmem:[#allocation11 + $0x30] sm:$0xff]  ;;  %v6409_v52 = vld [vmem:[#allocation11 + $0x48] sm:$0xff] }
0x12a7   :  { %11759 = vmatprep.subr.bf16.mxu0 %v11758_v54  ;;  %11887 = vmatprep.subr.bf16.mxu1 %v11886_v43  ;;  %v6415_v54 = vld [vmem:[#allocation11 + $0x78] sm:$0xff]  ;;  %v11904_v43 = vpack.c.bf16 %v6404_v6, %v6400_v35  ;;  %v12032_v58 = vpack.c.bf16 %v6406_v50, %v6402_v55  ;;  %v11906_v56 = vpack.c.bf16 %v6413_v4, %v6409_v52  ;;  %v6438_v34 = vld [vmem:[#allocation11 + $0x130] sm:$0xff]  ;;  %v6444_v55 = vld [vmem:[#allocation11 + $0x160] sm:$0xff] }
0x12a8   :  { %v12034_v8 = vpack.c.bf16 %v6415_v54, %v6411_v53  ;;  %v6443_v35 = vld [vmem:[#allocation11 + $0x158] sm:$0xff]  ;;  %v6442_v4 = vld [vmem:[#allocation11 + $0x150] sm:$0xff]  ;;  %v6449_v54 = vld [vmem:[#allocation11 + $0x188] sm:$0xff] }
0x12a9   :  { %v6447_v6 = vld [vmem:[#allocation11 + $0x178] sm:$0xff]  ;;  %v6446_v53 = vld [vmem:[#allocation11 + $0x170] sm:$0xff]  ;;  %v6477_v41 = vld [vmem:[#allocation11 + $0x268] sm:$0xff] }
0x12aa   :  { %11761 = vmatpush1.bf16.msra.mxu0 %v11760_v10  ;;  %11889 = vmatpush1.bf16.msra.mxu1 %v11888_v11  ;;  %v6414_v10 = vld [vmem:[#allocation11 + $0x70] sm:$0xff]  ;;  %v6417_v11 = vld [vmem:[#allocation11 + $0x88] sm:$0xff]  ;;  %v12050_v52 = vpack.c.bf16 %v6447_v6, %v6443_v35 }
0x12ab   :  { %11763 = vmatprep.subr.bf16.mxu0 %v11762_v14  ;;  %11891 = vmatprep.subr.bf16.mxu1 %v11890_v15  ;;  %v6423_v14 = vld [vmem:[#allocation11 + $0xb8] sm:$0xff]  ;;  %v11908_v15 = vpack.c.bf16 %v6412_v60, %v6408_v59  ;;  %v12036_v16 = vpack.c.bf16 %v6414_v10, %v6410_v9  ;;  %v11910_v19 = vpack.c.bf16 %v6421_v62, %v6417_v11  ;;  %v6450_v11 = vld [vmem:[#allocation11 + $0x190] sm:$0xff]  ;;  %v6481_v35 = vld [vmem:[#allocation11 + $0x288] sm:$0xff] }
0x12ac   :  { %v12038_v20 = vpack.c.bf16 %v6423_v14, %v6419_v12  ;;  %v6455_v59 = vld [vmem:[#allocation11 + $0x1b8] sm:$0xff]  ;;  %v6454_v62 = vld [vmem:[#allocation11 + $0x1b0] sm:$0xff]  ;;  %v6457_v12 = vld [vmem:[#allocation11 + $0x1c8] sm:$0xff] }
0x12ad   :  { %v6461_v14 = vld [vmem:[#allocation11 + $0x1e8] sm:$0xff] }
0x12ae   :  { %11765 = vmatpush1.bf16.msra.mxu0 %v11764_v22  ;;  %11893 = vmatpush1.bf16.msra.mxu1 %v11892_v23  ;;  %v6422_v22 = vld [vmem:[#allocation11 + $0xb0] sm:$0xff]  ;;  %v6425_v23 = vld [vmem:[#allocation11 + $0xc8] sm:$0xff] }
0x12af   :  { %11767 = vmatprep.subr.bf16.mxu0 %v11766_v26  ;;  %11895 = vmatprep.subr.bf16.mxu1 %v11894_v28  ;;  %v6431_v26 = vld [vmem:[#allocation11 + $0xf8] sm:$0xff]  ;;  %v11912_v28 = vpack.c.bf16 %v6420_v18, %v6416_v17  ;;  %v12040_v0 = vpack.c.bf16 %v6422_v22, %v6418_v21  ;;  %v11914_v31 = vpack.c.bf16 %v6429_v24, %v6425_v23  ;;  %v6458_v23 = vld [vmem:[#allocation11 + $0x1d0] sm:$0xff]  ;;  %v6485_v6 = vld [vmem:[#allocation11 + $0x2a8] sm:$0xff] }
0x12b0   :  { %v12042_v32 = vpack.c.bf16 %v6431_v26, %v6427_v25  ;;  %v12056_v18 = vpack.c.bf16 %v6454_v62, %v6450_v11  ;;  %v11930_v21 = vpack.c.bf16 %v6461_v14, %v6457_v12  ;;  %v6462_v24 = vld [vmem:[#allocation11 + $0x1f0] sm:$0xff]  ;;  %v6465_v25 = vld [vmem:[#allocation11 + $0x208] sm:$0xff] }
0x12b1   :  { %v6469_v26 = vld [vmem:[#allocation11 + $0x228] sm:$0xff]  ;;  %v6490_v12 = vld [vmem:[#allocation11 + $0x2d0] sm:$0xff] }
0x12b2   :  { %11769 = vmatpush1.bf16.msra.mxu0 %v11768_v37  ;;  %11897 = vmatpush1.bf16.msra.mxu1 %v11896_v38  ;;  %v6430_v37 = vld [vmem:[#allocation11 + $0xf0] sm:$0xff]  ;;  %v6433_v38 = vld [vmem:[#allocation11 + $0x108] sm:$0xff] }
0x12b3   :  { %11771 = vmatprep.subr.bf16.mxu0 %v11770_v42  ;;  %11899 = vmatprep.subr.bf16.mxu1 %v11898_v27  ;;  %v11916_v42 = vpack.c.bf16 %v6428_v51, %v6424_v29  ;;  %v12044_v27 = vpack.c.bf16 %v6430_v37, %v6426_v63  ;;  %v11918_v33 = vpack.c.bf16 %v6437_v39, %v6433_v38  ;;  %v6466_v38 = vld [vmem:[#allocation11 + $0x210] sm:$0xff] }
0x12b4   :  { %v12060_v51 = vpack.c.bf16 %v6462_v24, %v6458_v23  ;;  %v11934_v63 = vpack.c.bf16 %v6469_v26, %v6465_v25  ;;  %v6470_v39 = vld [vmem:[#allocation11 + $0x230] sm:$0xff] }
0x12b5   :  { %v12064_v45 = vpack.c.bf16 %v6470_v39, %v6466_v38  ;;  %v6494_v14 = vld [vmem:[#allocation11 + $0x2f0] sm:$0xff] }
0x12b6   :  { %11773 = vmatpush1.bf16.msra.mxu0 %v11772_v2  ;;  %11901 = vmatpush1.bf16.msra.mxu1 %v11900_v13  ;;  %v6441_v2 = vld [vmem:[#allocation11 + $0x148] sm:$0xff]  ;;  %v6498_v25 = vld [vmem:[#allocation11 + $0x310] sm:$0xff] }
0x12b7   :  { %11903 = vmatprep.subr.bf16.mxu0 %v11902_v48  ;;  %12031 = vmatprep.subr.bf16.mxu1 %v12030_v49  ;;  %v6445_v13 = vld [vmem:[#allocation11 + $0x168] sm:$0xff]  ;;  %v12048_v48 = vpack.c.bf16 %v6438_v34, %v6434_v61  ;;  %v6440_v49 = vld [vmem:[#allocation11 + $0x140] sm:$0xff]  ;;  %v11938_v61 = vpack.c.bf16 %v6477_v41, %v6473_v40  ;;  %v6502_v26 = vld [vmem:[#allocation11 + $0x330] sm:$0xff] }
0x12b8   :  { %v11922_v50 = vpack.c.bf16 %v6445_v13, %v6441_v2  ;;  %v11924_v60 = vpack.c.bf16 %v6444_v55, %v6440_v49  ;;  %v6474_v2 = vld [vmem:[#allocation11 + $0x250] sm:$0xff] }
0x12b9   :  { %6248 = vmatmul.mubr.f32.vlgmr.msra.gmra.mrb[40].mxu0 %v5832_v1  ;;  %6390 = vmatmul.mubr.f32.vlgmr.msra.gmra.mrb[46].mxu1 %v5832_v1  ;;  %v12052_v1 = vpack.c.bf16 %v6446_v53, %v6442_v4  ;;  %v6478_v13 = vld [vmem:[#allocation11 + $0x270] sm:$0xff]  ;;  %v11942_v4 = vpack.c.bf16 %v6485_v6, %v6481_v35 }
0x12ba   :  { %11905 = vmatpush1.bf16.msra.mxu0 %v11904_v43  ;;  %12033 = vmatpush1.bf16.msra.mxu1 %v12032_v58  ;;  %v6453_v43 = vld [vmem:[#allocation11 + $0x1a8] sm:$0xff]  ;;  %v6451_v58 = vld [vmem:[#allocation11 + $0x198] sm:$0xff]  ;;  %v12068_v55 = vpack.c.bf16 %v6478_v13, %v6474_v2  ;;  %v6506_v40 = vld [vmem:[#allocation11 + $0x350] sm:$0xff] }
0x12bb   :  { %11907 = vmatprep.subr.bf16.mxu0 %v11906_v56  ;;  %12035 = vmatprep.subr.bf16.mxu1 %v12034_v8  ;;  %v6448_v56 = vld [vmem:[#allocation11 + $0x180] sm:$0xff]  ;;  %v11926_v9 = vpack.c.bf16 %v6453_v43, %v6449_v54  ;;  %v12054_v10 = vpack.c.bf16 %v6455_v59, %v6451_v58  ;;  %v6482_v54 = vld [vmem:[#allocation11 + $0x290] sm:$0xff]  ;;  %v6489_v58 = vld [vmem:[#allocation11 + $0x2c8] sm:$0xff] }
0x12bc   :  { %v6452_v8 = vld [vmem:[#allocation11 + $0x1a0] sm:$0xff]  ;;  %v6486_v43 = vld [vmem:[#allocation11 + $0x2b0] sm:$0xff]  ;;  %v6493_v59 = vld [vmem:[#allocation11 + $0x2e8] sm:$0xff] }
0x12bd   :  { %v11928_v17 = vpack.c.bf16 %v6452_v8, %v6448_v56  ;;  %v12072_v8 = vpack.c.bf16 %v6486_v43, %v6482_v54  ;;  %v11946_v11 = vpack.c.bf16 %v6493_v59, %v6489_v58  ;;  %v6510_v41 = vld [vmem:[#allocation11 + $0x370] sm:$0xff]  ;;  %v6516_v13 = vld [vmem:[#allocation11 + $0x3a0] sm:$0xff] }
0x12be   :  { %11909 = vmatpush1.bf16.msra.mxu0 %v11908_v15  ;;  %12037 = vmatpush1.bf16.msra.mxu1 %v12036_v16  ;;  %v6459_v15 = vld [vmem:[#allocation11 + $0x1d8] sm:$0xff]  ;;  %v6514_v35 = vld [vmem:[#allocation11 + $0x390] sm:$0xff]  ;;  %v6524_v54 = vld [vmem:[#allocation11 + $0x3e0] sm:$0xff] }
0x12bf   :  { %11911 = vmatprep.subr.bf16.mxu0 %v11910_v19  ;;  %12039 = vmatprep.subr.bf16.mxu1 %v12038_v20  ;;  %v6463_v16 = vld [vmem:[#allocation11 + $0x1f8] sm:$0xff]  ;;  %v6456_v19 = vld [vmem:[#allocation11 + $0x1c0] sm:$0xff]  ;;  %v6518_v6 = vld [vmem:[#allocation11 + $0x3b0] sm:$0xff] }
0x12c0   :  { %v6460_v20 = vld [vmem:[#allocation11 + $0x1e0] sm:$0xff]  ;;  %v12058_v22 = vpack.c.bf16 %v6463_v16, %v6459_v15  ;;  %v6497_v15 = vld [vmem:[#allocation11 + $0x308] sm:$0xff]  ;;  %v6522_v59 = vld [vmem:[#allocation11 + $0x3d0] sm:$0xff] }
0x12c1   :  { %v11932_v29 = vpack.c.bf16 %v6460_v20, %v6456_v19  ;;  %v6501_v16 = vld [vmem:[#allocation11 + $0x328] sm:$0xff]  ;;  %v12076_v20 = vpack.c.bf16 %v6494_v14, %v6490_v12  ;;  %v16098_v12 = vld [vmem:[%s17339_s20] sm:$0xf] }
0x12c2   :  { %11913 = vmatpush1.bf16.msra.mxu0 %v11912_v28  ;;  %12041 = vmatpush1.bf16.msra.mxu1 %v12040_v0  ;;  %v6467_v28 = vld [vmem:[#allocation11 + $0x218] sm:$0xff]  ;;  %v11950_v23 = vpack.c.bf16 %v6501_v16, %v6497_v15  ;;  %v6095_v14 = vrot.slane %v16098_v12, %v13620_v7  ;;  %v6099_v15 = vrot.slane %v16098_v12, %v13614_v5 }
0x12c3   :  { %11915 = vmatprep.subr.bf16.mxu0 %v11914_v31  ;;  %12043 = vmatprep.subr.bf16.mxu1 %v12042_v32  ;;  %v6471_v0 = vld [vmem:[#allocation11 + $0x238] sm:$0xff]  ;;  %v6464_v31 = vld [vmem:[#allocation11 + $0x200] sm:$0xff]  ;;  %v6107_v16 = vrot.slane %v16098_v12, %v15283_v36 }
0x12c4   :  { %v6468_v32 = vld [vmem:[#allocation11 + $0x220] sm:$0xff]  ;;  %v12062_v37 = vpack.c.bf16 %v6471_v0, %v6467_v28  ;;  %v6505_v28 = vld [vmem:[#allocation11 + $0x348] sm:$0xff] }
0x12c5   :  { %v11936_v44 = vpack.c.bf16 %v6468_v32, %v6464_v31  ;;  %v6509_v0 = vld [vmem:[#allocation11 + $0x368] sm:$0xff]  ;;  %v12080_v32 = vpack.c.bf16 %v6502_v26, %v6498_v25  ;;  %v6534_v25 = vld [vmem:[#allocation11 + $0x430] sm:$0xff] }
0x12c6   :  { %11917 = vmatpush1.bf16.msra.mxu0 %v11916_v42  ;;  %12045 = vmatpush1.bf16.msra.mxu1 %v12044_v27  ;;  %v6475_v42 = vld [vmem:[#allocation11 + $0x258] sm:$0xff]  ;;  %v11954_v38 = vpack.c.bf16 %v6509_v0, %v6505_v28  ;;  %v6537_v28 = vld [vmem:[#allocation11 + $0x448] sm:$0xff] }
0x12c7   :  { %11919 = vmatprep.subr.bf16.mxu0 %v11918_v33  ;;  %12047 = vmatprep.subr.bf16.mxu1 %v12046_v46  ;;  %v6479_v27 = vld [vmem:[#allocation11 + $0x278] sm:$0xff]  ;;  %v6472_v33 = vld [vmem:[#allocation11 + $0x240] sm:$0xff] }
0x12c8   :  { %v6476_v46 = vld [vmem:[#allocation11 + $0x260] sm:$0xff]  ;;  %v12066_v34 = vpack.c.bf16 %v6479_v27, %v6475_v42  ;;  %v6513_v42 = vld [vmem:[#allocation11 + $0x388] sm:$0xff] }
0x12c9   :  { %v11940_v49 = vpack.c.bf16 %v6476_v46, %v6472_v33  ;;  %v6517_v27 = vld [vmem:[#allocation11 + $0x3a8] sm:$0xff]  ;;  %v12084_v46 = vpack.c.bf16 %v6510_v41, %v6506_v40  ;;  %v6538_v41 = vld [vmem:[#allocation11 + $0x450] sm:$0xff] }
0x12ca   :  { %11921 = vmatpush1.bf16.msra.mxu0 %v11920_v47  ;;  %12049 = vmatpush1.bf16.msra.mxu1 %v12048_v48  ;;  %v6483_v47 = vld [vmem:[#allocation11 + $0x298] sm:$0xff] }
0x12cb   :  { %11923 = vmatprep.subr.bf16.mxu0 %v11922_v50  ;;  %12051 = vmatprep.subr.bf16.mxu1 %v12050_v52  ;;  %v6487_v48 = vld [vmem:[#allocation11 + $0x2b8] sm:$0xff]  ;;  %v6480_v50 = vld [vmem:[#allocation11 + $0x280] sm:$0xff] }
0x12cc   :  { %v6484_v52 = vld [vmem:[#allocation11 + $0x2a0] sm:$0xff]  ;;  %v12070_v53 = vpack.c.bf16 %v6487_v48, %v6483_v47  ;;  %v12088_v48 = vpack.c.bf16 %v6518_v6, %v6514_v35 }
0x12cd   :  { %v11944_v56 = vpack.c.bf16 %v6484_v52, %v6480_v50  ;;  %v6523_v50 = vld [vmem:[#allocation11 + $0x3d8] sm:$0xff]  ;;  %v6544_v35 = vld [vmem:[#allocation11 + $0x480] sm:$0xff] }
0x12ce   :  { %11925 = vmatpush1.bf16.msra.mxu0 %v11924_v60  ;;  %12053 = vmatpush1.bf16.msra.mxu1 %v12052_v1  ;;  %v6491_v60 = vld [vmem:[#allocation11 + $0x2d8] sm:$0xff]  ;;  %v6548_v6 = vld [vmem:[#allocation11 + $0x4a0] sm:$0xff] }
0x12cf   :  { %11927 = vmatprep.subr.bf16.mxu0 %v11926_v9  ;;  %12055 = vmatprep.subr.bf16.mxu1 %v12054_v10  ;;  %v6495_v1 = vld [vmem:[#allocation11 + $0x2f8] sm:$0xff]  ;;  %v6488_v9 = vld [vmem:[#allocation11 + $0x2c0] sm:$0xff] }
0x12d0   :  { %v6492_v10 = vld [vmem:[#allocation11 + $0x2e0] sm:$0xff]  ;;  %v12074_v62 = vpack.c.bf16 %v6495_v1, %v6491_v60  ;;  %v6526_v60 = vld [vmem:[#allocation11 + $0x3f0] sm:$0xff] }
0x12d1   :  { %v11948_v19 = vpack.c.bf16 %v6492_v10, %v6488_v9  ;;  %v12092_v1 = vpack.c.bf16 %v6526_v60, %v6522_v59  ;;  %v6531_v9 = vld [vmem:[#allocation11 + $0x418] sm:$0xff]  ;;  %v6556_v59 = vld [vmem:[#allocation11 + $0x4e0] sm:$0xff] }
0x12d2   :  { %11929 = vmatpush1.bf16.msra.mxu0 %v11928_v17  ;;  %12057 = vmatpush1.bf16.msra.mxu1 %v12056_v18  ;;  %v6499_v17 = vld [vmem:[#allocation11 + $0x318] sm:$0xff] }
0x12d3   :  { %11931 = vmatprep.subr.bf16.mxu0 %v11930_v21  ;;  %12059 = vmatprep.subr.bf16.mxu1 %v12058_v22  ;;  %v6503_v18 = vld [vmem:[#allocation11 + $0x338] sm:$0xff]  ;;  %v6496_v21 = vld [vmem:[#allocation11 + $0x300] sm:$0xff] }
0x12d4   :  { %v6500_v22 = vld [vmem:[#allocation11 + $0x320] sm:$0xff]  ;;  %v12078_v24 = vpack.c.bf16 %v6503_v18, %v6499_v17 }
0x12d5   :  { %v11952_v31 = vpack.c.bf16 %v6500_v22, %v6496_v21 }
0x12d6   :  { %11933 = vmatpush1.bf16.msra.mxu0 %v11932_v29  ;;  %12061 = vmatpush1.bf16.msra.mxu1 %v12060_v51  ;;  %v6507_v29 = vld [vmem:[#allocation11 + $0x358] sm:$0xff] }
0x12d7   :  { %11935 = vmatprep.subr.bf16.mxu0 %v11934_v63  ;;  %12063 = vmatprep.subr.bf16.mxu1 %v12062_v37  ;;  %v6511_v51 = vld [vmem:[#allocation11 + $0x378] sm:$0xff]  ;;  %v6504_v63 = vld [vmem:[#allocation11 + $0x340] sm:$0xff] }
0x12d8   :  { %v6508_v37 = vld [vmem:[#allocation11 + $0x360] sm:$0xff]  ;;  %v12082_v39 = vpack.c.bf16 %v6511_v51, %v6507_v29  ;;  %v6541_v29 = vld [vmem:[#allocation11 + $0x468] sm:$0xff]  ;;  %v6539_v51 = vld [vmem:[#allocation11 + $0x458] sm:$0xff] }
0x12d9   :  { %v11956_v33 = vpack.c.bf16 %v6508_v37, %v6504_v63 }
0x12da   :  { %11937 = vmatpush1.bf16.msra.mxu0 %v11936_v44  ;;  %12065 = vmatpush1.bf16.msra.mxu1 %v12064_v45  ;;  %v6515_v44 = vld [vmem:[#allocation11 + $0x398] sm:$0xff] }
0x12db   :  { %11939 = vmatprep.subr.bf16.mxu0 %v11938_v61  ;;  %12067 = vmatprep.subr.bf16.mxu1 %v12066_v34  ;;  %v6519_v45 = vld [vmem:[#allocation11 + $0x3b8] sm:$0xff]  ;;  %v6512_v61 = vld [vmem:[#allocation11 + $0x380] sm:$0xff]  ;;  %v11958_v34 = vpack.c.bf16 %v6517_v27, %v6513_v42  ;;  %v6542_v42 = vld [vmem:[#allocation11 + $0x470] sm:$0xff] }
0x12dc   :  { %v12086_v2 = vpack.c.bf16 %v6519_v45, %v6515_v44  ;;  %v11960_v47 = vpack.c.bf16 %v6516_v13, %v6512_v61  ;;  %v6545_v27 = vld [vmem:[#allocation11 + $0x488] sm:$0xff]  ;;  %v11970_v44 = vpack.c.bf16 %v6541_v29, %v6537_v28  ;;  %v6551_v61 = vld [vmem:[#allocation11 + $0x4b8] sm:$0xff]  ;;  %v12100_v13 = vpack.c.bf16 %v6542_v42, %v6538_v41  ;;  %v6568_v29 = vld [vmem:[#allocation11 + $0x540] sm:$0xff] }
0x12dd   :  { %v6583_v41 = vld [vmem:[#allocation11 + $0x5b8] sm:$0xff] }
0x12de   :  { %11941 = vmatpush1.bf16.msra.mxu0 %v11940_v49  ;;  %12069 = vmatpush1.bf16.msra.mxu1 %v12068_v55  ;;  %v6521_v49 = vld [vmem:[#allocation11 + $0x3c8] sm:$0xff] }
0x12df   :  { %11943 = vmatprep.subr.bf16.mxu0 %v11942_v4  ;;  %12071 = vmatprep.subr.bf16.mxu1 %v12070_v53  ;;  %v6525_v55 = vld [vmem:[#allocation11 + $0x3e8] sm:$0xff]  ;;  %v6527_v4 = vld [vmem:[#allocation11 + $0x3f8] sm:$0xff]  ;;  %v6520_v53 = vld [vmem:[#allocation11 + $0x3c0] sm:$0xff] }
0x12e0   :  { %v11962_v52 = vpack.c.bf16 %v6525_v55, %v6521_v49  ;;  %v12090_v43 = vpack.c.bf16 %v6527_v4, %v6523_v50  ;;  %v11964_v58 = vpack.c.bf16 %v6524_v54, %v6520_v53  ;;  %v6546_v49 = vld [vmem:[#allocation11 + $0x490] sm:$0xff]  ;;  %v6553_v50 = vld [vmem:[#allocation11 + $0x4c8] sm:$0xff]  ;;  %v6555_v4 = vld [vmem:[#allocation11 + $0x4d8] sm:$0xff]  ;;  %v11976_v54 = vpack.c.bf16 %v6548_v6, %v6544_v35 }
0x12e1   :  { %v6550_v55 = vld [vmem:[#allocation11 + $0x4b0] sm:$0xff]  ;;  %v6559_v53 = vld [vmem:[#allocation11 + $0x4f8] sm:$0xff] }
0x12e2   :  { %11945 = vmatpush1.bf16.msra.mxu0 %v11944_v56  ;;  %12073 = vmatpush1.bf16.msra.mxu1 %v12072_v8  ;;  %v6529_v56 = vld [vmem:[#allocation11 + $0x408] sm:$0xff]  ;;  %v6587_v35 = vld [vmem:[#allocation11 + $0x5d8] sm:$0xff] }
0x12e3   :  { %11947 = vmatprep.subr.bf16.mxu0 %v11946_v11  ;;  %12075 = vmatprep.subr.bf16.mxu1 %v12074_v62  ;;  %v6533_v8 = vld [vmem:[#allocation11 + $0x428] sm:$0xff]  ;;  %v6535_v11 = vld [vmem:[#allocation11 + $0x438] sm:$0xff] }
0x12e4   :  { %v11966_v10 = vpack.c.bf16 %v6533_v8, %v6529_v56  ;;  %v12094_v62 = vpack.c.bf16 %v6535_v11, %v6531_v9  ;;  %v6554_v56 = vld [vmem:[#allocation11 + $0x4d0] sm:$0xff]  ;;  %v6561_v9 = vld [vmem:[#allocation11 + $0x508] sm:$0xff]  ;;  %v6563_v11 = vld [vmem:[#allocation11 + $0x518] sm:$0xff] }
0x12e5   :  { %v6558_v8 = vld [vmem:[#allocation11 + $0x4f0] sm:$0xff]  ;;  %v6591_v6 = vld [vmem:[#allocation11 + $0x5f8] sm:$0xff] }
0x12e6   :  { %11949 = vmatpush1.bf16.msra.mxu0 %v11948_v19  ;;  %12077 = vmatpush1.bf16.msra.mxu1 %v12076_v20  ;;  %v6528_v19 = vld [vmem:[#allocation11 + $0x400] sm:$0xff] }
0x12e7   :  { %11951 = vmatprep.subr.bf16.mxu0 %v11950_v23  ;;  %12079 = vmatprep.subr.bf16.mxu1 %v12078_v24  ;;  %v6532_v23 = vld [vmem:[#allocation11 + $0x420] sm:$0xff]  ;;  %v6530_v24 = vld [vmem:[#allocation11 + $0x410] sm:$0xff] }
0x12e8   :  { %v11968_v63 = vpack.c.bf16 %v6532_v23, %v6528_v19  ;;  %v12096_v37 = vpack.c.bf16 %v6534_v25, %v6530_v24  ;;  %v6569_v23 = vld [vmem:[#allocation11 + $0x548] sm:$0xff]  ;;  %v6571_v25 = vld [vmem:[#allocation11 + $0x558] sm:$0xff] }
0x12e9   :  { %v6573_v24 = vld [vmem:[#allocation11 + $0x568] sm:$0xff] }
0x12ea   :  { %11953 = vmatpush1.bf16.msra.mxu0 %v11952_v31  ;;  %12081 = vmatpush1.bf16.msra.mxu1 %v12080_v32  ;;  %v6543_v31 = vld [vmem:[#allocation11 + $0x478] sm:$0xff] }
0x12eb   :  { %11955 = vmatprep.subr.bf16.mxu0 %v11954_v38  ;;  %12083 = vmatprep.subr.bf16.mxu1 %v12082_v39  ;;  %v6536_v38 = vld [vmem:[#allocation11 + $0x440] sm:$0xff]  ;;  %v12098_v45 = vpack.c.bf16 %v6543_v31, %v6539_v51  ;;  %v11986_v31 = vpack.c.bf16 %v6573_v24, %v6569_v23 }
0x12ec   :  { %v6540_v39 = vld [vmem:[#allocation11 + $0x460] sm:$0xff] }
0x12ed   :  { %v6572_v51 = vld [vmem:[#allocation11 + $0x560] sm:$0xff] }
0x12ee   :  { %11957 = vmatpush1.bf16.msra.mxu0 %v11956_v33  ;;  %12085 = vmatpush1.bf16.msra.mxu1 %v12084_v46  ;;  %v6549_v33 = vld [vmem:[#allocation11 + $0x4a8] sm:$0xff]  ;;  %v6547_v46 = vld [vmem:[#allocation11 + $0x498] sm:$0xff]  ;;  %v11988_v42 = vpack.c.bf16 %v6572_v51, %v6568_v29 }
0x12ef   :  { %11959 = vmatprep.subr.bf16.mxu0 %v11958_v34  ;;  %12087 = vmatprep.subr.bf16.mxu1 %v12086_v2  ;;  %v11972_v2 = vpack.c.bf16 %v6540_v39, %v6536_v38  ;;  %v6577_v38 = vld [vmem:[#allocation11 + $0x588] sm:$0xff]  ;;  %v6611_v29 = vld [vmem:[#allocation11 + $0x698] sm:$0xff] }
0x12f0   :  { %v6581_v39 = vld [vmem:[#allocation11 + $0x5a8] sm:$0xff]  ;;  %v6615_v51 = vld [vmem:[#allocation11 + $0x6b8] sm:$0xff] }
0x12f2   :  { %11961 = vmatpush1.bf16.msra.mxu0 %v11960_v47  ;;  %12089 = vmatpush1.bf16.msra.mxu1 %v12088_v48  ;;  %v11974_v47 = vpack.c.bf16 %v6549_v33, %v6545_v27  ;;  %v12102_v48 = vpack.c.bf16 %v6551_v61, %v6547_v46  ;;  %v11990_v33 = vpack.c.bf16 %v6581_v39, %v6577_v38  ;;  %v6578_v61 = vld [vmem:[#allocation11 + $0x590] sm:$0xff] }
0x12f3   :  { %11963 = vmatprep.subr.bf16.mxu0 %v11962_v52  ;;  %12091 = vmatprep.subr.bf16.mxu1 %v12090_v43  ;;  %v6557_v52 = vld [vmem:[#allocation11 + $0x4e8] sm:$0xff]  ;;  %v12104_v43 = vpack.c.bf16 %v6550_v55, %v6546_v49  ;;  %v6584_v49 = vld [vmem:[#allocation11 + $0x5c0] sm:$0xff]  ;;  %v12134_v39 = vpack.c.bf16 %v6615_v51, %v6611_v29  ;;  %v6642_v29 = vld [vmem:[#allocation11 + $0x790] sm:$0xff] }
0x12f4   :  { %v11978_v60 = vpack.c.bf16 %v6557_v52, %v6553_v50  ;;  %v6588_v55 = vld [vmem:[#allocation11 + $0x5e0] sm:$0xff]  ;;  %v12122_v52 = vpack.c.bf16 %v6591_v6, %v6587_v35  ;;  %v6618_v35 = vld [vmem:[#allocation11 + $0x6d0] sm:$0xff] }
0x12f5   :  { %v6622_v6 = vld [vmem:[#allocation11 + $0x6f0] sm:$0xff] }
0x12f6   :  { %11965 = vmatpush1.bf16.msra.mxu0 %v11964_v58  ;;  %12093 = vmatpush1.bf16.msra.mxu1 %v12092_v1  ;;  %v6552_v58 = vld [vmem:[#allocation11 + $0x4c0] sm:$0xff]  ;;  %v12106_v1 = vpack.c.bf16 %v6559_v53, %v6555_v4  ;;  %v6586_v4 = vld [vmem:[#allocation11 + $0x5d0] sm:$0xff] }
0x12f7   :  { %11967 = vmatprep.subr.bf16.mxu0 %v11966_v10  ;;  %12095 = vmatprep.subr.bf16.mxu1 %v12094_v62  ;;  %v6565_v10 = vld [vmem:[#allocation11 + $0x528] sm:$0xff]  ;;  %v6567_v62 = vld [vmem:[#allocation11 + $0x538] sm:$0xff]  ;;  %v6590_v53 = vld [vmem:[#allocation11 + $0x5f0] sm:$0xff] }
0x12f8   :  { %v11982_v19 = vpack.c.bf16 %v6565_v10, %v6561_v9  ;;  %v6646_v51 = vld [vmem:[#allocation11 + $0x7b0] sm:$0xff] }
0x138c   :  { %v6249_v17 = vpop.f32.mrb[40].mxu0  ;;  %v16106_v18 = vpop.f32.mrb[46].mxu1 }
0x138d   :  { %v12940_v20 = vadd.f32 %v6249_v17, %v6095_v14  ;;  %v6251_v21 = vpop.f32.mrb[41].mxu0  ;;  %v6393_v22 = vpop.f32.mrb[47].mxu1  ;;  %v11980_v14 = vpack.c.bf16 %v6556_v59, %v6552_v58  ;;  %v6564_v17 = vld [vmem:[#allocation11 + $0x520] sm:$0xff]  ;;  %v6595_v58 = vld [vmem:[#allocation11 + $0x618] sm:$0xff] }
0x138e   :  { %v12941_v26 = vadd.f32 %v6251_v21, %v6099_v15  ;;  %v12943_v0 = vadd.f32 %v6393_v22, %v6107_v16  ;;  %v12108_v15 = vpack.c.bf16 %v6558_v8, %v6554_v56  ;;  %v6560_v16 = vld [vmem:[#allocation11 + $0x500] sm:$0xff]  ;;  %v6562_v21 = vld [vmem:[#allocation11 + $0x510] sm:$0xff]  ;;  %v6599_v59 = vld [vmem:[#allocation11 + $0x638] sm:$0xff] }
0x138f   :  { %v6396_v40 = vmax.f32 %v12940_v20, 0.0  ;;  %v12110_v20 = vpack.c.bf16 %v6567_v62, %v6563_v11  ;;  %v6566_v22 = vld [vmem:[#allocation11 + $0x530] sm:$0xff]  ;;  %v11984_v28 = vpack.c.bf16 %v6564_v17, %v6560_v16  ;;  %v6592_v56 = vld [vmem:[#allocation11 + $0x600] sm:$0xff]  ;;  %v12126_v10 = vpack.c.bf16 %v6599_v59, %v6595_v58  ;;  %v6603_v16 = vld [vmem:[#allocation11 + $0x658] sm:$0xff] }
0x1390   :  { %v6397_v32 = vmax.f32 %v12941_v26, 0.0  ;;  %v6399_v34 = vmax.f32 %v12943_v0, 0.0  ;;  %v6575_v26 = vld [vmem:[#allocation11 + $0x578] sm:$0xff]  ;;  %v12112_v0 = vpack.c.bf16 %v6566_v22, %v6562_v21  ;;  %v6596_v8 = vld [vmem:[#allocation11 + $0x620] sm:$0xff]  ;;  %v6594_v11 = vld [vmem:[#allocation11 + $0x610] sm:$0xff] }
0x1391   :  { %v6598_v62 = vld [vmem:[#allocation11 + $0x630] sm:$0xff]  ;;  %v6607_v17 = vld [vmem:[#allocation11 + $0x678] sm:$0xff]  ;;  %v6600_v21 = vld [vmem:[#allocation11 + $0x640] sm:$0xff] }
0x1392   :  { %6742 = vmatprep.mubr.f32.mxu0 %v6397_v32  ;;  %6884 = vmatprep.mubr.f32.mxu1 %v6397_v32  ;;  %v12114_v32 = vpack.c.bf16 %v6575_v26, %v6571_v25  ;;  %v6604_v22 = vld [vmem:[#allocation11 + $0x660] sm:$0xff]  ;;  %v12130_v24 = vpack.c.bf16 %v6607_v17, %v6603_v16  ;;  %v6602_v25 = vld [vmem:[#allocation11 + $0x650] sm:$0xff] }
0x1393   :  { %6743 = vmatmul.mubr.f32.vlgmr.msra.gmra.mrb[42].mxu0 %v6396_v40  ;;  %6885 = vmatmul.mubr.f32.vlgmr.msra.gmra.mrb[48].mxu1 %v6396_v40  ;;  %v6579_v40 = vld [vmem:[#allocation11 + $0x598] sm:$0xff]  ;;  %v6606_v26 = vld [vmem:[#allocation11 + $0x670] sm:$0xff] }
0x1394   :  { %11969 = vmatpush1.bf16.msra.mxu0 %v11968_v63  ;;  %12097 = vmatpush1.bf16.msra.mxu1 %v12096_v37  ;;  %v6570_v63 = vld [vmem:[#allocation11 + $0x550] sm:$0xff]  ;;  %v12118_v46 = vpack.c.bf16 %v6583_v41, %v6579_v40 }
0x1395   :  { %6813 = vmatprep.mubr.f32.mxu0 %v6399_v34  ;;  %6955 = vmatprep.mubr.f32.mxu1 %v6399_v34  ;;  %v6574_v37 = vld [vmem:[#allocation11 + $0x570] sm:$0xff] }
0x1396   :  { %11971 = vmatprep.subr.bf16.mxu0 %v11970_v44  ;;  %12099 = vmatprep.subr.bf16.mxu1 %v12098_v45  ;;  %v12116_v27 = vpack.c.bf16 %v6574_v37, %v6570_v63  ;;  %v6576_v44 = vld [vmem:[#allocation11 + $0x580] sm:$0xff]  ;;  %v6582_v34 = vld [vmem:[#allocation11 + $0x5b0] sm:$0xff] }
0x1397   :  { %v6580_v45 = vld [vmem:[#allocation11 + $0x5a0] sm:$0xff]  ;;  %v6610_v40 = vld [vmem:[#allocation11 + $0x690] sm:$0xff] }
0x1398   :  { %11973 = vmatpush1.bf16.msra.mxu0 %v11972_v2  ;;  %12101 = vmatpush1.bf16.msra.mxu1 %v12100_v13  ;;  %v6585_v2 = vld [vmem:[#allocation11 + $0x5c8] sm:$0xff]  ;;  %v6608_v63 = vld [vmem:[#allocation11 + $0x680] sm:$0xff]  ;;  %v6614_v41 = vld [vmem:[#allocation11 + $0x6b0] sm:$0xff] }
0x1399   :  { %11975 = vmatprep.subr.bf16.mxu0 %v11974_v47  ;;  %12103 = vmatprep.subr.bf16.mxu1 %v12102_v48  ;;  %v6589_v13 = vld [vmem:[#allocation11 + $0x5e8] sm:$0xff]  ;;  %v11992_v47 = vpack.c.bf16 %v6580_v45, %v6576_v44  ;;  %v12120_v48 = vpack.c.bf16 %v6582_v34, %v6578_v61  ;;  %v6612_v37 = vld [vmem:[#allocation11 + $0x6a0] sm:$0xff]  ;;  %v6619_v44 = vld [vmem:[#allocation11 + $0x6d8] sm:$0xff] }
0x139a   :  { %v11994_v50 = vpack.c.bf16 %v6589_v13, %v6585_v2  ;;  %v6623_v45 = vld [vmem:[#allocation11 + $0x6f8] sm:$0xff]  ;;  %v6616_v61 = vld [vmem:[#allocation11 + $0x6c0] sm:$0xff]  ;;  %v6626_v58 = vld [vmem:[#allocation11 + $0x710] sm:$0xff] }
0x139b   :  { %v6620_v34 = vld [vmem:[#allocation11 + $0x6e0] sm:$0xff]  ;;  %v12138_v13 = vpack.c.bf16 %v6623_v45, %v6619_v44  ;;  %v6630_v59 = vld [vmem:[#allocation11 + $0x730] sm:$0xff] }
0x139c   :  { %11977 = vmatpush1.bf16.msra.mxu0 %v11976_v54  ;;  %12105 = vmatpush1.bf16.msra.mxu1 %v12104_v43  ;;  %v6593_v54 = vld [vmem:[#allocation11 + $0x608] sm:$0xff]  ;;  %v6634_v16 = vld [vmem:[#allocation11 + $0x750] sm:$0xff] }
0x139d   :  { %11979 = vmatprep.subr.bf16.mxu0 %v11978_v60  ;;  %12107 = vmatprep.subr.bf16.mxu1 %v12106_v1  ;;  %v6597_v43 = vld [vmem:[#allocation11 + $0x628] sm:$0xff]  ;;  %v11996_v60 = vpack.c.bf16 %v6588_v55, %v6584_v49  ;;  %v12124_v1 = vpack.c.bf16 %v6590_v53, %v6586_v4  ;;  %v6627_v49 = vld [vmem:[#allocation11 + $0x718] sm:$0xff]  ;;  %v6624_v4 = vld [vmem:[#allocation11 + $0x700] sm:$0xff] }
0x139e   :  { %v11998_v9 = vpack.c.bf16 %v6597_v43, %v6593_v54  ;;  %v6631_v55 = vld [vmem:[#allocation11 + $0x738] sm:$0xff]  ;;  %v6628_v53 = vld [vmem:[#allocation11 + $0x720] sm:$0xff]  ;;  %v6638_v17 = vld [vmem:[#allocation11 + $0x770] sm:$0xff] }
0x139f   :  { %v12142_v43 = vpack.c.bf16 %v6631_v55, %v6627_v49  ;;  %v6650_v45 = vld [vmem:[#allocation11 + $0x7d0] sm:$0xff]  ;;  %v6998_v55 = vld [vmem:[%s17342_s23 + $0x100] sm:$0xff] }
0x13a0   :  { %11981 = vmatpush1.bf16.msra.mxu0 %v11980_v14  ;;  %12109 = vmatpush1.bf16.msra.mxu1 %v12108_v15  ;;  %v6601_v14 = vld [vmem:[#allocation11 + $0x648] sm:$0xff] }
0x13a1   :  { %11983 = vmatprep.subr.bf16.mxu0 %v11982_v19  ;;  %12111 = vmatprep.subr.bf16.mxu1 %v12110_v20  ;;  %v6605_v15 = vld [vmem:[#allocation11 + $0x668] sm:$0xff]  ;;  %v12000_v19 = vpack.c.bf16 %v6596_v8, %v6592_v56  ;;  %v12128_v20 = vpack.c.bf16 %v6598_v62, %v6594_v11  ;;  %v6635_v56 = vld [vmem:[#allocation11 + $0x758] sm:$0xff]  ;;  %v6632_v11 = vld [vmem:[#allocation11 + $0x740] sm:$0xff] }
0x13a2   :  { %v12002_v23 = vpack.c.bf16 %v6605_v15, %v6601_v14  ;;  %v6639_v8 = vld [vmem:[#allocation11 + $0x778] sm:$0xff]  ;;  %v6636_v62 = vld [vmem:[#allocation11 + $0x760] sm:$0xff] }
0x13a3   :  { %v12146_v15 = vpack.c.bf16 %v6639_v8, %v6635_v56  ;;  %v7000_v8 = vld [vmem:[%s17342_s23 + $0x110] sm:$0xff] }
0x13a4   :  { %11985 = vmatpush1.bf16.msra.mxu0 %v11984_v28  ;;  %12113 = vmatpush1.bf16.msra.mxu1 %v12112_v0  ;;  %v6609_v28 = vld [vmem:[#allocation11 + $0x688] sm:$0xff] }
0x13a5   :  { %11987 = vmatprep.subr.bf16.mxu0 %v11986_v31  ;;  %12115 = vmatprep.subr.bf16.mxu1 %v12114_v32  ;;  %v6613_v0 = vld [vmem:[#allocation11 + $0x6a8] sm:$0xff]  ;;  %v12004_v31 = vpack.c.bf16 %v6604_v22, %v6600_v21  ;;  %v12132_v32 = vpack.c.bf16 %v6606_v26, %v6602_v25  ;;  %v6643_v21 = vld [vmem:[#allocation11 + $0x798] sm:$0xff]  ;;  %v6640_v25 = vld [vmem:[#allocation11 + $0x780] sm:$0xff] }
0x13a6   :  { %v12006_v38 = vpack.c.bf16 %v6613_v0, %v6609_v28  ;;  %v6647_v22 = vld [vmem:[#allocation11 + $0x7b8] sm:$0xff]  ;;  %v6644_v26 = vld [vmem:[#allocation11 + $0x7a0] sm:$0xff] }
0x13a7   :  { %v12150_v0 = vpack.c.bf16 %v6647_v22, %v6643_v21  ;;  %v7002_v22 = vld [vmem:[%s17342_s23 + $0x120] sm:$0xff] }
0x13a8   :  { %11989 = vmatpush1.bf16.msra.mxu0 %v11988_v42  ;;  %12117 = vmatpush1.bf16.msra.mxu1 %v12116_v27  ;;  %v6617_v42 = vld [vmem:[#allocation11 + $0x6c8] sm:$0xff] }
0x13a9   :  { %11991 = vmatprep.subr.bf16.mxu0 %v11990_v33  ;;  %12119 = vmatprep.subr.bf16.mxu1 %v12118_v46  ;;  %v6621_v27 = vld [vmem:[#allocation11 + $0x6e8] sm:$0xff]  ;;  %v12008_v33 = vpack.c.bf16 %v6612_v37, %v6608_v63  ;;  %v12136_v46 = vpack.c.bf16 %v6614_v41, %v6610_v40  ;;  %v6651_v63 = vld [vmem:[#allocation11 + $0x7d8] sm:$0xff]  ;;  %v6648_v40 = vld [vmem:[#allocation11 + $0x7c0] sm:$0xff] }
0x13aa   :  { %v12010_v2 = vpack.c.bf16 %v6621_v27, %v6617_v42  ;;  %v6655_v37 = vld [vmem:[#allocation11 + $0x7f8] sm:$0xff]  ;;  %v6652_v41 = vld [vmem:[#allocation11 + $0x7e0] sm:$0xff]  ;;  %v6103_v42 = vrot.slane %v16098_v12, %v15280_v30 }
0x13ab   :  { %v12154_v44 = vpack.c.bf16 %v6655_v37, %v6651_v63  ;;  %v7015_v12 = vld [vmem:[%s17342_s23 + $0x188] sm:$0xff]  ;;  %v7004_v37 = vld [vmem:[%s17342_s23 + $0x130] sm:$0xff] }
0x13ac   :  { %11993 = vmatpush1.bf16.msra.mxu0 %v11992_v47  ;;  %12121 = vmatpush1.bf16.msra.mxu1 %v12120_v48  ;;  %v6625_v47 = vld [vmem:[#allocation11 + $0x708] sm:$0xff] }
0x13ad   :  { %11995 = vmatprep.subr.bf16.mxu0 %v11994_v50  ;;  %12123 = vmatprep.subr.bf16.mxu1 %v12122_v52  ;;  %v6629_v48 = vld [vmem:[#allocation11 + $0x728] sm:$0xff]  ;;  %v12012_v50 = vpack.c.bf16 %v6620_v34, %v6616_v61  ;;  %v12140_v52 = vpack.c.bf16 %v6622_v6, %v6618_v35  ;;  %v7014_v34 = vld [vmem:[%s17342_s23 + $0x180] sm:$0xff] }
0x13ae   :  { %v12014_v54 = vpack.c.bf16 %v6629_v48, %v6625_v47  ;;  %v6983_v61 = vld [vmem:[%s17342_s23 + $0x88] sm:$0xff]  ;;  %v6966_v35 = vld [vmem:[%s17342_s23] sm:$0xff]  ;;  %v12942_v47 = vadd.f32 %v16106_v18, %v6103_v42  ;;  %v12190_v49 = vpack.c.bf16 %v7015_v12, %v7014_v34  ;;  %v6985_v18 = vld [vmem:[%s17342_s23 + $0x98] sm:$0xff] }
0x13af   :  { %v6967_v6 = vld [vmem:[%s17342_s23 + $0x8] sm:$0xff]  ;;  %v7006_v34 = vld [vmem:[%s17342_s23 + $0x140] sm:$0xff] }
0x13b0   :  { %11997 = vmatpush1.bf16.msra.mxu0 %v11996_v60  ;;  %12125 = vmatpush1.bf16.msra.mxu1 %v12124_v1  ;;  %v6633_v60 = vld [vmem:[#allocation11 + $0x748] sm:$0xff] }
0x13b1   :  { %11999 = vmatprep.subr.bf16.mxu0 %v11998_v9  ;;  %12127 = vmatprep.subr.bf16.mxu1 %v12126_v10  ;;  %v6637_v1 = vld [vmem:[#allocation11 + $0x768] sm:$0xff]  ;;  %v12016_v9 = vpack.c.bf16 %v6628_v53, %v6624_v4  ;;  %v12144_v10 = vpack.c.bf16 %v6630_v59, %v6626_v58  ;;  %v7017_v53 = vld [vmem:[%s17342_s23 + $0x198] sm:$0xff] }
0x13b2   :  { %v12018_v14 = vpack.c.bf16 %v6637_v1, %v6633_v60  ;;  %v7016_v4 = vld [vmem:[%s17342_s23 + $0x190] sm:$0xff]  ;;  %v6969_v59 = vld [vmem:[%s17342_s23 + $0x18] sm:$0xff]  ;;  %v6398_v60 = vmax.f32 %v12942_v47, 0.0  ;;  %v7023_v42 = vld [vmem:[%s17342_s23 + $0x1c8] sm:$0xff] }
0x13b3   :  { %v6968_v58 = vld [vmem:[%s17342_s23 + $0x10] sm:$0xff]  ;;  %v12194_v56 = vpack.c.bf16 %v7017_v53, %v7016_v4  ;;  %v7007_v12 = vld [vmem:[%s17342_s23 + $0x148] sm:$0xff]  ;;  %v7009_v4 = vld [vmem:[%s17342_s23 + $0x158] sm:$0xff] }
0x13b4   :  { %12001 = vmatpush1.bf16.msra.mxu0 %v12000_v19  ;;  %12129 = vmatpush1.bf16.msra.mxu1 %v12128_v20  ;;  %v6641_v19 = vld [vmem:[#allocation11 + $0x788] sm:$0xff]  ;;  %v6994_v53 = vld [vmem:[%s17342_s23 + $0xe0] sm:$0xff] }
0x13b5   :  { %12003 = vmatprep.subr.bf16.mxu0 %v12002_v23  ;;  %12131 = vmatprep.subr.bf16.mxu1 %v12130_v24  ;;  %v6645_v20 = vld [vmem:[#allocation11 + $0x7a8] sm:$0xff]  ;;  %v12020_v23 = vpack.c.bf16 %v6636_v62, %v6632_v11  ;;  %v12148_v24 = vpack.c.bf16 %v6638_v17, %v6634_v16  ;;  %v7018_v62 = vld [vmem:[%s17342_s23 + $0x1a0] sm:$0xff] }
0x13b6   :  { %v12022_v28 = vpack.c.bf16 %v6645_v20, %v6641_v19  ;;  %v6987_v11 = vld [vmem:[%s17342_s23 + $0xa8] sm:$0xff]  ;;  %v6970_v17 = vld [vmem:[%s17342_s23 + $0x20] sm:$0xff] }
0x13b7   :  { %v6971_v19 = vld [vmem:[%s17342_s23 + $0x28] sm:$0xff] }
0x13b8   :  { %12005 = vmatpush1.bf16.msra.mxu0 %v12004_v31  ;;  %12133 = vmatpush1.bf16.msra.mxu1 %v12132_v32  ;;  %v6649_v31 = vld [vmem:[#allocation11 + $0x7c8] sm:$0xff] }
0x13b9   :  { %12007 = vmatprep.subr.bf16.mxu0 %v12006_v38  ;;  %12135 = vmatprep.subr.bf16.mxu1 %v12134_v39  ;;  %v6653_v32 = vld [vmem:[#allocation11 + $0x7e8] sm:$0xff]  ;;  %v12024_v38 = vpack.c.bf16 %v6644_v26, %v6640_v25  ;;  %v12152_v39 = vpack.c.bf16 %v6646_v51, %v6642_v29  ;;  %v6989_v25 = vld [vmem:[%s17342_s23 + $0xb8] sm:$0xff] }
0x13ba   :  { %v12026_v27 = vpack.c.bf16 %v6653_v32, %v6649_v31  ;;  %v7020_v26 = vld [vmem:[%s17342_s23 + $0x1b0] sm:$0xff]  ;;  %v6973_v31 = vld [vmem:[%s17342_s23 + $0x38] sm:$0xff] }
0x13bb   :  { %v6972_v51 = vld [vmem:[%s17342_s23 + $0x30] sm:$0xff] }
0x13bc   :  { %12009 = vmatpush1.bf16.msra.mxu0 %v12008_v33  ;;  %12137 = vmatpush1.bf16.msra.mxu1 %v12136_v46  ;;  %v6654_v33 = vld [vmem:[#allocation11 + $0x7f0] sm:$0xff]  ;;  %v6982_v46 = vld [vmem:[%s17342_s23 + $0x80] sm:$0xff] }
0x13bd   :  { %12011 = vmatprep.subr.bf16.mxu0 %v12010_v2  ;;  %12139 = vmatprep.subr.bf16.mxu1 %v12138_v13  ;;  %v12028_v2 = vpack.c.bf16 %v6652_v41, %v6648_v40  ;;  %v12156_v13 = vpack.c.bf16 %v6654_v33, %v6650_v45  ;;  %v12158_v48 = vpack.c.bf16 %v6983_v61, %v6982_v46  ;;  %v6991_v40 = vld [vmem:[%s17342_s23 + $0xc8] sm:$0xff]  ;;  %v7022_v41 = vld [vmem:[%s17342_s23 + $0x1c0] sm:$0xff] }
0x13be   :  { %v6974_v45 = vld [vmem:[%s17342_s23 + $0x40] sm:$0xff]  ;;  %v6975_v33 = vld [vmem:[%s17342_s23 + $0x48] sm:$0xff]  ;;  %v12206_v61 = vpack.c.bf16 %v7023_v42, %v7022_v41 }
0x13bf   :  { %v12176_v47 = vpack.c.bf16 %v6975_v33, %v6974_v45 }
0x13c0   :  { %12013 = vmatpush1.bf16.msra.mxu0 %v12012_v50  ;;  %12141 = vmatpush1.bf16.msra.mxu1 %v12140_v52  ;;  %v6999_v50 = vld [vmem:[%s17342_s23 + $0x108] sm:$0xff]  ;;  %v6984_v52 = vld [vmem:[%s17342_s23 + $0x90] sm:$0xff] }
0x13c1   :  { %12015 = vmatprep.subr.bf16.mxu0 %v12014_v54  ;;  %12143 = vmatprep.subr.bf16.mxu1 %v12142_v43  ;;  %v12160_v54 = vpack.c.bf16 %v6967_v6, %v6966_v35  ;;  %v12192_v43 = vpack.c.bf16 %v6999_v50, %v6998_v55  ;;  %v12162_v1 = vpack.c.bf16 %v6985_v18, %v6984_v52  ;;  %v7024_v35 = vld [vmem:[%s17342_s23 + $0x1d0] sm:$0xff]  ;;  %v7025_v6 = vld [vmem:[%s17342_s23 + $0x1d8] sm:$0xff] }
0x13c2   :  { %v6977_v55 = vld [vmem:[%s17342_s23 + $0x58] sm:$0xff]  ;;  %v12210_v52 = vpack.c.bf16 %v7025_v6, %v7024_v35  ;;  %v7008_v18 = vld [vmem:[%s17342_s23 + $0x150] sm:$0xff] }
0x13c3   :  { %v7189_v6 = vld [vmem:[#allocation10 + $0x448] sm:$0xff] }
0x13c4   :  { %12017 = vmatpush1.bf16.msra.mxu0 %v12016_v9  ;;  %12145 = vmatpush1.bf16.msra.mxu1 %v12144_v10  ;;  %v7001_v9 = vld [vmem:[%s17342_s23 + $0x118] sm:$0xff]  ;;  %v6986_v10 = vld [vmem:[%s17342_s23 + $0xa0] sm:$0xff] }
0x13c5   :  { %12019 = vmatprep.subr.bf16.mxu0 %v12018_v14  ;;  %12147 = vmatprep.subr.bf16.mxu1 %v12146_v15  ;;  %v7019_v14 = vld [vmem:[%s17342_s23 + $0x1a8] sm:$0xff]  ;;  %v12164_v15 = vpack.c.bf16 %v6969_v59, %v6968_v58  ;;  %v12196_v16 = vpack.c.bf16 %v7001_v9, %v7000_v8  ;;  %v12166_v20 = vpack.c.bf16 %v6987_v11, %v6986_v10  ;;  %v7010_v10 = vld [vmem:[%s17342_s23 + $0x160] sm:$0xff] }
0x13c6   :  { %v12198_v21 = vpack.c.bf16 %v7019_v14, %v7018_v62  ;;  %v7027_v58 = vld [vmem:[%s17342_s23 + $0x1e8] sm:$0xff] }
0x13c7   :  { %v6979_v9 = vld [vmem:[%s17342_s23 + $0x68] sm:$0xff] }
0x13c8   :  { %12021 = vmatpush1.bf16.msra.mxu0 %v12020_v23  ;;  %12149 = vmatpush1.bf16.msra.mxu1 %v12148_v24  ;;  %v7003_v23 = vld [vmem:[%s17342_s23 + $0x128] sm:$0xff]  ;;  %v6988_v24 = vld [vmem:[%s17342_s23 + $0xb0] sm:$0xff] }
0x13c9   :  { %12023 = vmatprep.subr.bf16.mxu0 %v12022_v28  ;;  %12151 = vmatprep.subr.bf16.mxu1 %v12150_v0  ;;  %v7021_v28 = vld [vmem:[%s17342_s23 + $0x1b8] sm:$0xff]  ;;  %v12168_v0 = vpack.c.bf16 %v6971_v19, %v6970_v17  ;;  %v12200_v29 = vpack.c.bf16 %v7003_v23, %v7002_v22  ;;  %v12170_v32 = vpack.c.bf16 %v6989_v25, %v6988_v24  ;;  %v7011_v11 = vld [vmem:[%s17342_s23 + $0x168] sm:$0xff]  ;;  %v7028_v17 = vld [vmem:[%s17342_s23 + $0x1f0] sm:$0xff] }
0x13ca   :  { %v12202_v63 = vpack.c.bf16 %v7021_v28, %v7020_v26  ;;  %v12216_v14 = vpack.c.bf16 %v7011_v11, %v7010_v10  ;;  %v6981_v22 = vld [vmem:[%s17342_s23 + $0x78] sm:$0xff]  ;;  %v7012_v25 = vld [vmem:[%s17342_s23 + $0x170] sm:$0xff] }
0x13cb   :  { %v7013_v26 = vld [vmem:[%s17342_s23 + $0x178] sm:$0xff] }
0x13cc   :  { %12025 = vmatpush1.bf16.msra.mxu0 %v12024_v38  ;;  %12153 = vmatpush1.bf16.msra.mxu1 %v12152_v39  ;;  %v7005_v38 = vld [vmem:[%s17342_s23 + $0x138] sm:$0xff]  ;;  %v6990_v39 = vld [vmem:[%s17342_s23 + $0xc0] sm:$0xff]  ;;  %v12220_v28 = vpack.c.bf16 %v7013_v26, %v7012_v25 }
0x13cd   :  { %12027 = vmatprep.subr.bf16.mxu0 %v12026_v27  ;;  %12155 = vmatprep.subr.bf16.mxu1 %v12154_v44  ;;  %v12172_v27 = vpack.c.bf16 %v6973_v31, %v6972_v51  ;;  %v12204_v44 = vpack.c.bf16 %v7005_v38, %v7004_v37  ;;  %v12174_v46 = vpack.c.bf16 %v6991_v40, %v6990_v39  ;;  %v7183_v51 = vld [vmem:[#allocation10 + $0x418] sm:$0xff] }
0x13ce   :  { %v6656_v37 = vld [vmem:[%s17341_s22] sm:$0xf] }
0x13cf   :  { %v6661_v38 = vrot.slane %v6656_v37, %v13620_v7  ;;  %v6669_v39 = vrot.slane %v6656_v37, %v15280_v30  ;;  %v6665_v40 = vrot.slane %v6656_v37, %v13614_v5  ;;  %v6673_v41 = vrot.slane %v6656_v37, %v15283_v36  ;;  %v7203_v10 = vld [vmem:[#allocation10 + $0x4b8] sm:$0xff] }
0x13d0   :  { %12029 = vmatpush1.bf16.msra.mxu0 %v12028_v2  ;;  %12157 = vmatpush1.bf16.msra.mxu1 %v12156_v13  ;;  %v6992_v2 = vld [vmem:[%s17342_s23 + $0xd0] sm:$0xff]  ;;  %v6993_v13 = vld [vmem:[%s17342_s23 + $0xd8] sm:$0xff] }
0x13d1   :  { %12159 = vmatprep.subr.bf16.mxu0 %v12158_v48  ;;  %12191 = vmatprep.subr.bf16.mxu1 %v12190_v49  ;;  %v12208_v48 = vpack.c.bf16 %v7007_v12, %v7006_v34  ;;  %v6976_v49 = vld [vmem:[%s17342_s23 + $0x50] sm:$0xff]  ;;  %v12178_v50 = vpack.c.bf16 %v6993_v13, %v6992_v2  ;;  %v7184_v34 = vld [vmem:[#allocation10 + $0x420] sm:$0xff]  ;;  %v7215_v37 = vld [vmem:[#allocation10 + $0x518] sm:$0xff] }
0x13d2   :  { %v12180_v59 = vpack.c.bf16 %v6977_v55, %v6976_v49  ;;  %v7182_v12 = vld [vmem:[#allocation10 + $0x410] sm:$0xff]  ;;  %v7195_v49 = vld [vmem:[#allocation10 + $0x478] sm:$0xff] }
0x13d3   :  { %6814 = vmatmul.mubr.f32.vlgmr.msra.gmra.mrb[42].mxu0 %v6398_v60  ;;  %6956 = vmatmul.mubr.f32.vlgmr.msra.gmra.mrb[48].mxu1 %v6398_v60  ;;  %v12212_v60 = vpack.c.bf16 %v7009_v4, %v7008_v18  ;;  %v7186_v2 = vld [vmem:[#allocation10 + $0x430] sm:$0xff]  ;;  %v7188_v4 = vld [vmem:[#allocation10 + $0x440] sm:$0xff] }
0x13d4   :  { %12161 = vmatpush3.bf16.msra.mxu0 %v12160_v54  ;;  %12193 = vmatpush3.bf16.msra.mxu1 %v12192_v43  ;;  %v6995_v54 = vld [vmem:[%s17342_s23 + $0xe8] sm:$0xff]  ;;  %v7026_v43 = vld [vmem:[%s17342_s23 + $0x1e0] sm:$0xff]  ;;  %v12288_v18 = vpack.c.bf16 %v7186_v2, %v7182_v12 }
0x13d5   :  { %12163 = vmatprep.subr.bf16.mxu0 %v12162_v1  ;;  %12195 = vmatprep.subr.bf16.mxu1 %v12194_v56  ;;  %v6978_v1 = vld [vmem:[%s17342_s23 + $0x60] sm:$0xff]  ;;  %v12182_v56 = vpack.c.bf16 %v6995_v54, %v6994_v53  ;;  %v12214_v8 = vpack.c.bf16 %v7027_v58, %v7026_v43  ;;  %v7190_v58 = vld [vmem:[#allocation10 + $0x450] sm:$0xff] }
0x13d6   :  { %v12184_v62 = vpack.c.bf16 %v6979_v9, %v6978_v1  ;;  %v7192_v53 = vld [vmem:[#allocation10 + $0x460] sm:$0xff]  ;;  %v7199_v9 = vld [vmem:[#allocation10 + $0x498] sm:$0xff] }
0x13d7   :  { %v12228_v11 = vpack.c.bf16 %v7192_v53, %v7188_v4  ;;  %v7227_v12 = vld [vmem:[#allocation10 + $0x578] sm:$0xff] }
0x13d8   :  { %12165 = vmatpush3.bf16.msra.mxu0 %v12164_v15  ;;  %12197 = vmatpush3.bf16.msra.mxu1 %v12196_v16  ;;  %v6996_v15 = vld [vmem:[%s17342_s23 + $0xf0] sm:$0xff]  ;;  %v6997_v16 = vld [vmem:[%s17342_s23 + $0xf8] sm:$0xff] }
0x13d9   :  { %12167 = vmatprep.subr.bf16.mxu0 %v12166_v20  ;;  %12199 = vmatprep.subr.bf16.mxu1 %v12198_v21  ;;  %v12186_v19 = vpack.c.bf16 %v6997_v16, %v6996_v15  ;;  %v7029_v20 = vld [vmem:[%s17342_s23 + $0x1f8] sm:$0xff]  ;;  %v6980_v21 = vld [vmem:[%s17342_s23 + $0x70] sm:$0xff]  ;;  %v7200_v15 = vld [vmem:[#allocation10 + $0x4a0] sm:$0xff] }
0x13da   :  { %v12218_v23 = vpack.c.bf16 %v7029_v20, %v7028_v17  ;;  %v12188_v24 = vpack.c.bf16 %v6981_v22, %v6980_v21  ;;  %v12294_v17 = vpack.c.bf16 %v7203_v10, %v7199_v9  ;;  %v7202_v20 = vld [vmem:[#allocation10 + $0x4b0] sm:$0xff]  ;;  %v7205_v21 = vld [vmem:[#allocation10 + $0x4c8] sm:$0xff]  ;;  %v7235_v4 = vld [vmem:[#allocation10 + $0x5b8] sm:$0xff] }
0x13db   :  { %v7209_v22 = vld [vmem:[#allocation10 + $0x4e8] sm:$0xff]  ;;  %v7239_v10 = vld [vmem:[#allocation10 + $0x5d8] sm:$0xff] }
0x13dc   :  { %12169 = vmatpush3.bf16.msra.mxu0 %v12168_v0  ;;  %12201 = vmatpush3.bf16.msra.mxu1 %v12200_v29  ;;  %v7181_v0 = vld [vmem:[#allocation10 + $0x408] sm:$0xff] }
0x13dd   :  { %12171 = vmatprep.subr.bf16.mxu0 %v12170_v32  ;;  %12203 = vmatprep.subr.bf16.mxu1 %v12202_v63  ;;  %v7185_v29 = vld [vmem:[#allocation10 + $0x428] sm:$0xff]  ;;  %v7187_v32 = vld [vmem:[#allocation10 + $0x438] sm:$0xff] }
0x13de   :  { %v12222_v31 = vpack.c.bf16 %v7185_v29, %v7181_v0  ;;  %v12286_v63 = vpack.c.bf16 %v7187_v32, %v7183_v51  ;;  %v7208_v0 = vld [vmem:[#allocation10 + $0x4e0] sm:$0xff]  ;;  %v12234_v29 = vpack.c.bf16 %v7209_v22, %v7205_v21  ;;  %v7206_v51 = vld [vmem:[#allocation10 + $0x4d0] sm:$0xff]  ;;  %v7213_v32 = vld [vmem:[#allocation10 + $0x508] sm:$0xff] }
0x13df   :  { %v7241_v9 = vld [vmem:[#allocation10 + $0x5e8] sm:$0xff]  ;;  %v7242_v21 = vld [vmem:[#allocation10 + $0x5f0] sm:$0xff] }
0x13e0   :  { %12173 = vmatpush3.bf16.msra.mxu0 %v12172_v27  ;;  %12205 = vmatpush3.bf16.msra.mxu1 %v12204_v44  ;;  %v7180_v44 = vld [vmem:[#allocation10 + $0x400] sm:$0xff]  ;;  %v7245_v22 = vld [vmem:[#allocation10 + $0x608] sm:$0xff] }
0x13e1   :  { %12175 = vmatprep.subr.bf16.mxu0 %v12174_v46  ;;  %12207 = vmatprep.subr.bf16.mxu1 %v12206_v61 }
0x13e4   :  { %12177 = vmatpush3.bf16.msra.mxu0 %v12176_v47  ;;  %12209 = vmatpush3.bf16.msra.mxu1 %v12208_v48  ;;  %v7193_v47 = vld [vmem:[#allocation10 + $0x468] sm:$0xff]  ;;  %v7191_v48 = vld [vmem:[#allocation10 + $0x458] sm:$0xff] }
0x13e5   :  { %12179 = vmatprep.subr.bf16.mxu0 %v12178_v50  ;;  %12211 = vmatprep.subr.bf16.mxu1 %v12210_v52  ;;  %v12224_v52 = vpack.c.bf16 %v7184_v34, %v7180_v44  ;;  %v12226_v1 = vpack.c.bf16 %v7193_v47, %v7189_v6  ;;  %v7223_v34 = vld [vmem:[#allocation10 + $0x558] sm:$0xff]  ;;  %v7224_v6 = vld [vmem:[#allocation10 + $0x560] sm:$0xff] }
0x13e8   :  { %12181 = vmatpush3.bf16.msra.mxu0 %v12180_v59  ;;  %12213 = vmatpush3.bf16.msra.mxu1 %v12212_v60  ;;  %v7194_v59 = vld [vmem:[#allocation10 + $0x470] sm:$0xff]  ;;  %v7197_v60 = vld [vmem:[#allocation10 + $0x488] sm:$0xff] }
0x13e9   :  { %12183 = vmatprep.subr.bf16.mxu0 %v12182_v56  ;;  %12215 = vmatprep.subr.bf16.mxu1 %v12214_v8  ;;  %v12290_v56 = vpack.c.bf16 %v7195_v49, %v7191_v48  ;;  %v7201_v8 = vld [vmem:[#allocation10 + $0x4a8] sm:$0xff]  ;;  %v12306_v48 = vpack.c.bf16 %v7227_v12, %v7223_v34  ;;  %v7222_v49 = vld [vmem:[#allocation10 + $0x550] sm:$0xff]  ;;  %v7263_v12 = vld [vmem:[#allocation10 + $0x698] sm:$0xff] }
0x13ea   :  { %v12230_v16 = vpack.c.bf16 %v7201_v8, %v7197_v60  ;;  %v7237_v8 = vld [vmem:[#allocation10 + $0x5c8] sm:$0xff] }
0x13eb   :  { %v7265_v34 = vld [vmem:[#allocation10 + $0x6a8] sm:$0xff] }
0x13ec   :  { %12185 = vmatpush3.bf16.msra.mxu0 %v12184_v62  ;;  %12217 = vmatpush3.bf16.msra.mxu1 %v12216_v14  ;;  %v12292_v62 = vpack.c.bf16 %v7194_v59, %v7190_v58  ;;  %v7196_v14 = vld [vmem:[#allocation10 + $0x480] sm:$0xff] }
0x13ed   :  { %12187 = vmatprep.subr.bf16.mxu0 %v12186_v19  ;;  %12219 = vmatprep.subr.bf16.mxu1 %v12218_v23  ;;  %v7198_v19 = vld [vmem:[#allocation10 + $0x490] sm:$0xff]  ;;  %v7207_v23 = vld [vmem:[#allocation10 + $0x4d8] sm:$0xff]  ;;  %v12232_v25 = vpack.c.bf16 %v7200_v15, %v7196_v14  ;;  %v7232_v58 = vld [vmem:[#allocation10 + $0x5a0] sm:$0xff] }
0x13ee   :  { %v12296_v26 = vpack.c.bf16 %v7202_v20, %v7198_v19  ;;  %v7236_v15 = vld [vmem:[#allocation10 + $0x5c0] sm:$0xff]  ;;  %v7238_v20 = vld [vmem:[#allocation10 + $0x5d0] sm:$0xff] }
0x13f0   :  { %12189 = vmatpush3.bf16.msra.mxu0 %v12188_v24  ;;  %12221 = vmatpush3.bf16.msra.mxu1 %v12220_v28  ;;  %v7211_v24 = vld [vmem:[#allocation10 + $0x4f8] sm:$0xff]  ;;  %v7204_v28 = vld [vmem:[#allocation10 + $0x4c0] sm:$0xff] }
0x13f1   :  { %12223 = vmatprep.subr.bf16.mxu0 %v12222_v31  ;;  %12287 = vmatprep.subr.bf16.mxu1 %v12286_v63  ;;  %v7210_v31 = vld [vmem:[#allocation10 + $0x4f0] sm:$0xff]  ;;  %v7217_v63 = vld [vmem:[#allocation10 + $0x528] sm:$0xff] }
0x14a6   :  { %v6815_v42 = vpop.f32.mrb[42].mxu0  ;;  %v6957_v27 = vpop.f32.mrb[48].mxu1 }
0x14a7   :  { %v12944_v45 = vadd.f32 %v6815_v42, %v6661_v38  ;;  %v12946_v33 = vadd.f32 %v6957_v27, %v6669_v39  ;;  %v6817_v46 = vpop.f32.mrb[43].mxu0  ;;  %v6959_v61 = vpop.f32.mrb[49].mxu1  ;;  %v7219_v38 = vld [vmem:[#allocation10 + $0x538] sm:$0xff]  ;;  %v12236_v39 = vpack.c.bf16 %v7208_v0, %v7204_v28  ;;  %v7216_v42 = vld [vmem:[#allocation10 + $0x520] sm:$0xff]  ;;  %v12238_v27 = vpack.c.bf16 %v7217_v63, %v7213_v32  ;;  %v7250_v32 = vld [vmem:[#allocation10 + $0x630] sm:$0xff] }
0x14a8   :  { %v12945_v13 = vadd.f32 %v6817_v46, %v6665_v40  ;;  %v12947_v35 = vadd.f32 %v6959_v61, %v6673_v41  ;;  %v12300_v40 = vpack.c.bf16 %v7210_v31, %v7206_v51  ;;  %v7212_v41 = vld [vmem:[#allocation10 + $0x500] sm:$0xff]  ;;  %v12302_v44 = vpack.c.bf16 %v7219_v38, %v7215_v37  ;;  %v7221_v46 = vld [vmem:[#allocation10 + $0x548] sm:$0xff]  ;;  %v7246_v31 = vld [vmem:[#allocation10 + $0x610] sm:$0xff] }
0x14a9   :  { %v6962_v54 = vmax.f32 %v12944_v45, 0.0  ;;  %v6964_v43 = vmax.f32 %v12946_v33, 0.0  ;;  %v7214_v45 = vld [vmem:[#allocation10 + $0x510] sm:$0xff]  ;;  %v7225_v61 = vld [vmem:[#allocation10 + $0x568] sm:$0xff]  ;;  %v12240_v2 = vpack.c.bf16 %v7216_v42, %v7212_v41  ;;  %v12316_v28 = vpack.c.bf16 %v7242_v21, %v7238_v20  ;;  %v7244_v0 = vld [vmem:[#allocation10 + $0x600] sm:$0xff] }
0x14aa   :  { %v6963_v55 = vmax.f32 %v12945_v13, 0.0  ;;  %v6965_v50 = vmax.f32 %v12947_v35, 0.0  ;;  %v7218_v33 = vld [vmem:[#allocation10 + $0x530] sm:$0xff]  ;;  %v7220_v35 = vld [vmem:[#allocation10 + $0x540] sm:$0xff]  ;;  %v12242_v47 = vpack.c.bf16 %v7225_v61, %v7221_v46  ;;  %v7253_v63 = vld [vmem:[#allocation10 + $0x648] sm:$0xff]  ;;  %v12320_v41 = vpack.c.bf16 %v7250_v32, %v7246_v31 }
0x14ab   :  { %v12304_v13 = vpack.c.bf16 %v7218_v33, %v7214_v45  ;;  %v12244_v53 = vpack.c.bf16 %v7224_v6, %v7220_v35  ;;  %v7257_v37 = vld [vmem:[#allocation10 + $0x668] sm:$0xff]  ;;  %v7255_v38 = vld [vmem:[#allocation10 + $0x658] sm:$0xff]  ;;  %v7252_v42 = vld [vmem:[#allocation10 + $0x640] sm:$0xff] }
0x14ac   :  { %7101 = vmatprep.mubr.f32.mxu0 %v6963_v55  ;;  %7171 = vmatprep.mubr.f32.mxu1 %v6965_v50  ;;  %v7226_v55 = vld [vmem:[#allocation10 + $0x570] sm:$0xff]  ;;  %v7229_v50 = vld [vmem:[#allocation10 + $0x588] sm:$0xff]  ;;  %v7260_v6 = vld [vmem:[#allocation10 + $0x680] sm:$0xff] }
0x14ad   :  { %7102 = vmatmul.mubr.f32.vlgmr.msra.gmra.mrb[44].mxu0 %v6962_v54  ;;  %7172 = vmatmul.mubr.f32.vlgmr.msra.gmra.mrb[50].mxu1 %v6964_v43  ;;  %v12308_v54 = vpack.c.bf16 %v7226_v55, %v7222_v49  ;;  %v7228_v43 = vld [vmem:[#allocation10 + $0x580] sm:$0xff]  ;;  %v7254_v33 = vld [vmem:[#allocation10 + $0x650] sm:$0xff]  ;;  %v7261_v61 = vld [vmem:[#allocation10 + $0x688] sm:$0xff] }
0x14ae   :  { %12225 = vmatpush1.bf16.msra.mxu0 %v12224_v52  ;;  %12289 = vmatpush1.bf16.msra.mxu1 %v12288_v18  ;;  %v7233_v52 = vld [vmem:[#allocation10 + $0x5a8] sm:$0xff]  ;;  %v7231_v18 = vld [vmem:[#allocation10 + $0x598] sm:$0xff]  ;;  %v7258_v46 = vld [vmem:[#allocation10 + $0x670] sm:$0xff] }
0x14af   :  { %7395 = vmatprep.mubr.f32.mxu0 %v15339_v57  ;;  %7466 = vmatprep.mubr.f32.mxu1 %v15339_v57  ;;  %v12298_v57 = vpack.c.bf16 %v7211_v24, %v7207_v23  ;;  %v12246_v59 = vpack.c.bf16 %v7233_v52, %v7229_v50  ;;  %v12310_v60 = vpack.c.bf16 %v7235_v4, %v7231_v18  ;;  %v7249_v23 = vld [vmem:[#allocation10 + $0x628] sm:$0xff]  ;;  %v7247_v24 = vld [vmem:[#allocation10 + $0x618] sm:$0xff]  ;;  %v7262_v55 = vld [vmem:[#allocation10 + $0x690] sm:$0xff] }
0x14b0   :  { %12227 = vmatprep.subr.bf16.mxu0 %v12226_v1  ;;  %12291 = vmatprep.subr.bf16.mxu1 %v12290_v56  ;;  %v7230_v1 = vld [vmem:[#allocation10 + $0x590] sm:$0xff]  ;;  %v12324_v35 = vpack.c.bf16 %v7258_v46, %v7254_v33  ;;  %v7269_v52 = vld [vmem:[#allocation10 + $0x6c8] sm:$0xff]  ;;  %v7271_v4 = vld [vmem:[#allocation10 + $0x6d8] sm:$0xff] }
0x14b1   :  { %v7234_v56 = vld [vmem:[#allocation10 + $0x5b0] sm:$0xff]  ;;  %v7273_v18 = vld [vmem:[#allocation10 + $0x6e8] sm:$0xff] }
0x14b2   :  { %12229 = vmatpush1.bf16.msra.mxu0 %v12228_v11  ;;  %12293 = vmatpush1.bf16.msra.mxu1 %v12292_v62  ;;  %v7243_v11 = vld [vmem:[#allocation10 + $0x5f8] sm:$0xff]  ;;  %v12248_v62 = vpack.c.bf16 %v7232_v58, %v7228_v43  ;;  %v12312_v14 = vpack.c.bf16 %v7234_v56, %v7230_v1  ;;  %v7266_v50 = vld [vmem:[#allocation10 + $0x6b0] sm:$0xff]  ;;  %v7268_v58 = vld [vmem:[#allocation10 + $0x6c0] sm:$0xff] }
0x14b3   :  { %12231 = vmatprep.subr.bf16.mxu0 %v12230_v16  ;;  %12295 = vmatprep.subr.bf16.mxu1 %v12294_v17  ;;  %v7240_v16 = vld [vmem:[#allocation10 + $0x5e0] sm:$0xff]  ;;  %v12250_v17 = vpack.c.bf16 %v7241_v9, %v7237_v8  ;;  %v12314_v19 = vpack.c.bf16 %v7243_v11, %v7239_v10  ;;  %v12328_v43 = vpack.c.bf16 %v7266_v50, %v7262_v55  ;;  %v7270_v56 = vld [vmem:[#allocation10 + $0x6d0] sm:$0xff]  ;;  %v7277_v9 = vld [vmem:[#allocation10 + $0x708] sm:$0xff] }
0x14b4   :  { %v7274_v8 = vld [vmem:[#allocation10 + $0x6f0] sm:$0xff]  ;;  %v7281_v10 = vld [vmem:[#allocation10 + $0x728] sm:$0xff]  ;;  %v7279_v11 = vld [vmem:[#allocation10 + $0x718] sm:$0xff] }
0x14b5   :  { %v7278_v21 = vld [vmem:[#allocation10 + $0x710] sm:$0xff]  ;;  %v7304_v55 = vld [vmem:[#allocation10 + $0x7e0] sm:$0xff] }
0x14b6   :  { %12233 = vmatpush1.bf16.msra.mxu0 %v12232_v25  ;;  %12297 = vmatpush1.bf16.msra.mxu1 %v12296_v26  ;;  %v7251_v25 = vld [vmem:[#allocation10 + $0x638] sm:$0xff]  ;;  %v12252_v26 = vpack.c.bf16 %v7240_v16, %v7236_v15  ;;  %v12332_v15 = vpack.c.bf16 %v7274_v8, %v7270_v56  ;;  %v7276_v16 = vld [vmem:[#allocation10 + $0x700] sm:$0xff]  ;;  %v7286_v32 = vld [vmem:[#allocation10 + $0x750] sm:$0xff] }
0x14b7   :  { %12235 = vmatprep.subr.bf16.mxu0 %v12234_v29  ;;  %12299 = vmatprep.subr.bf16.mxu1 %v12298_v57  ;;  %v7248_v29 = vld [vmem:[#allocation10 + $0x620] sm:$0xff]  ;;  %v12254_v57 = vpack.c.bf16 %v7249_v23, %v7245_v22  ;;  %v12318_v51 = vpack.c.bf16 %v7251_v25, %v7247_v24  ;;  %v7282_v22 = vld [vmem:[#allocation10 + $0x730] sm:$0xff]  ;;  %v7285_v23 = vld [vmem:[#allocation10 + $0x748] sm:$0xff] }
0x14b8   :  { %v7289_v24 = vld [vmem:[#allocation10 + $0x768] sm:$0xff]  ;;  %v7287_v25 = vld [vmem:[#allocation10 + $0x758] sm:$0xff]  ;;  %v7294_v46 = vld [vmem:[#allocation10 + $0x790] sm:$0xff] }
0x14b9   :  { %v7302_v50 = vld [vmem:[#allocation10 + $0x7d0] sm:$0xff] }
0x14ba   :  { %12237 = vmatpush1.bf16.msra.mxu0 %v12236_v39  ;;  %12301 = vmatpush1.bf16.msra.mxu1 %v12300_v40  ;;  %v7259_v39 = vld [vmem:[#allocation10 + $0x678] sm:$0xff]  ;;  %v12256_v40 = vpack.c.bf16 %v7248_v29, %v7244_v0  ;;  %v12336_v0 = vpack.c.bf16 %v7282_v22, %v7278_v21  ;;  %v7284_v29 = vld [vmem:[#allocation10 + $0x740] sm:$0xff]  ;;  %v9200_v8 = vld [vmem:[%s17338_s19 + $0x810] sm:$0xff] }
0x14bb   :  { %12239 = vmatprep.subr.bf16.mxu0 %v12238_v27  ;;  %12303 = vmatprep.subr.bf16.mxu1 %v12302_v44  ;;  %v7256_v27 = vld [vmem:[#allocation10 + $0x660] sm:$0xff]  ;;  %v12258_v44 = vpack.c.bf16 %v7257_v37, %v7253_v63  ;;  %v12322_v45 = vpack.c.bf16 %v7259_v39, %v7255_v38  ;;  %v7290_v63 = vld [vmem:[#allocation10 + $0x770] sm:$0xff]  ;;  %v7293_v37 = vld [vmem:[#allocation10 + $0x788] sm:$0xff] }
0x14bc   :  { %v7297_v38 = vld [vmem:[#allocation10 + $0x7a8] sm:$0xff]  ;;  %v7295_v39 = vld [vmem:[#allocation10 + $0x798] sm:$0xff] }
0x14bd   :  { %v9208_v22 = vld [vmem:[%s17338_s19 + $0x850] sm:$0xff] }
0x14be   :  { %12241 = vmatpush1.bf16.msra.mxu0 %v12240_v2  ;;  %12305 = vmatpush1.bf16.msra.mxu1 %v12304_v13  ;;  %v7267_v2 = vld [vmem:[#allocation10 + $0x6b8] sm:$0xff]  ;;  %v12260_v13 = vpack.c.bf16 %v7256_v27, %v7252_v42  ;;  %v12340_v42 = vpack.c.bf16 %v7290_v63, %v7286_v32  ;;  %v7292_v27 = vld [vmem:[#allocation10 + $0x780] sm:$0xff]  ;;  %v9216_v32 = vld [vmem:[%s17338_s19 + $0x890] sm:$0xff] }
0x14bf   :  { %12243 = vmatprep.subr.bf16.mxu0 %v12242_v47  ;;  %12307 = vmatprep.subr.bf16.mxu1 %v12306_v48  ;;  %v7264_v47 = vld [vmem:[#allocation10 + $0x6a0] sm:$0xff]  ;;  %v12262_v48 = vpack.c.bf16 %v7265_v34, %v7261_v61  ;;  %v12326_v49 = vpack.c.bf16 %v7267_v2, %v7263_v12  ;;  %v7298_v61 = vld [vmem:[#allocation10 + $0x7b0] sm:$0xff]  ;;  %v7301_v34 = vld [vmem:[#allocation10 + $0x7c8] sm:$0xff] }
0x14c0   :  { %v7305_v12 = vld [vmem:[#allocation10 + $0x7e8] sm:$0xff]  ;;  %v7303_v2 = vld [vmem:[#allocation10 + $0x7d8] sm:$0xff] }
0x14c2   :  { %12245 = vmatpush1.bf16.msra.mxu0 %v12244_v53  ;;  %12309 = vmatpush1.bf16.msra.mxu1 %v12308_v54  ;;  %v7275_v53 = vld [vmem:[#allocation10 + $0x6f8] sm:$0xff]  ;;  %v12264_v54 = vpack.c.bf16 %v7264_v47, %v7260_v6  ;;  %v12344_v6 = vpack.c.bf16 %v7298_v61, %v7294_v46  ;;  %v7300_v47 = vld [vmem:[#allocation10 + $0x7c0] sm:$0xff]  ;;  %v9224_v46 = vld [vmem:[%s17338_s19 + $0x8d0] sm:$0xff] }
0x14c3   :  { %12247 = vmatprep.subr.bf16.mxu0 %v12246_v59  ;;  %12311 = vmatprep.subr.bf16.mxu1 %v12310_v60  ;;  %v7272_v59 = vld [vmem:[#allocation10 + $0x6e0] sm:$0xff]  ;;  %v12266_v60 = vpack.c.bf16 %v7273_v18, %v7269_v52  ;;  %v12330_v1 = vpack.c.bf16 %v7275_v53, %v7271_v4  ;;  %v7306_v52 = vld [vmem:[#allocation10 + $0x7f0] sm:$0xff]  ;;  %v12284_v18 = vpack.c.bf16 %v7304_v55, %v7300_v47 }
0x14c4   :  { %v12348_v4 = vpack.c.bf16 %v7306_v52, %v7302_v50  ;;  %v9199_v53 = vld [vmem:[%s17338_s19 + $0x808] sm:$0xff]  ;;  %v9228_v61 = vld [vmem:[%s17338_s19 + $0x8f0] sm:$0xff]  ;;  %v9237_v47 = vld [vmem:[%s17338_s19 + $0x938] sm:$0xff] }
0x14c5   :  { %v9232_v50 = vld [vmem:[%s17338_s19 + $0x910] sm:$0xff] }
0x14c6   :  { %12249 = vmatpush1.bf16.msra.mxu0 %v12248_v62  ;;  %12313 = vmatpush1.bf16.msra.mxu1 %v12312_v14  ;;  %v7283_v62 = vld [vmem:[#allocation10 + $0x738] sm:$0xff]  ;;  %v12268_v14 = vpack.c.bf16 %v7272_v59, %v7268_v58  ;;  %v9236_v52 = vld [vmem:[%s17338_s19 + $0x930] sm:$0xff] }
0x14c7   :  { %12251 = vmatprep.subr.bf16.mxu0 %v12250_v17  ;;  %12315 = vmatprep.subr.bf16.mxu1 %v12314_v19  ;;  %v7280_v17 = vld [vmem:[#allocation10 + $0x720] sm:$0xff]  ;;  %v12270_v19 = vpack.c.bf16 %v7281_v10, %v7277_v9  ;;  %v12334_v20 = vpack.c.bf16 %v7283_v62, %v7279_v11  ;;  %v9205_v59 = vld [vmem:[%s17338_s19 + $0x838] sm:$0xff]  ;;  %v9204_v9 = vld [vmem:[%s17338_s19 + $0x830] sm:$0xff] }
0x14c8   :  { %v12480_v10 = vpack.c.bf16 %v9204_v9, %v9200_v8  ;;  %v9207_v11 = vld [vmem:[%s17338_s19 + $0x848] sm:$0xff]  ;;  %v9244_v8 = vld [vmem:[%s17338_s19 + $0x970] sm:$0xff] }
0x14c9   :  { %v9211_v62 = vld [vmem:[%s17338_s19 + $0x868] sm:$0xff] }
0x14ca   :  { %12253 = vmatpush1.bf16.msra.mxu0 %v12252_v26  ;;  %12317 = vmatpush1.bf16.msra.mxu1 %v12316_v28  ;;  %v7291_v26 = vld [vmem:[#allocation10 + $0x778] sm:$0xff]  ;;  %v12272_v28 = vpack.c.bf16 %v7280_v17, %v7276_v16  ;;  %v9247_v9 = vld [vmem:[%s17338_s19 + $0x988] sm:$0xff] }
0x14cb   :  { %12255 = vmatprep.subr.bf16.mxu0 %v12254_v57  ;;  %12319 = vmatprep.subr.bf16.mxu1 %v12318_v51  ;;  %v7288_v57 = vld [vmem:[#allocation10 + $0x760] sm:$0xff]  ;;  %v12274_v51 = vpack.c.bf16 %v7289_v24, %v7285_v23  ;;  %v12338_v31 = vpack.c.bf16 %v7291_v26, %v7287_v25  ;;  %v9213_v16 = vld [vmem:[%s17338_s19 + $0x878] sm:$0xff]  ;;  %v9212_v23 = vld [vmem:[%s17338_s19 + $0x870] sm:$0xff] }
0x14cc   :  { %v9206_v17 = vld [vmem:[%s17338_s19 + $0x840] sm:$0xff]  ;;  %v9215_v24 = vld [vmem:[%s17338_s19 + $0x888] sm:$0xff]  ;;  %v12484_v25 = vpack.c.bf16 %v9212_v23, %v9208_v22  ;;  %v9252_v22 = vld [vmem:[%s17338_s19 + $0x9b0] sm:$0xff] }
0x14cd   :  { %v9219_v26 = vld [vmem:[%s17338_s19 + $0x8a8] sm:$0xff] }
0x14ce   :  { %12257 = vmatpush1.bf16.msra.mxu0 %v12256_v40  ;;  %12321 = vmatpush1.bf16.msra.mxu1 %v12320_v41  ;;  %v7299_v40 = vld [vmem:[#allocation10 + $0x7b8] sm:$0xff]  ;;  %v12276_v41 = vpack.c.bf16 %v7288_v57, %v7284_v29  ;;  %v12358_v29 = vpack.c.bf16 %v9219_v26, %v9215_v24  ;;  %v9255_v23 = vld [vmem:[%s17338_s19 + $0x9c8] sm:$0xff] }
0x14cf   :  { %12259 = vmatprep.subr.bf16.mxu0 %v12258_v44  ;;  %12323 = vmatprep.subr.bf16.mxu1 %v12322_v45  ;;  %v7296_v44 = vld [vmem:[#allocation10 + $0x7a0] sm:$0xff]  ;;  %v12278_v45 = vpack.c.bf16 %v7297_v38, %v7293_v37  ;;  %v12342_v33 = vpack.c.bf16 %v7299_v40, %v7295_v39  ;;  %v9220_v37 = vld [vmem:[%s17338_s19 + $0x8b0] sm:$0xff]  ;;  %v9261_v26 = vld [vmem:[%s17338_s19 + $0x9f8] sm:$0xff] }
0x14d0   :  { %v9223_v38 = vld [vmem:[%s17338_s19 + $0x8c8] sm:$0xff]  ;;  %v12488_v40 = vpack.c.bf16 %v9220_v37, %v9216_v32 }
0x14d1   :  { %v9227_v39 = vld [vmem:[%s17338_s19 + $0x8e8] sm:$0xff] }
0x14d2   :  { %12261 = vmatpush1.bf16.msra.mxu0 %v12260_v13  ;;  %12325 = vmatpush1.bf16.msra.mxu1 %v12324_v35  ;;  %v7307_v13 = vld [vmem:[#allocation10 + $0x7f8] sm:$0xff]  ;;  %v12280_v35 = vpack.c.bf16 %v7296_v44, %v7292_v27  ;;  %v9259_v24 = vld [vmem:[%s17338_s19 + $0x9e8] sm:$0xff] }
0x14d3   :  { %12263 = vmatprep.subr.bf16.mxu0 %v12262_v48  ;;  %12327 = vmatprep.subr.bf16.mxu1 %v12326_v49  ;;  %v12282_v48 = vpack.c.bf16 %v7305_v12, %v7301_v34  ;;  %v12346_v49 = vpack.c.bf16 %v7307_v13, %v7303_v2  ;;  %v9229_v27 = vld [vmem:[%s17338_s19 + $0x8f8] sm:$0xff]  ;;  %v9222_v44 = vld [vmem:[%s17338_s19 + $0x8c0] sm:$0xff]  ;;  %v9231_v12 = vld [vmem:[%s17338_s19 + $0x908] sm:$0xff] }
0x14d4   :  { %v9235_v2 = vld [vmem:[%s17338_s19 + $0x928] sm:$0xff]  ;;  %v9233_v13 = vld [vmem:[%s17338_s19 + $0x918] sm:$0xff] }
0x14d5   :  { %v12494_v55 = vpack.c.bf16 %v9237_v47, %v9233_v13  ;;  %v9263_v37 = vld [vmem:[%s17338_s19 + $0xa08] sm:$0xff]  ;;  %v9277_v13 = vld [vmem:[%s17338_s19 + $0xa78] sm:$0xff] }
0x14d6   :  { %12265 = vmatpush1.bf16.msra.mxu0 %v12264_v54  ;;  %12329 = vmatpush1.bf16.msra.mxu1 %v12328_v43  ;;  %v9203_v54 = vld [vmem:[%s17338_s19 + $0x828] sm:$0xff]  ;;  %v9201_v43 = vld [vmem:[%s17338_s19 + $0x818] sm:$0xff] }
0x14d7   :  { %12267 = vmatprep.subr.bf16.mxu0 %v12266_v60  ;;  %12331 = vmatprep.subr.bf16.mxu1 %v12330_v1  ;;  %v12350_v58 = vpack.c.bf16 %v9203_v54, %v9199_v53  ;;  %v9202_v60 = vld [vmem:[%s17338_s19 + $0x820] sm:$0xff]  ;;  %v12478_v1 = vpack.c.bf16 %v9205_v59, %v9201_v43  ;;  %v9241_v53 = vld [vmem:[%s17338_s19 + $0x958] sm:$0xff] }
0x14d8   :  { %v9245_v54 = vld [vmem:[%s17338_s19 + $0x978] sm:$0xff] }
0x14da   :  { %12269 = vmatpush1.bf16.msra.mxu0 %v12268_v14  ;;  %12333 = vmatpush1.bf16.msra.mxu1 %v12332_v15  ;;  %v9209_v14 = vld [vmem:[%s17338_s19 + $0x858] sm:$0xff]  ;;  %v12354_v15 = vpack.c.bf16 %v9211_v62, %v9207_v11 }
0x14db   :  { %12271 = vmatprep.subr.bf16.mxu0 %v12270_v19  ;;  %12335 = vmatprep.subr.bf16.mxu1 %v12334_v20  ;;  %v9210_v19 = vld [vmem:[%s17338_s19 + $0x860] sm:$0xff]  ;;  %v12482_v20 = vpack.c.bf16 %v9213_v16, %v9209_v14  ;;  %v9249_v11 = vld [vmem:[%s17338_s19 + $0x998] sm:$0xff] }
0x14dc   :  { %v12356_v21 = vpack.c.bf16 %v9210_v19, %v9206_v17  ;;  %v9253_v62 = vld [vmem:[%s17338_s19 + $0x9b8] sm:$0xff]  ;;  %v9246_v17 = vld [vmem:[%s17338_s19 + $0x980] sm:$0xff] }
0x14dd   :  { %v9250_v19 = vld [vmem:[%s17338_s19 + $0x9a0] sm:$0xff] }
0x14de   :  { %12273 = vmatpush1.bf16.msra.mxu0 %v12272_v28  ;;  %12337 = vmatpush1.bf16.msra.mxu1 %v12336_v0  ;;  %v9217_v28 = vld [vmem:[%s17338_s19 + $0x898] sm:$0xff] }
0x14df   :  { %12275 = vmatprep.subr.bf16.mxu0 %v12274_v51  ;;  %12339 = vmatprep.subr.bf16.mxu1 %v12338_v31  ;;  %v9221_v0 = vld [vmem:[%s17338_s19 + $0x8b8] sm:$0xff]  ;;  %v9214_v51 = vld [vmem:[%s17338_s19 + $0x880] sm:$0xff] }
0x14e0   :  { %v12486_v57 = vpack.c.bf16 %v9221_v0, %v9217_v28  ;;  %v9218_v31 = vld [vmem:[%s17338_s19 + $0x8a0] sm:$0xff]  ;;  %v12376_v28 = vpack.c.bf16 %v9250_v19, %v9246_v17 }
0x14e1   :  { %v12360_v63 = vpack.c.bf16 %v9218_v31, %v9214_v51  ;;  %v9258_v51 = vld [vmem:[%s17338_s19 + $0x9e0] sm:$0xff]  ;;  %v9256_v31 = vld [vmem:[%s17338_s19 + $0x9d0] sm:$0xff] }
0x14e2   :  { %12277 = vmatpush1.bf16.msra.mxu0 %v12276_v41  ;;  %12341 = vmatpush1.bf16.msra.mxu1 %v12340_v42  ;;  %v12362_v41 = vpack.c.bf16 %v9227_v39, %v9223_v38  ;;  %v9225_v42 = vld [vmem:[%s17338_s19 + $0x8d8] sm:$0xff]  ;;  %v9267_v38 = vld [vmem:[%s17338_s19 + $0xa28] sm:$0xff]  ;;  %v9286_v17 = vld [vmem:[%s17338_s19 + $0xac0] sm:$0xff] }
0x14e3   :  { %12279 = vmatprep.subr.bf16.mxu0 %v12278_v45  ;;  %12343 = vmatprep.subr.bf16.mxu1 %v12342_v33  ;;  %v12490_v45 = vpack.c.bf16 %v9229_v27, %v9225_v42  ;;  %v9226_v33 = vld [vmem:[%s17338_s19 + $0x8e0] sm:$0xff]  ;;  %v9265_v39 = vld [vmem:[%s17338_s19 + $0xa18] sm:$0xff]  ;;  %v12382_v27 = vpack.c.bf16 %v9267_v38, %v9263_v37  ;;  %v9303_v37 = vld [vmem:[%s17338_s19 + $0xb48] sm:$0xff] }
0x14e4   :  { %v12364_v34 = vpack.c.bf16 %v9226_v33, %v9222_v44  ;;  %v9262_v44 = vld [vmem:[%s17338_s19 + $0xa00] sm:$0xff]  ;;  %v9264_v33 = vld [vmem:[%s17338_s19 + $0xa10] sm:$0xff]  ;;  %v9307_v38 = vld [vmem:[%s17338_s19 + $0xb68] sm:$0xff] }
0x14e5   :  { %v9290_v19 = vld [vmem:[%s17338_s19 + $0xae0] sm:$0xff] }
0x14e6   :  { %12281 = vmatpush1.bf16.msra.mxu0 %v12280_v35  ;;  %12345 = vmatpush1.bf16.msra.mxu1 %v12344_v6  ;;  %v12492_v35 = vpack.c.bf16 %v9228_v61, %v9224_v46  ;;  %v12366_v6 = vpack.c.bf16 %v9235_v2, %v9231_v12  ;;  %v9268_v61 = vld [vmem:[%s17338_s19 + $0xa30] sm:$0xff]  ;;  %v9275_v12 = vld [vmem:[%s17338_s19 + $0xa68] sm:$0xff]  ;;  %v9273_v2 = vld [vmem:[%s17338_s19 + $0xa58] sm:$0xff] }
0x14e7   :  { %12283 = vmatprep.subr.bf16.mxu0 %v12282_v48  ;;  %12347 = vmatprep.subr.bf16.mxu1 %v12346_v49  ;;  %v9230_v48 = vld [vmem:[%s17338_s19 + $0x900] sm:$0xff] }
0x14e8   :  { %v9234_v49 = vld [vmem:[%s17338_s19 + $0x920] sm:$0xff] }
0x14e9   :  { %v12368_v43 = vpack.c.bf16 %v9234_v49, %v9230_v48  ;;  %v9270_v48 = vld [vmem:[%s17338_s19 + $0xa40] sm:$0xff] }
0x14ea   :  { %12285 = vmatpush1.bf16.msra.mxu0 %v12284_v18  ;;  %12349 = vmatpush1.bf16.msra.mxu1 %v12348_v4  ;;  %v9239_v18 = vld [vmem:[%s17338_s19 + $0x948] sm:$0xff]  ;;  %v9274_v49 = vld [vmem:[%s17338_s19 + $0xa60] sm:$0xff] }
0x14eb   :  { %12351 = vmatprep.subr.bf16.mxu0 %v12350_v58  ;;  %12479 = vmatprep.subr.bf16.mxu1 %v12478_v1  ;;  %v9243_v4 = vld [vmem:[%s17338_s19 + $0x968] sm:$0xff]  ;;  %v12496_v58 = vpack.c.bf16 %v9236_v52, %v9232_v50  ;;  %v9240_v1 = vld [vmem:[%s17338_s19 + $0x950] sm:$0xff]  ;;  %v12514_v50 = vpack.c.bf16 %v9277_v13, %v9273_v2  ;;  %v9313_v2 = vld [vmem:[%s17338_s19 + $0xb98] sm:$0xff] }
0x14ec   :  { %v12370_v59 = vpack.c.bf16 %v9243_v4, %v9239_v18  ;;  %v9276_v52 = vld [vmem:[%s17338_s19 + $0xa70] sm:$0xff]  ;;  %v9279_v18 = vld [vmem:[%s17338_s19 + $0xa88] sm:$0xff]  ;;  %v9317_v13 = vld [vmem:[%s17338_s19 + $0xbb8] sm:$0xff] }
0x14ed   :  { %7396 = vmatmul.mubr.f32.vlgmr.msra.gmra.mrb[46].mxu0 %v15347_v3  ;;  %7467 = vmatmul.mubr.f32.vlgmr.msra.gmra.mrb[52].mxu1 %v15347_v3  ;;  %v9198_v3 = vld [vmem:[%s17338_s19 + $0x800] sm:$0xff]  ;;  %v9283_v4 = vld [vmem:[%s17338_s19 + $0xaa8] sm:$0xff] }
0x14ee   :  { %v12352_v56 = vpack.c.bf16 %v9202_v60, %v9198_v3  ;;  %12481 = vmatpush1.bf16.msra.mxu1 %v12480_v10  ;;  %v9238_v3 = vld [vmem:[%s17338_s19 + $0x940] sm:$0xff]  ;;  %v9251_v10 = vld [vmem:[%s17338_s19 + $0x9a8] sm:$0xff] }
0x14ef   :  { %12483 = vmatprep.subr.bf16.mxu1 %v12482_v20  ;;  %v9242_v60 = vld [vmem:[%s17338_s19 + $0x960] sm:$0xff]  ;;  %v12374_v16 = vpack.c.bf16 %v9251_v10, %v9247_v9  ;;  %v9248_v20 = vld [vmem:[%s17338_s19 + $0x990] sm:$0xff]  ;;  %v9287_v9 = vld [vmem:[%s17338_s19 + $0xac8] sm:$0xff] }
0x14f0   :  { %12353 = vmatpush1.bf16.msra.mxu0 %v12352_v56  ;;  %v12498_v56 = vpack.c.bf16 %v9245_v54, %v9241_v53  ;;  %v12372_v14 = vpack.c.bf16 %v9242_v60, %v9238_v3  ;;  %v12504_v0 = vpack.c.bf16 %v9252_v22, %v9248_v20  ;;  %v9281_v53 = vld [vmem:[%s17338_s19 + $0xa98] sm:$0xff]  ;;  %v9278_v3 = vld [vmem:[%s17338_s19 + $0xa80] sm:$0xff]  ;;  %v9291_v10 = vld [vmem:[%s17338_s19 + $0xae8] sm:$0xff] }
0x14f1   :  { %12355 = vmatprep.subr.bf16.mxu0 %v12354_v15  ;;  %v12500_v15 = vpack.c.bf16 %v9244_v8, %v9240_v1  ;;  %v9285_v54 = vld [vmem:[%s17338_s19 + $0xab8] sm:$0xff]  ;;  %v9282_v60 = vld [vmem:[%s17338_s19 + $0xaa0] sm:$0xff]  ;;  %v9280_v1 = vld [vmem:[%s17338_s19 + $0xa90] sm:$0xff] }
0x14f2   :  { %12485 = vmatpush1.bf16.msra.mxu1 %v12484_v25  ;;  %v9257_v25 = vld [vmem:[%s17338_s19 + $0x9d8] sm:$0xff]  ;;  %v9284_v8 = vld [vmem:[%s17338_s19 + $0xab0] sm:$0xff] }
0x14f3   :  { %12487 = vmatprep.subr.bf16.mxu1 %v12486_v57  ;;  %v9254_v57 = vld [vmem:[%s17338_s19 + $0x9c0] sm:$0xff]  ;;  %v12506_v32 = vpack.c.bf16 %v9261_v26, %v9257_v25  ;;  %v9288_v20 = vld [vmem:[%s17338_s19 + $0xad0] sm:$0xff]  ;;  %v9297_v25 = vld [vmem:[%s17338_s19 + $0xb18] sm:$0xff] }
0x14f4   :  { %12357 = vmatpush1.bf16.msra.mxu0 %v12356_v21  ;;  %v12502_v21 = vpack.c.bf16 %v9253_v62, %v9249_v11  ;;  %v9289_v11 = vld [vmem:[%s17338_s19 + $0xad8] sm:$0xff]  ;;  %v9292_v22 = vld [vmem:[%s17338_s19 + $0xaf0] sm:$0xff] }
0x14f5   :  { %12359 = vmatprep.subr.bf16.mxu0 %v12358_v29  ;;  %v12378_v29 = vpack.c.bf16 %v9259_v24, %v9255_v23  ;;  %v9293_v62 = vld [vmem:[%s17338_s19 + $0xaf8] sm:$0xff]  ;;  %v9295_v23 = vld [vmem:[%s17338_s19 + $0xb08] sm:$0xff] }
0x14f6   :  { %12489 = vmatpush1.bf16.msra.mxu1 %v12488_v40  ;;  %v9269_v40 = vld [vmem:[%s17338_s19 + $0xa38] sm:$0xff]  ;;  %v9299_v24 = vld [vmem:[%s17338_s19 + $0xb28] sm:$0xff] }
0x14f7   :  { %12491 = vmatprep.subr.bf16.mxu1 %v12490_v45  ;;  %v9266_v45 = vld [vmem:[%s17338_s19 + $0xa20] sm:$0xff]  ;;  %v12510_v46 = vpack.c.bf16 %v9269_v40, %v9265_v39  ;;  %v9301_v26 = vld [vmem:[%s17338_s19 + $0xb38] sm:$0xff] }
0x14f8   :  { %12361 = vmatpush1.bf16.msra.mxu0 %v12360_v63  ;;  %v9260_v63 = vld [vmem:[%s17338_s19 + $0x9f0] sm:$0xff]  ;;  %v9305_v39 = vld [vmem:[%s17338_s19 + $0xb58] sm:$0xff] }
0x14f9   :  { %12363 = vmatprep.subr.bf16.mxu0 %v12362_v41  ;;  %v12380_v41 = vpack.c.bf16 %v9258_v51, %v9254_v57  ;;  %v12508_v42 = vpack.c.bf16 %v9260_v63, %v9256_v31  ;;  %v9294_v57 = vld [vmem:[%s17338_s19 + $0xb00] sm:$0xff]  ;;  %v9296_v31 = vld [vmem:[%s17338_s19 + $0xb10] sm:$0xff]  ;;  %v9309_v40 = vld [vmem:[%s17338_s19 + $0xb78] sm:$0xff] }
0x14fa   :  { %12493 = vmatpush1.bf16.msra.mxu1 %v12492_v35  ;;  %v12384_v35 = vpack.c.bf16 %v9266_v45, %v9262_v44  ;;  %v9298_v51 = vld [vmem:[%s17338_s19 + $0xb20] sm:$0xff]  ;;  %v9300_v63 = vld [vmem:[%s17338_s19 + $0xb30] sm:$0xff] }
0x14fb   :  { %12495 = vmatprep.subr.bf16.mxu1 %v12494_v55  ;;  %v9272_v55 = vld [vmem:[%s17338_s19 + $0xa50] sm:$0xff]  ;;  %v9302_v44 = vld [vmem:[%s17338_s19 + $0xb40] sm:$0xff] }
0x14fc   :  { %12365 = vmatpush1.bf16.msra.mxu0 %v12364_v34  ;;  %v9271_v34 = vld [vmem:[%s17338_s19 + $0xa48] sm:$0xff]  ;;  %v9306_v45 = vld [vmem:[%s17338_s19 + $0xb60] sm:$0xff] }
0x14fd   :  { %12367 = vmatprep.subr.bf16.mxu0 %v12366_v6  ;;  %v12512_v6 = vpack.c.bf16 %v9268_v61, %v9264_v33  ;;  %v12386_v47 = vpack.c.bf16 %v9275_v12, %v9271_v34  ;;  %v9304_v33 = vld [vmem:[%s17338_s19 + $0xb50] sm:$0xff]  ;;  %v9311_v34 = vld [vmem:[%s17338_s19 + $0xb88] sm:$0xff] }
0x14fe   :  { %12497 = vmatpush1.bf16.msra.mxu1 %v12496_v58  ;;  %v12516_v58 = vpack.c.bf16 %v9276_v52, %v9272_v55  ;;  %v9308_v61 = vld [vmem:[%s17338_s19 + $0xb70] sm:$0xff]  ;;  %v9315_v12 = vld [vmem:[%s17338_s19 + $0xba8] sm:$0xff]  ;;  %v12534_v55 = vpack.c.bf16 %v9317_v13, %v9313_v2 }
0x14ff   :  { %12499 = vmatprep.subr.bf16.mxu1 %v12498_v56  ;;  %v12518_v56 = vpack.c.bf16 %v9285_v54, %v9281_v53  ;;  %v9316_v52 = vld [vmem:[%s17338_s19 + $0xbb0] sm:$0xff]  ;;  %v9319_v53 = vld [vmem:[%s17338_s19 + $0xbc8] sm:$0xff] }
0x1500   :  { %12369 = vmatpush1.bf16.msra.mxu0 %v12368_v43  ;;  %v12388_v43 = vpack.c.bf16 %v9274_v49, %v9270_v48  ;;  %v9310_v48 = vld [vmem:[%s17338_s19 + $0xb80] sm:$0xff]  ;;  %v9323_v54 = vld [vmem:[%s17338_s19 + $0xbe8] sm:$0xff] }
0x1501   :  { %12371 = vmatprep.subr.bf16.mxu0 %v12370_v59  ;;  %v12390_v59 = vpack.c.bf16 %v9283_v4, %v9279_v18  ;;  %v9314_v49 = vld [vmem:[%s17338_s19 + $0xba0] sm:$0xff] }
0x1502   :  { %12501 = vmatpush1.bf16.msra.mxu1 %v12500_v15  ;;  %v12520_v15 = vpack.c.bf16 %v9284_v8, %v9280_v1  ;;  %v12408_v18 = vpack.c.bf16 %v9314_v49, %v9310_v48  ;;  %v9320_v8 = vld [vmem:[%s17338_s19 + $0xbd0] sm:$0xff] }
0x1503   :  { %12503 = vmatprep.subr.bf16.mxu1 %v12502_v21  ;;  %v12522_v21 = vpack.c.bf16 %v9293_v62, %v9289_v11  ;;  %v9327_v11 = vld [vmem:[%s17338_s19 + $0xc08] sm:$0xff]  ;;  %v9336_v49 = vld [vmem:[%s17338_s19 + $0xc50] sm:$0xff] }
0x1504   :  { %12373 = vmatpush1.bf16.msra.mxu0 %v12372_v14  ;;  %v12392_v14 = vpack.c.bf16 %v9282_v60, %v9278_v3  ;;  %v9318_v3 = vld [vmem:[%s17338_s19 + $0xbc0] sm:$0xff]  ;;  %v9331_v62 = vld [vmem:[%s17338_s19 + $0xc28] sm:$0xff] }
0x1505   :  { %12375 = vmatprep.subr.bf16.mxu0 %v12374_v16  ;;  %v12394_v16 = vpack.c.bf16 %v9291_v10, %v9287_v9  ;;  %v9322_v60 = vld [vmem:[%s17338_s19 + $0xbe0] sm:$0xff]  ;;  %v9324_v9 = vld [vmem:[%s17338_s19 + $0xbf0] sm:$0xff] }
0x1506   :  { %12505 = vmatpush1.bf16.msra.mxu1 %v12504_v0  ;;  %v12524_v0 = vpack.c.bf16 %v9292_v22, %v9288_v20  ;;  %v12540_v10 = vpack.c.bf16 %v9324_v9, %v9320_v8  ;;  %v9344_v8 = vld [vmem:[%s17338_s19 + $0xc90] sm:$0xff] }
0x1507   :  { %12507 = vmatprep.subr.bf16.mxu1 %v12506_v32  ;;  %v12526_v32 = vpack.c.bf16 %v9301_v26, %v9297_v25  ;;  %v9348_v9 = vld [vmem:[%s17338_s19 + $0xcb0] sm:$0xff] }
0x1508   :  { %12377 = vmatpush1.bf16.msra.mxu0 %v12376_v28  ;;  %v12396_v28 = vpack.c.bf16 %v9290_v19, %v9286_v17 }
0x1509   :  { %12379 = vmatprep.subr.bf16.mxu0 %v12378_v29  ;;  %v12398_v29 = vpack.c.bf16 %v9299_v24, %v9295_v23 }
0x150a   :  { %12509 = vmatpush1.bf16.msra.mxu1 %v12508_v42  ;;  %v12528_v42 = vpack.c.bf16 %v9300_v63, %v9296_v31 }
0x150b   :  { %12511 = vmatprep.subr.bf16.mxu1 %v12510_v46  ;;  %v12530_v46 = vpack.c.bf16 %v9309_v40, %v9305_v39 }
0x150c   :  { %12381 = vmatpush1.bf16.msra.mxu0 %v12380_v41  ;;  %v12400_v41 = vpack.c.bf16 %v9298_v51, %v9294_v57 }
0x150d   :  { %12383 = vmatprep.subr.bf16.mxu0 %v12382_v27  ;;  %v12402_v27 = vpack.c.bf16 %v9307_v38, %v9303_v37  ;;  %v9326_v37 = vld [vmem:[%s17338_s19 + $0xc00] sm:$0xff] }
0x150e   :  { %12513 = vmatpush1.bf16.msra.mxu1 %v12512_v6  ;;  %v12532_v6 = vpack.c.bf16 %v9308_v61, %v9304_v33  ;;  %v9335_v33 = vld [vmem:[%s17338_s19 + $0xc48] sm:$0xff] }
0x150f   :  { %12515 = vmatprep.subr.bf16.mxu1 %v12514_v50  ;;  %v9312_v50 = vld [vmem:[%s17338_s19 + $0xb90] sm:$0xff]  ;;  %v9339_v61 = vld [vmem:[%s17338_s19 + $0xc68] sm:$0xff] }
0x1510   :  { %12385 = vmatpush1.bf16.msra.mxu0 %v12384_v35  ;;  %v12404_v35 = vpack.c.bf16 %v9306_v45, %v9302_v44  ;;  %v12536_v4 = vpack.c.bf16 %v9316_v52, %v9312_v50  ;;  %v9332_v44 = vld [vmem:[%s17338_s19 + $0xc30] sm:$0xff]  ;;  %v9343_v50 = vld [vmem:[%s17338_s19 + $0xc88] sm:$0xff]  ;;  %v12418_v52 = vpack.c.bf16 %v9339_v61, %v9335_v33  ;;  %v9370_v33 = vld [vmem:[%s17338_s19 + $0xd60] sm:$0xff] }
0x1511   :  { %12387 = vmatprep.subr.bf16.mxu0 %v12386_v47  ;;  %v12406_v47 = vpack.c.bf16 %v9315_v12, %v9311_v34  ;;  %v9337_v34 = vld [vmem:[%s17338_s19 + $0xc58] sm:$0xff] }
0x1512   :  { %12517 = vmatpush1.bf16.msra.mxu1 %v12516_v58  ;;  %v12410_v58 = vpack.c.bf16 %v9323_v54, %v9319_v53  ;;  %v9341_v12 = vld [vmem:[%s17338_s19 + $0xc78] sm:$0xff] }
0x1513   :  { %12519 = vmatprep.subr.bf16.mxu1 %v12518_v56  ;;  %v12412_v56 = vpack.c.bf16 %v9322_v60, %v9318_v3  ;;  %v9345_v53 = vld [vmem:[%s17338_s19 + $0xc98] sm:$0xff]  ;;  %v9342_v3 = vld [vmem:[%s17338_s19 + $0xc80] sm:$0xff] }
0x1514   :  { %12389 = vmatpush1.bf16.msra.mxu0 %v12388_v43  ;;  %v9321_v43 = vld [vmem:[%s17338_s19 + $0xbd8] sm:$0xff]  ;;  %v9346_v60 = vld [vmem:[%s17338_s19 + $0xca0] sm:$0xff] }
0x1515   :  { %12391 = vmatprep.subr.bf16.mxu0 %v12390_v59  ;;  %v9325_v59 = vld [vmem:[%s17338_s19 + $0xbf8] sm:$0xff] }
0x1516   :  { %12521 = vmatpush1.bf16.msra.mxu1 %v12520_v15  ;;  %v12538_v1 = vpack.c.bf16 %v9325_v59, %v9321_v43  ;;  %v12414_v15 = vpack.c.bf16 %v9331_v62, %v9327_v11  ;;  %v9349_v54 = vld [vmem:[%s17338_s19 + $0xcb8] sm:$0xff]  ;;  %v9355_v11 = vld [vmem:[%s17338_s19 + $0xce8] sm:$0xff] }
0x1517   :  { %12523 = vmatprep.subr.bf16.mxu1 %v12522_v21  ;;  %v9196_v21 = vld [vmem:[%s17343_s24] ss:$0 sm:$0xff]  ;;  %v9353_v62 = vld [vmem:[%s17338_s19 + $0xcd8] sm:$0xff] }
0x1518   :  { %12393 = vmatpush1.bf16.msra.mxu0 %v12392_v14  ;;  %v9329_v14 = vld [vmem:[%s17338_s19 + $0xc18] sm:$0xff] }
0x1519   :  { %12395 = vmatprep.subr.bf16.mxu0 %v12394_v16  ;;  %v9333_v16 = vld [vmem:[%s17338_s19 + $0xc38] sm:$0xff] }
0x151a   :  { %12525 = vmatpush1.bf16.msra.mxu1 %v12524_v0  ;;  %v12542_v17 = vpack.c.bf16 %v9333_v16, %v9329_v14  ;;  %v9197_v0 = vld [vmem:[%s17337_s18 + $0x4] sm:$0xf]  ;;  %v9357_v14 = vld [vmem:[%s17338_s19 + $0xcf8] sm:$0xff]  ;;  %v12552_v16 = vpack.c.bf16 %v9348_v9, %v9344_v8  ;;  %v9384_v9 = vld [vmem:[%s17338_s19 + $0xdd0] sm:$0xff] }
0x151b   :  { %12527 = vmatprep.subr.bf16.mxu1 %v12526_v32  ;;  %v7322_v57 = vrot.slane %v9197_v0, %v15280_v30  ;;  %v7318_v51 = vrot.slane %v9197_v0, %v13614_v5  ;;  %v7326_v31 = vrot.slane %v9197_v0, %v15283_v36 }
0x151c   :  { %12397 = vmatpush1.bf16.msra.mxu0 %v12396_v28 }
0x151d   :  { %12399 = vmatprep.subr.bf16.mxu0 %v12398_v29  ;;  %v7314_v29 = vrot.slane %v9197_v0, %v13620_v7 }
0x151e   :  { %12529 = vmatpush1.bf16.msra.mxu1 %v12528_v42  ;;  %v9330_v42 = vld [vmem:[%s17338_s19 + $0xc20] sm:$0xff] }
0x151f   :  { %12531 = vmatprep.subr.bf16.mxu1 %v12530_v46  ;;  %v12416_v13 = vpack.c.bf16 %v9330_v42, %v9326_v37  ;;  %v9364_v37 = vld [vmem:[%s17338_s19 + $0xd30] sm:$0xff]  ;;  %v9373_v42 = vld [vmem:[%s17338_s19 + $0xd78] sm:$0xff] }
0x1520   :  { %12401 = vmatpush1.bf16.msra.mxu0 %v12400_v41 }
0x1521   :  { %12403 = vmatprep.subr.bf16.mxu0 %v12402_v27  ;;  %v9328_v27 = vld [vmem:[%s17338_s19 + $0xc10] sm:$0xff] }
0x1522   :  { %12533 = vmatpush1.bf16.msra.mxu1 %v12532_v6  ;;  %v9334_v6 = vld [vmem:[%s17338_s19 + $0xc40] sm:$0xff] }
0x1523   :  { %12535 = vmatprep.subr.bf16.mxu1 %v12534_v55  ;;  %v9340_v55 = vld [vmem:[%s17338_s19 + $0xc70] sm:$0xff] }
0x1524   :  { %12405 = vmatpush1.bf16.msra.mxu0 %v12404_v35  ;;  %v12544_v35 = vpack.c.bf16 %v9332_v44, %v9328_v27  ;;  %v12548_v59 = vpack.c.bf16 %v9340_v55, %v9336_v49  ;;  %v9374_v49 = vld [vmem:[%s17338_s19 + $0xd80] sm:$0xff] }
0x1525   :  { %12407 = vmatprep.subr.bf16.mxu0 %v12406_v47  ;;  %v9338_v47 = vld [vmem:[%s17338_s19 + $0xc60] sm:$0xff] }
0x1526   :  { %12537 = vmatpush1.bf16.msra.mxu1 %v12536_v4  ;;  %v9347_v4 = vld [vmem:[%s17338_s19 + $0xca8] sm:$0xff]  ;;  %v9378_v55 = vld [vmem:[%s17338_s19 + $0xda0] sm:$0xff] }
0x1527   :  { %12539 = vmatprep.subr.bf16.mxu1 %v12538_v1  ;;  %v12422_v1 = vpack.c.bf16 %v9347_v4, %v9343_v50  ;;  %v9380_v4 = vld [vmem:[%s17338_s19 + $0xdb0] sm:$0xff] }
0x1528   :  { %12409 = vmatpush1.bf16.msra.mxu0 %v12408_v18  ;;  %v12546_v18 = vpack.c.bf16 %v9341_v12, %v9337_v34  ;;  %v9368_v34 = vld [vmem:[%s17338_s19 + $0xd50] sm:$0xff] }
0x1529   :  { %12411 = vmatprep.subr.bf16.mxu0 %v12410_v58  ;;  %v12420_v58 = vpack.c.bf16 %v9338_v47, %v9334_v6  ;;  %v9372_v12 = vld [vmem:[%s17338_s19 + $0xd70] sm:$0xff]  ;;  %v9381_v6 = vld [vmem:[%s17338_s19 + $0xdb8] sm:$0xff] }
0x152a   :  { %12541 = vmatpush1.bf16.msra.mxu1 %v12540_v10  ;;  %v9351_v10 = vld [vmem:[%s17338_s19 + $0xcc8] sm:$0xff] }
0x152b   :  { %12543 = vmatprep.subr.bf16.mxu1 %v12542_v17  ;;  %v9350_v17 = vld [vmem:[%s17338_s19 + $0xcc0] sm:$0xff] }
0x152c   :  { %12413 = vmatpush1.bf16.msra.mxu0 %v12412_v56  ;;  %v12550_v56 = vpack.c.bf16 %v9349_v54, %v9345_v53  ;;  %v9383_v53 = vld [vmem:[%s17338_s19 + $0xdc8] sm:$0xff] }
0x152d   :  { %12415 = vmatprep.subr.bf16.mxu0 %v12414_v15  ;;  %v12424_v15 = vpack.c.bf16 %v9346_v60, %v9342_v3  ;;  %v9387_v54 = vld [vmem:[%s17338_s19 + $0xde8] sm:$0xff]  ;;  %v9382_v60 = vld [vmem:[%s17338_s19 + $0xdc0] sm:$0xff] }
0x1580   :  { %v9892_v19 = vpop.f32.mrb[44].mxu0  ;;  %v9927_v20 = vpop.f32.mrb[50].mxu1 }
0x1581   :  { %v9893_v22 = vpop.f32.mrb[45].mxu0  ;;  %v9928_v23 = vpop.f32.mrb[51].mxu1 }
0x1582   :  { %v9894_v24 = vadd.f32 %v9893_v22, %v9892_v19  ;;  %v9929_v25 = vadd.f32 %v9928_v23, %v9927_v20  ;;  %v9354_v19 = vld [vmem:[%s17338_s19 + $0xce0] sm:$0xff]  ;;  %v12426_v20 = vpack.c.bf16 %v9355_v11, %v9351_v10  ;;  %v9352_v22 = vld [vmem:[%s17338_s19 + $0xcd0] sm:$0xff]  ;;  %v9391_v11 = vld [vmem:[%s17338_s19 + $0xe08] sm:$0xff] }
0x1583   :  { %v9356_v23 = vld [vmem:[%s17338_s19 + $0xcf0] sm:$0xff]  ;;  %v12428_v0 = vpack.c.bf16 %v9354_v19, %v9350_v17  ;;  %v9390_v19 = vld [vmem:[%s17338_s19 + $0xe00] sm:$0xff] }
0x1584   :  { %v7104_v26 = vadd.f32 %v9894_v24, %v9196_v21  ;;  %v12554_v21 = vpack.c.bf16 %v9357_v14, %v9353_v62  ;;  %v9359_v24 = vld [vmem:[%s17338_s19 + $0xd08] sm:$0xff]  ;;  %v9388_v10 = vld [vmem:[%s17338_s19 + $0xdf0] sm:$0xff]  ;;  %v9393_v14 = vld [vmem:[%s17338_s19 + $0xe18] sm:$0xff] }
0x1585   :  { %v9395_v62 = vld [vmem:[%s17338_s19 + $0xe28] sm:$0xff]  ;;  %v12572_v17 = vpack.c.bf16 %v9388_v10, %v9384_v9  ;;  %v9424_v10 = vld [vmem:[%s17338_s19 + $0xf10] sm:$0xff] }
0x1586   :  { %v7174_v28 = vadd.f32 %v9929_v25, %v7104_v26  ;;  %v9363_v25 = vld [vmem:[%s17338_s19 + $0xd28] sm:$0xff]  ;;  %v9361_v26 = vld [vmem:[%s17338_s19 + $0xd18] sm:$0xff] }
0x1588   :  { %7178 = vst.msk [vmem:[%s17344_s25] sm:$0x3] %vm7177_vm5, %v7174_v28  ;;  %v9365_v28 = vld [vmem:[%s17338_s19 + $0xd38] sm:$0xff] }
0x15c0   :  { %v7397_v32 = vpop.f32.mrb[46].mxu0  ;;  %v7468_v63 = vpop.f32.mrb[52].mxu1 }
0x15c1   :  { %v7398_v38 = vadd.f32 %v7397_v32, %v7314_v29  ;;  %v16726_v39 = vadd.f32 %v7468_v63, %v7322_v57  ;;  %v7399_v40 = vpop.f32.mrb[47].mxu0  ;;  %v7470_v41 = vpop.f32.mrb[53].mxu1  ;;  %v12556_v29 = vpack.c.bf16 %v9356_v23, %v9352_v22  ;;  %v9358_v57 = vld [vmem:[%s17338_s19 + $0xd00] sm:$0xff]  ;;  %v12558_v32 = vpack.c.bf16 %v9365_v28, %v9361_v26  ;;  %v9360_v63 = vld [vmem:[%s17338_s19 + $0xd10] sm:$0xff]  ;;  %v9403_v26 = vld [vmem:[%s17338_s19 + $0xe68] sm:$0xff] }
0x15c2   :  { %v7400_v45 = vadd.f32 %v7399_v40, %v7318_v51  ;;  %v7471_v46 = vadd.f32 %v7470_v41, %v7326_v31  ;;  %v9362_v51 = vld [vmem:[%s17338_s19 + $0xd20] sm:$0xff]  ;;  %v12430_v31 = vpack.c.bf16 %v9363_v25, %v9359_v24  ;;  %v9371_v40 = vld [vmem:[%s17338_s19 + $0xd68] sm:$0xff]  ;;  %v9369_v41 = vld [vmem:[%s17338_s19 + $0xd58] sm:$0xff]  ;;  %v12560_v44 = vpack.c.bf16 %v9364_v37, %v9360_v63 }
0x15c3   :  { %v7473_v48 = vmax.f32 %v7398_v38, 0.0  ;;  %v9367_v38 = vld [vmem:[%s17338_s19 + $0xd48] sm:$0xff]  ;;  %v12432_v27 = vpack.c.bf16 %v9362_v51, %v9358_v57  ;;  %v12562_v61 = vpack.c.bf16 %v9373_v42, %v9369_v41  ;;  %v9392_v23 = vld [vmem:[%s17338_s19 + $0xe10] sm:$0xff]  ;;  %v9401_v28 = vld [vmem:[%s17338_s19 + $0xe58] sm:$0xff] }
0x15c4   :  { %v7474_v2 = vmax.f32 %v7400_v45, 0.0  ;;  %v7476_v43 = vmax.f32 %v7471_v46, 0.0  ;;  %v9366_v45 = vld [vmem:[%s17338_s19 + $0xd40] sm:$0xff]  ;;  %v12434_v46 = vpack.c.bf16 %v9371_v40, %v9367_v38  ;;  %v9396_v24 = vld [vmem:[%s17338_s19 + $0xe30] sm:$0xff]  ;;  %v9399_v25 = vld [vmem:[%s17338_s19 + $0xe48] sm:$0xff] }
0x15c5   :  { %v12436_v47 = vpack.c.bf16 %v9370_v33, %v9366_v45  ;;  %v12576_v57 = vpack.c.bf16 %v9396_v24, %v9392_v23  ;;  %v9398_v51 = vld [vmem:[%s17338_s19 + $0xe40] sm:$0xff]  ;;  %v9400_v37 = vld [vmem:[%s17338_s19 + $0xe50] sm:$0xff]  ;;  %v9407_v40 = vld [vmem:[%s17338_s19 + $0xe88] sm:$0xff] }
0x15c6   :  { %7821 = vmatprep.mubr.f32.mxu0 %v7474_v2  ;;  %7963 = vmatprep.mubr.f32.mxu1 %v7474_v2  ;;  %v9375_v2 = vld [vmem:[%s17338_s19 + $0xd88] sm:$0xff]  ;;  %v9404_v38 = vld [vmem:[%s17338_s19 + $0xe70] sm:$0xff]  ;;  %v9409_v42 = vld [vmem:[%s17338_s19 + $0xe98] sm:$0xff] }
0x15c7   :  { %7822 = vmatmul.mubr.f32.vlgmr.msra.gmra.mrb[48].mxu0 %v7473_v48  ;;  %7964 = vmatmul.mubr.f32.vlgmr.msra.gmra.mrb[54].mxu1 %v7473_v48  ;;  %v12564_v48 = vpack.c.bf16 %v9372_v12, %v9368_v34  ;;  %v9411_v41 = vld [vmem:[%s17338_s19 + $0xea8] sm:$0xff]  ;;  %v12580_v45 = vpack.c.bf16 %v9404_v38, %v9400_v37  ;;  %v9406_v33 = vld [vmem:[%s17338_s19 + $0xe80] sm:$0xff]  ;;  %v9408_v12 = vld [vmem:[%s17338_s19 + $0xe90] sm:$0xff] }
0x15c8   :  { %12417 = vmatpush1.bf16.msra.mxu0 %v12416_v13  ;;  %12545 = vmatpush1.bf16.msra.mxu1 %v12544_v35  ;;  %v9379_v13 = vld [vmem:[%s17338_s19 + $0xda8] sm:$0xff]  ;;  %v9377_v35 = vld [vmem:[%s17338_s19 + $0xd98] sm:$0xff]  ;;  %v9432_v24 = vld [vmem:[%s17338_s19 + $0xf50] sm:$0xff] }
0x15c9   :  { %7892 = vmatprep.mubr.f32.mxu0 %v7476_v43  ;;  %8034 = vmatprep.mubr.f32.mxu1 %v7476_v43  ;;  %v12438_v50 = vpack.c.bf16 %v9379_v13, %v9375_v2  ;;  %v9385_v43 = vld [vmem:[%s17338_s19 + $0xdd8] sm:$0xff]  ;;  %v9412_v2 = vld [vmem:[%s17338_s19 + $0xeb0] sm:$0xff]  ;;  %v9415_v13 = vld [vmem:[%s17338_s19 + $0xec8] sm:$0xff] }
0x15ca   :  { %12419 = vmatprep.subr.bf16.mxu0 %v12418_v52  ;;  %12547 = vmatprep.subr.bf16.mxu1 %v12546_v18  ;;  %v12566_v52 = vpack.c.bf16 %v9381_v6, %v9377_v35  ;;  %v9376_v18 = vld [vmem:[%s17338_s19 + $0xd90] sm:$0xff]  ;;  %v9419_v35 = vld [vmem:[%s17338_s19 + $0xee8] sm:$0xff]  ;;  %v9417_v6 = vld [vmem:[%s17338_s19 + $0xed8] sm:$0xff] }
0x15cb   :  { %v12568_v3 = vpack.c.bf16 %v9380_v4, %v9376_v18  ;;  %v9416_v4 = vld [vmem:[%s17338_s19 + $0xed0] sm:$0xff] }
0x15cc   :  { %12421 = vmatpush1.bf16.msra.mxu0 %v12420_v58  ;;  %12549 = vmatpush1.bf16.msra.mxu1 %v12548_v59  ;;  %v9389_v58 = vld [vmem:[%s17338_s19 + $0xdf8] sm:$0xff]  ;;  %v12440_v59 = vpack.c.bf16 %v9378_v55, %v9374_v49  ;;  %v12584_v49 = vpack.c.bf16 %v9412_v2, %v9408_v12  ;;  %v9414_v55 = vld [vmem:[%s17338_s19 + $0xec0] sm:$0xff]  ;;  %v9440_v38 = vld [vmem:[%s17338_s19 + $0xf90] sm:$0xff] }
0x15cd   :  { %12423 = vmatprep.subr.bf16.mxu0 %v12422_v1  ;;  %12551 = vmatprep.subr.bf16.mxu1 %v12550_v56  ;;  %v9386_v1 = vld [vmem:[%s17338_s19 + $0xde0] sm:$0xff]  ;;  %v12442_v56 = vpack.c.bf16 %v9387_v54, %v9383_v53  ;;  %v12570_v8 = vpack.c.bf16 %v9389_v58, %v9385_v43  ;;  %v9420_v53 = vld [vmem:[%s17338_s19 + $0xef0] sm:$0xff]  ;;  %v9423_v54 = vld [vmem:[%s17338_s19 + $0xf08] sm:$0xff] }
0x15ce   :  { %v9427_v43 = vld [vmem:[%s17338_s19 + $0xf28] sm:$0xff]  ;;  %v9425_v58 = vld [vmem:[%s17338_s19 + $0xf18] sm:$0xff]  ;;  %v9448_v2 = vld [vmem:[%s17338_s19 + $0xfd0] sm:$0xff] }
0x15d0   :  { %12425 = vmatpush1.bf16.msra.mxu0 %v12424_v15  ;;  %12553 = vmatpush1.bf16.msra.mxu1 %v12552_v16  ;;  %v9397_v15 = vld [vmem:[%s17338_s19 + $0xe38] sm:$0xff]  ;;  %v12444_v16 = vpack.c.bf16 %v9386_v1, %v9382_v60  ;;  %v12588_v60 = vpack.c.bf16 %v9420_v53, %v9416_v4  ;;  %v9422_v1 = vld [vmem:[%s17338_s19 + $0xf00] sm:$0xff] }
0x15d1   :  { %12427 = vmatprep.subr.bf16.mxu0 %v12426_v20  ;;  %12555 = vmatprep.subr.bf16.mxu1 %v12554_v21  ;;  %v9394_v20 = vld [vmem:[%s17338_s19 + $0xe20] sm:$0xff]  ;;  %v12446_v21 = vpack.c.bf16 %v9395_v62, %v9391_v11  ;;  %v12574_v22 = vpack.c.bf16 %v9397_v15, %v9393_v14  ;;  %v9428_v11 = vld [vmem:[%s17338_s19 + $0xf30] sm:$0xff]  ;;  %v9431_v62 = vld [vmem:[%s17338_s19 + $0xf48] sm:$0xff] }
0x15d2   :  { %v9435_v14 = vld [vmem:[%s17338_s19 + $0xf68] sm:$0xff]  ;;  %v9433_v15 = vld [vmem:[%s17338_s19 + $0xf58] sm:$0xff] }
0x15d3   :  { %v8048_v53 = vld [vmem:[#allocation11 + $0x810] sm:$0xff] }
0x15d4   :  { %12429 = vmatpush1.bf16.msra.mxu0 %v12428_v0  ;;  %12557 = vmatpush1.bf16.msra.mxu1 %v12556_v29  ;;  %v9405_v0 = vld [vmem:[%s17338_s19 + $0xe78] sm:$0xff]  ;;  %v12448_v29 = vpack.c.bf16 %v9394_v20, %v9390_v19  ;;  %v12592_v19 = vpack.c.bf16 %v9428_v11, %v9424_v10  ;;  %v9430_v20 = vld [vmem:[%s17338_s19 + $0xf40] sm:$0xff] }
0x15d5   :  { %12431 = vmatprep.subr.bf16.mxu0 %v12430_v31  ;;  %12559 = vmatprep.subr.bf16.mxu1 %v12558_v32  ;;  %v9402_v31 = vld [vmem:[%s17338_s19 + $0xe60] sm:$0xff]  ;;  %v12450_v32 = vpack.c.bf16 %v9403_v26, %v9399_v25  ;;  %v12578_v63 = vpack.c.bf16 %v9405_v0, %v9401_v28  ;;  %v9436_v25 = vld [vmem:[%s17338_s19 + $0xf70] sm:$0xff]  ;;  %v9439_v26 = vld [vmem:[%s17338_s19 + $0xf88] sm:$0xff] }
0x15d6   :  { %v9443_v28 = vld [vmem:[%s17338_s19 + $0xfa8] sm:$0xff]  ;;  %v9441_v0 = vld [vmem:[%s17338_s19 + $0xf98] sm:$0xff] }
0x15d8   :  { %12433 = vmatpush1.bf16.msra.mxu0 %v12432_v27  ;;  %12561 = vmatpush1.bf16.msra.mxu1 %v12560_v44  ;;  %v9413_v27 = vld [vmem:[%s17338_s19 + $0xeb8] sm:$0xff]  ;;  %v12452_v44 = vpack.c.bf16 %v9402_v31, %v9398_v51  ;;  %v12596_v51 = vpack.c.bf16 %v9436_v25, %v9432_v24  ;;  %v9438_v31 = vld [vmem:[%s17338_s19 + $0xf80] sm:$0xff] }
0x15d9   :  { %12435 = vmatprep.subr.bf16.mxu0 %v12434_v46  ;;  %12563 = vmatprep.subr.bf16.mxu1 %v12562_v61  ;;  %v9410_v46 = vld [vmem:[%s17338_s19 + $0xea0] sm:$0xff]  ;;  %v12454_v61 = vpack.c.bf16 %v9411_v41, %v9407_v40  ;;  %v12582_v34 = vpack.c.bf16 %v9413_v27, %v9409_v42  ;;  %v9444_v40 = vld [vmem:[%s17338_s19 + $0xfb0] sm:$0xff]  ;;  %v9447_v41 = vld [vmem:[%s17338_s19 + $0xfc8] sm:$0xff] }
0x15da   :  { %v9451_v42 = vld [vmem:[%s17338_s19 + $0xfe8] sm:$0xff]  ;;  %v9449_v27 = vld [vmem:[%s17338_s19 + $0xfd8] sm:$0xff] }
0x15db   :  { %v8064_v25 = vld [vmem:[#allocation11 + $0x890] sm:$0xff] }
0x15dc   :  { %12437 = vmatpush1.bf16.msra.mxu0 %v12436_v47  ;;  %12565 = vmatpush1.bf16.msra.mxu1 %v12564_v48  ;;  %v9421_v47 = vld [vmem:[%s17338_s19 + $0xef8] sm:$0xff]  ;;  %v12456_v48 = vpack.c.bf16 %v9410_v46, %v9406_v33  ;;  %v12600_v33 = vpack.c.bf16 %v9444_v40, %v9440_v38  ;;  %v9446_v46 = vld [vmem:[%s17338_s19 + $0xfc0] sm:$0xff] }
0x15dd   :  { %12439 = vmatprep.subr.bf16.mxu0 %v12438_v50  ;;  %12567 = vmatprep.subr.bf16.mxu1 %v12566_v52  ;;  %v9418_v50 = vld [vmem:[%s17338_s19 + $0xee0] sm:$0xff]  ;;  %v12458_v52 = vpack.c.bf16 %v9419_v35, %v9415_v13  ;;  %v12586_v18 = vpack.c.bf16 %v9421_v47, %v9417_v6  ;;  %v9452_v13 = vld [vmem:[%s17338_s19 + $0xff0] sm:$0xff] }
0x15de   :  { %v8047_v35 = vld [vmem:[#allocation11 + $0x808] sm:$0xff]  ;;  %v8049_v47 = vld [vmem:[#allocation11 + $0x818] sm:$0xff]  ;;  %v8072_v40 = vld [vmem:[#allocation11 + $0x8d0] sm:$0xff] }
0x15df   :  { %v8051_v6 = vld [vmem:[#allocation11 + $0x828] sm:$0xff] }
0x15e0   :  { %12441 = vmatpush1.bf16.msra.mxu0 %v12440_v59  ;;  %12569 = vmatpush1.bf16.msra.mxu1 %v12568_v3  ;;  %v9429_v59 = vld [vmem:[%s17338_s19 + $0xf38] sm:$0xff]  ;;  %v12460_v3 = vpack.c.bf16 %v9418_v50, %v9414_v55  ;;  %v12604_v55 = vpack.c.bf16 %v9452_v13, %v9448_v2  ;;  %v8046_v50 = vld [vmem:[#allocation11 + $0x800] sm:$0xff] }
0x15e1   :  { %12443 = vmatprep.subr.bf16.mxu0 %v12442_v56  ;;  %12571 = vmatprep.subr.bf16.mxu1 %v12570_v8  ;;  %v9426_v56 = vld [vmem:[%s17338_s19 + $0xf20] sm:$0xff]  ;;  %v12462_v8 = vpack.c.bf16 %v9427_v43, %v9423_v54  ;;  %v12590_v9 = vpack.c.bf16 %v9429_v59, %v9425_v58  ;;  %v8052_v54 = vld [vmem:[#allocation11 + $0x830] sm:$0xff]  ;;  %v8055_v43 = vld [vmem:[#allocation11 + $0x848] sm:$0xff] }
0x15e2   :  { %v8059_v58 = vld [vmem:[#allocation11 + $0x868] sm:$0xff]  ;;  %v8057_v59 = vld [vmem:[#allocation11 + $0x858] sm:$0xff]  ;;  %v8080_v13 = vld [vmem:[#allocation11 + $0x910] sm:$0xff] }
0x15e3   :  { %v12610_v10 = vpack.c.bf16 %v8059_v58, %v8055_v43  ;;  %v8092_v43 = vld [vmem:[#allocation11 + $0x970] sm:$0xff]  ;;  %v8095_v58 = vld [vmem:[#allocation11 + $0x988] sm:$0xff] }
0x15e4   :  { %12445 = vmatpush1.bf16.msra.mxu0 %v12444_v16  ;;  %12573 = vmatpush1.bf16.msra.mxu1 %v12572_v17  ;;  %v9437_v16 = vld [vmem:[%s17338_s19 + $0xf78] sm:$0xff]  ;;  %v12464_v17 = vpack.c.bf16 %v9426_v56, %v9422_v1  ;;  %v12736_v1 = vpack.c.bf16 %v8052_v54, %v8048_v53  ;;  %v8054_v56 = vld [vmem:[#allocation11 + $0x840] sm:$0xff] }
0x15e5   :  { %12447 = vmatprep.subr.bf16.mxu0 %v12446_v21  ;;  %12575 = vmatprep.subr.bf16.mxu1 %v12574_v22  ;;  %v9434_v21 = vld [vmem:[%s17338_s19 + $0xf60] sm:$0xff]  ;;  %v12466_v22 = vpack.c.bf16 %v9435_v14, %v9431_v62  ;;  %v12594_v23 = vpack.c.bf16 %v9437_v16, %v9433_v15  ;;  %v8056_v62 = vld [vmem:[#allocation11 + $0x850] sm:$0xff]  ;;  %v8063_v15 = vld [vmem:[#allocation11 + $0x888] sm:$0xff] }
0x15e6   :  { %v8060_v14 = vld [vmem:[#allocation11 + $0x870] sm:$0xff]  ;;  %v8067_v16 = vld [vmem:[#allocation11 + $0x8a8] sm:$0xff] }
0x15e7   :  { %v8088_v54 = vld [vmem:[#allocation11 + $0x950] sm:$0xff] }
0x15e8   :  { %12449 = vmatpush1.bf16.msra.mxu0 %v12448_v29  ;;  %12577 = vmatpush1.bf16.msra.mxu1 %v12576_v57  ;;  %v9445_v29 = vld [vmem:[%s17338_s19 + $0xfb8] sm:$0xff]  ;;  %v12468_v57 = vpack.c.bf16 %v9434_v21, %v9430_v20  ;;  %v12740_v21 = vpack.c.bf16 %v8060_v14, %v8056_v62 }
0x15e9   :  { %12451 = vmatprep.subr.bf16.mxu0 %v12450_v32  ;;  %12579 = vmatprep.subr.bf16.mxu1 %v12578_v63  ;;  %v9442_v32 = vld [vmem:[%s17338_s19 + $0xfa0] sm:$0xff]  ;;  %v12470_v63 = vpack.c.bf16 %v9443_v28, %v9439_v26  ;;  %v12598_v37 = vpack.c.bf16 %v9445_v29, %v9441_v0  ;;  %v8068_v26 = vld [vmem:[#allocation11 + $0x8b0] sm:$0xff]  ;;  %v8071_v28 = vld [vmem:[#allocation11 + $0x8c8] sm:$0xff] }
0x15ea   :  { %v8075_v0 = vld [vmem:[#allocation11 + $0x8e8] sm:$0xff]  ;;  %v8073_v29 = vld [vmem:[#allocation11 + $0x8d8] sm:$0xff]  ;;  %v8096_v62 = vld [vmem:[#allocation11 + $0x990] sm:$0xff] }
0x15eb   :  { %v8100_v14 = vld [vmem:[#allocation11 + $0x9b0] sm:$0xff] }
0x15ec   :  { %12453 = vmatpush1.bf16.msra.mxu0 %v12452_v44  ;;  %12581 = vmatpush1.bf16.msra.mxu1 %v12580_v45  ;;  %v9453_v44 = vld [vmem:[%s17338_s19 + $0xff8] sm:$0xff]  ;;  %v12472_v45 = vpack.c.bf16 %v9442_v32, %v9438_v31  ;;  %v12744_v31 = vpack.c.bf16 %v8068_v26, %v8064_v25  ;;  %v8070_v32 = vld [vmem:[#allocation11 + $0x8c0] sm:$0xff] }
0x15ed   :  { %12455 = vmatprep.subr.bf16.mxu0 %v12454_v61  ;;  %12583 = vmatprep.subr.bf16.mxu1 %v12582_v34  ;;  %v9450_v61 = vld [vmem:[%s17338_s19 + $0xfe0] sm:$0xff]  ;;  %v12474_v34 = vpack.c.bf16 %v9451_v42, %v9447_v41  ;;  %v12602_v12 = vpack.c.bf16 %v9453_v44, %v9449_v27  ;;  %v8076_v41 = vld [vmem:[#allocation11 + $0x8f0] sm:$0xff]  ;;  %v8079_v42 = vld [vmem:[#allocation11 + $0x908] sm:$0xff] }
0x15ee   :  { %v8083_v27 = vld [vmem:[#allocation11 + $0x928] sm:$0xff]  ;;  %v8081_v44 = vld [vmem:[#allocation11 + $0x918] sm:$0xff]  ;;  %v8104_v25 = vld [vmem:[#allocation11 + $0x9d0] sm:$0xff] }
0x15ef   :  { %v8108_v26 = vld [vmem:[#allocation11 + $0x9f0] sm:$0xff] }
0x15f0   :  { %12457 = vmatpush1.bf16.msra.mxu0 %v12456_v48  ;;  %12585 = vmatpush1.bf16.msra.mxu1 %v12584_v49  ;;  %v8053_v48 = vld [vmem:[#allocation11 + $0x838] sm:$0xff]  ;;  %v12476_v49 = vpack.c.bf16 %v9450_v61, %v9446_v46  ;;  %v12748_v46 = vpack.c.bf16 %v8076_v41, %v8072_v40  ;;  %v8078_v61 = vld [vmem:[#allocation11 + $0x900] sm:$0xff]  ;;  %v8112_v40 = vld [vmem:[#allocation11 + $0xa10] sm:$0xff] }
0x15f1   :  { %12459 = vmatprep.subr.bf16.mxu0 %v12458_v52  ;;  %12587 = vmatprep.subr.bf16.mxu1 %v12586_v18  ;;  %v8050_v52 = vld [vmem:[#allocation11 + $0x820] sm:$0xff]  ;;  %v12606_v18 = vpack.c.bf16 %v8051_v6, %v8047_v35  ;;  %v12734_v4 = vpack.c.bf16 %v8053_v48, %v8049_v47  ;;  %v8084_v35 = vld [vmem:[#allocation11 + $0x930] sm:$0xff]  ;;  %v8087_v6 = vld [vmem:[#allocation11 + $0x948] sm:$0xff] }
0x15f2   :  { %v8091_v47 = vld [vmem:[#allocation11 + $0x968] sm:$0xff]  ;;  %v8089_v48 = vld [vmem:[#allocation11 + $0x958] sm:$0xff]  ;;  %v8116_v41 = vld [vmem:[#allocation11 + $0xa30] sm:$0xff] }
0x15f4   :  { %12461 = vmatpush1.bf16.msra.mxu0 %v12460_v3  ;;  %12589 = vmatpush1.bf16.msra.mxu1 %v12588_v60  ;;  %v8061_v3 = vld [vmem:[#allocation11 + $0x878] sm:$0xff]  ;;  %v12608_v60 = vpack.c.bf16 %v8050_v52, %v8046_v50  ;;  %v12752_v50 = vpack.c.bf16 %v8084_v35, %v8080_v13  ;;  %v8086_v52 = vld [vmem:[#allocation11 + $0x940] sm:$0xff]  ;;  %v8120_v13 = vld [vmem:[#allocation11 + $0xa50] sm:$0xff] }
0x15f5   :  { %12463 = vmatprep.subr.bf16.mxu0 %v12462_v8  ;;  %12591 = vmatprep.subr.bf16.mxu1 %v12590_v9  ;;  %v8058_v8 = vld [vmem:[#allocation11 + $0x860] sm:$0xff]  ;;  %v7475_v9 = vmax.f32 %v16726_v39, 0.0  ;;  %v12738_v11 = vpack.c.bf16 %v8061_v3, %v8057_v59  ;;  %v12614_v39 = vpack.c.bf16 %v8067_v16, %v8063_v15  ;;  %v8099_v59 = vld [vmem:[#allocation11 + $0x9a8] sm:$0xff]  ;;  %v8097_v3 = vld [vmem:[#allocation11 + $0x998] sm:$0xff] }
0x15f6   :  { %v12612_v20 = vpack.c.bf16 %v8058_v8, %v8054_v56  ;;  %v12756_v56 = vpack.c.bf16 %v8092_v43, %v8088_v54  ;;  %v8094_v8 = vld [vmem:[#allocation11 + $0x980] sm:$0xff]  ;;  %v8103_v15 = vld [vmem:[#allocation11 + $0x9c8] sm:$0xff]  ;;  %v8124_v35 = vld [vmem:[#allocation11 + $0xa70] sm:$0xff] }
0x15f7   :  { %v8107_v16 = vld [vmem:[#allocation11 + $0x9e8] sm:$0xff]  ;;  %v8128_v54 = vld [vmem:[#allocation11 + $0xa90] sm:$0xff] }
0x15f8   :  { %12465 = vmatpush1.bf16.msra.mxu0 %v12464_v17  ;;  %12593 = vmatpush1.bf16.msra.mxu1 %v12592_v19  ;;  %v8065_v17 = vld [vmem:[#allocation11 + $0x898] sm:$0xff]  ;;  %v8132_v43 = vld [vmem:[#allocation11 + $0xab0] sm:$0xff] }
0x15f9   :  { %12467 = vmatprep.subr.bf16.mxu0 %v12466_v22  ;;  %12595 = vmatprep.subr.bf16.mxu1 %v12594_v23  ;;  %v8069_v19 = vld [vmem:[#allocation11 + $0x8b8] sm:$0xff]  ;;  %v8062_v22 = vld [vmem:[#allocation11 + $0x880] sm:$0xff] }
0x15fa   :  { %v8066_v23 = vld [vmem:[#allocation11 + $0x8a0] sm:$0xff]  ;;  %v12742_v24 = vpack.c.bf16 %v8069_v19, %v8065_v17  ;;  %v8105_v17 = vld [vmem:[#allocation11 + $0x9d8] sm:$0xff] }
0x15fb   :  { %v8109_v19 = vld [vmem:[#allocation11 + $0x9f8] sm:$0xff] }
0x15fc   :  { %12469 = vmatpush1.bf16.msra.mxu0 %v12468_v57  ;;  %12597 = vmatpush1.bf16.msra.mxu1 %v12596_v51  ;;  %v8077_v57 = vld [vmem:[#allocation11 + $0x8f8] sm:$0xff]  ;;  %v12616_v51 = vpack.c.bf16 %v8066_v23, %v8062_v22  ;;  %v8102_v22 = vld [vmem:[#allocation11 + $0x9c0] sm:$0xff] }
0x15fd   :  { %12471 = vmatprep.subr.bf16.mxu0 %v12470_v63  ;;  %12599 = vmatprep.subr.bf16.mxu1 %v12598_v37  ;;  %v8074_v63 = vld [vmem:[#allocation11 + $0x8e0] sm:$0xff]  ;;  %v12618_v37 = vpack.c.bf16 %v8075_v0, %v8071_v28  ;;  %v12746_v38 = vpack.c.bf16 %v8077_v57, %v8073_v29  ;;  %v8111_v28 = vld [vmem:[#allocation11 + $0xa08] sm:$0xff]  ;;  %v8113_v29 = vld [vmem:[#allocation11 + $0xa18] sm:$0xff] }
0x15fe   :  { %v8106_v23 = vld [vmem:[#allocation11 + $0x9e0] sm:$0xff]  ;;  %v8115_v0 = vld [vmem:[#allocation11 + $0xa28] sm:$0xff]  ;;  %v8117_v57 = vld [vmem:[#allocation11 + $0xa38] sm:$0xff] }
0x1600   :  { %12473 = vmatpush1.bf16.msra.mxu0 %v12472_v45  ;;  %12601 = vmatpush1.bf16.msra.mxu1 %v12600_v33  ;;  %v8085_v45 = vld [vmem:[#allocation11 + $0x938] sm:$0xff]  ;;  %v12620_v33 = vpack.c.bf16 %v8074_v63, %v8070_v32  ;;  %v8110_v32 = vld [vmem:[#allocation11 + $0xa00] sm:$0xff] }
0x1601   :  { %12475 = vmatprep.subr.bf16.mxu0 %v12474_v34  ;;  %12603 = vmatprep.subr.bf16.mxu1 %v12602_v12  ;;  %v8082_v34 = vld [vmem:[#allocation11 + $0x920] sm:$0xff]  ;;  %v12622_v12 = vpack.c.bf16 %v8083_v27, %v8079_v42  ;;  %v12750_v2 = vpack.c.bf16 %v8085_v45, %v8081_v44  ;;  %v8119_v42 = vld [vmem:[#allocation11 + $0xa48] sm:$0xff]  ;;  %v8121_v44 = vld [vmem:[#allocation11 + $0xa58] sm:$0xff] }
0x1602   :  { %v8114_v63 = vld [vmem:[#allocation11 + $0xa20] sm:$0xff]  ;;  %v8123_v27 = vld [vmem:[#allocation11 + $0xa68] sm:$0xff]  ;;  %v8125_v45 = vld [vmem:[#allocation11 + $0xa78] sm:$0xff] }
0x1604   :  { %12477 = vmatpush1.bf16.msra.mxu0 %v12476_v49  ;;  %12605 = vmatpush1.bf16.msra.mxu1 %v12604_v55  ;;  %v8093_v49 = vld [vmem:[#allocation11 + $0x978] sm:$0xff]  ;;  %v12624_v55 = vpack.c.bf16 %v8082_v34, %v8078_v61  ;;  %v8118_v61 = vld [vmem:[#allocation11 + $0xa40] sm:$0xff] }
0x1605   :  { %12607 = vmatprep.subr.bf16.mxu0 %v12606_v18  ;;  %12735 = vmatprep.subr.bf16.mxu1 %v12734_v4  ;;  %v8090_v18 = vld [vmem:[#allocation11 + $0x960] sm:$0xff]  ;;  %v12626_v4 = vpack.c.bf16 %v8091_v47, %v8087_v6  ;;  %v12754_v53 = vpack.c.bf16 %v8093_v49, %v8089_v48  ;;  %v8127_v6 = vld [vmem:[#allocation11 + $0xa88] sm:$0xff]  ;;  %v8129_v48 = vld [vmem:[#allocation11 + $0xa98] sm:$0xff] }
0x1606   :  { %v8122_v34 = vld [vmem:[#allocation11 + $0xa60] sm:$0xff]  ;;  %v8131_v47 = vld [vmem:[#allocation11 + $0xaa8] sm:$0xff]  ;;  %v8133_v49 = vld [vmem:[#allocation11 + $0xab8] sm:$0xff] }
0x1607   :  { %7893 = vmatmul.mubr.f32.vlgmr.msra.gmra.mrb[48].mxu0 %v7475_v9  ;;  %8035 = vmatmul.mubr.f32.vlgmr.msra.gmra.mrb[54].mxu1 %v7475_v9  ;;  %v8098_v9 = vld [vmem:[#allocation11 + $0x9a0] sm:$0xff] }
0x1608   :  { %12609 = vmatpush1.bf16.msra.mxu0 %v12608_v60  ;;  %12737 = vmatpush1.bf16.msra.mxu1 %v12736_v1  ;;  %v8101_v60 = vld [vmem:[#allocation11 + $0x9b8] sm:$0xff]  ;;  %v12628_v1 = vpack.c.bf16 %v8090_v18, %v8086_v52  ;;  %v8126_v52 = vld [vmem:[#allocation11 + $0xa80] sm:$0xff] }
0x1609   :  { %12611 = vmatprep.subr.bf16.mxu0 %v12610_v10  ;;  %12739 = vmatprep.subr.bf16.mxu1 %v12738_v11  ;;  %v12630_v10 = vpack.c.bf16 %v8099_v59, %v8095_v58  ;;  %v12758_v11 = vpack.c.bf16 %v8101_v60, %v8097_v3  ;;  %v8130_v18 = vld [vmem:[#allocation11 + $0xaa0] sm:$0xff]  ;;  %v8135_v58 = vld [vmem:[#allocation11 + $0xac8] sm:$0xff]  ;;  %v8137_v3 = vld [vmem:[#allocation11 + $0xad8] sm:$0xff] }
0x160a   :  { %v8139_v59 = vld [vmem:[#allocation11 + $0xae8] sm:$0xff]  ;;  %v8141_v60 = vld [vmem:[#allocation11 + $0xaf8] sm:$0xff] }
0x160c   :  { %12613 = vmatpush1.bf16.msra.mxu0 %v12612_v20  ;;  %12741 = vmatpush1.bf16.msra.mxu1 %v12740_v21  ;;  %v12632_v20 = vpack.c.bf16 %v8098_v9, %v8094_v8  ;;  %v12760_v21 = vpack.c.bf16 %v8100_v14, %v8096_v62  ;;  %v8134_v8 = vld [vmem:[#allocation11 + $0xac0] sm:$0xff]  ;;  %v8136_v62 = vld [vmem:[#allocation11 + $0xad0] sm:$0xff] }
0x160d   :  { %12615 = vmatprep.subr.bf16.mxu0 %v12614_v39  ;;  %12743 = vmatprep.subr.bf16.mxu1 %v12742_v24  ;;  %v12634_v39 = vpack.c.bf16 %v8107_v16, %v8103_v15  ;;  %v12762_v24 = vpack.c.bf16 %v8109_v19, %v8105_v17  ;;  %v8138_v9 = vld [vmem:[#allocation11 + $0xae0] sm:$0xff]  ;;  %v8140_v14 = vld [vmem:[#allocation11 + $0xaf0] sm:$0xff]  ;;  %v8143_v15 = vld [vmem:[#allocation11 + $0xb08] sm:$0xff] }
0x160e   :  { %v8147_v16 = vld [vmem:[#allocation11 + $0xb28] sm:$0xff]  ;;  %v8145_v17 = vld [vmem:[#allocation11 + $0xb18] sm:$0xff] }
0x160f   :  { %v8149_v19 = vld [vmem:[#allocation11 + $0xb38] sm:$0xff] }
0x1610   :  { %12617 = vmatpush1.bf16.msra.mxu0 %v12616_v51  ;;  %12745 = vmatpush1.bf16.msra.mxu1 %v12744_v31  ;;  %v12636_v51 = vpack.c.bf16 %v8106_v23, %v8102_v22  ;;  %v12764_v31 = vpack.c.bf16 %v8108_v26, %v8104_v25  ;;  %v8142_v22 = vld [vmem:[#allocation11 + $0xb00] sm:$0xff]  ;;  %v8144_v25 = vld [vmem:[#allocation11 + $0xb10] sm:$0xff] }
0x1611   :  { %12619 = vmatprep.subr.bf16.mxu0 %v12618_v37  ;;  %12747 = vmatprep.subr.bf16.mxu1 %v12746_v38  ;;  %v12638_v37 = vpack.c.bf16 %v8115_v0, %v8111_v28  ;;  %v12766_v38 = vpack.c.bf16 %v8117_v57, %v8113_v29  ;;  %v8146_v23 = vld [vmem:[#allocation11 + $0xb20] sm:$0xff]  ;;  %v8148_v26 = vld [vmem:[#allocation11 + $0xb30] sm:$0xff]  ;;  %v8151_v28 = vld [vmem:[#allocation11 + $0xb48] sm:$0xff] }
0x1612   :  { %v8155_v0 = vld [vmem:[#allocation11 + $0xb68] sm:$0xff]  ;;  %v8153_v29 = vld [vmem:[#allocation11 + $0xb58] sm:$0xff] }
0x1613   :  { %v8157_v57 = vld [vmem:[#allocation11 + $0xb78] sm:$0xff] }
0x1614   :  { %12621 = vmatpush1.bf16.msra.mxu0 %v12620_v33  ;;  %12749 = vmatpush1.bf16.msra.mxu1 %v12748_v46  ;;  %v12640_v33 = vpack.c.bf16 %v8114_v63, %v8110_v32  ;;  %v12768_v46 = vpack.c.bf16 %v8116_v41, %v8112_v40  ;;  %v8150_v32 = vld [vmem:[#allocation11 + $0xb40] sm:$0xff]  ;;  %v8152_v40 = vld [vmem:[#allocation11 + $0xb50] sm:$0xff] }
0x1615   :  { %12623 = vmatprep.subr.bf16.mxu0 %v12622_v12  ;;  %12751 = vmatprep.subr.bf16.mxu1 %v12750_v2  ;;  %v12642_v12 = vpack.c.bf16 %v8123_v27, %v8119_v42  ;;  %v12770_v2 = vpack.c.bf16 %v8125_v45, %v8121_v44  ;;  %v8154_v63 = vld [vmem:[#allocation11 + $0xb60] sm:$0xff]  ;;  %v8156_v41 = vld [vmem:[#allocation11 + $0xb70] sm:$0xff]  ;;  %v8159_v42 = vld [vmem:[#allocation11 + $0xb88] sm:$0xff] }
0x1616   :  { %v8163_v27 = vld [vmem:[#allocation11 + $0xba8] sm:$0xff]  ;;  %v8161_v44 = vld [vmem:[#allocation11 + $0xb98] sm:$0xff] }
0x1617   :  { %v8165_v45 = vld [vmem:[#allocation11 + $0xbb8] sm:$0xff] }
0x1618   :  { %12625 = vmatpush1.bf16.msra.mxu0 %v12624_v55  ;;  %12753 = vmatpush1.bf16.msra.mxu1 %v12752_v50  ;;  %v12644_v55 = vpack.c.bf16 %v8122_v34, %v8118_v61  ;;  %v12772_v50 = vpack.c.bf16 %v8124_v35, %v8120_v13  ;;  %v8158_v61 = vld [vmem:[#allocation11 + $0xb80] sm:$0xff]  ;;  %v12662_v34 = vpack.c.bf16 %v8163_v27, %v8159_v42  ;;  %v8160_v13 = vld [vmem:[#allocation11 + $0xb90] sm:$0xff] }
0x1619   :  { %12627 = vmatprep.subr.bf16.mxu0 %v12626_v4  ;;  %12755 = vmatprep.subr.bf16.mxu1 %v12754_v53  ;;  %v12646_v4 = vpack.c.bf16 %v8131_v47, %v8127_v6  ;;  %v12774_v53 = vpack.c.bf16 %v8133_v49, %v8129_v48  ;;  %v8164_v35 = vld [vmem:[#allocation11 + $0xbb0] sm:$0xff]  ;;  %v8167_v48 = vld [vmem:[#allocation11 + $0xbc8] sm:$0xff] }
0x161a   :  { %v12792_v47 = vpack.c.bf16 %v8164_v35, %v8160_v13  ;;  %v8171_v49 = vld [vmem:[#allocation11 + $0xbe8] sm:$0xff] }
0x161c   :  { %12629 = vmatpush1.bf16.msra.mxu0 %v12628_v1  ;;  %12757 = vmatpush1.bf16.msra.mxu1 %v12756_v56  ;;  %v12648_v1 = vpack.c.bf16 %v8130_v18, %v8126_v52  ;;  %v12776_v56 = vpack.c.bf16 %v8132_v43, %v8128_v54  ;;  %v8173_v52 = vld [vmem:[#allocation11 + $0xbf8] sm:$0xff]  ;;  %v8166_v18 = vld [vmem:[#allocation11 + $0xbc0] sm:$0xff]  ;;  %v8168_v43 = vld [vmem:[#allocation11 + $0xbd0] sm:$0xff] }
0x161d   :  { %12631 = vmatprep.subr.bf16.mxu0 %v12630_v10  ;;  %12759 = vmatprep.subr.bf16.mxu1 %v12758_v11  ;;  %v12650_v10 = vpack.c.bf16 %v8139_v59, %v8135_v58  ;;  %v12778_v11 = vpack.c.bf16 %v8141_v60, %v8137_v3  ;;  %v8172_v58 = vld [vmem:[#allocation11 + $0xbf0] sm:$0xff]  ;;  %v8175_v3 = vld [vmem:[#allocation11 + $0xc08] sm:$0xff] }
0x161e   :  { %v12796_v59 = vpack.c.bf16 %v8172_v58, %v8168_v43  ;;  %v8179_v60 = vld [vmem:[#allocation11 + $0xc28] sm:$0xff]  ;;  %v8200_v58 = vld [vmem:[#allocation11 + $0xcd0] sm:$0xff] }
0x1620   :  { %12633 = vmatpush1.bf16.msra.mxu0 %v12632_v20  ;;  %12761 = vmatpush1.bf16.msra.mxu1 %v12760_v21  ;;  %v12652_v20 = vpack.c.bf16 %v8138_v9, %v8134_v8  ;;  %v12780_v21 = vpack.c.bf16 %v8140_v14, %v8136_v62  ;;  %v8181_v8 = vld [vmem:[#allocation11 + $0xc38] sm:$0xff] }
0x1621   :  { %12635 = vmatprep.subr.bf16.mxu0 %v12634_v39  ;;  %12763 = vmatprep.subr.bf16.mxu1 %v12762_v24  ;;  %v12654_v39 = vpack.c.bf16 %v8147_v16, %v8143_v15  ;;  %v12782_v24 = vpack.c.bf16 %v8149_v19, %v8145_v17  ;;  %v8174_v17 = vld [vmem:[#allocation11 + $0xc00] sm:$0xff] }
0x1624   :  { %12637 = vmatpush1.bf16.msra.mxu0 %v12636_v51  ;;  %12765 = vmatpush1.bf16.msra.mxu1 %v12764_v31  ;;  %v12656_v51 = vpack.c.bf16 %v8146_v23, %v8142_v22  ;;  %v12784_v31 = vpack.c.bf16 %v8148_v26, %v8144_v25  ;;  %v8178_v22 = vld [vmem:[#allocation11 + $0xc20] sm:$0xff]  ;;  %v8176_v23 = vld [vmem:[#allocation11 + $0xc10] sm:$0xff]  ;;  %v8183_v25 = vld [vmem:[#allocation11 + $0xc48] sm:$0xff] }
0x1625   :  { %12639 = vmatprep.subr.bf16.mxu0 %v12638_v37  ;;  %12767 = vmatprep.subr.bf16.mxu1 %v12766_v38  ;;  %v12658_v37 = vpack.c.bf16 %v8155_v0, %v8151_v28  ;;  %v12786_v38 = vpack.c.bf16 %v8157_v57, %v8153_v29  ;;  %v8187_v28 = vld [vmem:[#allocation11 + $0xc68] sm:$0xff]  ;;  %v8185_v0 = vld [vmem:[#allocation11 + $0xc58] sm:$0xff] }
0x1626   :  { %v8189_v29 = vld [vmem:[#allocation11 + $0xc78] sm:$0xff]  ;;  %v12674_v42 = vpack.c.bf16 %v8187_v28, %v8183_v25  ;;  %v8214_v25 = vld [vmem:[#allocation11 + $0xd40] sm:$0xff] }
0x1627   :  { %v12802_v27 = vpack.c.bf16 %v8189_v29, %v8185_v0  ;;  %v8216_v29 = vld [vmem:[#allocation11 + $0xd50] sm:$0xff] }
0x1628   :  { %12641 = vmatpush1.bf16.msra.mxu0 %v12640_v33  ;;  %12769 = vmatpush1.bf16.msra.mxu1 %v12768_v46  ;;  %v12660_v33 = vpack.c.bf16 %v8154_v63, %v8150_v32  ;;  %v12788_v46 = vpack.c.bf16 %v8156_v41, %v8152_v40  ;;  %v8182_v32 = vld [vmem:[#allocation11 + $0xc40] sm:$0xff]  ;;  %v8188_v40 = vld [vmem:[#allocation11 + $0xc70] sm:$0xff]  ;;  %v8191_v41 = vld [vmem:[#allocation11 + $0xc88] sm:$0xff] }
0x1629   :  { %12643 = vmatprep.subr.bf16.mxu0 %v12642_v12  ;;  %12771 = vmatprep.subr.bf16.mxu1 %v12770_v2  ;;  %v12790_v12 = vpack.c.bf16 %v8165_v45, %v8161_v44  ;;  %v8162_v2 = vld [vmem:[#allocation11 + $0xba0] sm:$0xff]  ;;  %v8195_v44 = vld [vmem:[#allocation11 + $0xca8] sm:$0xff]  ;;  %v8193_v45 = vld [vmem:[#allocation11 + $0xc98] sm:$0xff] }
0x162a   :  { %v12664_v6 = vpack.c.bf16 %v8162_v2, %v8158_v61  ;;  %v8186_v63 = vld [vmem:[#allocation11 + $0xc60] sm:$0xff]  ;;  %v12678_v13 = vpack.c.bf16 %v8195_v44, %v8191_v41  ;;  %v8224_v44 = vld [vmem:[#allocation11 + $0xd90] sm:$0xff] }
0x162b   :  { %v12676_v61 = vpack.c.bf16 %v8186_v63, %v8182_v32  ;;  %v8194_v2 = vld [vmem:[#allocation11 + $0xca0] sm:$0xff]  ;;  %v8225_v32 = vld [vmem:[#allocation11 + $0xd98] sm:$0xff] }
0x162c   :  { %12645 = vmatpush1.bf16.msra.mxu0 %v12644_v55  ;;  %12773 = vmatpush1.bf16.msra.mxu1 %v12772_v50  ;;  %v8169_v55 = vld [vmem:[#allocation11 + $0xbd8] sm:$0xff]  ;;  %v12666_v50 = vpack.c.bf16 %v8171_v49, %v8167_v48  ;;  %v8199_v48 = vld [vmem:[#allocation11 + $0xcc8] sm:$0xff]  ;;  %v8226_v41 = vld [vmem:[#allocation11 + $0xda0] sm:$0xff] }
0x162d   :  { %12647 = vmatprep.subr.bf16.mxu0 %v12646_v4  ;;  %12775 = vmatprep.subr.bf16.mxu1 %v12774_v53  ;;  %v8170_v4 = vld [vmem:[#allocation11 + $0xbe0] sm:$0xff]  ;;  %v12794_v53 = vpack.c.bf16 %v8173_v52, %v8169_v55  ;;  %v8203_v49 = vld [vmem:[#allocation11 + $0xce8] sm:$0xff]  ;;  %v8201_v55 = vld [vmem:[#allocation11 + $0xcd8] sm:$0xff] }
0x162e   :  { %v12668_v54 = vpack.c.bf16 %v8170_v4, %v8166_v18  ;;  %v8198_v4 = vld [vmem:[#allocation11 + $0xcc0] sm:$0xff]  ;;  %v8229_v63 = vld [vmem:[#allocation11 + $0xdb8] sm:$0xff] }
0x1630   :  { %12649 = vmatpush1.bf16.msra.mxu0 %v12648_v1  ;;  %12777 = vmatpush1.bf16.msra.mxu1 %v12776_v56  ;;  %v8177_v1 = vld [vmem:[#allocation11 + $0xc18] sm:$0xff]  ;;  %v12670_v56 = vpack.c.bf16 %v8179_v60, %v8175_v3  ;;  %v8207_v3 = vld [vmem:[#allocation11 + $0xd08] sm:$0xff] }
0x1631   :  { %12651 = vmatprep.subr.bf16.mxu0 %v12650_v10  ;;  %12779 = vmatprep.subr.bf16.mxu1 %v12778_v11  ;;  %v12798_v9 = vpack.c.bf16 %v8181_v8, %v8177_v1  ;;  %v17101_v10 = vld [vmem:[%s17339_s20 + $0x4] sm:$0xf]  ;;  %v8211_v60 = vld [vmem:[#allocation11 + $0xd28] sm:$0xff]  ;;  %v8209_v1 = vld [vmem:[#allocation11 + $0xd18] sm:$0xff] }
0x1632   :  { %v7740_v11 = vrot.slane %v17101_v10, %v13620_v7  ;;  %v7744_v62 = vrot.slane %v17101_v10, %v13614_v5  ;;  %v7752_v14 = vrot.slane %v17101_v10, %v15283_v36 }
0x1634   :  { %12653 = vmatpush1.bf16.msra.mxu0 %v12652_v20  ;;  %12781 = vmatpush1.bf16.msra.mxu1 %v12780_v21 }
0x1635   :  { %12655 = vmatprep.subr.bf16.mxu0 %v12654_v39  ;;  %12783 = vmatprep.subr.bf16.mxu1 %v12782_v24  ;;  %v8180_v39 = vld [vmem:[#allocation11 + $0xc30] sm:$0xff] }
0x1638   :  { %12657 = vmatpush1.bf16.msra.mxu0 %v12656_v51  ;;  %12785 = vmatpush1.bf16.msra.mxu1 %v12784_v31  ;;  %v12672_v51 = vpack.c.bf16 %v8178_v22, %v8174_v17  ;;  %v12800_v31 = vpack.c.bf16 %v8180_v39, %v8176_v23  ;;  %v8208_v17 = vld [vmem:[#allocation11 + $0xd10] sm:$0xff]  ;;  %v8217_v22 = vld [vmem:[#allocation11 + $0xd58] sm:$0xff] }
0x1639   :  { %12659 = vmatprep.subr.bf16.mxu0 %v12658_v37  ;;  %12787 = vmatprep.subr.bf16.mxu1 %v12786_v38  ;;  %v8184_v38 = vld [vmem:[#allocation11 + $0xc50] sm:$0xff]  ;;  %v8221_v23 = vld [vmem:[#allocation11 + $0xd78] sm:$0xff] }
0x163a   :  { %v12818_v0 = vpack.c.bf16 %v8221_v23, %v8217_v22  ;;  %v8255_v22 = vld [vmem:[#allocation11 + $0xe88] sm:$0xff] }
0x163b   :  { %v8259_v23 = vld [vmem:[#allocation11 + $0xea8] sm:$0xff] }
0x163c   :  { %12661 = vmatpush1.bf16.msra.mxu0 %v12660_v33  ;;  %12789 = vmatpush1.bf16.msra.mxu1 %v12788_v46  ;;  %v8197_v33 = vld [vmem:[#allocation11 + $0xcb8] sm:$0xff] }
0x163d   :  { %12663 = vmatprep.subr.bf16.mxu0 %v12662_v34  ;;  %12791 = vmatprep.subr.bf16.mxu1 %v12790_v12  ;;  %v12804_v34 = vpack.c.bf16 %v8188_v40, %v8184_v38  ;;  %v8190_v12 = vld [vmem:[#allocation11 + $0xc80] sm:$0xff]  ;;  %v12806_v35 = vpack.c.bf16 %v8197_v33, %v8193_v45  ;;  %v8228_v45 = vld [vmem:[#allocation11 + $0xdb0] sm:$0xff]  ;;  %v8231_v33 = vld [vmem:[#allocation11 + $0xdc8] sm:$0xff] }
0x163e   :  { %v12680_v52 = vpack.c.bf16 %v8194_v2, %v8190_v12  ;;  %v8222_v40 = vld [vmem:[#allocation11 + $0xd80] sm:$0xff]  ;;  %v12824_v2 = vpack.c.bf16 %v8228_v45, %v8224_v44 }
0x163f   :  { %v12696_v12 = vpack.c.bf16 %v8226_v41, %v8222_v40 }
0x1640   :  { %12665 = vmatpush1.bf16.msra.mxu0 %v12664_v6  ;;  %12793 = vmatpush1.bf16.msra.mxu1 %v12792_v47  ;;  %v8192_v6 = vld [vmem:[#allocation11 + $0xc90] sm:$0xff] }
0x1641   :  { %12667 = vmatprep.subr.bf16.mxu0 %v12666_v50  ;;  %12795 = vmatprep.subr.bf16.mxu1 %v12794_v53  ;;  %v8196_v47 = vld [vmem:[#allocation11 + $0xcb0] sm:$0xff]  ;;  %v8205_v50 = vld [vmem:[#allocation11 + $0xcf8] sm:$0xff]  ;;  %v8202_v53 = vld [vmem:[#allocation11 + $0xce0] sm:$0xff] }
0x1642   :  { %v12808_v18 = vpack.c.bf16 %v8196_v47, %v8192_v6  ;;  %v12810_v43 = vpack.c.bf16 %v8205_v50, %v8201_v55  ;;  %v12684_v8 = vpack.c.bf16 %v8202_v53, %v8198_v4  ;;  %v8239_v55 = vld [vmem:[#allocation11 + $0xe08] sm:$0xff] }
0x1643   :  { %v8243_v50 = vld [vmem:[#allocation11 + $0xe28] sm:$0xff] }
0x1644   :  { %12669 = vmatpush1.bf16.msra.mxu0 %v12668_v54  ;;  %12797 = vmatpush1.bf16.msra.mxu1 %v12796_v59  ;;  %v12682_v54 = vpack.c.bf16 %v8203_v49, %v8199_v48  ;;  %v8204_v59 = vld [vmem:[#allocation11 + $0xcf0] sm:$0xff] }
0x1645   :  { %12671 = vmatprep.subr.bf16.mxu0 %v12670_v56  ;;  %12799 = vmatprep.subr.bf16.mxu1 %v12798_v9  ;;  %v8213_v56 = vld [vmem:[#allocation11 + $0xd38] sm:$0xff]  ;;  %v12812_v9 = vpack.c.bf16 %v8204_v59, %v8200_v58  ;;  %v8232_v48 = vld [vmem:[#allocation11 + $0xdd0] sm:$0xff]  ;;  %v12702_v58 = vpack.c.bf16 %v8243_v50, %v8239_v55 }
0x1646   :  { %v8236_v49 = vld [vmem:[#allocation11 + $0xdf0] sm:$0xff] }
0x1647   :  { %v12828_v53 = vpack.c.bf16 %v8236_v49, %v8232_v48  ;;  %v8272_v55 = vld [vmem:[#allocation11 + $0xf10] sm:$0xff] }
0x1648   :  { %v8276_v50 = vld [vmem:[#allocation11 + $0xf30] sm:$0xff] }
0x16da   :  { %v7894_v15 = vpop.f32.mrb[48].mxu0  ;;  %v17109_v16 = vpop.f32.mrb[54].mxu1 }
0x16db   :  { %v12948_v19 = vadd.f32 %v7894_v15, %v7740_v11  ;;  %v7896_v20 = vpop.f32.mrb[49].mxu0  ;;  %v8038_v21 = vpop.f32.mrb[55].mxu1  ;;  %v8206_v11 = vld [vmem:[#allocation11 + $0xd00] sm:$0xff]  ;;  %v12814_v15 = vpack.c.bf16 %v8213_v56, %v8209_v1  ;;  %v8247_v1 = vld [vmem:[#allocation11 + $0xe48] sm:$0xff] }
0x16dc   :  { %v12949_v24 = vadd.f32 %v7896_v20, %v7744_v62  ;;  %v12951_v26 = vadd.f32 %v8038_v21, %v7752_v14  ;;  %v8210_v62 = vld [vmem:[#allocation11 + $0xd20] sm:$0xff]  ;;  %v12686_v14 = vpack.c.bf16 %v8211_v60, %v8207_v3  ;;  %v8215_v20 = vld [vmem:[#allocation11 + $0xd48] sm:$0xff]  ;;  %v8240_v3 = vld [vmem:[#allocation11 + $0xe10] sm:$0xff] }
0x16dd   :  { %v8041_v37 = vmax.f32 %v12948_v19, 0.0  ;;  %v8212_v19 = vld [vmem:[#allocation11 + $0xd30] sm:$0xff]  ;;  %v8219_v21 = vld [vmem:[#allocation11 + $0xd68] sm:$0xff]  ;;  %v12688_v39 = vpack.c.bf16 %v8210_v62, %v8206_v11 }
0x16de   :  { %v8042_v57 = vmax.f32 %v12949_v24, 0.0  ;;  %v8044_v46 = vmax.f32 %v12951_v26, 0.0  ;;  %v12816_v24 = vpack.c.bf16 %v8212_v19, %v8208_v17  ;;  %v8218_v26 = vld [vmem:[#allocation11 + $0xd60] sm:$0xff]  ;;  %v12690_v28 = vpack.c.bf16 %v8219_v21, %v8215_v20  ;;  %v8244_v60 = vld [vmem:[#allocation11 + $0xe30] sm:$0xff]  ;;  %v8251_v56 = vld [vmem:[#allocation11 + $0xe68] sm:$0xff] }
0x16df   :  { %v12832_v62 = vpack.c.bf16 %v8244_v60, %v8240_v3  ;;  %v12706_v17 = vpack.c.bf16 %v8251_v56, %v8247_v1  ;;  %v8248_v20 = vld [vmem:[#allocation11 + $0xe50] sm:$0xff] }
0x16e0   :  { %8389 = vmatprep.mubr.f32.mxu0 %v8042_v57  ;;  %8531 = vmatprep.mubr.f32.mxu1 %v8042_v57  ;;  %v8220_v57 = vld [vmem:[#allocation11 + $0xd70] sm:$0xff] }
0x16e1   :  { %8390 = vmatmul.mubr.f32.vlgmr.msra.gmra.mrb[50].mxu0 %v8041_v37  ;;  %8532 = vmatmul.mubr.f32.vlgmr.msra.gmra.mrb[56].mxu1 %v8041_v37  ;;  %v12692_v37 = vpack.c.bf16 %v8218_v26, %v8214_v25  ;;  %v12820_v38 = vpack.c.bf16 %v8220_v57, %v8216_v29  ;;  %v8252_v21 = vld [vmem:[#allocation11 + $0xe70] sm:$0xff]  ;;  %v12710_v29 = vpack.c.bf16 %v8259_v23, %v8255_v22 }
0x16e2   :  { %12673 = vmatpush1.bf16.msra.mxu0 %v12672_v51  ;;  %12801 = vmatpush1.bf16.msra.mxu1 %v12800_v31  ;;  %v8223_v51 = vld [vmem:[#allocation11 + $0xd88] sm:$0xff]  ;;  %v12836_v26 = vpack.c.bf16 %v8252_v21, %v8248_v20  ;;  %v8280_v1 = vld [vmem:[#allocation11 + $0xf50] sm:$0xff] }
0x16e3   :  { %8460 = vmatprep.mubr.f32.mxu0 %v8044_v46  ;;  %8602 = vmatprep.mubr.f32.mxu1 %v8044_v46  ;;  %v8227_v31 = vld [vmem:[#allocation11 + $0xda8] sm:$0xff]  ;;  %v8284_v56 = vld [vmem:[#allocation11 + $0xf70] sm:$0xff] }
0x16e4   :  { %12675 = vmatprep.subr.bf16.mxu0 %v12674_v42  ;;  %12803 = vmatprep.subr.bf16.mxu1 %v12802_v27  ;;  %v12694_v42 = vpack.c.bf16 %v8227_v31, %v8223_v51  ;;  %v12822_v27 = vpack.c.bf16 %v8229_v63, %v8225_v32  ;;  %v8235_v46 = vld [vmem:[#allocation11 + $0xde8] sm:$0xff]  ;;  %v8256_v51 = vld [vmem:[#allocation11 + $0xe90] sm:$0xff] }
0x16e5   :  { %v12698_v6 = vpack.c.bf16 %v8235_v46, %v8231_v33  ;;  %v8260_v31 = vld [vmem:[#allocation11 + $0xeb0] sm:$0xff]  ;;  %v8263_v32 = vld [vmem:[#allocation11 + $0xec8] sm:$0xff] }
0x16e6   :  { %12677 = vmatpush1.bf16.msra.mxu0 %v12676_v61  ;;  %12805 = vmatpush1.bf16.msra.mxu1 %v12804_v34  ;;  %v8233_v61 = vld [vmem:[#allocation11 + $0xdd8] sm:$0xff]  ;;  %v8267_v63 = vld [vmem:[#allocation11 + $0xee8] sm:$0xff]  ;;  %v12840_v41 = vpack.c.bf16 %v8260_v31, %v8256_v51  ;;  %v8264_v33 = vld [vmem:[#allocation11 + $0xed0] sm:$0xff]  ;;  %v7748_v51 = vrot.slane %v17101_v10, %v15280_v30 }
0x16e7   :  { %12679 = vmatprep.subr.bf16.mxu0 %v12678_v13  ;;  %12807 = vmatprep.subr.bf16.mxu1 %v12806_v35  ;;  %v8237_v34 = vld [vmem:[#allocation11 + $0xdf8] sm:$0xff]  ;;  %v8230_v13 = vld [vmem:[#allocation11 + $0xdc0] sm:$0xff]  ;;  %v12714_v44 = vpack.c.bf16 %v8267_v63, %v8263_v32  ;;  %v8268_v46 = vld [vmem:[#allocation11 + $0xef0] sm:$0xff] }
0x16e8   :  { %v8234_v35 = vld [vmem:[#allocation11 + $0xde0] sm:$0xff]  ;;  %v12826_v47 = vpack.c.bf16 %v8237_v34, %v8233_v61  ;;  %v8271_v61 = vld [vmem:[#allocation11 + $0xf08] sm:$0xff]  ;;  %v8288_v22 = vld [vmem:[#allocation11 + $0xf90] sm:$0xff] }
0x16e9   :  { %v12700_v4 = vpack.c.bf16 %v8234_v35, %v8230_v13  ;;  %v8275_v34 = vld [vmem:[#allocation11 + $0xf28] sm:$0xff]  ;;  %v12844_v35 = vpack.c.bf16 %v8268_v46, %v8264_v33  ;;  %v8292_v23 = vld [vmem:[#allocation11 + $0xfb0] sm:$0xff]  ;;  %v12950_v33 = vadd.f32 %v17109_v16, %v7748_v51 }
0x16ea   :  { %12681 = vmatpush1.bf16.msra.mxu0 %v12680_v52  ;;  %12809 = vmatpush1.bf16.msra.mxu1 %v12808_v18  ;;  %v8241_v52 = vld [vmem:[#allocation11 + $0xe18] sm:$0xff]  ;;  %v12718_v48 = vpack.c.bf16 %v8275_v34, %v8271_v61  ;;  %v8296_v63 = vld [vmem:[#allocation11 + $0xfd0] sm:$0xff]  ;;  %v9505_v10 = vld [vmem:[%s17342_s23 + $0x388] sm:$0xff] }
0x16eb   :  { %12683 = vmatprep.subr.bf16.mxu0 %v12682_v54  ;;  %12811 = vmatprep.subr.bf16.mxu1 %v12810_v43  ;;  %v8245_v18 = vld [vmem:[#allocation11 + $0xe38] sm:$0xff]  ;;  %v8238_v54 = vld [vmem:[#allocation11 + $0xe00] sm:$0xff] }
0x16ec   :  { %v8242_v43 = vld [vmem:[#allocation11 + $0xe20] sm:$0xff]  ;;  %v12830_v59 = vpack.c.bf16 %v8245_v18, %v8241_v52  ;;  %v8279_v52 = vld [vmem:[#allocation11 + $0xf48] sm:$0xff]  ;;  %v9475_v16 = vld [vmem:[%s17342_s23 + $0x298] sm:$0xff] }
0x16ed   :  { %v12704_v11 = vpack.c.bf16 %v8242_v43, %v8238_v54  ;;  %v8283_v18 = vld [vmem:[#allocation11 + $0xf68] sm:$0xff]  ;;  %v12848_v43 = vpack.c.bf16 %v8276_v50, %v8272_v55  ;;  %v9488_v34 = vld [vmem:[%s17342_s23 + $0x300] sm:$0xff]  ;;  %v8043_v55 = vmax.f32 %v12950_v33, 0.0 }
0x16ee   :  { %12685 = vmatpush1.bf16.msra.mxu0 %v12684_v8  ;;  %12813 = vmatpush1.bf16.msra.mxu1 %v12812_v9  ;;  %v8249_v8 = vld [vmem:[#allocation11 + $0xe58] sm:$0xff]  ;;  %v12722_v3 = vpack.c.bf16 %v8283_v18, %v8279_v52  ;;  %v9490_v18 = vld [vmem:[%s17342_s23 + $0x310] sm:$0xff] }
0x16ef   :  { %12687 = vmatprep.subr.bf16.mxu0 %v12686_v14  ;;  %12815 = vmatprep.subr.bf16.mxu1 %v12814_v15  ;;  %v8253_v9 = vld [vmem:[#allocation11 + $0xe78] sm:$0xff]  ;;  %v8246_v14 = vld [vmem:[#allocation11 + $0xe40] sm:$0xff]  ;;  %v9466_v33 = vld [vmem:[%s17342_s23 + $0x250] sm:$0xff] }
0x16f0   :  { %v8250_v15 = vld [vmem:[#allocation11 + $0xe60] sm:$0xff]  ;;  %v12834_v19 = vpack.c.bf16 %v8253_v9, %v8249_v8  ;;  %v8287_v8 = vld [vmem:[#allocation11 + $0xf88] sm:$0xff] }
0x16f1   :  { %v12708_v25 = vpack.c.bf16 %v8250_v15, %v8246_v14  ;;  %v8291_v9 = vld [vmem:[#allocation11 + $0xfa8] sm:$0xff]  ;;  %v12852_v15 = vpack.c.bf16 %v8284_v56, %v8280_v1 }
0x16f2   :  { %12689 = vmatpush1.bf16.msra.mxu0 %v12688_v39  ;;  %12817 = vmatpush1.bf16.msra.mxu1 %v12816_v24  ;;  %v8257_v39 = vld [vmem:[#allocation11 + $0xe98] sm:$0xff]  ;;  %v12726_v20 = vpack.c.bf16 %v8291_v9, %v8287_v8  ;;  %v9461_v1 = vld [vmem:[%s17342_s23 + $0x228] sm:$0xff] }
0x16f3   :  { %12691 = vmatprep.subr.bf16.mxu0 %v12690_v28  ;;  %12819 = vmatprep.subr.bf16.mxu1 %v12818_v0  ;;  %v8261_v24 = vld [vmem:[#allocation11 + $0xeb8] sm:$0xff]  ;;  %v8254_v28 = vld [vmem:[#allocation11 + $0xe80] sm:$0xff] }
0x16f4   :  { %v8258_v0 = vld [vmem:[#allocation11 + $0xea0] sm:$0xff]  ;;  %v12838_v57 = vpack.c.bf16 %v8261_v24, %v8257_v39  ;;  %v8295_v39 = vld [vmem:[#allocation11 + $0xfc8] sm:$0xff] }
0x16f5   :  { %v12712_v40 = vpack.c.bf16 %v8258_v0, %v8254_v28  ;;  %v8299_v24 = vld [vmem:[#allocation11 + $0xfe8] sm:$0xff]  ;;  %v12856_v0 = vpack.c.bf16 %v8292_v23, %v8288_v22  ;;  %v9492_v9 = vld [vmem:[%s17342_s23 + $0x320] sm:$0xff]  ;;  %v9463_v22 = vld [vmem:[%s17342_s23 + $0x238] sm:$0xff] }
0x16f6   :  { %12693 = vmatpush1.bf16.msra.mxu0 %v12692_v37  ;;  %12821 = vmatpush1.bf16.msra.mxu1 %v12820_v38  ;;  %v8265_v37 = vld [vmem:[#allocation11 + $0xed8] sm:$0xff]  ;;  %v12730_v31 = vpack.c.bf16 %v8299_v24, %v8295_v39  ;;  %v9494_v24 = vld [vmem:[%s17342_s23 + $0x330] sm:$0xff] }
0x16f7   :  { %12695 = vmatprep.subr.bf16.mxu0 %v12694_v42  ;;  %12823 = vmatprep.subr.bf16.mxu1 %v12822_v27  ;;  %v8269_v38 = vld [vmem:[#allocation11 + $0xef8] sm:$0xff]  ;;  %v8262_v42 = vld [vmem:[#allocation11 + $0xec0] sm:$0xff] }
0x16f8   :  { %v8266_v27 = vld [vmem:[#allocation11 + $0xee0] sm:$0xff]  ;;  %v12842_v45 = vpack.c.bf16 %v8269_v38, %v8265_v37  ;;  %v8300_v37 = vld [vmem:[#allocation11 + $0xff0] sm:$0xff] }
0x16f9   :  { %v12716_v13 = vpack.c.bf16 %v8266_v27, %v8262_v42  ;;  %v9472_v38 = vld [vmem:[%s17342_s23 + $0x280] sm:$0xff]  ;;  %v12860_v27 = vpack.c.bf16 %v8300_v37, %v8296_v63 }
0x16fa   :  { %12697 = vmatpush1.bf16.msra.mxu0 %v12696_v12  ;;  %12825 = vmatpush1.bf16.msra.mxu1 %v12824_v2  ;;  %v8273_v12 = vld [vmem:[#allocation11 + $0xf18] sm:$0xff] }
0x16fb   :  { %12699 = vmatprep.subr.bf16.mxu0 %v12698_v6  ;;  %12827 = vmatprep.subr.bf16.mxu1 %v12826_v47  ;;  %v8277_v2 = vld [vmem:[#allocation11 + $0xf38] sm:$0xff]  ;;  %v8270_v6 = vld [vmem:[#allocation11 + $0xf00] sm:$0xff] }
0x16fc   :  { %v8274_v47 = vld [vmem:[#allocation11 + $0xf20] sm:$0xff]  ;;  %v12846_v49 = vpack.c.bf16 %v8277_v2, %v8273_v12  ;;  %v9474_v2 = vld [vmem:[%s17342_s23 + $0x290] sm:$0xff] }
0x16fd   :  { %v12720_v54 = vpack.c.bf16 %v8274_v47, %v8270_v6  ;;  %v9489_v12 = vld [vmem:[%s17342_s23 + $0x308] sm:$0xff]  ;;  %v12866_v50 = vpack.c.bf16 %v9475_v16, %v9474_v2  ;;  %v9499_v2 = vld [vmem:[%s17342_s23 + $0x358] sm:$0xff]  ;;  %v9484_v16 = vld [vmem:[%s17342_s23 + $0x2e0] sm:$0xff] }
0x16fe   :  { %12701 = vmatpush1.bf16.msra.mxu0 %v12700_v4  ;;  %12829 = vmatpush1.bf16.msra.mxu1 %v12828_v53  ;;  %v8281_v4 = vld [vmem:[#allocation11 + $0xf58] sm:$0xff]  ;;  %v12896_v47 = vpack.c.bf16 %v9489_v12, %v9488_v34  ;;  %v9498_v12 = vld [vmem:[%s17342_s23 + $0x350] sm:$0xff] }
0x16ff   :  { %12703 = vmatprep.subr.bf16.mxu0 %v12702_v58  ;;  %12831 = vmatprep.subr.bf16.mxu1 %v12830_v59  ;;  %v8285_v53 = vld [vmem:[#allocation11 + $0xf78] sm:$0xff]  ;;  %v8278_v58 = vld [vmem:[#allocation11 + $0xf40] sm:$0xff] }
0x1700   :  { %v8282_v59 = vld [vmem:[#allocation11 + $0xf60] sm:$0xff]  ;;  %v12850_v60 = vpack.c.bf16 %v8285_v53, %v8281_v4  ;;  %v9491_v4 = vld [vmem:[%s17342_s23 + $0x318] sm:$0xff] }
0x1701   :  { %v12724_v14 = vpack.c.bf16 %v8282_v59, %v8278_v58  ;;  %v9476_v53 = vld [vmem:[%s17342_s23 + $0x2a0] sm:$0xff]  ;;  %v9509_v58 = vld [vmem:[%s17342_s23 + $0x3a8] sm:$0xff] }
0x1702   :  { %12705 = vmatpush1.bf16.msra.mxu0 %v12704_v11  ;;  %12833 = vmatpush1.bf16.msra.mxu1 %v12832_v62  ;;  %v8289_v11 = vld [vmem:[#allocation11 + $0xf98] sm:$0xff] }
0x1703   :  { %12707 = vmatprep.subr.bf16.mxu0 %v12706_v17  ;;  %12835 = vmatprep.subr.bf16.mxu1 %v12834_v19  ;;  %v8293_v62 = vld [vmem:[#allocation11 + $0xfb8] sm:$0xff]  ;;  %v8286_v17 = vld [vmem:[#allocation11 + $0xf80] sm:$0xff] }
0x1704   :  { %v8290_v19 = vld [vmem:[#allocation11 + $0xfa0] sm:$0xff]  ;;  %v12854_v21 = vpack.c.bf16 %v8293_v62, %v8289_v11  ;;  %v9478_v62 = vld [vmem:[%s17342_s23 + $0x2b0] sm:$0xff] }
0x1705   :  { %v12728_v28 = vpack.c.bf16 %v8290_v19, %v8286_v17  ;;  %v9493_v11 = vld [vmem:[%s17342_s23 + $0x328] sm:$0xff]  ;;  %v9511_v17 = vld [vmem:[%s17342_s23 + $0x3b8] sm:$0xff] }
0x1706   :  { %12709 = vmatpush1.bf16.msra.mxu0 %v12708_v25  ;;  %12837 = vmatpush1.bf16.msra.mxu1 %v12836_v26  ;;  %v8297_v25 = vld [vmem:[#allocation11 + $0xfd8] sm:$0xff] }
0x1707   :  { %12711 = vmatprep.subr.bf16.mxu0 %v12710_v29  ;;  %12839 = vmatprep.subr.bf16.mxu1 %v12838_v57  ;;  %v8301_v26 = vld [vmem:[#allocation11 + $0xff8] sm:$0xff]  ;;  %v8294_v29 = vld [vmem:[#allocation11 + $0xfc0] sm:$0xff] }
0x1708   :  { %v8298_v57 = vld [vmem:[#allocation11 + $0xfe0] sm:$0xff]  ;;  %v12858_v32 = vpack.c.bf16 %v8301_v26, %v8297_v25  ;;  %v9495_v25 = vld [vmem:[%s17342_s23 + $0x338] sm:$0xff] }
0x1709   :  { %v12732_v42 = vpack.c.bf16 %v8298_v57, %v8294_v29  ;;  %v9480_v26 = vld [vmem:[%s17342_s23 + $0x2c0] sm:$0xff]  ;;  %v9513_v29 = vld [vmem:[%s17342_s23 + $0x3c8] sm:$0xff]  ;;  %v12908_v51 = vpack.c.bf16 %v9495_v25, %v9494_v24 }
0x170a   :  { %12713 = vmatpush1.bf16.msra.mxu0 %v12712_v40  ;;  %12841 = vmatpush1.bf16.msra.mxu1 %v12840_v41  ;;  %v9473_v40 = vld [vmem:[%s17342_s23 + $0x288] sm:$0xff]  ;;  %v9504_v41 = vld [vmem:[%s17342_s23 + $0x380] sm:$0xff] }
0x170b   :  { %12715 = vmatprep.subr.bf16.mxu0 %v12714_v44  ;;  %12843 = vmatprep.subr.bf16.mxu1 %v12842_v45  ;;  %v9456_v44 = vld [vmem:[%s17342_s23 + $0x200] sm:$0xff]  ;;  %v9457_v45 = vld [vmem:[%s17342_s23 + $0x208] sm:$0xff]  ;;  %v12862_v46 = vpack.c.bf16 %v9473_v40, %v9472_v38  ;;  %v12894_v61 = vpack.c.bf16 %v9505_v10, %v9504_v41  ;;  %v9482_v41 = vld [vmem:[%s17342_s23 + $0x2d0] sm:$0xff] }
0x170c   :  { %v12864_v6 = vpack.c.bf16 %v9457_v45, %v9456_v44  ;;  %v9496_v38 = vld [vmem:[%s17342_s23 + $0x340] sm:$0xff]  ;;  %v9497_v40 = vld [vmem:[%s17342_s23 + $0x348] sm:$0xff]  ;;  %v9483_v10 = vld [vmem:[%s17342_s23 + $0x2d8] sm:$0xff] }
0x170d   :  { %v12912_v45 = vpack.c.bf16 %v9497_v40, %v9496_v38 }
0x170e   :  { %12717 = vmatpush1.bf16.msra.mxu0 %v12716_v13  ;;  %12845 = vmatpush1.bf16.msra.mxu1 %v12844_v35  ;;  %v9506_v13 = vld [vmem:[%s17342_s23 + $0x390] sm:$0xff]  ;;  %v9507_v35 = vld [vmem:[%s17342_s23 + $0x398] sm:$0xff] }
0x170f   :  { %12719 = vmatprep.subr.bf16.mxu0 %v12718_v48  ;;  %12847 = vmatprep.subr.bf16.mxu1 %v12846_v49  ;;  %v9458_v48 = vld [vmem:[%s17342_s23 + $0x210] sm:$0xff]  ;;  %v9459_v49 = vld [vmem:[%s17342_s23 + $0x218] sm:$0xff]  ;;  %v12898_v52 = vpack.c.bf16 %v9507_v35, %v9506_v13  ;;  %v9485_v13 = vld [vmem:[%s17342_s23 + $0x2e8] sm:$0xff] }
0x1710   :  { %v12868_v59 = vpack.c.bf16 %v9459_v49, %v9458_v48  ;;  %v9516_v35 = vld [vmem:[%s17342_s23 + $0x3e0] sm:$0xff]  ;;  %v12916_v48 = vpack.c.bf16 %v9499_v2, %v9498_v12  ;;  %v12886_v49 = vpack.c.bf16 %v9485_v13, %v9484_v16 }
0x1712   :  { %12721 = vmatpush1.bf16.msra.mxu0 %v12720_v54  ;;  %12849 = vmatpush1.bf16.msra.mxu1 %v12848_v43  ;;  %v9477_v54 = vld [vmem:[%s17342_s23 + $0x2a8] sm:$0xff]  ;;  %v9508_v43 = vld [vmem:[%s17342_s23 + $0x3a0] sm:$0xff] }
0x1713   :  { %12723 = vmatprep.subr.bf16.mxu0 %v12722_v3  ;;  %12851 = vmatprep.subr.bf16.mxu1 %v12850_v60  ;;  %v12900_v3 = vpack.c.bf16 %v9491_v4, %v9490_v18  ;;  %v9460_v60 = vld [vmem:[%s17342_s23 + $0x220] sm:$0xff]  ;;  %v12870_v56 = vpack.c.bf16 %v9477_v54, %v9476_v53  ;;  %v12902_v8 = vpack.c.bf16 %v9509_v58, %v9508_v43  ;;  %v9501_v53 = vld [vmem:[%s17342_s23 + $0x368] sm:$0xff]  ;;  %v9486_v43 = vld [vmem:[%s17342_s23 + $0x2f0] sm:$0xff] }
0x1714   :  { %v12872_v19 = vpack.c.bf16 %v9461_v1, %v9460_v60  ;;  %v9500_v18 = vld [vmem:[%s17342_s23 + $0x360] sm:$0xff]  ;;  %v9487_v58 = vld [vmem:[%s17342_s23 + $0x2f8] sm:$0xff]  ;;  %v9470_v1 = vld [vmem:[%s17342_s23 + $0x270] sm:$0xff] }
0x1715   :  { %v12920_v54 = vpack.c.bf16 %v9501_v53, %v9500_v18  ;;  %v9519_v60 = vld [vmem:[%s17342_s23 + $0x3f8] sm:$0xff] }
0x1716   :  { %12725 = vmatpush1.bf16.msra.mxu0 %v12724_v14  ;;  %12853 = vmatpush1.bf16.msra.mxu1 %v12852_v15  ;;  %v9479_v14 = vld [vmem:[%s17342_s23 + $0x2b8] sm:$0xff]  ;;  %v9510_v15 = vld [vmem:[%s17342_s23 + $0x3b0] sm:$0xff] }
0x1717   :  { %12727 = vmatprep.subr.bf16.mxu0 %v12726_v20  ;;  %12855 = vmatprep.subr.bf16.mxu1 %v12854_v21  ;;  %v12904_v20 = vpack.c.bf16 %v9493_v11, %v9492_v9  ;;  %v9462_v21 = vld [vmem:[%s17342_s23 + $0x230] sm:$0xff]  ;;  %v12874_v23 = vpack.c.bf16 %v9479_v14, %v9478_v62  ;;  %v12906_v39 = vpack.c.bf16 %v9511_v17, %v9510_v15  ;;  %v9503_v62 = vld [vmem:[%s17342_s23 + $0x378] sm:$0xff]  ;;  %v9455_v15 = vld [vmem:[%s17341_s22 + $0x4] sm:$0xf] }
0x1718   :  { %v12876_v57 = vpack.c.bf16 %v9463_v22, %v9462_v21  ;;  %v9502_v11 = vld [vmem:[%s17342_s23 + $0x370] sm:$0xff]  ;;  %v8308_v17 = vrot.slane %v9455_v15, %v13620_v7  ;;  %v8320_v21 = vrot.slane %v9455_v15, %v15283_v36 }
0x1719   :  { %v12924_v14 = vpack.c.bf16 %v9503_v62, %v9502_v11 }
0x171a   :  { %12729 = vmatpush1.bf16.msra.mxu0 %v12728_v28  ;;  %12857 = vmatpush1.bf16.msra.mxu1 %v12856_v0  ;;  %v9481_v28 = vld [vmem:[%s17342_s23 + $0x2c8] sm:$0xff]  ;;  %v9512_v0 = vld [vmem:[%s17342_s23 + $0x3c0] sm:$0xff] }
0x171b   :  { %12731 = vmatprep.subr.bf16.mxu0 %v12730_v31  ;;  %12859 = vmatprep.subr.bf16.mxu1 %v12858_v32  ;;  %v9464_v31 = vld [vmem:[%s17342_s23 + $0x240] sm:$0xff]  ;;  %v9465_v32 = vld [vmem:[%s17342_s23 + $0x248] sm:$0xff]  ;;  %v12878_v63 = vpack.c.bf16 %v9481_v28, %v9480_v26  ;;  %v12910_v37 = vpack.c.bf16 %v9513_v29, %v9512_v0 }
0x171c   :  { %v12880_v44 = vpack.c.bf16 %v9465_v32, %v9464_v31 }
0x171e   :  { %12733 = vmatpush1.bf16.msra.mxu0 %v12732_v42  ;;  %12861 = vmatpush1.bf16.msra.mxu1 %v12860_v27  ;;  %v9514_v42 = vld [vmem:[%s17342_s23 + $0x3d0] sm:$0xff]  ;;  %v9515_v27 = vld [vmem:[%s17342_s23 + $0x3d8] sm:$0xff] }
0x171f   :  { %12863 = vmatprep.subr.bf16.mxu0 %v12862_v46  ;;  %12895 = vmatprep.subr.bf16.mxu1 %v12894_v61  ;;  %v9467_v46 = vld [vmem:[%s17342_s23 + $0x258] sm:$0xff]  ;;  %v12882_v61 = vpack.c.bf16 %v9483_v10, %v9482_v41  ;;  %v12914_v34 = vpack.c.bf16 %v9515_v27, %v9514_v42 }
0x1721   :  { %8461 = vmatmul.mubr.f32.vlgmr.msra.gmra.mrb[50].mxu0 %v8043_v55  ;;  %8603 = vmatmul.mubr.f32.vlgmr.msra.gmra.mrb[56].mxu1 %v8043_v55 }
0x1722   :  { %12865 = vmatpush3.bf16.msra.mxu0 %v12864_v6  ;;  %12897 = vmatpush3.bf16.msra.mxu1 %v12896_v47  ;;  %v9517_v6 = vld [vmem:[%s17342_s23 + $0x3e8] sm:$0xff]  ;;  %v12884_v47 = vpack.c.bf16 %v9467_v46, %v9466_v33 }
0x1723   :  { %12867 = vmatprep.subr.bf16.mxu0 %v12866_v50  ;;  %12899 = vmatprep.subr.bf16.mxu1 %v12898_v52  ;;  %v12918_v55 = vpack.c.bf16 %v9517_v6, %v9516_v35  ;;  %v9468_v50 = vld [vmem:[%s17342_s23 + $0x260] sm:$0xff]  ;;  %v9469_v52 = vld [vmem:[%s17342_s23 + $0x268] sm:$0xff] }
0x1724   :  { %v12888_v4 = vpack.c.bf16 %v9469_v52, %v9468_v50 }
0x1726   :  { %12869 = vmatpush3.bf16.msra.mxu0 %v12868_v59  ;;  %12901 = vmatpush3.bf16.msra.mxu1 %v12900_v3  ;;  %v9518_v59 = vld [vmem:[%s17342_s23 + $0x3f0] sm:$0xff]  ;;  %v12890_v3 = vpack.c.bf16 %v9487_v58, %v9486_v43 }
0x1727   :  { %12871 = vmatprep.subr.bf16.mxu0 %v12870_v56  ;;  %12903 = vmatprep.subr.bf16.mxu1 %v12902_v8  ;;  %v9471_v56 = vld [vmem:[%s17342_s23 + $0x278] sm:$0xff]  ;;  %v12922_v8 = vpack.c.bf16 %v9519_v60, %v9518_v59 }
0x1728   :  { %v12892_v9 = vpack.c.bf16 %v9471_v56, %v9470_v1 }
0x172a   :  { %12873 = vmatpush3.bf16.msra.mxu0 %v12872_v19  ;;  %12905 = vmatpush3.bf16.msra.mxu1 %v12904_v20  ;;  %v8316_v19 = vrot.slane %v9455_v15, %v15280_v30  ;;  %v8312_v20 = vrot.slane %v9455_v15, %v13614_v5  ;;  %v9521_v30 = vld [vmem:[%s17343_s24 + $0x1] ss:$0 sm:$0xff] }
0x172b   :  { %12875 = vmatprep.subr.bf16.mxu0 %v12874_v23  ;;  %12907 = vmatprep.subr.bf16.mxu1 %v12906_v39 }
0x172e   :  { %12877 = vmatpush3.bf16.msra.mxu0 %v12876_v57  ;;  %12909 = vmatpush3.bf16.msra.mxu1 %v12908_v51 }
0x172f   :  { %12879 = vmatprep.subr.bf16.mxu0 %v12878_v63  ;;  %12911 = vmatprep.subr.bf16.mxu1 %v12910_v37 }
0x1732   :  { %12881 = vmatpush3.bf16.msra.mxu0 %v12880_v44  ;;  %12913 = vmatpush3.bf16.msra.mxu1 %v12912_v45 }
0x1733   :  { %12883 = vmatprep.subr.bf16.mxu0 %v12882_v61  ;;  %12915 = vmatprep.subr.bf16.mxu1 %v12914_v34 }
0x1736   :  { %12885 = vmatpush3.bf16.msra.mxu0 %v12884_v47  ;;  %12917 = vmatpush3.bf16.msra.mxu1 %v12916_v48 }
0x1737   :  { %12887 = vmatprep.subr.bf16.mxu0 %v12886_v49  ;;  %12919 = vmatprep.subr.bf16.mxu1 %v12918_v55 }
0x173a   :  { %12889 = vmatpush3.bf16.msra.mxu0 %v12888_v4  ;;  %12921 = vmatpush3.bf16.msra.mxu1 %v12920_v54 }
0x173b   :  { %12891 = vmatprep.subr.bf16.mxu0 %v12890_v3  ;;  %12923 = vmatprep.subr.bf16.mxu1 %v12922_v8 }
0x173e   :  { %12893 = vmatpush3.bf16.msra.mxu0 %v12892_v9  ;;  %12925 = vmatpush3.bf16.msra.mxu1 %v12924_v14 }
0x17f4   :  { %v8462_v22 = vpop.f32.mrb[50].mxu0  ;;  %v8604_v23 = vpop.f32.mrb[56].mxu1 }
0x17f5   :  { %v12952_v39 = vadd.f32 %v8462_v22, %v8308_v17  ;;  %v12954_v24 = vadd.f32 %v8604_v23, %v8316_v19  ;;  %v8464_v25 = vpop.f32.mrb[51].mxu0  ;;  %v8606_v26 = vpop.f32.mrb[57].mxu1 }
0x17f6   :  { %v12953_v28 = vadd.f32 %v8464_v25, %v8312_v20  ;;  %v12955_v0 = vadd.f32 %v8606_v26, %v8320_v21 }
0x17f7   :  { %v8609_v51 = vmax.f32 %v12952_v39, 0.0  ;;  %v8611_v31 = vmax.f32 %v12954_v24, 0.0 }
0x17f8   :  { %v8610_v29 = vmax.f32 %v12953_v28, 0.0  ;;  %v8612_v57 = vmax.f32 %v12955_v0, 0.0 }
0x17fa   :  { %8750 = vmatprep.mubr.f32.mxu0 %v8610_v29  ;;  %8820 = vmatprep.mubr.f32.mxu1 %v8612_v57 }
0x17fb   :  { %8751 = vmatmul.mubr.f32.vlgmr.msra.gmra.mrb[52].mxu0 %v8609_v51  ;;  %8821 = vmatmul.mubr.f32.vlgmr.msra.gmra.mrb[58].mxu1 %v8611_v31 }
0x18ce   :  { %v9962_v7 = vpop.f32.mrb[52].mxu0  ;;  %v9997_v5 = vpop.f32.mrb[58].mxu1 }
0x18cf   :  { %v9963_v36 = vpop.f32.mrb[53].mxu0  ;;  %v9998_v32 = vpop.f32.mrb[59].mxu1 }
0x18d0   :  { %v9964_v63 = vadd.f32 %v9963_v36, %v9962_v7  ;;  %v9999_v37 = vadd.f32 %v9998_v32, %v9997_v5 }
0x18d2   :  { %v8753_v38 = vadd.f32 %v9964_v63, %v9521_v30 }
0x18d4   :  { %v8823_v40 = vadd.f32 %v9999_v37, %v8753_v38 }
0x18d6   :  { %8827 = vrot.lane.b32.xlu0 %v8823_v40, %s13151_s2 }
0x1948   :  { %v8828_v41 = vpop.permute.xlu0 %8827 }
0x1949   :  { %8831 = vst.msk [vmem:[%s17344_s25] sm:$0x3] %vm8830_vm6, %v8828_v41 }
0x194a   :  { %8836 = vsyncpa [#allocation7], 1 }
0x194b   :  { %8837 = vsyncpa [#allocation9], 1 }
0x194c   :  { %8838 = vsyncpa [#allocation12], 1 }

</bundles_post_ra>
